<compile_context>
chip_gen: v5e
topology: v5e:2x2
jax: 0.10.0
libtpu: 0.0.40
codegen_flags: <defaults>
</compile_context>

<pallas_src>
import functools

import jax
import jax.numpy as jnp
from jax.experimental import pallas as pl
from jax.experimental.pallas import tpu as pltpu


def _round_up(x, m):
    return ((x + m - 1) // m) * m


# ----------------------------- in-kernel helpers -----------------------------

def _gelu(x):
    # TODO(synk): PyTorch F.gelu defaults to the exact (erf) GELU; the tanh
    # approximation is used because erf lowering inside Mosaic kernels is not
    # guaranteed.  Numerical difference is < 1e-3.
    c = jnp.float32(0.7978845608028654)  # sqrt(2/pi)
    return 0.5 * x * (1.0 + jnp.tanh(c * (x + 0.044715 * x * x * x)))


def _layernorm(x, gamma, beta, eps=1e-5):
    mu = jnp.mean(x, axis=-1, keepdims=True)
    var = jnp.mean(jnp.square(x - mu), axis=-1, keepdims=True)
    return (x - mu) * jax.lax.rsqrt(var + eps) * gamma + beta


def _bdot(a, b_bf16):
    # bf16 operands (weights are pre-cast in the wrapper), f32 accumulation.
    return jnp.dot(a.astype(jnp.bfloat16), b_bf16,
                   preferred_element_type=jnp.float32)


# --------------------------------- kernels -----------------------------------

def conv_dense_gates_kernel(xc_ref, wconv_ref, bconv_ref, g1_ref, b1_ref,
                            w1_ref, bfc1_ref, g2_ref, b2_ref,
                            w2_ref, bfc2_ref, g3_ref, b3_ref,
                            wih_ref, blstm_ref, gates_ref):
    """conv-as-matmul -> LN -> GELU -> fc1 -> LN -> GELU -> fc2 -> LN -> GELU
       -> LSTM input projection (x @ W_ih^T + b_ih + b_hh), all kept in VMEM.
       Weights are bf16, accumulation and LN/GELU math are f32."""
    h = _bdot(xc_ref[0], wconv_ref[...]) + bconv_ref[...]
    h = _gelu(_layernorm(h, g1_ref[...], b1_ref[...]))
    h = _bdot(h, w1_ref[...]) + bfc1_ref[...]
    h = _gelu(_layernorm(h, g2_ref[...], b2_ref[...]))
    h = _bdot(h, w2_ref[...]) + bfc2_ref[...]
    h = _gelu(_layernorm(h, g3_ref[...], b3_ref[...]))
    gates_ref[0] = _bdot(h, wih_ref[...]) + blstm_ref[...]


def lstm_recurrence_kernel(gates_ref, h0_ref, c0_ref, whh_ref,
                           hseq_ref, hn_ref, cn_ref, h_s, c_s,
                           *, hidden_pad, time_tile, t_valid):
    """`time_tile` LSTM steps per grid iteration; gates_ref already contains
    x_t @ W_ih^T + b_ih + b_hh so only h @ W_hh^T remains per step.

    h/c are carried in registers across the statically unrolled chunk; the
    VMEM scratch is read once at chunk entry and written once at chunk exit.

    Padded-lane invariant: lanes >= H of h0/c0, of the W_hh rows and gate
    columns, and of the gate bias are exactly zero, so padded lanes of the
    running h/c state remain exactly zero (i,f,o = sigmoid(0), g = tanh(0)=0,
    c = 0.5*0 = 0, h = 0.5*tanh(0) = 0).  The downstream LayerNorm relies on
    this invariant -- do not change the padding values.
    """
    chunk = pl.program_id(0)
    Hp = hidden_pad

    @pl.when(chunk == 0)
    def _():
        h_s[...] = h0_ref[...]
        c_s[...] = c0_ref[...]

    h = h_s[...]
    c = c_s[...]

    # TODO(synk): hold W_hh weight-stationary across the chunk via
    # pltpu.matmul_push_rhs / matmul_acc_lhs / matmul_pop so the (Hp, 4Hp)
    # RHS is not re-pushed every step when B << 128.
    for s in range(time_tile):              # static unroll
        t = chunk * time_tile + s
        gates = gates_ref[:, s, :] + jnp.dot(
            h.astype(jnp.bfloat16), whh_ref[...],
            preferred_element_type=jnp.float32)
        i = jax.nn.sigmoid(gates[:, 0 * Hp:1 * Hp])
        f = jax.nn.sigmoid(gates[:, 1 * Hp:2 * Hp])
        g = jnp.tanh(gates[:, 2 * Hp:3 * Hp])
        o = jax.nn.sigmoid(gates[:, 3 * Hp:4 * Hp])
        c_new = f * c + i * g
        h_new = o * jnp.tanh(c_new)
        # Padded time steps (sequence padded to a multiple of time_tile) must
        # not move the recurrent state.
        keep = (t < t_valid).astype(jnp.float32)
        h = h + keep * (h_new - h)
        c = c + keep * (c_new - c)
        hseq_ref[s] = h

    h_s[...] = h
    c_s[...] = c

    @pl.when(chunk == pl.num_programs(0) - 1)
    def _():
        hn_ref[...] = h
        cn_ref[...] = c


def ln_gelu_fc_kernel(h_ref, g_ref, b_ref, wfc_ref, bfc_ref, out_ref,
                      *, hidden_size):
    """Hoisted head: LayerNorm over the real H lanes (padded lanes of h,
    gamma, beta are exactly zero so Hp-lane sums equal H-lane sums) -> GELU ->
    final FC.  Row-parallel over the full (time*batch) h sequence."""
    h = h_ref[...]
    inv_h = jnp.float32(1.0 / hidden_size)
    mu = jnp.sum(h, axis=-1, keepdims=True) * inv_h
    var = jnp.sum(h * h, axis=-1, keepdims=True) * inv_h - mu * mu
    y = (h - mu) * jax.lax.rsqrt(var + 1e-5) * g_ref[...] + b_ref[...]
    y = _gelu(y)
    out_ref[...] = _bdot(y, wfc_ref[...]) + bfc_ref[...]


# --------------------------------- wrapper ------------------------------------

def speech_recognition_forward(x, hidden, params, *, row_tile=256, time_tile=16):
    """x: (B, 1, n_feats, T) float32; hidden = (h0, c0) each (1, B, H)."""
    B, _, nf, T = x.shape
    x = x[:, 0]                                       # squeeze(1) -> (B, nf, T)

    K, stride, pad = 10, 2, 5
    T_out = (T + 2 * pad - K) // stride + 1

    D = params['fc1_w'].shape[1]                      # 128
    H = params['w_hh_t'].shape[0]                     # hidden size
    C = params['fc_out_w'].shape[1]                   # num classes
    Hp = _round_up(H, 128)                            # lane-aligned hidden
    Cp = _round_up(C, 128)                            # lane-dense logits store
    Knf = K * nf
    Knf_p = _round_up(Knf, 128)                       # lane-aligned contraction

    ts = time_tile
    T_pad = _round_up(T_out, ts)                      # recurrence time padding
    rt = max(8, (min(row_tile, T_pad) // 8) * 8)      # kernel-1 time tile
    T_pad1 = _round_up(T_pad, rt)

    # ---- im2col (glue) for Conv1d(nf, nf, K=10, stride=2, padding=5) ----
    # TODO(synk): build the im2col taps inside kernel 1 from a strided DMA of
    # the padded input to avoid the K-fold HBM duplication of x.
    xp = jnp.pad(x, ((0, 0), (0, 0), (pad, pad)))
    idx = jnp.arange(T_out)[:, None] * stride + jnp.arange(K)[None, :]
    cols = jnp.transpose(xp[:, :, idx], (0, 2, 3, 1))          # (B, T_out, K, nf)
    x_cols = cols.reshape(B, T_out, Knf)
    x_cols = jnp.pad(x_cols, ((0, 0), (0, T_pad1 - T_out), (0, Knf_p - Knf)))

    # conv weight (Cout, Cin, K) -> (K*Cin, Cout), matching im2col flatten order
    w_conv = jnp.transpose(params['conv_w'], (2, 1, 0)).reshape(Knf, nf)
    w_conv = jnp.pad(w_conv, ((0, Knf_p - Knf), (0, 0))).astype(jnp.bfloat16)

    # ---- pad LSTM / head params to lane-aligned widths (per gate block) ----
    def pad_gate_cols(w):                             # (..., 4H) -> (..., 4Hp)
        lead = w.shape[:-1]
        w4 = w.reshape(lead + (4, H))
        w4 = jnp.pad(w4, [(0, 0)] * len(lead) + [(0, 0), (0, Hp - H)])
        return w4.reshape(lead + (4 * Hp,))

    w_ih = pad_gate_cols(params['w_ih_t']).astype(jnp.bfloat16)        # (D, 4Hp)
    w_hh = jnp.pad(pad_gate_cols(params['w_hh_t']),
                   ((0, Hp - H), (0, 0))).astype(jnp.bfloat16)         # (Hp, 4Hp)
    b_lstm = pad_gate_cols(params['b_ih'] + params['b_hh']).reshape(1, 4 * Hp)
    ln4_g = jnp.pad(params['ln4_g'], (0, Hp - H)).reshape(1, Hp)
    ln4_b = jnp.pad(params['ln4_b'], (0, Hp - H)).reshape(1, Hp)
    w_fc = jnp.pad(params['fc_out_w'],
                   ((0, Hp - H), (0, Cp - C))).astype(jnp.bfloat16)    # (Hp, Cp)
    b_fc = jnp.pad(params['fc_out_b'], (0, Cp - C)).reshape(1, Cp)
    h0 = jnp.pad(hidden[0][0], ((0, 0), (0, Hp - H)))                  # (B, Hp)
    c0 = jnp.pad(hidden[1][0], ((0, 0), (0, Hp - H)))

    fc1_w = params['fc1_w'].astype(jnp.bfloat16)
    fc2_w = params['fc2_w'].astype(jnp.bfloat16)

    c2 = lambda b, t: (0, 0)
    c1 = lambda i: (0, 0)

    # ---- kernel 1: conv + dense stack + LSTM input projection ---------------
    gates = pl.pallas_call(
        conv_dense_gates_kernel,
        grid=(B, T_pad1 // rt),
        in_specs=[
            pl.BlockSpec((1, rt, Knf_p), lambda b, t: (b, t, 0)),    # im2col rows
            pl.BlockSpec((Knf_p, nf), c2),                           # conv W (bf16)
            pl.BlockSpec((1, nf), c2),                               # conv b
            pl.BlockSpec((1, nf), c2), pl.BlockSpec((1, nf), c2),    # ln1
            pl.BlockSpec((nf, D), c2), pl.BlockSpec((1, D), c2),     # fc1
            pl.BlockSpec((1, D), c2), pl.BlockSpec((1, D), c2),      # ln2
            pl.BlockSpec((D, D), c2), pl.BlockSpec((1, D), c2),      # fc2
            pl.BlockSpec((1, D), c2), pl.BlockSpec((1, D), c2),      # ln3
            pl.BlockSpec((D, 4 * Hp), c2),                           # W_ih^T (bf16)
            pl.BlockSpec((1, 4 * Hp), c2),                           # b_ih + b_hh
        ],
        out_specs=pl.BlockSpec((1, rt, 4 * Hp), lambda b, t: (b, t, 0)),
        out_shape=jax.ShapeDtypeStruct((B, T_pad1, 4 * Hp), jnp.float32),
        compiler_params=pltpu.CompilerParams(
            dimension_semantics=("parallel", "parallel")),
    )(x_cols, w_conv,
      params['conv_b'].reshape(1, nf),
      params['ln1_g'].reshape(1, nf), params['ln1_b'].reshape(1, nf),
      fc1_w, params['fc1_b'].reshape(1, D),
      params['ln2_g'].reshape(1, D), params['ln2_b'].reshape(1, D),
      fc2_w, params['fc2_b'].reshape(1, D),
      params['ln3_g'].reshape(1, D), params['ln3_b'].reshape(1, D),
      w_ih, b_lstm)

    # ---- kernel 2: recurrence only (gates + state update) -------------------
    # TODO(synk): on v7x (2 TensorCores) split the batch across cores with a
    # leading parallel axis when B is large enough.
    n_chunks = T_pad // ts
    rec_kernel = functools.partial(lstm_recurrence_kernel, hidden_pad=Hp,
                                   time_tile=ts, t_valid=T_out)
    hseq, hn, cn = pl.pallas_call(
        rec_kernel,
        grid=(n_chunks,),
        in_specs=[
            pl.BlockSpec((B, ts, 4 * Hp), lambda ch: (0, ch, 0)),    # gate preacts
            pl.BlockSpec((B, Hp), c1),                               # h0
            pl.BlockSpec((B, Hp), c1),                               # c0
            pl.BlockSpec((Hp, 4 * Hp), c1),                          # W_hh^T (bf16)
        ],
        out_specs=[
            pl.BlockSpec((ts, B, Hp), lambda ch: (ch, 0, 0)),        # h sequence
            pl.BlockSpec((B, Hp), c1),                               # hn
            pl.BlockSpec((B, Hp), c1),                               # cn
        ],
        out_shape=[
            jax.ShapeDtypeStruct((T_pad, B, Hp), jnp.float32),
            jax.ShapeDtypeStruct((B, Hp), jnp.float32),
            jax.ShapeDtypeStruct((B, Hp), jnp.float32),
        ],
        scratch_shapes=[pltpu.VMEM((B, Hp), jnp.float32),
                        pltpu.VMEM((B, Hp), jnp.float32)],
        compiler_params=pltpu.CompilerParams(
            dimension_semantics=("arbitrary",)),
    )(gates, h0, c0, w_hh)

    # ---- kernel 3: hoisted LN4 + GELU + final FC (row-parallel) -------------
    rows = T_pad * B
    h_flat = hseq.reshape(rows, Hp)
    rt_h = min(512, _round_up(rows, 8))
    rows_p = _round_up(rows, rt_h)
    h_flat = jnp.pad(h_flat, ((0, rows_p - rows), (0, 0)))

    head_kernel = functools.partial(ln_gelu_fc_kernel, hidden_size=H)
    logits_flat = pl.pallas_call(
        head_kernel,
        grid=(rows_p // rt_h,),
        in_specs=[
            pl.BlockSpec((rt_h, Hp), lambda i: (i, 0)),              # h rows
            pl.BlockSpec((1, Hp), c1), pl.BlockSpec((1, Hp), c1),    # ln4
            pl.BlockSpec((Hp, Cp), c1),                              # fc_out W (bf16)
            pl.BlockSpec((1, Cp), c1),                               # fc_out b
        ],
        out_specs=pl.BlockSpec((rt_h, Cp), lambda i: (i, 0)),
        out_shape=jax.ShapeDtypeStruct((rows_p, Cp), jnp.float32),
        compiler_params=pltpu.CompilerParams(
            dimension_semantics=("parallel",)),
    )(h_flat, ln4_g, ln4_b, w_fc, b_fc)

    logits = logits_flat[:rows].reshape(T_pad, B, Cp)[:T_out, :, :C]
    return logits, (hn[:, :H][None], cn[:, :H][None])


# ------------------------------ parameter init --------------------------------

def init_params(key, n_feats, hidden_size, num_classes, dense_dim=128, kernel_size=10):
    ks = jax.random.split(key, 12)
    s = 0.05
    p = {}
    p['conv_w'] = jax.random.normal(ks[0], (n_feats, n_feats, kernel_size), jnp.float32) * s
    p['conv_b'] = jax.random.normal(ks[1], (n_feats,), jnp.float32) * s
    p['ln1_g'] = jnp.ones((n_feats,), jnp.float32)
    p['ln1_b'] = jnp.zeros((n_feats,), jnp.float32)
    p['fc1_w'] = jax.random.normal(ks[2], (n_feats, dense_dim), jnp.float32) * s
    p['fc1_b'] = jax.random.normal(ks[3], (dense_dim,), jnp.float32) * s
    p['ln2_g'] = jnp.ones((dense_dim,), jnp.float32)
    p['ln2_b'] = jnp.zeros((dense_dim,), jnp.float32)
    p['fc2_w'] = jax.random.normal(ks[4], (dense_dim, dense_dim), jnp.float32) * s
    p['fc2_b'] = jax.random.normal(ks[5], (dense_dim,), jnp.float32) * s
    p['ln3_g'] = jnp.ones((dense_dim,), jnp.float32)
    p['ln3_b'] = jnp.zeros((dense_dim,), jnp.float32)
    p['w_ih_t'] = jax.random.normal(ks[6], (dense_dim, 4 * hidden_size), jnp.float32) * s
    p['w_hh_t'] = jax.random.normal(ks[7], (hidden_size, 4 * hidden_size), jnp.float32) * s
    p['b_ih'] = jax.random.normal(ks[8], (4 * hidden_size,), jnp.float32) * s
    p['b_hh'] = jax.random.normal(ks[9], (4 * hidden_size,), jnp.float32) * s
    p['ln4_g'] = jnp.ones((hidden_size,), jnp.float32)
    p['ln4_b'] = jnp.zeros((hidden_size,), jnp.float32)
    p['fc_out_w'] = jax.random.normal(ks[10], (hidden_size, num_classes), jnp.float32) * s
    p['fc_out_b'] = jax.random.normal(ks[11], (num_classes,), jnp.float32) * s
    return p


# ------------------------------ pure-JAX reference -----------------------------

def _reference_forward(x, hidden, params):
    """Pure-JAX reference mirroring the kernel's numerics (tanh-GELU, bf16
    matmul operands with f32 accumulation, f32 state)."""
    B, _, nf, T = x.shape
    xs = x[:, 0]
    K, stride, pad = 10, 2, 5
    T_out = (T + 2 * pad - K) // stride + 1

    def bdot(a, b):
        return jnp.dot(a.astype(jnp.bfloat16), b.astype(jnp.bfloat16),
                       preferred_element_type=jnp.float32)

    def ln(v, g, b, eps=1e-5):
        mu = jnp.mean(v, axis=-1, keepdims=True)
        var = jnp.mean(jnp.square(v - mu), axis=-1, keepdims=True)
        return (v - mu) * jax.lax.rsqrt(var + eps) * g + b

    xp = jnp.pad(xs, ((0, 0), (0, 0), (pad, pad)))
    idx = jnp.arange(T_out)[:, None] * stride + jnp.arange(K)[None, :]
    cols = jnp.transpose(xp[:, :, idx], (0, 2, 3, 1)).reshape(B * T_out, K * nf)
    w_conv = jnp.transpose(params['conv_w'], (2, 1, 0)).reshape(K * nf, nf)
    h = bdot(cols, w_conv) + params['conv_b']
    h = _gelu(ln(h, params['ln1_g'], params['ln1_b']))
    h = _gelu(ln(bdot(h, params['fc1_w']) + params['fc1_b'],
                 params['ln2_g'], params['ln2_b']))
    h = _gelu(ln(bdot(h, params['fc2_w']) + params['fc2_b'],
                 params['ln3_g'], params['ln3_b']))
    D = params['fc1_w'].shape[1]
    seq = jnp.transpose(h.reshape(B, T_out, D), (1, 0, 2))       # (T_out, B, D)

    H = params['w_hh_t'].shape[0]
    b = params['b_ih'] + params['b_hh']

    def step(carry, x_t):
        hh, cc = carry
        gates = bdot(x_t, params['w_ih_t']) + bdot(hh, params['w_hh_t']) + b
        i = jax.nn.sigmoid(gates[:, 0 * H:1 * H])
        f = jax.nn.sigmoid(gates[:, 1 * H:2 * H])
        g = jnp.tanh(gates[:, 2 * H:3 * H])
        o = jax.nn.sigmoid(gates[:, 3 * H:4 * H])
        cc = f * cc + i * g
        hh = o * jnp.tanh(cc)
        return (hh, cc), hh

    (hn, cn), outs = jax.lax.scan(step, (hidden[0][0], hidden[1][0]), seq)
    y = _gelu(ln(outs, params['ln4_g'], params['ln4_b']))
    logits = bdot(y, params['fc_out_w']) + params['fc_out_b']
    return logits, (hn[None], cn[None])


# ----------------------------------- main --------------------------------------

if __name__ == "__main__":
    # small shapes consistent with the module (n_feats, hidden_size scaled down)
    B, n_feats, T = 2, 16, 16
    hidden_size, num_classes = 64, 29

    key = jax.random.PRNGKey(0)
    kx, kp = jax.random.split(key)
    x = jax.random.normal(kx, (B, 1, n_feats, T), jnp.float32)
    params = init_params(kp, n_feats, hidden_size, num_classes)
    hidden = (jnp.zeros((1, B, hidden_size), jnp.float32),
              jnp.zeros((1, B, hidden_size), jnp.float32))

    fwd = jax.jit(speech_recognition_forward)
    logits, (hn, cn) = fwd(x, hidden, params)
    jax.block_until_ready((logits, hn, cn))

    T_out = (T + 2 * 5 - 10) // 2 + 1
    assert logits.shape == (T_out, B, num_classes)
    assert hn.shape == (1, B, hidden_size)
    assert cn.shape == (1, B, hidden_size)
    assert bool(jnp.all(jnp.isfinite(logits)))

    # numerical sanity check against a pure-JAX reference that mirrors the
    # kernel's bf16-operand / f32-accumulate matmul numerics
    ref_logits, (ref_hn, ref_cn) = _reference_forward(x, hidden, params)
    assert float(jnp.max(jnp.abs(logits - ref_logits))) < 3e-2
    assert float(jnp.max(jnp.abs(hn - ref_hn))) < 3e-2
    assert float(jnp.max(jnp.abs(cn - ref_cn))) < 3e-2

    print("KERNEL_OK")
</pallas_src>

<mosaic_0001>
module attributes {stable_mosaic.version = 11 : i64} {
  func.func @conv_dense_gates_kernel(%arg0: i32, %arg1: i32, %arg2: memref<1x16x256xf32, #tpu.memory_space<vmem>>, %arg3: memref<256x16xbf16, #tpu.memory_space<vmem>>, %arg4: memref<1x16xf32, #tpu.memory_space<vmem>>, %arg5: memref<1x16xf32, #tpu.memory_space<vmem>>, %arg6: memref<1x16xf32, #tpu.memory_space<vmem>>, %arg7: memref<16x128xbf16, #tpu.memory_space<vmem>>, %arg8: memref<1x128xf32, #tpu.memory_space<vmem>>, %arg9: memref<1x128xf32, #tpu.memory_space<vmem>>, %arg10: memref<1x128xf32, #tpu.memory_space<vmem>>, %arg11: memref<128x128xbf16, #tpu.memory_space<vmem>>, %arg12: memref<1x128xf32, #tpu.memory_space<vmem>>, %arg13: memref<1x128xf32, #tpu.memory_space<vmem>>, %arg14: memref<1x128xf32, #tpu.memory_space<vmem>>, %arg15: memref<128x512xbf16, #tpu.memory_space<vmem>>, %arg16: memref<1x512xf32, #tpu.memory_space<vmem>>, %arg17: memref<1x16x512xf32, #tpu.memory_space<vmem>>) attributes {dimension_semantics = [#tpu.dimension_semantics<parallel>, #tpu.dimension_semantics<parallel>], iteration_bounds = array<i64: 2, 1>, scalar_prefetch = 0 : i64, scratch_operands = 0 : i64, tpu.core_type = #tpu.core_type<tc>, window_params = [{transform_indices = @transform_0, window_bounds = array<i64: 1, 16, 256>}, {pipeline_mode = #tpu.pipeline_mode<synchronous>, transform_indices = @transform_1, window_bounds = array<i64: 256, 16>}, {pipeline_mode = #tpu.pipeline_mode<synchronous>, transform_indices = @transform_2, window_bounds = array<i64: 1, 16>}, {pipeline_mode = #tpu.pipeline_mode<synchronous>, transform_indices = @transform_3, window_bounds = array<i64: 1, 16>}, {pipeline_mode = #tpu.pipeline_mode<synchronous>, transform_indices = @transform_4, window_bounds = array<i64: 1, 16>}, {pipeline_mode = #tpu.pipeline_mode<synchronous>, transform_indices = @transform_5, window_bounds = array<i64: 16, 128>}, {pipeline_mode = #tpu.pipeline_mode<synchronous>, transform_indices = @transform_6, window_bounds = array<i64: 1, 128>}, {pipeline_mode = #tpu.pipeline_mode<synchronous>, transform_indices = @transform_7, window_bounds = array<i64: 1, 128>}, {pipeline_mode = #tpu.pipeline_mode<synchronous>, transform_indices = @transform_8, window_bounds = array<i64: 1, 128>}, {pipeline_mode = #tpu.pipeline_mode<synchronous>, transform_indices = @transform_9, window_bounds = array<i64: 128, 128>}, {pipeline_mode = #tpu.pipeline_mode<synchronous>, transform_indices = @transform_10, window_bounds = array<i64: 1, 128>}, {pipeline_mode = #tpu.pipeline_mode<synchronous>, transform_indices = @transform_11, window_bounds = array<i64: 1, 128>}, {pipeline_mode = #tpu.pipeline_mode<synchronous>, transform_indices = @transform_12, window_bounds = array<i64: 1, 128>}, {pipeline_mode = #tpu.pipeline_mode<synchronous>, transform_indices = @transform_13, window_bounds = array<i64: 128, 512>}, {pipeline_mode = #tpu.pipeline_mode<synchronous>, transform_indices = @transform_14, window_bounds = array<i64: 1, 512>}, {transform_indices = @transform_15, window_bounds = array<i64: 1, 16, 512>}]} {
    %c0 = arith.constant 0 : index
    %c0_0 = arith.constant 0 : index
    %c0_1 = arith.constant 0 : index
    %0 = vector.load %arg2[%c0, %c0_0, %c0_1] : memref<1x16x256xf32, #tpu.memory_space<vmem>>, vector<1x16x256xf32>
    %1 = vector.shape_cast %0 : vector<1x16x256xf32> to vector<16x256xf32>
    %c0_2 = arith.constant 0 : index
    %c0_3 = arith.constant 0 : index
    %2 = vector.load %arg3[%c0_2, %c0_3] : memref<256x16xbf16, #tpu.memory_space<vmem>>, vector<256x16xbf16>
    %3 = arith.truncf %1 : vector<16x256xf32> to vector<16x256xbf16>
    %cst = arith.constant dense<0.000000e+00> : vector<16x16xf32>
    %4 = tpu.matmul %3, %2, %cst {dimension_numbers = #tpu.dot_dimension_numbers<[1], [0], [0], [1], [0, 0, 1, 1], [], []>} : vector<16x256xbf16>, vector<256x16xbf16>, vector<16x16xf32> -> vector<16x16xf32>
    %c0_4 = arith.constant 0 : index
    %c0_5 = arith.constant 0 : index
    %5 = vector.load %arg4[%c0_4, %c0_5] : memref<1x16xf32, #tpu.memory_space<vmem>>, vector<1x16xf32>
    %6 = vector.broadcast %5 : vector<1x16xf32> to vector<16x16xf32>
    %7 = arith.addf %4, %6 : vector<16x16xf32>
    %c0_6 = arith.constant 0 : index
    %c0_7 = arith.constant 0 : index
    %8 = vector.load %arg5[%c0_6, %c0_7] : memref<1x16xf32, #tpu.memory_space<vmem>>, vector<1x16xf32>
    %c0_8 = arith.constant 0 : index
    %c0_9 = arith.constant 0 : index
    %9 = vector.load %arg6[%c0_8, %c0_9] : memref<1x16xf32, #tpu.memory_space<vmem>>, vector<1x16xf32>
    %cst_10 = arith.constant dense<0.000000e+00> : vector<16xf32>
    %10 = vector.multi_reduction <add>, %7, %cst_10 [1] : vector<16x16xf32> to vector<16xf32>
    %11 = vector.shape_cast %10 : vector<16xf32> to vector<16x1xf32>
    %cst_11 = arith.constant 1.600000e+01 : f32
    %12 = vector.broadcast %cst_11 : f32 to vector<16x1xf32>
    %13 = arith.divf %11, %12 : vector<16x1xf32>
    %14 = vector.broadcast %13 : vector<16x1xf32> to vector<16x16xf32>
    %15 = arith.subf %7, %14 : vector<16x16xf32>
    %16 = arith.mulf %15, %15 : vector<16x16xf32>
    %cst_12 = arith.constant dense<0.000000e+00> : vector<16xf32>
    %17 = vector.multi_reduction <add>, %16, %cst_12 [1] : vector<16x16xf32> to vector<16xf32>
    %18 = vector.shape_cast %17 : vector<16xf32> to vector<16x1xf32>
    %cst_13 = arith.constant 1.600000e+01 : f32
    %19 = vector.broadcast %cst_13 : f32 to vector<16x1xf32>
    %20 = arith.divf %18, %19 : vector<16x1xf32>
    %21 = vector.broadcast %13 : vector<16x1xf32> to vector<16x16xf32>
    %22 = arith.subf %7, %21 : vector<16x16xf32>
    %cst_14 = arith.constant 9.99999974E-6 : f32
    %23 = vector.broadcast %cst_14 : f32 to vector<16x1xf32>
    %24 = arith.addf %20, %23 : vector<16x1xf32>
    %25 = math.rsqrt %24 : vector<16x1xf32>
    %26 = vector.broadcast %25 : vector<16x1xf32> to vector<16x16xf32>
    %27 = arith.mulf %22, %26 : vector<16x16xf32>
    %28 = vector.broadcast %8 : vector<1x16xf32> to vector<16x16xf32>
    %29 = arith.mulf %27, %28 : vector<16x16xf32>
    %30 = vector.broadcast %9 : vector<1x16xf32> to vector<16x16xf32>
    %31 = arith.addf %29, %30 : vector<16x16xf32>
    %cst_15 = arith.constant 5.000000e-01 : f32
    %32 = vector.broadcast %cst_15 : f32 to vector<16x16xf32>
    %33 = arith.mulf %32, %31 : vector<16x16xf32>
    %cst_16 = arith.constant 4.471500e-02 : f32
    %34 = vector.broadcast %cst_16 : f32 to vector<16x16xf32>
    %35 = arith.mulf %34, %31 : vector<16x16xf32>
    %36 = arith.mulf %35, %31 : vector<16x16xf32>
    %37 = arith.mulf %36, %31 : vector<16x16xf32>
    %38 = arith.addf %31, %37 : vector<16x16xf32>
    %cst_17 = arith.constant 0.797884583 : f32
    %39 = vector.broadcast %cst_17 : f32 to vector<16x16xf32>
    %40 = arith.mulf %39, %38 : vector<16x16xf32>
    %41 = math.tanh %40 : vector<16x16xf32>
    %cst_18 = arith.constant 1.000000e+00 : f32
    %42 = vector.broadcast %cst_18 : f32 to vector<16x16xf32>
    %43 = arith.addf %42, %41 : vector<16x16xf32>
    %44 = arith.mulf %33, %43 : vector<16x16xf32>
    %c0_19 = arith.constant 0 : index
    %c0_20 = arith.constant 0 : index
    %45 = vector.load %arg7[%c0_19, %c0_20] : memref<16x128xbf16, #tpu.memory_space<vmem>>, vector<16x128xbf16>
    %46 = arith.truncf %44 : vector<16x16xf32> to vector<16x16xbf16>
    %cst_21 = arith.constant dense<0.000000e+00> : vector<16x128xf32>
    %47 = tpu.matmul %46, %45, %cst_21 {dimension_numbers = #tpu.dot_dimension_numbers<[1], [0], [0], [1], [0, 0, 1, 1], [], []>} : vector<16x16xbf16>, vector<16x128xbf16>, vector<16x128xf32> -> vector<16x128xf32>
    %c0_22 = arith.constant 0 : index
    %c0_23 = arith.constant 0 : index
    %48 = vector.load %arg8[%c0_22, %c0_23] : memref<1x128xf32, #tpu.memory_space<vmem>>, vector<1x128xf32>
    %49 = vector.broadcast %48 : vector<1x128xf32> to vector<16x128xf32>
    %50 = arith.addf %47, %49 : vector<16x128xf32>
    %c0_24 = arith.constant 0 : index
    %c0_25 = arith.constant 0 : index
    %51 = vector.load %arg9[%c0_24, %c0_25] : memref<1x128xf32, #tpu.memory_space<vmem>>, vector<1x128xf32>
    %c0_26 = arith.constant 0 : index
    %c0_27 = arith.constant 0 : index
    %52 = vector.load %arg10[%c0_26, %c0_27] : memref<1x128xf32, #tpu.memory_space<vmem>>, vector<1x128xf32>
    %cst_28 = arith.constant dense<0.000000e+00> : vector<16xf32>
    %53 = vector.multi_reduction <add>, %50, %cst_28 [1] : vector<16x128xf32> to vector<16xf32>
    %54 = vector.shape_cast %53 : vector<16xf32> to vector<16x1xf32>
    %cst_29 = arith.constant 1.280000e+02 : f32
    %55 = vector.broadcast %cst_29 : f32 to vector<16x1xf32>
    %56 = arith.divf %54, %55 : vector<16x1xf32>
    %57 = vector.broadcast %56 : vector<16x1xf32> to vector<16x128xf32>
    %58 = arith.subf %50, %57 : vector<16x128xf32>
    %59 = arith.mulf %58, %58 : vector<16x128xf32>
    %cst_30 = arith.constant dense<0.000000e+00> : vector<16xf32>
    %60 = vector.multi_reduction <add>, %59, %cst_30 [1] : vector<16x128xf32> to vector<16xf32>
    %61 = vector.shape_cast %60 : vector<16xf32> to vector<16x1xf32>
    %cst_31 = arith.constant 1.280000e+02 : f32
    %62 = vector.broadcast %cst_31 : f32 to vector<16x1xf32>
    %63 = arith.divf %61, %62 : vector<16x1xf32>
    %64 = vector.broadcast %56 : vector<16x1xf32> to vector<16x128xf32>
    %65 = arith.subf %50, %64 : vector<16x128xf32>
    %cst_32 = arith.constant 9.99999974E-6 : f32
    %66 = vector.broadcast %cst_32 : f32 to vector<16x1xf32>
    %67 = arith.addf %63, %66 : vector<16x1xf32>
    %68 = math.rsqrt %67 : vector<16x1xf32>
    %69 = vector.broadcast %68 : vector<16x1xf32> to vector<16x128xf32>
    %70 = arith.mulf %65, %69 : vector<16x128xf32>
    %71 = vector.broadcast %51 : vector<1x128xf32> to vector<16x128xf32>
    %72 = arith.mulf %70, %71 : vector<16x128xf32>
    %73 = vector.broadcast %52 : vector<1x128xf32> to vector<16x128xf32>
    %74 = arith.addf %72, %73 : vector<16x128xf32>
    %cst_33 = arith.constant 5.000000e-01 : f32
    %75 = vector.broadcast %cst_33 : f32 to vector<16x128xf32>
    %76 = arith.mulf %75, %74 : vector<16x128xf32>
    %cst_34 = arith.constant 4.471500e-02 : f32
    %77 = vector.broadcast %cst_34 : f32 to vector<16x128xf32>
    %78 = arith.mulf %77, %74 : vector<16x128xf32>
    %79 = arith.mulf %78, %74 : vector<16x128xf32>
    %80 = arith.mulf %79, %74 : vector<16x128xf32>
    %81 = arith.addf %74, %80 : vector<16x128xf32>
    %cst_35 = arith.constant 0.797884583 : f32
    %82 = vector.broadcast %cst_35 : f32 to vector<16x128xf32>
    %83 = arith.mulf %82, %81 : vector<16x128xf32>
    %84 = math.tanh %83 : vector<16x128xf32>
    %cst_36 = arith.constant 1.000000e+00 : f32
    %85 = vector.broadcast %cst_36 : f32 to vector<16x128xf32>
    %86 = arith.addf %85, %84 : vector<16x128xf32>
    %87 = arith.mulf %76, %86 : vector<16x128xf32>
    %c0_37 = arith.constant 0 : index
    %c0_38 = arith.constant 0 : index
    %88 = vector.load %arg11[%c0_37, %c0_38] : memref<128x128xbf16, #tpu.memory_space<vmem>>, vector<128x128xbf16>
    %89 = arith.truncf %87 : vector<16x128xf32> to vector<16x128xbf16>
    %cst_39 = arith.constant dense<0.000000e+00> : vector<16x128xf32>
    %90 = tpu.matmul %89, %88, %cst_39 {dimension_numbers = #tpu.dot_dimension_numbers<[1], [0], [0], [1], [0, 0, 1, 1], [], []>} : vector<16x128xbf16>, vector<128x128xbf16>, vector<16x128xf32> -> vector<16x128xf32>
    %c0_40 = arith.constant 0 : index
    %c0_41 = arith.constant 0 : index
    %91 = vector.load %arg12[%c0_40, %c0_41] : memref<1x128xf32, #tpu.memory_space<vmem>>, vector<1x128xf32>
    %92 = vector.broadcast %91 : vector<1x128xf32> to vector<16x128xf32>
    %93 = arith.addf %90, %92 : vector<16x128xf32>
    %c0_42 = arith.constant 0 : index
    %c0_43 = arith.constant 0 : index
    %94 = vector.load %arg13[%c0_42, %c0_43] : memref<1x128xf32, #tpu.memory_space<vmem>>, vector<1x128xf32>
    %c0_44 = arith.constant 0 : index
    %c0_45 = arith.constant 0 : index
    %95 = vector.load %arg14[%c0_44, %c0_45] : memref<1x128xf32, #tpu.memory_space<vmem>>, vector<1x128xf32>
    %cst_46 = arith.constant dense<0.000000e+00> : vector<16xf32>
    %96 = vector.multi_reduction <add>, %93, %cst_46 [1] : vector<16x128xf32> to vector<16xf32>
    %97 = vector.shape_cast %96 : vector<16xf32> to vector<16x1xf32>
    %cst_47 = arith.constant 1.280000e+02 : f32
    %98 = vector.broadcast %cst_47 : f32 to vector<16x1xf32>
    %99 = arith.divf %97, %98 : vector<16x1xf32>
    %100 = vector.broadcast %99 : vector<16x1xf32> to vector<16x128xf32>
    %101 = arith.subf %93, %100 : vector<16x128xf32>
    %102 = arith.mulf %101, %101 : vector<16x128xf32>
    %cst_48 = arith.constant dense<0.000000e+00> : vector<16xf32>
    %103 = vector.multi_reduction <add>, %102, %cst_48 [1] : vector<16x128xf32> to vector<16xf32>
    %104 = vector.shape_cast %103 : vector<16xf32> to vector<16x1xf32>
    %cst_49 = arith.constant 1.280000e+02 : f32
    %105 = vector.broadcast %cst_49 : f32 to vector<16x1xf32>
    %106 = arith.divf %104, %105 : vector<16x1xf32>
    %107 = vector.broadcast %99 : vector<16x1xf32> to vector<16x128xf32>
    %108 = arith.subf %93, %107 : vector<16x128xf32>
    %cst_50 = arith.constant 9.99999974E-6 : f32
    %109 = vector.broadcast %cst_50 : f32 to vector<16x1xf32>
    %110 = arith.addf %106, %109 : vector<16x1xf32>
    %111 = math.rsqrt %110 : vector<16x1xf32>
    %112 = vector.broadcast %111 : vector<16x1xf32> to vector<16x128xf32>
    %113 = arith.mulf %108, %112 : vector<16x128xf32>
    %114 = vector.broadcast %94 : vector<1x128xf32> to vector<16x128xf32>
    %115 = arith.mulf %113, %114 : vector<16x128xf32>
    %116 = vector.broadcast %95 : vector<1x128xf32> to vector<16x128xf32>
    %117 = arith.addf %115, %116 : vector<16x128xf32>
    %cst_51 = arith.constant 5.000000e-01 : f32
    %118 = vector.broadcast %cst_51 : f32 to vector<16x128xf32>
    %119 = arith.mulf %118, %117 : vector<16x128xf32>
    %cst_52 = arith.constant 4.471500e-02 : f32
    %120 = vector.broadcast %cst_52 : f32 to vector<16x128xf32>
    %121 = arith.mulf %120, %117 : vector<16x128xf32>
    %122 = arith.mulf %121, %117 : vector<16x128xf32>
    %123 = arith.mulf %122, %117 : vector<16x128xf32>
    %124 = arith.addf %117, %123 : vector<16x128xf32>
    %cst_53 = arith.constant 0.797884583 : f32
    %125 = vector.broadcast %cst_53 : f32 to vector<16x128xf32>
    %126 = arith.mulf %125, %124 : vector<16x128xf32>
    %127 = math.tanh %126 : vector<16x128xf32>
    %cst_54 = arith.constant 1.000000e+00 : f32
    %128 = vector.broadcast %cst_54 : f32 to vector<16x128xf32>
    %129 = arith.addf %128, %127 : vector<16x128xf32>
    %130 = arith.mulf %119, %129 : vector<16x128xf32>
    %c0_55 = arith.constant 0 : index
    %c0_56 = arith.constant 0 : index
    %131 = vector.load %arg15[%c0_55, %c0_56] : memref<128x512xbf16, #tpu.memory_space<vmem>>, vector<128x512xbf16>
    %132 = arith.truncf %130 : vector<16x128xf32> to vector<16x128xbf16>
    %cst_57 = arith.constant dense<0.000000e+00> : vector<16x512xf32>
    %133 = tpu.matmul %132, %131, %cst_57 {dimension_numbers = #tpu.dot_dimension_numbers<[1], [0], [0], [1], [0, 0, 1, 1], [], []>} : vector<16x128xbf16>, vector<128x512xbf16>, vector<16x512xf32> -> vector<16x512xf32>
    %c0_58 = arith.constant 0 : index
    %c0_59 = arith.constant 0 : index
    %134 = vector.load %arg16[%c0_58, %c0_59] : memref<1x512xf32, #tpu.memory_space<vmem>>, vector<1x512xf32>
    %135 = vector.broadcast %134 : vector<1x512xf32> to vector<16x512xf32>
    %136 = arith.addf %133, %135 : vector<16x512xf32>
    %c0_60 = arith.constant 0 : index
    %c0_61 = arith.constant 0 : index
    %c0_62 = arith.constant 0 : index
    %137 = vector.load %arg17[%c0_60, %c0_61, %c0_62] : memref<1x16x512xf32, #tpu.memory_space<vmem>>, vector<1x16x512xf32>
    %138 = vector.shape_cast %137 : vector<1x16x512xf32> to vector<16x512xf32>
    %139 = vector.shape_cast %136 : vector<16x512xf32> to vector<1x16x512xf32>
    tpu.vector_store %arg17[%c0_60, %c0_61, %c0_62], %139 {strides = array<i32>} : memref<1x16x512xf32, #tpu.memory_space<vmem>>, vector<1x16x512xf32>,
    return
  }
  func.func @transform_0(%arg0: i32, %arg1: i32) -> (i32, i32, i32) {
    %c0_i32 = arith.constant 0 : i32
    %c0_i32_0 = arith.constant 0 : i32
    return %arg0, %arg1, %c0_i32 : i32, i32, i32
  }
  func.func @transform_1(%arg0: i32, %arg1: i32) -> (i32, i32) {
    %c0_i32 = arith.constant 0 : i32
    %c0_i32_0 = arith.constant 0 : i32
    %c0_i32_1 = arith.constant 0 : i32
    return %c0_i32, %c0_i32_0 : i32, i32
  }
  func.func @transform_2(%arg0: i32, %arg1: i32) -> (i32, i32) {
    %c0_i32 = arith.constant 0 : i32
    %c0_i32_0 = arith.constant 0 : i32
    %c0_i32_1 = arith.constant 0 : i32
    return %c0_i32, %c0_i32_0 : i32, i32
  }
  func.func @transform_3(%arg0: i32, %arg1: i32) -> (i32, i32) {
    %c0_i32 = arith.constant 0 : i32
    %c0_i32_0 = arith.constant 0 : i32
    %c0_i32_1 = arith.constant 0 : i32
    return %c0_i32, %c0_i32_0 : i32, i32
  }
  func.func @transform_4(%arg0: i32, %arg1: i32) -> (i32, i32) {
    %c0_i32 = arith.constant 0 : i32
    %c0_i32_0 = arith.constant 0 : i32
    %c0_i32_1 = arith.constant 0 : i32
    return %c0_i32, %c0_i32_0 : i32, i32
  }
  func.func @transform_5(%arg0: i32, %arg1: i32) -> (i32, i32) {
    %c0_i32 = arith.constant 0 : i32
    %c0_i32_0 = arith.constant 0 : i32
    %c0_i32_1 = arith.constant 0 : i32
    return %c0_i32, %c0_i32_0 : i32, i32
  }
  func.func @transform_6(%arg0: i32, %arg1: i32) -> (i32, i32) {
    %c0_i32 = arith.constant 0 : i32
    %c0_i32_0 = arith.constant 0 : i32
    %c0_i32_1 = arith.constant 0 : i32
    return %c0_i32, %c0_i32_0 : i32, i32
  }
  func.func @transform_7(%arg0: i32, %arg1: i32) -> (i32, i32) {
    %c0_i32 = arith.constant 0 : i32
    %c0_i32_0 = arith.constant 0 : i32
    %c0_i32_1 = arith.constant 0 : i32
    return %c0_i32, %c0_i32_0 : i32, i32
  }
  func.func @transform_8(%arg0: i32, %arg1: i32) -> (i32, i32) {
    %c0_i32 = arith.constant 0 : i32
    %c0_i32_0 = arith.constant 0 : i32
    %c0_i32_1 = arith.constant 0 : i32
    return %c0_i32, %c0_i32_0 : i32, i32
  }
  func.func @transform_9(%arg0: i32, %arg1: i32) -> (i32, i32) {
    %c0_i32 = arith.constant 0 : i32
    %c0_i32_0 = arith.constant 0 : i32
    %c0_i32_1 = arith.constant 0 : i32
    return %c0_i32, %c0_i32_0 : i32, i32
  }
  func.func @transform_10(%arg0: i32, %arg1: i32) -> (i32, i32) {
    %c0_i32 = arith.constant 0 : i32
    %c0_i32_0 = arith.constant 0 : i32
    %c0_i32_1 = arith.constant 0 : i32
    return %c0_i32, %c0_i32_0 : i32, i32
  }
  func.func @transform_11(%arg0: i32, %arg1: i32) -> (i32, i32) {
    %c0_i32 = arith.constant 0 : i32
    %c0_i32_0 = arith.constant 0 : i32
    %c0_i32_1 = arith.constant 0 : i32
    return %c0_i32, %c0_i32_0 : i32, i32
  }
  func.func @transform_12(%arg0: i32, %arg1: i32) -> (i32, i32) {
    %c0_i32 = arith.constant 0 : i32
    %c0_i32_0 = arith.constant 0 : i32
    %c0_i32_1 = arith.constant 0 : i32
    return %c0_i32, %c0_i32_0 : i32, i32
  }
  func.func @transform_13(%arg0: i32, %arg1: i32) -> (i32, i32) {
    %c0_i32 = arith.constant 0 : i32
    %c0_i32_0 = arith.constant 0 : i32
    %c0_i32_1 = arith.constant 0 : i32
    return %c0_i32, %c0_i32_0 : i32, i32
  }
  func.func @transform_14(%arg0: i32, %arg1: i32) -> (i32, i32) {
    %c0_i32 = arith.constant 0 : i32
    %c0_i32_0 = arith.constant 0 : i32
    %c0_i32_1 = arith.constant 0 : i32
    return %c0_i32, %c0_i32_0 : i32, i32
  }
  func.func @transform_15(%arg0: i32, %arg1: i32) -> (i32, i32, i32) {
    %c0_i32 = arith.constant 0 : i32
    %c0_i32_0 = arith.constant 0 : i32
    return %arg0, %arg1, %c0_i32 : i32, i32, i32
  }
}

module attributes {stable_mosaic.version = 11 : i64} {
  func.func @lstm_recurrence_kernel(%arg0: i32, %arg1: memref<2x16x512xf32, #tpu.memory_space<vmem>>, %arg2: memref<2x128xf32, #tpu.memory_space<vmem>>, %arg3: memref<2x128xf32, #tpu.memory_space<vmem>>, %arg4: memref<128x512xbf16, #tpu.memory_space<vmem>>, %arg5: memref<16x2x128xf32, #tpu.memory_space<vmem>>, %arg6: memref<2x128xf32, #tpu.memory_space<vmem>>, %arg7: memref<2x128xf32, #tpu.memory_space<vmem>>, %arg8: memref<2x128xf32, #tpu.memory_space<vmem>>, %arg9: memref<2x128xf32, #tpu.memory_space<vmem>>) attributes {dimension_semantics = [#tpu.dimension_semantics<arbitrary>], iteration_bounds = array<i64: 1>, scalar_prefetch = 0 : i64, scratch_operands = 2 : i64, tpu.core_type = #tpu.core_type<tc>, window_params = [{transform_indices = @transform_0, window_bounds = array<i64: 2, 16, 512>}, {pipeline_mode = #tpu.pipeline_mode<synchronous>, transform_indices = @transform_1, window_bounds = array<i64: 2, 128>}, {pipeline_mode = #tpu.pipeline_mode<synchronous>, transform_indices = @transform_2, window_bounds = array<i64: 2, 128>}, {pipeline_mode = #tpu.pipeline_mode<synchronous>, transform_indices = @transform_3, window_bounds = array<i64: 128, 512>}, {transform_indices = @transform_4, window_bounds = array<i64: 16, 2, 128>}, {pipeline_mode = #tpu.pipeline_mode<synchronous>, transform_indices = @transform_5, window_bounds = array<i64: 2, 128>}, {pipeline_mode = #tpu.pipeline_mode<synchronous>, transform_indices = @transform_6, window_bounds = array<i64: 2, 128>}]} {
    %c0_i32 = arith.constant 0 : i32
    %0 = arith.cmpi eq, %arg0, %c0_i32 : i32
    %1 = arith.extui %0 : i1 to i32
    %c0_i32_0 = arith.constant 0 : i32
    %2 = arith.cmpi ne, %1, %c0_i32_0 : i32
    scf.if %2 {
      %c0_218 = arith.constant 0 : index
      %c0_219 = arith.constant 0 : index
      %762 = vector.load %arg2[%c0_218, %c0_219] : memref<2x128xf32, #tpu.memory_space<vmem>>, vector<2x128xf32>
      %c0_220 = arith.constant 0 : index
      %c0_221 = arith.constant 0 : index
      %763 = vector.load %arg8[%c0_220, %c0_221] : memref<2x128xf32, #tpu.memory_space<vmem>>, vector<2x128xf32>
      tpu.vector_store %arg8[%c0_220, %c0_221], %762 {strides = array<i32>} : memref<2x128xf32, #tpu.memory_space<vmem>>, vector<2x128xf32>,
      %c0_222 = arith.constant 0 : index
      %c0_223 = arith.constant 0 : index
      %764 = vector.load %arg3[%c0_222, %c0_223] : memref<2x128xf32, #tpu.memory_space<vmem>>, vector<2x128xf32>
      %c0_224 = arith.constant 0 : index
      %c0_225 = arith.constant 0 : index
      %765 = vector.load %arg9[%c0_224, %c0_225] : memref<2x128xf32, #tpu.memory_space<vmem>>, vector<2x128xf32>
      tpu.vector_store %arg9[%c0_224, %c0_225], %764 {strides = array<i32>} : memref<2x128xf32, #tpu.memory_space<vmem>>, vector<2x128xf32>,
    } else {
    }
    %c0 = arith.constant 0 : index
    %c0_1 = arith.constant 0 : index
    %3 = vector.load %arg8[%c0, %c0_1] : memref<2x128xf32, #tpu.memory_space<vmem>>, vector<2x128xf32>
    %c0_2 = arith.constant 0 : index
    %c0_3 = arith.constant 0 : index
    %4 = vector.load %arg9[%c0_2, %c0_3] : memref<2x128xf32, #tpu.memory_space<vmem>>, vector<2x128xf32>
    %c16_i32 = arith.constant 16 : i32
    %5 = arith.muli %arg0, %c16_i32 : i32
    %c0_i32_4 = arith.constant 0 : i32
    %6 = arith.addi %5, %c0_i32_4 : i32
    %c0_5 = arith.constant 0 : index
    %c0_6 = arith.constant 0 : index
    %c0_7 = arith.constant 0 : index
    %7 = vector.load %arg1[%c0_5, %c0_6, %c0_7] : memref<2x16x512xf32, #tpu.memory_space<vmem>>, vector<2x1x512xf32>
    %8 = vector.shape_cast %7 : vector<2x1x512xf32> to vector<2x512xf32>
    %9 = arith.truncf %3 : vector<2x128xf32> to vector<2x128xbf16>
    %c0_8 = arith.constant 0 : index
    %c0_9 = arith.constant 0 : index
    %10 = vector.load %arg4[%c0_8, %c0_9] : memref<128x512xbf16, #tpu.memory_space<vmem>>, vector<128x512xbf16>
    %cst = arith.constant dense<0.000000e+00> : vector<2x512xf32>
    %11 = tpu.matmul %9, %10, %cst {dimension_numbers = #tpu.dot_dimension_numbers<[1], [0], [0], [1], [0, 0, 1, 1], [], []>} : vector<2x128xbf16>, vector<128x512xbf16>, vector<2x512xf32> -> vector<2x512xf32>
    %12 = arith.addf %8, %11 : vector<2x512xf32>
    %13 = vector.extract_strided_slice %12 {offsets = [0, 0], sizes = [2, 128], strides = [1, 1]} : vector<2x512xf32> to vector<2x128xf32>
    %14 = arith.negf %13 : vector<2x128xf32>
    %15 = math.exp %14 : vector<2x128xf32>
    %cst_10 = arith.constant 1.000000e+00 : f32
    %16 = vector.broadcast %cst_10 : f32 to vector<2x128xf32>
    %17 = arith.addf %16, %15 : vector<2x128xf32>
    %18 = arith.divf %16, %17 : vector<2x128xf32>
    %19 = vector.extract_strided_slice %12 {offsets = [0, 128], sizes = [2, 128], strides = [1, 1]} : vector<2x512xf32> to vector<2x128xf32>
    %20 = arith.negf %19 : vector<2x128xf32>
    %21 = math.exp %20 : vector<2x128xf32>
    %cst_11 = arith.constant 1.000000e+00 : f32
    %22 = vector.broadcast %cst_11 : f32 to vector<2x128xf32>
    %23 = arith.addf %22, %21 : vector<2x128xf32>
    %24 = arith.divf %22, %23 : vector<2x128xf32>
    %25 = vector.extract_strided_slice %12 {offsets = [0, 256], sizes = [2, 128], strides = [1, 1]} : vector<2x512xf32> to vector<2x128xf32>
    %26 = math.tanh %25 : vector<2x128xf32>
    %27 = vector.extract_strided_slice %12 {offsets = [0, 384], sizes = [2, 128], strides = [1, 1]} : vector<2x512xf32> to vector<2x128xf32>
    %28 = arith.negf %27 : vector<2x128xf32>
    %29 = math.exp %28 : vector<2x128xf32>
    %cst_12 = arith.constant 1.000000e+00 : f32
    %30 = vector.broadcast %cst_12 : f32 to vector<2x128xf32>
    %31 = arith.addf %30, %29 : vector<2x128xf32>
    %32 = arith.divf %30, %31 : vector<2x128xf32>
    %33 = arith.mulf %24, %4 : vector<2x128xf32>
    %34 = arith.mulf %18, %26 : vector<2x128xf32>
    %35 = arith.addf %33, %34 : vector<2x128xf32>
    %36 = math.tanh %35 : vector<2x128xf32>
    %37 = arith.mulf %32, %36 : vector<2x128xf32>
    %c9_i32 = arith.constant 9 : i32
    %38 = arith.cmpi slt, %6, %c9_i32 : i32
    %39 = arith.extui %38 : i1 to i32
    %40 = arith.sitofp %39 : i32 to f32
    %41 = arith.subf %37, %3 : vector<2x128xf32>
    %42 = vector.broadcast %40 : f32 to vector<2x128xf32>
    %43 = arith.mulf %42, %41 : vector<2x128xf32>
    %44 = arith.addf %3, %43 : vector<2x128xf32>
    %45 = arith.subf %35, %4 : vector<2x128xf32>
    %46 = vector.broadcast %40 : f32 to vector<2x128xf32>
    %47 = arith.mulf %46, %45 : vector<2x128xf32>
    %48 = arith.addf %4, %47 : vector<2x128xf32>
    %c0_13 = arith.constant 0 : index
    %c0_14 = arith.constant 0 : index
    %c0_15 = arith.constant 0 : index
    %49 = vector.load %arg5[%c0_13, %c0_14, %c0_15] : memref<16x2x128xf32, #tpu.memory_space<vmem>>, vector<1x2x128xf32>
    %50 = vector.shape_cast %49 : vector<1x2x128xf32> to vector<2x128xf32>
    %51 = vector.shape_cast %44 : vector<2x128xf32> to vector<1x2x128xf32>
    tpu.vector_store %arg5[%c0_13, %c0_14, %c0_15], %51 {strides = array<i32>} : memref<16x2x128xf32, #tpu.memory_space<vmem>>, vector<1x2x128xf32>,
    %c16_i32_16 = arith.constant 16 : i32
    %52 = arith.muli %arg0, %c16_i32_16 : i32
    %c1_i32 = arith.constant 1 : i32
    %53 = arith.addi %52, %c1_i32 : i32
    %c0_17 = arith.constant 0 : index
    %c1 = arith.constant 1 : index
    %c0_18 = arith.constant 0 : index
    %54 = vector.load %arg1[%c0_17, %c1, %c0_18] : memref<2x16x512xf32, #tpu.memory_space<vmem>>, vector<2x1x512xf32>
    %55 = vector.shape_cast %54 : vector<2x1x512xf32> to vector<2x512xf32>
    %56 = arith.truncf %44 : vector<2x128xf32> to vector<2x128xbf16>
    %c0_19 = arith.constant 0 : index
    %c0_20 = arith.constant 0 : index
    %57 = vector.load %arg4[%c0_19, %c0_20] : memref<128x512xbf16, #tpu.memory_space<vmem>>, vector<128x512xbf16>
    %cst_21 = arith.constant dense<0.000000e+00> : vector<2x512xf32>
    %58 = tpu.matmul %56, %57, %cst_21 {dimension_numbers = #tpu.dot_dimension_numbers<[1], [0], [0], [1], [0, 0, 1, 1], [], []>} : vector<2x128xbf16>, vector<128x512xbf16>, vector<2x512xf32> -> vector<2x512xf32>
    %59 = arith.addf %55, %58 : vector<2x512xf32>
    %60 = vector.extract_strided_slice %59 {offsets = [0, 0], sizes = [2, 128], strides = [1, 1]} : vector<2x512xf32> to vector<2x128xf32>
    %61 = arith.negf %60 : vector<2x128xf32>
    %62 = math.exp %61 : vector<2x128xf32>
    %cst_22 = arith.constant 1.000000e+00 : f32
    %63 = vector.broadcast %cst_22 : f32 to vector<2x128xf32>
    %64 = arith.addf %63, %62 : vector<2x128xf32>
    %65 = arith.divf %63, %64 : vector<2x128xf32>
    %66 = vector.extract_strided_slice %59 {offsets = [0, 128], sizes = [2, 128], strides = [1, 1]} : vector<2x512xf32> to vector<2x128xf32>
    %67 = arith.negf %66 : vector<2x128xf32>
    %68 = math.exp %67 : vector<2x128xf32>
    %cst_23 = arith.constant 1.000000e+00 : f32
    %69 = vector.broadcast %cst_23 : f32 to vector<2x128xf32>
    %70 = arith.addf %69, %68 : vector<2x128xf32>
    %71 = arith.divf %69, %70 : vector<2x128xf32>
    %72 = vector.extract_strided_slice %59 {offsets = [0, 256], sizes = [2, 128], strides = [1, 1]} : vector<2x512xf32> to vector<2x128xf32>
    %73 = math.tanh %72 : vector<2x128xf32>
    %74 = vector.extract_strided_slice %59 {offsets = [0, 384], sizes = [2, 128], strides = [1, 1]} : vector<2x512xf32> to vector<2x128xf32>
    %75 = arith.negf %74 : vector<2x128xf32>
    %76 = math.exp %75 : vector<2x128xf32>
    %cst_24 = arith.constant 1.000000e+00 : f32
    %77 = vector.broadcast %cst_24 : f32 to vector<2x128xf32>
    %78 = arith.addf %77, %76 : vector<2x128xf32>
    %79 = arith.divf %77, %78 : vector<2x128xf32>
    %80 = arith.mulf %71, %48 : vector<2x128xf32>
    %81 = arith.mulf %65, %73 : vector<2x128xf32>
    %82 = arith.addf %80, %81 : vector<2x128xf32>
    %83 = math.tanh %82 : vector<2x128xf32>
    %84 = arith.mulf %79, %83 : vector<2x128xf32>
    %c9_i32_25 = arith.constant 9 : i32
    %85 = arith.cmpi slt, %53, %c9_i32_25 : i32
    %86 = arith.extui %85 : i1 to i32
    %87 = arith.sitofp %86 : i32 to f32
    %88 = arith.subf %84, %44 : vector<2x128xf32>
    %89 = vector.broadcast %87 : f32 to vector<2x128xf32>
    %90 = arith.mulf %89, %88 : vector<2x128xf32>
    %91 = arith.addf %44, %90 : vector<2x128xf32>
    %92 = arith.subf %82, %48 : vector<2x128xf32>
    %93 = vector.broadcast %87 : f32 to vector<2x128xf32>
    %94 = arith.mulf %93, %92 : vector<2x128xf32>
    %95 = arith.addf %48, %94 : vector<2x128xf32>
    %c1_26 = arith.constant 1 : index
    %c0_27 = arith.constant 0 : index
    %c0_28 = arith.constant 0 : index
    %96 = vector.load %arg5[%c1_26, %c0_27, %c0_28] : memref<16x2x128xf32, #tpu.memory_space<vmem>>, vector<1x2x128xf32>
    %97 = vector.shape_cast %96 : vector<1x2x128xf32> to vector<2x128xf32>
    %98 = vector.shape_cast %91 : vector<2x128xf32> to vector<1x2x128xf32>
    tpu.vector_store %arg5[%c1_26, %c0_27, %c0_28], %98 {strides = array<i32>} : memref<16x2x128xf32, #tpu.memory_space<vmem>>, vector<1x2x128xf32>,
    %c16_i32_29 = arith.constant 16 : i32
    %99 = arith.muli %arg0, %c16_i32_29 : i32
    %c2_i32 = arith.constant 2 : i32
    %100 = arith.addi %99, %c2_i32 : i32
    %c0_30 = arith.constant 0 : index
    %c2 = arith.constant 2 : index
    %c0_31 = arith.constant 0 : index
    %101 = vector.load %arg1[%c0_30, %c2, %c0_31] : memref<2x16x512xf32, #tpu.memory_space<vmem>>, vector<2x1x512xf32>
    %102 = vector.shape_cast %101 : vector<2x1x512xf32> to vector<2x512xf32>
    %103 = arith.truncf %91 : vector<2x128xf32> to vector<2x128xbf16>
    %c0_32 = arith.constant 0 : index
    %c0_33 = arith.constant 0 : index
    %104 = vector.load %arg4[%c0_32, %c0_33] : memref<128x512xbf16, #tpu.memory_space<vmem>>, vector<128x512xbf16>
    %cst_34 = arith.constant dense<0.000000e+00> : vector<2x512xf32>
    %105 = tpu.matmul %103, %104, %cst_34 {dimension_numbers = #tpu.dot_dimension_numbers<[1], [0], [0], [1], [0, 0, 1, 1], [], []>} : vector<2x128xbf16>, vector<128x512xbf16>, vector<2x512xf32> -> vector<2x512xf32>
    %106 = arith.addf %102, %105 : vector<2x512xf32>
    %107 = vector.extract_strided_slice %106 {offsets = [0, 0], sizes = [2, 128], strides = [1, 1]} : vector<2x512xf32> to vector<2x128xf32>
    %108 = arith.negf %107 : vector<2x128xf32>
    %109 = math.exp %108 : vector<2x128xf32>
    %cst_35 = arith.constant 1.000000e+00 : f32
    %110 = vector.broadcast %cst_35 : f32 to vector<2x128xf32>
    %111 = arith.addf %110, %109 : vector<2x128xf32>
    %112 = arith.divf %110, %111 : vector<2x128xf32>
    %113 = vector.extract_strided_slice %106 {offsets = [0, 128], sizes = [2, 128], strides = [1, 1]} : vector<2x512xf32> to vector<2x128xf32>
    %114 = arith.negf %113 : vector<2x128xf32>
    %115 = math.exp %114 : vector<2x128xf32>
    %cst_36 = arith.constant 1.000000e+00 : f32
    %116 = vector.broadcast %cst_36 : f32 to vector<2x128xf32>
    %117 = arith.addf %116, %115 : vector<2x128xf32>
    %118 = arith.divf %116, %117 : vector<2x128xf32>
    %119 = vector.extract_strided_slice %106 {offsets = [0, 256], sizes = [2, 128], strides = [1, 1]} : vector<2x512xf32> to vector<2x128xf32>
    %120 = math.tanh %119 : vector<2x128xf32>
    %121 = vector.extract_strided_slice %106 {offsets = [0, 384], sizes = [2, 128], strides = [1, 1]} : vector<2x512xf32> to vector<2x128xf32>
    %122 = arith.negf %121 : vector<2x128xf32>
    %123 = math.exp %122 : vector<2x128xf32>
    %cst_37 = arith.constant 1.000000e+00 : f32
    %124 = vector.broadcast %cst_37 : f32 to vector<2x128xf32>
    %125 = arith.addf %124, %123 : vector<2x128xf32>
    %126 = arith.divf %124, %125 : vector<2x128xf32>
    %127 = arith.mulf %118, %95 : vector<2x128xf32>
    %128 = arith.mulf %112, %120 : vector<2x128xf32>
    %129 = arith.addf %127, %128 : vector<2x128xf32>
    %130 = math.tanh %129 : vector<2x128xf32>
    %131 = arith.mulf %126, %130 : vector<2x128xf32>
    %c9_i32_38 = arith.constant 9 : i32
    %132 = arith.cmpi slt, %100, %c9_i32_38 : i32
    %133 = arith.extui %132 : i1 to i32
    %134 = arith.sitofp %133 : i32 to f32
    %135 = arith.subf %131, %91 : vector<2x128xf32>
    %136 = vector.broadcast %134 : f32 to vector<2x128xf32>
    %137 = arith.mulf %136, %135 : vector<2x128xf32>
    %138 = arith.addf %91, %137 : vector<2x128xf32>
    %139 = arith.subf %129, %95 : vector<2x128xf32>
    %140 = vector.broadcast %134 : f32 to vector<2x128xf32>
    %141 = arith.mulf %140, %139 : vector<2x128xf32>
    %142 = arith.addf %95, %141 : vector<2x128xf32>
    %c2_39 = arith.constant 2 : index
    %c0_40 = arith.constant 0 : index
    %c0_41 = arith.constant 0 : index
    %143 = vector.load %arg5[%c2_39, %c0_40, %c0_41] : memref<16x2x128xf32, #tpu.memory_space<vmem>>, vector<1x2x128xf32>
    %144 = vector.shape_cast %143 : vector<1x2x128xf32> to vector<2x128xf32>
    %145 = vector.shape_cast %138 : vector<2x128xf32> to vector<1x2x128xf32>
    tpu.vector_store %arg5[%c2_39, %c0_40, %c0_41], %145 {strides = array<i32>} : memref<16x2x128xf32, #tpu.memory_space<vmem>>, vector<1x2x128xf32>,
    %c16_i32_42 = arith.constant 16 : i32
    %146 = arith.muli %arg0, %c16_i32_42 : i32
    %c3_i32 = arith.constant 3 : i32
    %147 = arith.addi %146, %c3_i32 : i32
    %c0_43 = arith.constant 0 : index
    %c3 = arith.constant 3 : index
    %c0_44 = arith.constant 0 : index
    %148 = vector.load %arg1[%c0_43, %c3, %c0_44] : memref<2x16x512xf32, #tpu.memory_space<vmem>>, vector<2x1x512xf32>
    %149 = vector.shape_cast %148 : vector<2x1x512xf32> to vector<2x512xf32>
    %150 = arith.truncf %138 : vector<2x128xf32> to vector<2x128xbf16>
    %c0_45 = arith.constant 0 : index
    %c0_46 = arith.constant 0 : index
    %151 = vector.load %arg4[%c0_45, %c0_46] : memref<128x512xbf16, #tpu.memory_space<vmem>>, vector<128x512xbf16>
    %cst_47 = arith.constant dense<0.000000e+00> : vector<2x512xf32>
    %152 = tpu.matmul %150, %151, %cst_47 {dimension_numbers = #tpu.dot_dimension_numbers<[1], [0], [0], [1], [0, 0, 1, 1], [], []>} : vector<2x128xbf16>, vector<128x512xbf16>, vector<2x512xf32> -> vector<2x512xf32>
    %153 = arith.addf %149, %152 : vector<2x512xf32>
    %154 = vector.extract_strided_slice %153 {offsets = [0, 0], sizes = [2, 128], strides = [1, 1]} : vector<2x512xf32> to vector<2x128xf32>
    %155 = arith.negf %154 : vector<2x128xf32>
    %156 = math.exp %155 : vector<2x128xf32>
    %cst_48 = arith.constant 1.000000e+00 : f32
    %157 = vector.broadcast %cst_48 : f32 to vector<2x128xf32>
    %158 = arith.addf %157, %156 : vector<2x128xf32>
    %159 = arith.divf %157, %158 : vector<2x128xf32>
    %160 = vector.extract_strided_slice %153 {offsets = [0, 128], sizes = [2, 128], strides = [1, 1]} : vector<2x512xf32> to vector<2x128xf32>
    %161 = arith.negf %160 : vector<2x128xf32>
    %162 = math.exp %161 : vector<2x128xf32>
    %cst_49 = arith.constant 1.000000e+00 : f32
    %163 = vector.broadcast %cst_49 : f32 to vector<2x128xf32>
    %164 = arith.addf %163, %162 : vector<2x128xf32>
    %165 = arith.divf %163, %164 : vector<2x128xf32>
    %166 = vector.extract_strided_slice %153 {offsets = [0, 256], sizes = [2, 128], strides = [1, 1]} : vector<2x512xf32> to vector<2x128xf32>
    %167 = math.tanh %166 : vector<2x128xf32>
    %168 = vector.extract_strided_slice %153 {offsets = [0, 384], sizes = [2, 128], strides = [1, 1]} : vector<2x512xf32> to vector<2x128xf32>
    %169 = arith.negf %168 : vector<2x128xf32>
    %170 = math.exp %169 : vector<2x128xf32>
    %cst_50 = arith.constant 1.000000e+00 : f32
    %171 = vector.broadcast %cst_50 : f32 to vector<2x128xf32>
    %172 = arith.addf %171, %170 : vector<2x128xf32>
    %173 = arith.divf %171, %172 : vector<2x128xf32>
    %174 = arith.mulf %165, %142 : vector<2x128xf32>
    %175 = arith.mulf %159, %167 : vector<2x128xf32>
    %176 = arith.addf %174, %175 : vector<2x128xf32>
    %177 = math.tanh %176 : vector<2x128xf32>
    %178 = arith.mulf %173, %177 : vector<2x128xf32>
    %c9_i32_51 = arith.constant 9 : i32
    %179 = arith.cmpi slt, %147, %c9_i32_51 : i32
    %180 = arith.extui %179 : i1 to i32
    %181 = arith.sitofp %180 : i32 to f32
    %182 = arith.subf %178, %138 : vector<2x128xf32>
    %183 = vector.broadcast %181 : f32 to vector<2x128xf32>
    %184 = arith.mulf %183, %182 : vector<2x128xf32>
    %185 = arith.addf %138, %184 : vector<2x128xf32>
    %186 = arith.subf %176, %142 : vector<2x128xf32>
    %187 = vector.broadcast %181 : f32 to vector<2x128xf32>
    %188 = arith.mulf %187, %186 : vector<2x128xf32>
    %189 = arith.addf %142, %188 : vector<2x128xf32>
    %c3_52 = arith.constant 3 : index
    %c0_53 = arith.constant 0 : index
    %c0_54 = arith.constant 0 : index
    %190 = vector.load %arg5[%c3_52, %c0_53, %c0_54] : memref<16x2x128xf32, #tpu.memory_space<vmem>>, vector<1x2x128xf32>
    %191 = vector.shape_cast %190 : vector<1x2x128xf32> to vector<2x128xf32>
    %192 = vector.shape_cast %185 : vector<2x128xf32> to vector<1x2x128xf32>
    tpu.vector_store %arg5[%c3_52, %c0_53, %c0_54], %192 {strides = array<i32>} : memref<16x2x128xf32, #tpu.memory_space<vmem>>, vector<1x2x128xf32>,
    %c16_i32_55 = arith.constant 16 : i32
    %193 = arith.muli %arg0, %c16_i32_55 : i32
    %c4_i32 = arith.constant 4 : i32
    %194 = arith.addi %193, %c4_i32 : i32
    %c0_56 = arith.constant 0 : index
    %c4 = arith.constant 4 : index
    %c0_57 = arith.constant 0 : index
    %195 = vector.load %arg1[%c0_56, %c4, %c0_57] : memref<2x16x512xf32, #tpu.memory_space<vmem>>, vector<2x1x512xf32>
    %196 = vector.shape_cast %195 : vector<2x1x512xf32> to vector<2x512xf32>
    %197 = arith.truncf %185 : vector<2x128xf32> to vector<2x128xbf16>
    %c0_58 = arith.constant 0 : index
    %c0_59 = arith.constant 0 : index
    %198 = vector.load %arg4[%c0_58, %c0_59] : memref<128x512xbf16, #tpu.memory_space<vmem>>, vector<128x512xbf16>
    %cst_60 = arith.constant dense<0.000000e+00> : vector<2x512xf32>
    %199 = tpu.matmul %197, %198, %cst_60 {dimension_numbers = #tpu.dot_dimension_numbers<[1], [0], [0], [1], [0, 0, 1, 1], [], []>} : vector<2x128xbf16>, vector<128x512xbf16>, vector<2x512xf32> -> vector<2x512xf32>
    %200 = arith.addf %196, %199 : vector<2x512xf32>
    %201 = vector.extract_strided_slice %200 {offsets = [0, 0], sizes = [2, 128], strides = [1, 1]} : vector<2x512xf32> to vector<2x128xf32>
    %202 = arith.negf %201 : vector<2x128xf32>
    %203 = math.exp %202 : vector<2x128xf32>
    %cst_61 = arith.constant 1.000000e+00 : f32
    %204 = vector.broadcast %cst_61 : f32 to vector<2x128xf32>
    %205 = arith.addf %204, %203 : vector<2x128xf32>
    %206 = arith.divf %204, %205 : vector<2x128xf32>
    %207 = vector.extract_strided_slice %200 {offsets = [0, 128], sizes = [2, 128], strides = [1, 1]} : vector<2x512xf32> to vector<2x128xf32>
    %208 = arith.negf %207 : vector<2x128xf32>
    %209 = math.exp %208 : vector<2x128xf32>
    %cst_62 = arith.constant 1.000000e+00 : f32
    %210 = vector.broadcast %cst_62 : f32 to vector<2x128xf32>
    %211 = arith.addf %210, %209 : vector<2x128xf32>
    %212 = arith.divf %210, %211 : vector<2x128xf32>
    %213 = vector.extract_strided_slice %200 {offsets = [0, 256], sizes = [2, 128], strides = [1, 1]} : vector<2x512xf32> to vector<2x128xf32>
    %214 = math.tanh %213 : vector<2x128xf32>
    %215 = vector.extract_strided_slice %200 {offsets = [0, 384], sizes = [2, 128], strides = [1, 1]} : vector<2x512xf32> to vector<2x128xf32>
    %216 = arith.negf %215 : vector<2x128xf32>
    %217 = math.exp %216 : vector<2x128xf32>
    %cst_63 = arith.constant 1.000000e+00 : f32
    %218 = vector.broadcast %cst_63 : f32 to vector<2x128xf32>
    %219 = arith.addf %218, %217 : vector<2x128xf32>
    %220 = arith.divf %218, %219 : vector<2x128xf32>
    %221 = arith.mulf %212, %189 : vector<2x128xf32>
    %222 = arith.mulf %206, %214 : vector<2x128xf32>
    %223 = arith.addf %221, %222 : vector<2x128xf32>
    %224 = math.tanh %223 : vector<2x128xf32>
    %225 = arith.mulf %220, %224 : vector<2x128xf32>
    %c9_i32_64 = arith.constant 9 : i32
    %226 = arith.cmpi slt, %194, %c9_i32_64 : i32
    %227 = arith.extui %226 : i1 to i32
    %228 = arith.sitofp %227 : i32 to f32
    %229 = arith.subf %225, %185 : vector<2x128xf32>
    %230 = vector.broadcast %228 : f32 to vector<2x128xf32>
    %231 = arith.mulf %230, %229 : vector<2x128xf32>
    %232 = arith.addf %185, %231 : vector<2x128xf32>
    %233 = arith.subf %223, %189 : vector<2x128xf32>
    %234 = vector.broadcast %228 : f32 to vector<2x128xf32>
    %235 = arith.mulf %234, %233 : vector<2x128xf32>
    %236 = arith.addf %189, %235 : vector<2x128xf32>
    %c4_65 = arith.constant 4 : index
    %c0_66 = arith.constant 0 : index
    %c0_67 = arith.constant 0 : index
    %237 = vector.load %arg5[%c4_65, %c0_66, %c0_67] : memref<16x2x128xf32, #tpu.memory_space<vmem>>, vector<1x2x128xf32>
    %238 = vector.shape_cast %237 : vector<1x2x128xf32> to vector<2x128xf32>
    %239 = vector.shape_cast %232 : vector<2x128xf32> to vector<1x2x128xf32>
    tpu.vector_store %arg5[%c4_65, %c0_66, %c0_67], %239 {strides = array<i32>} : memref<16x2x128xf32, #tpu.memory_space<vmem>>, vector<1x2x128xf32>,
    %c16_i32_68 = arith.constant 16 : i32
    %240 = arith.muli %arg0, %c16_i32_68 : i32
    %c5_i32 = arith.constant 5 : i32
    %241 = arith.addi %240, %c5_i32 : i32
    %c0_69 = arith.constant 0 : index
    %c5 = arith.constant 5 : index
    %c0_70 = arith.constant 0 : index
    %242 = vector.load %arg1[%c0_69, %c5, %c0_70] : memref<2x16x512xf32, #tpu.memory_space<vmem>>, vector<2x1x512xf32>
    %243 = vector.shape_cast %242 : vector<2x1x512xf32> to vector<2x512xf32>
    %244 = arith.truncf %232 : vector<2x128xf32> to vector<2x128xbf16>
    %c0_71 = arith.constant 0 : index
    %c0_72 = arith.constant 0 : index
    %245 = vector.load %arg4[%c0_71, %c0_72] : memref<128x512xbf16, #tpu.memory_space<vmem>>, vector<128x512xbf16>
    %cst_73 = arith.constant dense<0.000000e+00> : vector<2x512xf32>
    %246 = tpu.matmul %244, %245, %cst_73 {dimension_numbers = #tpu.dot_dimension_numbers<[1], [0], [0], [1], [0, 0, 1, 1], [], []>} : vector<2x128xbf16>, vector<128x512xbf16>, vector<2x512xf32> -> vector<2x512xf32>
    %247 = arith.addf %243, %246 : vector<2x512xf32>
    %248 = vector.extract_strided_slice %247 {offsets = [0, 0], sizes = [2, 128], strides = [1, 1]} : vector<2x512xf32> to vector<2x128xf32>
    %249 = arith.negf %248 : vector<2x128xf32>
    %250 = math.exp %249 : vector<2x128xf32>
    %cst_74 = arith.constant 1.000000e+00 : f32
    %251 = vector.broadcast %cst_74 : f32 to vector<2x128xf32>
    %252 = arith.addf %251, %250 : vector<2x128xf32>
    %253 = arith.divf %251, %252 : vector<2x128xf32>
    %254 = vector.extract_strided_slice %247 {offsets = [0, 128], sizes = [2, 128], strides = [1, 1]} : vector<2x512xf32> to vector<2x128xf32>
    %255 = arith.negf %254 : vector<2x128xf32>
    %256 = math.exp %255 : vector<2x128xf32>
    %cst_75 = arith.constant 1.000000e+00 : f32
    %257 = vector.broadcast %cst_75 : f32 to vector<2x128xf32>
    %258 = arith.addf %257, %256 : vector<2x128xf32>
    %259 = arith.divf %257, %258 : vector<2x128xf32>
    %260 = vector.extract_strided_slice %247 {offsets = [0, 256], sizes = [2, 128], strides = [1, 1]} : vector<2x512xf32> to vector<2x128xf32>
    %261 = math.tanh %260 : vector<2x128xf32>
    %262 = vector.extract_strided_slice %247 {offsets = [0, 384], sizes = [2, 128], strides = [1, 1]} : vector<2x512xf32> to vector<2x128xf32>
    %263 = arith.negf %262 : vector<2x128xf32>
    %264 = math.exp %263 : vector<2x128xf32>
    %cst_76 = arith.constant 1.000000e+00 : f32
    %265 = vector.broadcast %cst_76 : f32 to vector<2x128xf32>
    %266 = arith.addf %265, %264 : vector<2x128xf32>
    %267 = arith.divf %265, %266 : vector<2x128xf32>
    %268 = arith.mulf %259, %236 : vector<2x128xf32>
    %269 = arith.mulf %253, %261 : vector<2x128xf32>
    %270 = arith.addf %268, %269 : vector<2x128xf32>
    %271 = math.tanh %270 : vector<2x128xf32>
    %272 = arith.mulf %267, %271 : vector<2x128xf32>
    %c9_i32_77 = arith.constant 9 : i32
    %273 = arith.cmpi slt, %241, %c9_i32_77 : i32
    %274 = arith.extui %273 : i1 to i32
    %275 = arith.sitofp %274 : i32 to f32
    %276 = arith.subf %272, %232 : vector<2x128xf32>
    %277 = vector.broadcast %275 : f32 to vector<2x128xf32>
    %278 = arith.mulf %277, %276 : vector<2x128xf32>
    %279 = arith.addf %232, %278 : vector<2x128xf32>
    %280 = arith.subf %270, %236 : vector<2x128xf32>
    %281 = vector.broadcast %275 : f32 to vector<2x128xf32>
    %282 = arith.mulf %281, %280 : vector<2x128xf32>
    %283 = arith.addf %236, %282 : vector<2x128xf32>
    %c5_78 = arith.constant 5 : index
    %c0_79 = arith.constant 0 : index
    %c0_80 = arith.constant 0 : index
    %284 = vector.load %arg5[%c5_78, %c0_79, %c0_80] : memref<16x2x128xf32, #tpu.memory_space<vmem>>, vector<1x2x128xf32>
    %285 = vector.shape_cast %284 : vector<1x2x128xf32> to vector<2x128xf32>
    %286 = vector.shape_cast %279 : vector<2x128xf32> to vector<1x2x128xf32>
    tpu.vector_store %arg5[%c5_78, %c0_79, %c0_80], %286 {strides = array<i32>} : memref<16x2x128xf32, #tpu.memory_space<vmem>>, vector<1x2x128xf32>,
    %c16_i32_81 = arith.constant 16 : i32
    %287 = arith.muli %arg0, %c16_i32_81 : i32
    %c6_i32 = arith.constant 6 : i32
    %288 = arith.addi %287, %c6_i32 : i32
    %c0_82 = arith.constant 0 : index
    %c6 = arith.constant 6 : index
    %c0_83 = arith.constant 0 : index
    %289 = vector.load %arg1[%c0_82, %c6, %c0_83] : memref<2x16x512xf32, #tpu.memory_space<vmem>>, vector<2x1x512xf32>
    %290 = vector.shape_cast %289 : vector<2x1x512xf32> to vector<2x512xf32>
    %291 = arith.truncf %279 : vector<2x128xf32> to vector<2x128xbf16>
    %c0_84 = arith.constant 0 : index
    %c0_85 = arith.constant 0 : index
    %292 = vector.load %arg4[%c0_84, %c0_85] : memref<128x512xbf16, #tpu.memory_space<vmem>>, vector<128x512xbf16>
    %cst_86 = arith.constant dense<0.000000e+00> : vector<2x512xf32>
    %293 = tpu.matmul %291, %292, %cst_86 {dimension_numbers = #tpu.dot_dimension_numbers<[1], [0], [0], [1], [0, 0, 1, 1], [], []>} : vector<2x128xbf16>, vector<128x512xbf16>, vector<2x512xf32> -> vector<2x512xf32>
    %294 = arith.addf %290, %293 : vector<2x512xf32>
    %295 = vector.extract_strided_slice %294 {offsets = [0, 0], sizes = [2, 128], strides = [1, 1]} : vector<2x512xf32> to vector<2x128xf32>
    %296 = arith.negf %295 : vector<2x128xf32>
    %297 = math.exp %296 : vector<2x128xf32>
    %cst_87 = arith.constant 1.000000e+00 : f32
    %298 = vector.broadcast %cst_87 : f32 to vector<2x128xf32>
    %299 = arith.addf %298, %297 : vector<2x128xf32>
    %300 = arith.divf %298, %299 : vector<2x128xf32>
    %301 = vector.extract_strided_slice %294 {offsets = [0, 128], sizes = [2, 128], strides = [1, 1]} : vector<2x512xf32> to vector<2x128xf32>
    %302 = arith.negf %301 : vector<2x128xf32>
    %303 = math.exp %302 : vector<2x128xf32>
    %cst_88 = arith.constant 1.000000e+00 : f32
    %304 = vector.broadcast %cst_88 : f32 to vector<2x128xf32>
    %305 = arith.addf %304, %303 : vector<2x128xf32>
    %306 = arith.divf %304, %305 : vector<2x128xf32>
    %307 = vector.extract_strided_slice %294 {offsets = [0, 256], sizes = [2, 128], strides = [1, 1]} : vector<2x512xf32> to vector<2x128xf32>
    %308 = math.tanh %307 : vector<2x128xf32>
    %309 = vector.extract_strided_slice %294 {offsets = [0, 384], sizes = [2, 128], strides = [1, 1]} : vector<2x512xf32> to vector<2x128xf32>
    %310 = arith.negf %309 : vector<2x128xf32>
    %311 = math.exp %310 : vector<2x128xf32>
    %cst_89 = arith.constant 1.000000e+00 : f32
    %312 = vector.broadcast %cst_89 : f32 to vector<2x128xf32>
    %313 = arith.addf %312, %311 : vector<2x128xf32>
    %314 = arith.divf %312, %313 : vector<2x128xf32>
    %315 = arith.mulf %306, %283 : vector<2x128xf32>
    %316 = arith.mulf %300, %308 : vector<2x128xf32>
    %317 = arith.addf %315, %316 : vector<2x128xf32>
    %318 = math.tanh %317 : vector<2x128xf32>
    %319 = arith.mulf %314, %318 : vector<2x128xf32>
    %c9_i32_90 = arith.constant 9 : i32
    %320 = arith.cmpi slt, %288, %c9_i32_90 : i32
    %321 = arith.extui %320 : i1 to i32
    %322 = arith.sitofp %321 : i32 to f32
    %323 = arith.subf %319, %279 : vector<2x128xf32>
    %324 = vector.broadcast %322 : f32 to vector<2x128xf32>
    %325 = arith.mulf %324, %323 : vector<2x128xf32>
    %326 = arith.addf %279, %325 : vector<2x128xf32>
    %327 = arith.subf %317, %283 : vector<2x128xf32>
    %328 = vector.broadcast %322 : f32 to vector<2x128xf32>
    %329 = arith.mulf %328, %327 : vector<2x128xf32>
    %330 = arith.addf %283, %329 : vector<2x128xf32>
    %c6_91 = arith.constant 6 : index
    %c0_92 = arith.constant 0 : index
    %c0_93 = arith.constant 0 : index
    %331 = vector.load %arg5[%c6_91, %c0_92, %c0_93] : memref<16x2x128xf32, #tpu.memory_space<vmem>>, vector<1x2x128xf32>
    %332 = vector.shape_cast %331 : vector<1x2x128xf32> to vector<2x128xf32>
    %333 = vector.shape_cast %326 : vector<2x128xf32> to vector<1x2x128xf32>
    tpu.vector_store %arg5[%c6_91, %c0_92, %c0_93], %333 {strides = array<i32>} : memref<16x2x128xf32, #tpu.memory_space<vmem>>, vector<1x2x128xf32>,
    %c16_i32_94 = arith.constant 16 : i32
    %334 = arith.muli %arg0, %c16_i32_94 : i32
    %c7_i32 = arith.constant 7 : i32
    %335 = arith.addi %334, %c7_i32 : i32
    %c0_95 = arith.constant 0 : index
    %c7 = arith.constant 7 : index
    %c0_96 = arith.constant 0 : index
    %336 = vector.load %arg1[%c0_95, %c7, %c0_96] : memref<2x16x512xf32, #tpu.memory_space<vmem>>, vector<2x1x512xf32>
    %337 = vector.shape_cast %336 : vector<2x1x512xf32> to vector<2x512xf32>
    %338 = arith.truncf %326 : vector<2x128xf32> to vector<2x128xbf16>
    %c0_97 = arith.constant 0 : index
    %c0_98 = arith.constant 0 : index
    %339 = vector.load %arg4[%c0_97, %c0_98] : memref<128x512xbf16, #tpu.memory_space<vmem>>, vector<128x512xbf16>
    %cst_99 = arith.constant dense<0.000000e+00> : vector<2x512xf32>
    %340 = tpu.matmul %338, %339, %cst_99 {dimension_numbers = #tpu.dot_dimension_numbers<[1], [0], [0], [1], [0, 0, 1, 1], [], []>} : vector<2x128xbf16>, vector<128x512xbf16>, vector<2x512xf32> -> vector<2x512xf32>
    %341 = arith.addf %337, %340 : vector<2x512xf32>
    %342 = vector.extract_strided_slice %341 {offsets = [0, 0], sizes = [2, 128], strides = [1, 1]} : vector<2x512xf32> to vector<2x128xf32>
    %343 = arith.negf %342 : vector<2x128xf32>
    %344 = math.exp %343 : vector<2x128xf32>
    %cst_100 = arith.constant 1.000000e+00 : f32
    %345 = vector.broadcast %cst_100 : f32 to vector<2x128xf32>
    %346 = arith.addf %345, %344 : vector<2x128xf32>
    %347 = arith.divf %345, %346 : vector<2x128xf32>
    %348 = vector.extract_strided_slice %341 {offsets = [0, 128], sizes = [2, 128], strides = [1, 1]} : vector<2x512xf32> to vector<2x128xf32>
    %349 = arith.negf %348 : vector<2x128xf32>
    %350 = math.exp %349 : vector<2x128xf32>
    %cst_101 = arith.constant 1.000000e+00 : f32
    %351 = vector.broadcast %cst_101 : f32 to vector<2x128xf32>
    %352 = arith.addf %351, %350 : vector<2x128xf32>
    %353 = arith.divf %351, %352 : vector<2x128xf32>
    %354 = vector.extract_strided_slice %341 {offsets = [0, 256], sizes = [2, 128], strides = [1, 1]} : vector<2x512xf32> to vector<2x128xf32>
    %355 = math.tanh %354 : vector<2x128xf32>
    %356 = vector.extract_strided_slice %341 {offsets = [0, 384], sizes = [2, 128], strides = [1, 1]} : vector<2x512xf32> to vector<2x128xf32>
    %357 = arith.negf %356 : vector<2x128xf32>
    %358 = math.exp %357 : vector<2x128xf32>
    %cst_102 = arith.constant 1.000000e+00 : f32
    %359 = vector.broadcast %cst_102 : f32 to vector<2x128xf32>
    %360 = arith.addf %359, %358 : vector<2x128xf32>
    %361 = arith.divf %359, %360 : vector<2x128xf32>
    %362 = arith.mulf %353, %330 : vector<2x128xf32>
    %363 = arith.mulf %347, %355 : vector<2x128xf32>
    %364 = arith.addf %362, %363 : vector<2x128xf32>
    %365 = math.tanh %364 : vector<2x128xf32>
    %366 = arith.mulf %361, %365 : vector<2x128xf32>
    %c9_i32_103 = arith.constant 9 : i32
    %367 = arith.cmpi slt, %335, %c9_i32_103 : i32
    %368 = arith.extui %367 : i1 to i32
    %369 = arith.sitofp %368 : i32 to f32
    %370 = arith.subf %366, %326 : vector<2x128xf32>
    %371 = vector.broadcast %369 : f32 to vector<2x128xf32>
    %372 = arith.mulf %371, %370 : vector<2x128xf32>
    %373 = arith.addf %326, %372 : vector<2x128xf32>
    %374 = arith.subf %364, %330 : vector<2x128xf32>
    %375 = vector.broadcast %369 : f32 to vector<2x128xf32>
    %376 = arith.mulf %375, %374 : vector<2x128xf32>
    %377 = arith.addf %330, %376 : vector<2x128xf32>
    %c7_104 = arith.constant 7 : index
    %c0_105 = arith.constant 0 : index
    %c0_106 = arith.constant 0 : index
    %378 = vector.load %arg5[%c7_104, %c0_105, %c0_106] : memref<16x2x128xf32, #tpu.memory_space<vmem>>, vector<1x2x128xf32>
    %379 = vector.shape_cast %378 : vector<1x2x128xf32> to vector<2x128xf32>
    %380 = vector.shape_cast %373 : vector<2x128xf32> to vector<1x2x128xf32>
    tpu.vector_store %arg5[%c7_104, %c0_105, %c0_106], %380 {strides = array<i32>} : memref<16x2x128xf32, #tpu.memory_space<vmem>>, vector<1x2x128xf32>,
    %c16_i32_107 = arith.constant 16 : i32
    %381 = arith.muli %arg0, %c16_i32_107 : i32
    %c8_i32 = arith.constant 8 : i32
    %382 = arith.addi %381, %c8_i32 : i32
    %c0_108 = arith.constant 0 : index
    %c8 = arith.constant 8 : index
    %c0_109 = arith.constant 0 : index
    %383 = vector.load %arg1[%c0_108, %c8, %c0_109] : memref<2x16x512xf32, #tpu.memory_space<vmem>>, vector<2x1x512xf32>
    %384 = vector.shape_cast %383 : vector<2x1x512xf32> to vector<2x512xf32>
    %385 = arith.truncf %373 : vector<2x128xf32> to vector<2x128xbf16>
    %c0_110 = arith.constant 0 : index
    %c0_111 = arith.constant 0 : index
    %386 = vector.load %arg4[%c0_110, %c0_111] : memref<128x512xbf16, #tpu.memory_space<vmem>>, vector<128x512xbf16>
    %cst_112 = arith.constant dense<0.000000e+00> : vector<2x512xf32>
    %387 = tpu.matmul %385, %386, %cst_112 {dimension_numbers = #tpu.dot_dimension_numbers<[1], [0], [0], [1], [0, 0, 1, 1], [], []>} : vector<2x128xbf16>, vector<128x512xbf16>, vector<2x512xf32> -> vector<2x512xf32>
    %388 = arith.addf %384, %387 : vector<2x512xf32>
    %389 = vector.extract_strided_slice %388 {offsets = [0, 0], sizes = [2, 128], strides = [1, 1]} : vector<2x512xf32> to vector<2x128xf32>
    %390 = arith.negf %389 : vector<2x128xf32>
    %391 = math.exp %390 : vector<2x128xf32>
    %cst_113 = arith.constant 1.000000e+00 : f32
    %392 = vector.broadcast %cst_113 : f32 to vector<2x128xf32>
    %393 = arith.addf %392, %391 : vector<2x128xf32>
    %394 = arith.divf %392, %393 : vector<2x128xf32>
    %395 = vector.extract_strided_slice %388 {offsets = [0, 128], sizes = [2, 128], strides = [1, 1]} : vector<2x512xf32> to vector<2x128xf32>
    %396 = arith.negf %395 : vector<2x128xf32>
    %397 = math.exp %396 : vector<2x128xf32>
    %cst_114 = arith.constant 1.000000e+00 : f32
    %398 = vector.broadcast %cst_114 : f32 to vector<2x128xf32>
    %399 = arith.addf %398, %397 : vector<2x128xf32>
    %400 = arith.divf %398, %399 : vector<2x128xf32>
    %401 = vector.extract_strided_slice %388 {offsets = [0, 256], sizes = [2, 128], strides = [1, 1]} : vector<2x512xf32> to vector<2x128xf32>
    %402 = math.tanh %401 : vector<2x128xf32>
    %403 = vector.extract_strided_slice %388 {offsets = [0, 384], sizes = [2, 128], strides = [1, 1]} : vector<2x512xf32> to vector<2x128xf32>
    %404 = arith.negf %403 : vector<2x128xf32>
    %405 = math.exp %404 : vector<2x128xf32>
    %cst_115 = arith.constant 1.000000e+00 : f32
    %406 = vector.broadcast %cst_115 : f32 to vector<2x128xf32>
    %407 = arith.addf %406, %405 : vector<2x128xf32>
    %408 = arith.divf %406, %407 : vector<2x128xf32>
    %409 = arith.mulf %400, %377 : vector<2x128xf32>
    %410 = arith.mulf %394, %402 : vector<2x128xf32>
    %411 = arith.addf %409, %410 : vector<2x128xf32>
    %412 = math.tanh %411 : vector<2x128xf32>
    %413 = arith.mulf %408, %412 : vector<2x128xf32>
    %c9_i32_116 = arith.constant 9 : i32
    %414 = arith.cmpi slt, %382, %c9_i32_116 : i32
    %415 = arith.extui %414 : i1 to i32
    %416 = arith.sitofp %415 : i32 to f32
    %417 = arith.subf %413, %373 : vector<2x128xf32>
    %418 = vector.broadcast %416 : f32 to vector<2x128xf32>
    %419 = arith.mulf %418, %417 : vector<2x128xf32>
    %420 = arith.addf %373, %419 : vector<2x128xf32>
    %421 = arith.subf %411, %377 : vector<2x128xf32>
    %422 = vector.broadcast %416 : f32 to vector<2x128xf32>
    %423 = arith.mulf %422, %421 : vector<2x128xf32>
    %424 = arith.addf %377, %423 : vector<2x128xf32>
    %c8_117 = arith.constant 8 : index
    %c0_118 = arith.constant 0 : index
    %c0_119 = arith.constant 0 : index
    %425 = vector.load %arg5[%c8_117, %c0_118, %c0_119] : memref<16x2x128xf32, #tpu.memory_space<vmem>>, vector<1x2x128xf32>
    %426 = vector.shape_cast %425 : vector<1x2x128xf32> to vector<2x128xf32>
    %427 = vector.shape_cast %420 : vector<2x128xf32> to vector<1x2x128xf32>
    tpu.vector_store %arg5[%c8_117, %c0_118, %c0_119], %427 {strides = array<i32>} : memref<16x2x128xf32, #tpu.memory_space<vmem>>, vector<1x2x128xf32>,
    %c16_i32_120 = arith.constant 16 : i32
    %428 = arith.muli %arg0, %c16_i32_120 : i32
    %c9_i32_121 = arith.constant 9 : i32
    %429 = arith.addi %428, %c9_i32_121 : i32
    %c0_122 = arith.constant 0 : index
    %c9 = arith.constant 9 : index
    %c0_123 = arith.constant 0 : index
    %430 = vector.load %arg1[%c0_122, %c9, %c0_123] : memref<2x16x512xf32, #tpu.memory_space<vmem>>, vector<2x1x512xf32>
    %431 = vector.shape_cast %430 : vector<2x1x512xf32> to vector<2x512xf32>
    %432 = arith.truncf %420 : vector<2x128xf32> to vector<2x128xbf16>
    %c0_124 = arith.constant 0 : index
    %c0_125 = arith.constant 0 : index
    %433 = vector.load %arg4[%c0_124, %c0_125] : memref<128x512xbf16, #tpu.memory_space<vmem>>, vector<128x512xbf16>
    %cst_126 = arith.constant dense<0.000000e+00> : vector<2x512xf32>
    %434 = tpu.matmul %432, %433, %cst_126 {dimension_numbers = #tpu.dot_dimension_numbers<[1], [0], [0], [1], [0, 0, 1, 1], [], []>} : vector<2x128xbf16>, vector<128x512xbf16>, vector<2x512xf32> -> vector<2x512xf32>
    %435 = arith.addf %431, %434 : vector<2x512xf32>
    %436 = vector.extract_strided_slice %435 {offsets = [0, 0], sizes = [2, 128], strides = [1, 1]} : vector<2x512xf32> to vector<2x128xf32>
    %437 = arith.negf %436 : vector<2x128xf32>
    %438 = math.exp %437 : vector<2x128xf32>
    %cst_127 = arith.constant 1.000000e+00 : f32
    %439 = vector.broadcast %cst_127 : f32 to vector<2x128xf32>
    %440 = arith.addf %439, %438 : vector<2x128xf32>
    %441 = arith.divf %439, %440 : vector<2x128xf32>
    %442 = vector.extract_strided_slice %435 {offsets = [0, 128], sizes = [2, 128], strides = [1, 1]} : vector<2x512xf32> to vector<2x128xf32>
    %443 = arith.negf %442 : vector<2x128xf32>
    %444 = math.exp %443 : vector<2x128xf32>
    %cst_128 = arith.constant 1.000000e+00 : f32
    %445 = vector.broadcast %cst_128 : f32 to vector<2x128xf32>
    %446 = arith.addf %445, %444 : vector<2x128xf32>
    %447 = arith.divf %445, %446 : vector<2x128xf32>
    %448 = vector.extract_strided_slice %435 {offsets = [0, 256], sizes = [2, 128], strides = [1, 1]} : vector<2x512xf32> to vector<2x128xf32>
    %449 = math.tanh %448 : vector<2x128xf32>
    %450 = vector.extract_strided_slice %435 {offsets = [0, 384], sizes = [2, 128], strides = [1, 1]} : vector<2x512xf32> to vector<2x128xf32>
    %451 = arith.negf %450 : vector<2x128xf32>
    %452 = math.exp %451 : vector<2x128xf32>
    %cst_129 = arith.constant 1.000000e+00 : f32
    %453 = vector.broadcast %cst_129 : f32 to vector<2x128xf32>
    %454 = arith.addf %453, %452 : vector<2x128xf32>
    %455 = arith.divf %453, %454 : vector<2x128xf32>
    %456 = arith.mulf %447, %424 : vector<2x128xf32>
    %457 = arith.mulf %441, %449 : vector<2x128xf32>
    %458 = arith.addf %456, %457 : vector<2x128xf32>
    %459 = math.tanh %458 : vector<2x128xf32>
    %460 = arith.mulf %455, %459 : vector<2x128xf32>
    %c9_i32_130 = arith.constant 9 : i32
    %461 = arith.cmpi slt, %429, %c9_i32_130 : i32
    %462 = arith.extui %461 : i1 to i32
    %463 = arith.sitofp %462 : i32 to f32
    %464 = arith.subf %460, %420 : vector<2x128xf32>
    %465 = vector.broadcast %463 : f32 to vector<2x128xf32>
    %466 = arith.mulf %465, %464 : vector<2x128xf32>
    %467 = arith.addf %420, %466 : vector<2x128xf32>
    %468 = arith.subf %458, %424 : vector<2x128xf32>
    %469 = vector.broadcast %463 : f32 to vector<2x128xf32>
    %470 = arith.mulf %469, %468 : vector<2x128xf32>
    %471 = arith.addf %424, %470 : vector<2x128xf32>
    %c9_131 = arith.constant 9 : index
    %c0_132 = arith.constant 0 : index
    %c0_133 = arith.constant 0 : index
    %472 = vector.load %arg5[%c9_131, %c0_132, %c0_133] : memref<16x2x128xf32, #tpu.memory_space<vmem>>, vector<1x2x128xf32>
    %473 = vector.shape_cast %472 : vector<1x2x128xf32> to vector<2x128xf32>
    %474 = vector.shape_cast %467 : vector<2x128xf32> to vector<1x2x128xf32>
    tpu.vector_store %arg5[%c9_131, %c0_132, %c0_133], %474 {strides = array<i32>} : memref<16x2x128xf32, #tpu.memory_space<vmem>>, vector<1x2x128xf32>,
    %c16_i32_134 = arith.constant 16 : i32
    %475 = arith.muli %arg0, %c16_i32_134 : i32
    %c10_i32 = arith.constant 10 : i32
    %476 = arith.addi %475, %c10_i32 : i32
    %c0_135 = arith.constant 0 : index
    %c10 = arith.constant 10 : index
    %c0_136 = arith.constant 0 : index
    %477 = vector.load %arg1[%c0_135, %c10, %c0_136] : memref<2x16x512xf32, #tpu.memory_space<vmem>>, vector<2x1x512xf32>
    %478 = vector.shape_cast %477 : vector<2x1x512xf32> to vector<2x512xf32>
    %479 = arith.truncf %467 : vector<2x128xf32> to vector<2x128xbf16>
    %c0_137 = arith.constant 0 : index
    %c0_138 = arith.constant 0 : index
    %480 = vector.load %arg4[%c0_137, %c0_138] : memref<128x512xbf16, #tpu.memory_space<vmem>>, vector<128x512xbf16>
    %cst_139 = arith.constant dense<0.000000e+00> : vector<2x512xf32>
    %481 = tpu.matmul %479, %480, %cst_139 {dimension_numbers = #tpu.dot_dimension_numbers<[1], [0], [0], [1], [0, 0, 1, 1], [], []>} : vector<2x128xbf16>, vector<128x512xbf16>, vector<2x512xf32> -> vector<2x512xf32>
    %482 = arith.addf %478, %481 : vector<2x512xf32>
    %483 = vector.extract_strided_slice %482 {offsets = [0, 0], sizes = [2, 128], strides = [1, 1]} : vector<2x512xf32> to vector<2x128xf32>
    %484 = arith.negf %483 : vector<2x128xf32>
    %485 = math.exp %484 : vector<2x128xf32>
    %cst_140 = arith.constant 1.000000e+00 : f32
    %486 = vector.broadcast %cst_140 : f32 to vector<2x128xf32>
    %487 = arith.addf %486, %485 : vector<2x128xf32>
    %488 = arith.divf %486, %487 : vector<2x128xf32>
    %489 = vector.extract_strided_slice %482 {offsets = [0, 128], sizes = [2, 128], strides = [1, 1]} : vector<2x512xf32> to vector<2x128xf32>
    %490 = arith.negf %489 : vector<2x128xf32>
    %491 = math.exp %490 : vector<2x128xf32>
    %cst_141 = arith.constant 1.000000e+00 : f32
    %492 = vector.broadcast %cst_141 : f32 to vector<2x128xf32>
    %493 = arith.addf %492, %491 : vector<2x128xf32>
    %494 = arith.divf %492, %493 : vector<2x128xf32>
    %495 = vector.extract_strided_slice %482 {offsets = [0, 256], sizes = [2, 128], strides = [1, 1]} : vector<2x512xf32> to vector<2x128xf32>
    %496 = math.tanh %495 : vector<2x128xf32>
    %497 = vector.extract_strided_slice %482 {offsets = [0, 384], sizes = [2, 128], strides = [1, 1]} : vector<2x512xf32> to vector<2x128xf32>
    %498 = arith.negf %497 : vector<2x128xf32>
    %499 = math.exp %498 : vector<2x128xf32>
    %cst_142 = arith.constant 1.000000e+00 : f32
    %500 = vector.broadcast %cst_142 : f32 to vector<2x128xf32>
    %501 = arith.addf %500, %499 : vector<2x128xf32>
    %502 = arith.divf %500, %501 : vector<2x128xf32>
    %503 = arith.mulf %494, %471 : vector<2x128xf32>
    %504 = arith.mulf %488, %496 : vector<2x128xf32>
    %505 = arith.addf %503, %504 : vector<2x128xf32>
    %506 = math.tanh %505 : vector<2x128xf32>
    %507 = arith.mulf %502, %506 : vector<2x128xf32>
    %c9_i32_143 = arith.constant 9 : i32
    %508 = arith.cmpi slt, %476, %c9_i32_143 : i32
    %509 = arith.extui %508 : i1 to i32
    %510 = arith.sitofp %509 : i32 to f32
    %511 = arith.subf %507, %467 : vector<2x128xf32>
    %512 = vector.broadcast %510 : f32 to vector<2x128xf32>
    %513 = arith.mulf %512, %511 : vector<2x128xf32>
    %514 = arith.addf %467, %513 : vector<2x128xf32>
    %515 = arith.subf %505, %471 : vector<2x128xf32>
    %516 = vector.broadcast %510 : f32 to vector<2x128xf32>
    %517 = arith.mulf %516, %515 : vector<2x128xf32>
    %518 = arith.addf %471, %517 : vector<2x128xf32>
    %c10_144 = arith.constant 10 : index
    %c0_145 = arith.constant 0 : index
    %c0_146 = arith.constant 0 : index
    %519 = vector.load %arg5[%c10_144, %c0_145, %c0_146] : memref<16x2x128xf32, #tpu.memory_space<vmem>>, vector<1x2x128xf32>
    %520 = vector.shape_cast %519 : vector<1x2x128xf32> to vector<2x128xf32>
    %521 = vector.shape_cast %514 : vector<2x128xf32> to vector<1x2x128xf32>
    tpu.vector_store %arg5[%c10_144, %c0_145, %c0_146], %521 {strides = array<i32>} : memref<16x2x128xf32, #tpu.memory_space<vmem>>, vector<1x2x128xf32>,
    %c16_i32_147 = arith.constant 16 : i32
    %522 = arith.muli %arg0, %c16_i32_147 : i32
    %c11_i32 = arith.constant 11 : i32
    %523 = arith.addi %522, %c11_i32 : i32
    %c0_148 = arith.constant 0 : index
    %c11 = arith.constant 11 : index
    %c0_149 = arith.constant 0 : index
    %524 = vector.load %arg1[%c0_148, %c11, %c0_149] : memref<2x16x512xf32, #tpu.memory_space<vmem>>, vector<2x1x512xf32>
    %525 = vector.shape_cast %524 : vector<2x1x512xf32> to vector<2x512xf32>
    %526 = arith.truncf %514 : vector<2x128xf32> to vector<2x128xbf16>
    %c0_150 = arith.constant 0 : index
    %c0_151 = arith.constant 0 : index
    %527 = vector.load %arg4[%c0_150, %c0_151] : memref<128x512xbf16, #tpu.memory_space<vmem>>, vector<128x512xbf16>
    %cst_152 = arith.constant dense<0.000000e+00> : vector<2x512xf32>
    %528 = tpu.matmul %526, %527, %cst_152 {dimension_numbers = #tpu.dot_dimension_numbers<[1], [0], [0], [1], [0, 0, 1, 1], [], []>} : vector<2x128xbf16>, vector<128x512xbf16>, vector<2x512xf32> -> vector<2x512xf32>
    %529 = arith.addf %525, %528 : vector<2x512xf32>
    %530 = vector.extract_strided_slice %529 {offsets = [0, 0], sizes = [2, 128], strides = [1, 1]} : vector<2x512xf32> to vector<2x128xf32>
    %531 = arith.negf %530 : vector<2x128xf32>
    %532 = math.exp %531 : vector<2x128xf32>
    %cst_153 = arith.constant 1.000000e+00 : f32
    %533 = vector.broadcast %cst_153 : f32 to vector<2x128xf32>
    %534 = arith.addf %533, %532 : vector<2x128xf32>
    %535 = arith.divf %533, %534 : vector<2x128xf32>
    %536 = vector.extract_strided_slice %529 {offsets = [0, 128], sizes = [2, 128], strides = [1, 1]} : vector<2x512xf32> to vector<2x128xf32>
    %537 = arith.negf %536 : vector<2x128xf32>
    %538 = math.exp %537 : vector<2x128xf32>
    %cst_154 = arith.constant 1.000000e+00 : f32
    %539 = vector.broadcast %cst_154 : f32 to vector<2x128xf32>
    %540 = arith.addf %539, %538 : vector<2x128xf32>
    %541 = arith.divf %539, %540 : vector<2x128xf32>
    %542 = vector.extract_strided_slice %529 {offsets = [0, 256], sizes = [2, 128], strides = [1, 1]} : vector<2x512xf32> to vector<2x128xf32>
    %543 = math.tanh %542 : vector<2x128xf32>
    %544 = vector.extract_strided_slice %529 {offsets = [0, 384], sizes = [2, 128], strides = [1, 1]} : vector<2x512xf32> to vector<2x128xf32>
    %545 = arith.negf %544 : vector<2x128xf32>
    %546 = math.exp %545 : vector<2x128xf32>
    %cst_155 = arith.constant 1.000000e+00 : f32
    %547 = vector.broadcast %cst_155 : f32 to vector<2x128xf32>
    %548 = arith.addf %547, %546 : vector<2x128xf32>
    %549 = arith.divf %547, %548 : vector<2x128xf32>
    %550 = arith.mulf %541, %518 : vector<2x128xf32>
    %551 = arith.mulf %535, %543 : vector<2x128xf32>
    %552 = arith.addf %550, %551 : vector<2x128xf32>
    %553 = math.tanh %552 : vector<2x128xf32>
    %554 = arith.mulf %549, %553 : vector<2x128xf32>
    %c9_i32_156 = arith.constant 9 : i32
    %555 = arith.cmpi slt, %523, %c9_i32_156 : i32
    %556 = arith.extui %555 : i1 to i32
    %557 = arith.sitofp %556 : i32 to f32
    %558 = arith.subf %554, %514 : vector<2x128xf32>
    %559 = vector.broadcast %557 : f32 to vector<2x128xf32>
    %560 = arith.mulf %559, %558 : vector<2x128xf32>
    %561 = arith.addf %514, %560 : vector<2x128xf32>
    %562 = arith.subf %552, %518 : vector<2x128xf32>
    %563 = vector.broadcast %557 : f32 to vector<2x128xf32>
    %564 = arith.mulf %563, %562 : vector<2x128xf32>
    %565 = arith.addf %518, %564 : vector<2x128xf32>
    %c11_157 = arith.constant 11 : index
    %c0_158 = arith.constant 0 : index
    %c0_159 = arith.constant 0 : index
    %566 = vector.load %arg5[%c11_157, %c0_158, %c0_159] : memref<16x2x128xf32, #tpu.memory_space<vmem>>, vector<1x2x128xf32>
    %567 = vector.shape_cast %566 : vector<1x2x128xf32> to vector<2x128xf32>
    %568 = vector.shape_cast %561 : vector<2x128xf32> to vector<1x2x128xf32>
    tpu.vector_store %arg5[%c11_157, %c0_158, %c0_159], %568 {strides = array<i32>} : memref<16x2x128xf32, #tpu.memory_space<vmem>>, vector<1x2x128xf32>,
    %c16_i32_160 = arith.constant 16 : i32
    %569 = arith.muli %arg0, %c16_i32_160 : i32
    %c12_i32 = arith.constant 12 : i32
    %570 = arith.addi %569, %c12_i32 : i32
    %c0_161 = arith.constant 0 : index
    %c12 = arith.constant 12 : index
    %c0_162 = arith.constant 0 : index
    %571 = vector.load %arg1[%c0_161, %c12, %c0_162] : memref<2x16x512xf32, #tpu.memory_space<vmem>>, vector<2x1x512xf32>
    %572 = vector.shape_cast %571 : vector<2x1x512xf32> to vector<2x512xf32>
    %573 = arith.truncf %561 : vector<2x128xf32> to vector<2x128xbf16>
    %c0_163 = arith.constant 0 : index
    %c0_164 = arith.constant 0 : index
    %574 = vector.load %arg4[%c0_163, %c0_164] : memref<128x512xbf16, #tpu.memory_space<vmem>>, vector<128x512xbf16>
    %cst_165 = arith.constant dense<0.000000e+00> : vector<2x512xf32>
    %575 = tpu.matmul %573, %574, %cst_165 {dimension_numbers = #tpu.dot_dimension_numbers<[1], [0], [0], [1], [0, 0, 1, 1], [], []>} : vector<2x128xbf16>, vector<128x512xbf16>, vector<2x512xf32> -> vector<2x512xf32>
    %576 = arith.addf %572, %575 : vector<2x512xf32>
    %577 = vector.extract_strided_slice %576 {offsets = [0, 0], sizes = [2, 128], strides = [1, 1]} : vector<2x512xf32> to vector<2x128xf32>
    %578 = arith.negf %577 : vector<2x128xf32>
    %579 = math.exp %578 : vector<2x128xf32>
    %cst_166 = arith.constant 1.000000e+00 : f32
    %580 = vector.broadcast %cst_166 : f32 to vector<2x128xf32>
    %581 = arith.addf %580, %579 : vector<2x128xf32>
    %582 = arith.divf %580, %581 : vector<2x128xf32>
    %583 = vector.extract_strided_slice %576 {offsets = [0, 128], sizes = [2, 128], strides = [1, 1]} : vector<2x512xf32> to vector<2x128xf32>
    %584 = arith.negf %583 : vector<2x128xf32>
    %585 = math.exp %584 : vector<2x128xf32>
    %cst_167 = arith.constant 1.000000e+00 : f32
    %586 = vector.broadcast %cst_167 : f32 to vector<2x128xf32>
    %587 = arith.addf %586, %585 : vector<2x128xf32>
    %588 = arith.divf %586, %587 : vector<2x128xf32>
    %589 = vector.extract_strided_slice %576 {offsets = [0, 256], sizes = [2, 128], strides = [1, 1]} : vector<2x512xf32> to vector<2x128xf32>
    %590 = math.tanh %589 : vector<2x128xf32>
    %591 = vector.extract_strided_slice %576 {offsets = [0, 384], sizes = [2, 128], strides = [1, 1]} : vector<2x512xf32> to vector<2x128xf32>
    %592 = arith.negf %591 : vector<2x128xf32>
    %593 = math.exp %592 : vector<2x128xf32>
    %cst_168 = arith.constant 1.000000e+00 : f32
    %594 = vector.broadcast %cst_168 : f32 to vector<2x128xf32>
    %595 = arith.addf %594, %593 : vector<2x128xf32>
    %596 = arith.divf %594, %595 : vector<2x128xf32>
    %597 = arith.mulf %588, %565 : vector<2x128xf32>
    %598 = arith.mulf %582, %590 : vector<2x128xf32>
    %599 = arith.addf %597, %598 : vector<2x128xf32>
    %600 = math.tanh %599 : vector<2x128xf32>
    %601 = arith.mulf %596, %600 : vector<2x128xf32>
    %c9_i32_169 = arith.constant 9 : i32
    %602 = arith.cmpi slt, %570, %c9_i32_169 : i32
    %603 = arith.extui %602 : i1 to i32
    %604 = arith.sitofp %603 : i32 to f32
    %605 = arith.subf %601, %561 : vector<2x128xf32>
    %606 = vector.broadcast %604 : f32 to vector<2x128xf32>
    %607 = arith.mulf %606, %605 : vector<2x128xf32>
    %608 = arith.addf %561, %607 : vector<2x128xf32>
    %609 = arith.subf %599, %565 : vector<2x128xf32>
    %610 = vector.broadcast %604 : f32 to vector<2x128xf32>
    %611 = arith.mulf %610, %609 : vector<2x128xf32>
    %612 = arith.addf %565, %611 : vector<2x128xf32>
    %c12_170 = arith.constant 12 : index
    %c0_171 = arith.constant 0 : index
    %c0_172 = arith.constant 0 : index
    %613 = vector.load %arg5[%c12_170, %c0_171, %c0_172] : memref<16x2x128xf32, #tpu.memory_space<vmem>>, vector<1x2x128xf32>
    %614 = vector.shape_cast %613 : vector<1x2x128xf32> to vector<2x128xf32>
    %615 = vector.shape_cast %608 : vector<2x128xf32> to vector<1x2x128xf32>
    tpu.vector_store %arg5[%c12_170, %c0_171, %c0_172], %615 {strides = array<i32>} : memref<16x2x128xf32, #tpu.memory_space<vmem>>, vector<1x2x128xf32>,
    %c16_i32_173 = arith.constant 16 : i32
    %616 = arith.muli %arg0, %c16_i32_173 : i32
    %c13_i32 = arith.constant 13 : i32
    %617 = arith.addi %616, %c13_i32 : i32
    %c0_174 = arith.constant 0 : index
    %c13 = arith.constant 13 : index
    %c0_175 = arith.constant 0 : index
    %618 = vector.load %arg1[%c0_174, %c13, %c0_175] : memref<2x16x512xf32, #tpu.memory_space<vmem>>, vector<2x1x512xf32>
    %619 = vector.shape_cast %618 : vector<2x1x512xf32> to vector<2x512xf32>
    %620 = arith.truncf %608 : vector<2x128xf32> to vector<2x128xbf16>
    %c0_176 = arith.constant 0 : index
    %c0_177 = arith.constant 0 : index
    %621 = vector.load %arg4[%c0_176, %c0_177] : memref<128x512xbf16, #tpu.memory_space<vmem>>, vector<128x512xbf16>
    %cst_178 = arith.constant dense<0.000000e+00> : vector<2x512xf32>
    %622 = tpu.matmul %620, %621, %cst_178 {dimension_numbers = #tpu.dot_dimension_numbers<[1], [0], [0], [1], [0, 0, 1, 1], [], []>} : vector<2x128xbf16>, vector<128x512xbf16>, vector<2x512xf32> -> vector<2x512xf32>
    %623 = arith.addf %619, %622 : vector<2x512xf32>
    %624 = vector.extract_strided_slice %623 {offsets = [0, 0], sizes = [2, 128], strides = [1, 1]} : vector<2x512xf32> to vector<2x128xf32>
    %625 = arith.negf %624 : vector<2x128xf32>
    %626 = math.exp %625 : vector<2x128xf32>
    %cst_179 = arith.constant 1.000000e+00 : f32
    %627 = vector.broadcast %cst_179 : f32 to vector<2x128xf32>
    %628 = arith.addf %627, %626 : vector<2x128xf32>
    %629 = arith.divf %627, %628 : vector<2x128xf32>
    %630 = vector.extract_strided_slice %623 {offsets = [0, 128], sizes = [2, 128], strides = [1, 1]} : vector<2x512xf32> to vector<2x128xf32>
    %631 = arith.negf %630 : vector<2x128xf32>
    %632 = math.exp %631 : vector<2x128xf32>
    %cst_180 = arith.constant 1.000000e+00 : f32
    %633 = vector.broadcast %cst_180 : f32 to vector<2x128xf32>
    %634 = arith.addf %633, %632 : vector<2x128xf32>
    %635 = arith.divf %633, %634 : vector<2x128xf32>
    %636 = vector.extract_strided_slice %623 {offsets = [0, 256], sizes = [2, 128], strides = [1, 1]} : vector<2x512xf32> to vector<2x128xf32>
    %637 = math.tanh %636 : vector<2x128xf32>
    %638 = vector.extract_strided_slice %623 {offsets = [0, 384], sizes = [2, 128], strides = [1, 1]} : vector<2x512xf32> to vector<2x128xf32>
    %639 = arith.negf %638 : vector<2x128xf32>
    %640 = math.exp %639 : vector<2x128xf32>
    %cst_181 = arith.constant 1.000000e+00 : f32
    %641 = vector.broadcast %cst_181 : f32 to vector<2x128xf32>
    %642 = arith.addf %641, %640 : vector<2x128xf32>
    %643 = arith.divf %641, %642 : vector<2x128xf32>
    %644 = arith.mulf %635, %612 : vector<2x128xf32>
    %645 = arith.mulf %629, %637 : vector<2x128xf32>
    %646 = arith.addf %644, %645 : vector<2x128xf32>
    %647 = math.tanh %646 : vector<2x128xf32>
    %648 = arith.mulf %643, %647 : vector<2x128xf32>
    %c9_i32_182 = arith.constant 9 : i32
    %649 = arith.cmpi slt, %617, %c9_i32_182 : i32
    %650 = arith.extui %649 : i1 to i32
    %651 = arith.sitofp %650 : i32 to f32
    %652 = arith.subf %648, %608 : vector<2x128xf32>
    %653 = vector.broadcast %651 : f32 to vector<2x128xf32>
    %654 = arith.mulf %653, %652 : vector<2x128xf32>
    %655 = arith.addf %608, %654 : vector<2x128xf32>
    %656 = arith.subf %646, %612 : vector<2x128xf32>
    %657 = vector.broadcast %651 : f32 to vector<2x128xf32>
    %658 = arith.mulf %657, %656 : vector<2x128xf32>
    %659 = arith.addf %612, %658 : vector<2x128xf32>
    %c13_183 = arith.constant 13 : index
    %c0_184 = arith.constant 0 : index
    %c0_185 = arith.constant 0 : index
    %660 = vector.load %arg5[%c13_183, %c0_184, %c0_185] : memref<16x2x128xf32, #tpu.memory_space<vmem>>, vector<1x2x128xf32>
    %661 = vector.shape_cast %660 : vector<1x2x128xf32> to vector<2x128xf32>
    %662 = vector.shape_cast %655 : vector<2x128xf32> to vector<1x2x128xf32>
    tpu.vector_store %arg5[%c13_183, %c0_184, %c0_185], %662 {strides = array<i32>} : memref<16x2x128xf32, #tpu.memory_space<vmem>>, vector<1x2x128xf32>,
    %c16_i32_186 = arith.constant 16 : i32
    %663 = arith.muli %arg0, %c16_i32_186 : i32
    %c14_i32 = arith.constant 14 : i32
    %664 = arith.addi %663, %c14_i32 : i32
    %c0_187 = arith.constant 0 : index
    %c14 = arith.constant 14 : index
    %c0_188 = arith.constant 0 : index
    %665 = vector.load %arg1[%c0_187, %c14, %c0_188] : memref<2x16x512xf32, #tpu.memory_space<vmem>>, vector<2x1x512xf32>
    %666 = vector.shape_cast %665 : vector<2x1x512xf32> to vector<2x512xf32>
    %667 = arith.truncf %655 : vector<2x128xf32> to vector<2x128xbf16>
    %c0_189 = arith.constant 0 : index
    %c0_190 = arith.constant 0 : index
    %668 = vector.load %arg4[%c0_189, %c0_190] : memref<128x512xbf16, #tpu.memory_space<vmem>>, vector<128x512xbf16>
    %cst_191 = arith.constant dense<0.000000e+00> : vector<2x512xf32>
    %669 = tpu.matmul %667, %668, %cst_191 {dimension_numbers = #tpu.dot_dimension_numbers<[1], [0], [0], [1], [0, 0, 1, 1], [], []>} : vector<2x128xbf16>, vector<128x512xbf16>, vector<2x512xf32> -> vector<2x512xf32>
    %670 = arith.addf %666, %669 : vector<2x512xf32>
    %671 = vector.extract_strided_slice %670 {offsets = [0, 0], sizes = [2, 128], strides = [1, 1]} : vector<2x512xf32> to vector<2x128xf32>
    %672 = arith.negf %671 : vector<2x128xf32>
    %673 = math.exp %672 : vector<2x128xf32>
    %cst_192 = arith.constant 1.000000e+00 : f32
    %674 = vector.broadcast %cst_192 : f32 to vector<2x128xf32>
    %675 = arith.addf %674, %673 : vector<2x128xf32>
    %676 = arith.divf %674, %675 : vector<2x128xf32>
    %677 = vector.extract_strided_slice %670 {offsets = [0, 128], sizes = [2, 128], strides = [1, 1]} : vector<2x512xf32> to vector<2x128xf32>
    %678 = arith.negf %677 : vector<2x128xf32>
    %679 = math.exp %678 : vector<2x128xf32>
    %cst_193 = arith.constant 1.000000e+00 : f32
    %680 = vector.broadcast %cst_193 : f32 to vector<2x128xf32>
    %681 = arith.addf %680, %679 : vector<2x128xf32>
    %682 = arith.divf %680, %681 : vector<2x128xf32>
    %683 = vector.extract_strided_slice %670 {offsets = [0, 256], sizes = [2, 128], strides = [1, 1]} : vector<2x512xf32> to vector<2x128xf32>
    %684 = math.tanh %683 : vector<2x128xf32>
    %685 = vector.extract_strided_slice %670 {offsets = [0, 384], sizes = [2, 128], strides = [1, 1]} : vector<2x512xf32> to vector<2x128xf32>
    %686 = arith.negf %685 : vector<2x128xf32>
    %687 = math.exp %686 : vector<2x128xf32>
    %cst_194 = arith.constant 1.000000e+00 : f32
    %688 = vector.broadcast %cst_194 : f32 to vector<2x128xf32>
    %689 = arith.addf %688, %687 : vector<2x128xf32>
    %690 = arith.divf %688, %689 : vector<2x128xf32>
    %691 = arith.mulf %682, %659 : vector<2x128xf32>
    %692 = arith.mulf %676, %684 : vector<2x128xf32>
    %693 = arith.addf %691, %692 : vector<2x128xf32>
    %694 = math.tanh %693 : vector<2x128xf32>
    %695 = arith.mulf %690, %694 : vector<2x128xf32>
    %c9_i32_195 = arith.constant 9 : i32
    %696 = arith.cmpi slt, %664, %c9_i32_195 : i32
    %697 = arith.extui %696 : i1 to i32
    %698 = arith.sitofp %697 : i32 to f32
    %699 = arith.subf %695, %655 : vector<2x128xf32>
    %700 = vector.broadcast %698 : f32 to vector<2x128xf32>
    %701 = arith.mulf %700, %699 : vector<2x128xf32>
    %702 = arith.addf %655, %701 : vector<2x128xf32>
    %703 = arith.subf %693, %659 : vector<2x128xf32>
    %704 = vector.broadcast %698 : f32 to vector<2x128xf32>
    %705 = arith.mulf %704, %703 : vector<2x128xf32>
    %706 = arith.addf %659, %705 : vector<2x128xf32>
    %c14_196 = arith.constant 14 : index
    %c0_197 = arith.constant 0 : index
    %c0_198 = arith.constant 0 : index
    %707 = vector.load %arg5[%c14_196, %c0_197, %c0_198] : memref<16x2x128xf32, #tpu.memory_space<vmem>>, vector<1x2x128xf32>
    %708 = vector.shape_cast %707 : vector<1x2x128xf32> to vector<2x128xf32>
    %709 = vector.shape_cast %702 : vector<2x128xf32> to vector<1x2x128xf32>
    tpu.vector_store %arg5[%c14_196, %c0_197, %c0_198], %709 {strides = array<i32>} : memref<16x2x128xf32, #tpu.memory_space<vmem>>, vector<1x2x128xf32>,
    %c16_i32_199 = arith.constant 16 : i32
    %710 = arith.muli %arg0, %c16_i32_199 : i32
    %c15_i32 = arith.constant 15 : i32
    %711 = arith.addi %710, %c15_i32 : i32
    %c0_200 = arith.constant 0 : index
    %c15 = arith.constant 15 : index
    %c0_201 = arith.constant 0 : index
    %712 = vector.load %arg1[%c0_200, %c15, %c0_201] : memref<2x16x512xf32, #tpu.memory_space<vmem>>, vector<2x1x512xf32>
    %713 = vector.shape_cast %712 : vector<2x1x512xf32> to vector<2x512xf32>
    %714 = arith.truncf %702 : vector<2x128xf32> to vector<2x128xbf16>
    %c0_202 = arith.constant 0 : index
    %c0_203 = arith.constant 0 : index
    %715 = vector.load %arg4[%c0_202, %c0_203] : memref<128x512xbf16, #tpu.memory_space<vmem>>, vector<128x512xbf16>
    %cst_204 = arith.constant dense<0.000000e+00> : vector<2x512xf32>
    %716 = tpu.matmul %714, %715, %cst_204 {dimension_numbers = #tpu.dot_dimension_numbers<[1], [0], [0], [1], [0, 0, 1, 1], [], []>} : vector<2x128xbf16>, vector<128x512xbf16>, vector<2x512xf32> -> vector<2x512xf32>
    %717 = arith.addf %713, %716 : vector<2x512xf32>
    %718 = vector.extract_strided_slice %717 {offsets = [0, 0], sizes = [2, 128], strides = [1, 1]} : vector<2x512xf32> to vector<2x128xf32>
    %719 = arith.negf %718 : vector<2x128xf32>
    %720 = math.exp %719 : vector<2x128xf32>
    %cst_205 = arith.constant 1.000000e+00 : f32
    %721 = vector.broadcast %cst_205 : f32 to vector<2x128xf32>
    %722 = arith.addf %721, %720 : vector<2x128xf32>
    %723 = arith.divf %721, %722 : vector<2x128xf32>
    %724 = vector.extract_strided_slice %717 {offsets = [0, 128], sizes = [2, 128], strides = [1, 1]} : vector<2x512xf32> to vector<2x128xf32>
    %725 = arith.negf %724 : vector<2x128xf32>
    %726 = math.exp %725 : vector<2x128xf32>
    %cst_206 = arith.constant 1.000000e+00 : f32
    %727 = vector.broadcast %cst_206 : f32 to vector<2x128xf32>
    %728 = arith.addf %727, %726 : vector<2x128xf32>
    %729 = arith.divf %727, %728 : vector<2x128xf32>
    %730 = vector.extract_strided_slice %717 {offsets = [0, 256], sizes = [2, 128], strides = [1, 1]} : vector<2x512xf32> to vector<2x128xf32>
    %731 = math.tanh %730 : vector<2x128xf32>
    %732 = vector.extract_strided_slice %717 {offsets = [0, 384], sizes = [2, 128], strides = [1, 1]} : vector<2x512xf32> to vector<2x128xf32>
    %733 = arith.negf %732 : vector<2x128xf32>
    %734 = math.exp %733 : vector<2x128xf32>
    %cst_207 = arith.constant 1.000000e+00 : f32
    %735 = vector.broadcast %cst_207 : f32 to vector<2x128xf32>
    %736 = arith.addf %735, %734 : vector<2x128xf32>
    %737 = arith.divf %735, %736 : vector<2x128xf32>
    %738 = arith.mulf %729, %706 : vector<2x128xf32>
    %739 = arith.mulf %723, %731 : vector<2x128xf32>
    %740 = arith.addf %738, %739 : vector<2x128xf32>
    %741 = math.tanh %740 : vector<2x128xf32>
    %742 = arith.mulf %737, %741 : vector<2x128xf32>
    %c9_i32_208 = arith.constant 9 : i32
    %743 = arith.cmpi slt, %711, %c9_i32_208 : i32
    %744 = arith.extui %743 : i1 to i32
    %745 = arith.sitofp %744 : i32 to f32
    %746 = arith.subf %742, %702 : vector<2x128xf32>
    %747 = vector.broadcast %745 : f32 to vector<2x128xf32>
    %748 = arith.mulf %747, %746 : vector<2x128xf32>
    %749 = arith.addf %702, %748 : vector<2x128xf32>
    %750 = arith.subf %740, %706 : vector<2x128xf32>
    %751 = vector.broadcast %745 : f32 to vector<2x128xf32>
    %752 = arith.mulf %751, %750 : vector<2x128xf32>
    %753 = arith.addf %706, %752 : vector<2x128xf32>
    %c15_209 = arith.constant 15 : index
    %c0_210 = arith.constant 0 : index
    %c0_211 = arith.constant 0 : index
    %754 = vector.load %arg5[%c15_209, %c0_210, %c0_211] : memref<16x2x128xf32, #tpu.memory_space<vmem>>, vector<1x2x128xf32>
    %755 = vector.shape_cast %754 : vector<1x2x128xf32> to vector<2x128xf32>
    %756 = vector.shape_cast %749 : vector<2x128xf32> to vector<1x2x128xf32>
    tpu.vector_store %arg5[%c15_209, %c0_210, %c0_211], %756 {strides = array<i32>} : memref<16x2x128xf32, #tpu.memory_space<vmem>>, vector<1x2x128xf32>,
    %c0_212 = arith.constant 0 : index
    %c0_213 = arith.constant 0 : index
    %757 = vector.load %arg8[%c0_212, %c0_213] : memref<2x128xf32, #tpu.memory_space<vmem>>, vector<2x128xf32>
    tpu.vector_store %arg8[%c0_212, %c0_213], %749 {strides = array<i32>} : memref<2x128xf32, #tpu.memory_space<vmem>>, vector<2x128xf32>,
    %c0_214 = arith.constant 0 : index
    %c0_215 = arith.constant 0 : index
    %758 = vector.load %arg9[%c0_214, %c0_215] : memref<2x128xf32, #tpu.memory_space<vmem>>, vector<2x128xf32>
    tpu.vector_store %arg9[%c0_214, %c0_215], %753 {strides = array<i32>} : memref<2x128xf32, #tpu.memory_space<vmem>>, vector<2x128xf32>,
    %c0_i32_216 = arith.constant 0 : i32
    %759 = arith.cmpi eq, %arg0, %c0_i32_216 : i32
    %760 = arith.extui %759 : i1 to i32
    %c0_i32_217 = arith.constant 0 : i32
    %761 = arith.cmpi ne, %760, %c0_i32_217 : i32
    scf.if %761 {
      %c0_218 = arith.constant 0 : index
      %c0_219 = arith.constant 0 : index
      %762 = vector.load %arg6[%c0_218, %c0_219] : memref<2x128xf32, #tpu.memory_space<vmem>>, vector<2x128xf32>
      tpu.vector_store %arg6[%c0_218, %c0_219], %749 {strides = array<i32>} : memref<2x128xf32, #tpu.memory_space<vmem>>, vector<2x128xf32>,
      %c0_220 = arith.constant 0 : index
      %c0_221 = arith.constant 0 : index
      %763 = vector.load %arg7[%c0_220, %c0_221] : memref<2x128xf32, #tpu.memory_space<vmem>>, vector<2x128xf32>
      tpu.vector_store %arg7[%c0_220, %c0_221], %753 {strides = array<i32>} : memref<2x128xf32, #tpu.memory_space<vmem>>, vector<2x128xf32>,
    } else {
    }
    return
  }
  func.func @transform_0(%arg0: i32) -> (i32, i32, i32) {
    %c0_i32 = arith.constant 0 : i32
    %c0_i32_0 = arith.constant 0 : i32
    %c0_i32_1 = arith.constant 0 : i32
    return %c0_i32, %arg0, %c0_i32_0 : i32, i32, i32
  }
  func.func @transform_1(%arg0: i32) -> (i32, i32) {
    %c0_i32 = arith.constant 0 : i32
    %c0_i32_0 = arith.constant 0 : i32
    %c0_i32_1 = arith.constant 0 : i32
    return %c0_i32, %c0_i32_0 : i32, i32
  }
  func.func @transform_2(%arg0: i32) -> (i32, i32) {
    %c0_i32 = arith.constant 0 : i32
    %c0_i32_0 = arith.constant 0 : i32
    %c0_i32_1 = arith.constant 0 : i32
    return %c0_i32, %c0_i32_0 : i32, i32
  }
  func.func @transform_3(%arg0: i32) -> (i32, i32) {
    %c0_i32 = arith.constant 0 : i32
    %c0_i32_0 = arith.constant 0 : i32
    %c0_i32_1 = arith.constant 0 : i32
    return %c0_i32, %c0_i32_0 : i32, i32
  }
  func.func @transform_4(%arg0: i32) -> (i32, i32, i32) {
    %c0_i32 = arith.constant 0 : i32
    %c0_i32_0 = arith.constant 0 : i32
    %c0_i32_1 = arith.constant 0 : i32
    return %arg0, %c0_i32, %c0_i32_0 : i32, i32, i32
  }
  func.func @transform_5(%arg0: i32) -> (i32, i32) {
    %c0_i32 = arith.constant 0 : i32
    %c0_i32_0 = arith.constant 0 : i32
    %c0_i32_1 = arith.constant 0 : i32
    return %c0_i32, %c0_i32_0 : i32, i32
  }
  func.func @transform_6(%arg0: i32) -> (i32, i32) {
    %c0_i32 = arith.constant 0 : i32
    %c0_i32_0 = arith.constant 0 : i32
    %c0_i32_1 = arith.constant 0 : i32
    return %c0_i32, %c0_i32_0 : i32, i32
  }
}

module attributes {stable_mosaic.version = 11 : i64} {
  func.func @ln_gelu_fc_kernel(%arg0: i32, %arg1: memref<32x128xf32, #tpu.memory_space<vmem>>, %arg2: memref<1x128xf32, #tpu.memory_space<vmem>>, %arg3: memref<1x128xf32, #tpu.memory_space<vmem>>, %arg4: memref<128x128xbf16, #tpu.memory_space<vmem>>, %arg5: memref<1x128xf32, #tpu.memory_space<vmem>>, %arg6: memref<32x128xf32, #tpu.memory_space<vmem>>) attributes {dimension_semantics = [#tpu.dimension_semantics<parallel>], iteration_bounds = array<i64: 1>, scalar_prefetch = 0 : i64, scratch_operands = 0 : i64, tpu.core_type = #tpu.core_type<tc>, window_params = [{transform_indices = @transform_0, window_bounds = array<i64: 32, 128>}, {pipeline_mode = #tpu.pipeline_mode<synchronous>, transform_indices = @transform_1, window_bounds = array<i64: 1, 128>}, {pipeline_mode = #tpu.pipeline_mode<synchronous>, transform_indices = @transform_2, window_bounds = array<i64: 1, 128>}, {pipeline_mode = #tpu.pipeline_mode<synchronous>, transform_indices = @transform_3, window_bounds = array<i64: 128, 128>}, {pipeline_mode = #tpu.pipeline_mode<synchronous>, transform_indices = @transform_4, window_bounds = array<i64: 1, 128>}, {transform_indices = @transform_5, window_bounds = array<i64: 32, 128>}]} {
    %c0 = arith.constant 0 : index
    %c0_0 = arith.constant 0 : index
    %0 = vector.load %arg1[%c0, %c0_0] : memref<32x128xf32, #tpu.memory_space<vmem>>, vector<32x128xf32>
    %cst = arith.constant dense<0.000000e+00> : vector<32xf32>
    %1 = vector.multi_reduction <add>, %0, %cst [1] : vector<32x128xf32> to vector<32xf32>
    %2 = vector.shape_cast %1 : vector<32xf32> to vector<32x1xf32>
    %cst_1 = arith.constant 1.562500e-02 : f32
    %3 = vector.broadcast %cst_1 : f32 to vector<32x1xf32>
    %4 = arith.mulf %2, %3 : vector<32x1xf32>
    %5 = arith.mulf %0, %0 : vector<32x128xf32>
    %cst_2 = arith.constant dense<0.000000e+00> : vector<32xf32>
    %6 = vector.multi_reduction <add>, %5, %cst_2 [1] : vector<32x128xf32> to vector<32xf32>
    %7 = vector.shape_cast %6 : vector<32xf32> to vector<32x1xf32>
    %cst_3 = arith.constant 1.562500e-02 : f32
    %8 = vector.broadcast %cst_3 : f32 to vector<32x1xf32>
    %9 = arith.mulf %7, %8 : vector<32x1xf32>
    %10 = arith.mulf %4, %4 : vector<32x1xf32>
    %11 = arith.subf %9, %10 : vector<32x1xf32>
    %12 = vector.broadcast %4 : vector<32x1xf32> to vector<32x128xf32>
    %13 = arith.subf %0, %12 : vector<32x128xf32>
    %cst_4 = arith.constant 9.99999974E-6 : f32
    %14 = vector.broadcast %cst_4 : f32 to vector<32x1xf32>
    %15 = arith.addf %11, %14 : vector<32x1xf32>
    %16 = math.rsqrt %15 : vector<32x1xf32>
    %17 = vector.broadcast %16 : vector<32x1xf32> to vector<32x128xf32>
    %18 = arith.mulf %13, %17 : vector<32x128xf32>
    %c0_5 = arith.constant 0 : index
    %c0_6 = arith.constant 0 : index
    %19 = vector.load %arg2[%c0_5, %c0_6] : memref<1x128xf32, #tpu.memory_space<vmem>>, vector<1x128xf32>
    %20 = vector.broadcast %19 : vector<1x128xf32> to vector<32x128xf32>
    %21 = arith.mulf %18, %20 : vector<32x128xf32>
    %c0_7 = arith.constant 0 : index
    %c0_8 = arith.constant 0 : index
    %22 = vector.load %arg3[%c0_7, %c0_8] : memref<1x128xf32, #tpu.memory_space<vmem>>, vector<1x128xf32>
    %23 = vector.broadcast %22 : vector<1x128xf32> to vector<32x128xf32>
    %24 = arith.addf %21, %23 : vector<32x128xf32>
    %cst_9 = arith.constant 5.000000e-01 : f32
    %25 = vector.broadcast %cst_9 : f32 to vector<32x128xf32>
    %26 = arith.mulf %25, %24 : vector<32x128xf32>
    %cst_10 = arith.constant 4.471500e-02 : f32
    %27 = vector.broadcast %cst_10 : f32 to vector<32x128xf32>
    %28 = arith.mulf %27, %24 : vector<32x128xf32>
    %29 = arith.mulf %28, %24 : vector<32x128xf32>
    %30 = arith.mulf %29, %24 : vector<32x128xf32>
    %31 = arith.addf %24, %30 : vector<32x128xf32>
    %cst_11 = arith.constant 0.797884583 : f32
    %32 = vector.broadcast %cst_11 : f32 to vector<32x128xf32>
    %33 = arith.mulf %32, %31 : vector<32x128xf32>
    %34 = math.tanh %33 : vector<32x128xf32>
    %cst_12 = arith.constant 1.000000e+00 : f32
    %35 = vector.broadcast %cst_12 : f32 to vector<32x128xf32>
    %36 = arith.addf %35, %34 : vector<32x128xf32>
    %37 = arith.mulf %26, %36 : vector<32x128xf32>
    %c0_13 = arith.constant 0 : index
    %c0_14 = arith.constant 0 : index
    %38 = vector.load %arg4[%c0_13, %c0_14] : memref<128x128xbf16, #tpu.memory_space<vmem>>, vector<128x128xbf16>
    %39 = arith.truncf %37 : vector<32x128xf32> to vector<32x128xbf16>
    %cst_15 = arith.constant dense<0.000000e+00> : vector<32x128xf32>
    %40 = tpu.matmul %39, %38, %cst_15 {dimension_numbers = #tpu.dot_dimension_numbers<[1], [0], [0], [1], [0, 0, 1, 1], [], []>} : vector<32x128xbf16>, vector<128x128xbf16>, vector<32x128xf32> -> vector<32x128xf32>
    %c0_16 = arith.constant 0 : index
    %c0_17 = arith.constant 0 : index
    %41 = vector.load %arg5[%c0_16, %c0_17] : memref<1x128xf32, #tpu.memory_space<vmem>>, vector<1x128xf32>
    %42 = vector.broadcast %41 : vector<1x128xf32> to vector<32x128xf32>
    %43 = arith.addf %40, %42 : vector<32x128xf32>
    %c0_18 = arith.constant 0 : index
    %c0_19 = arith.constant 0 : index
    %44 = vector.load %arg6[%c0_18, %c0_19] : memref<32x128xf32, #tpu.memory_space<vmem>>, vector<32x128xf32>
    tpu.vector_store %arg6[%c0_18, %c0_19], %43 {strides = array<i32>} : memref<32x128xf32, #tpu.memory_space<vmem>>, vector<32x128xf32>,
    return
  }
  func.func @transform_0(%arg0: i32) -> (i32, i32) {
    %c0_i32 = arith.constant 0 : i32
    %c0_i32_0 = arith.constant 0 : i32
    return %arg0, %c0_i32 : i32, i32
  }
  func.func @transform_1(%arg0: i32) -> (i32, i32) {
    %c0_i32 = arith.constant 0 : i32
    %c0_i32_0 = arith.constant 0 : i32
    %c0_i32_1 = arith.constant 0 : i32
    return %c0_i32, %c0_i32_0 : i32, i32
  }
  func.func @transform_2(%arg0: i32) -> (i32, i32) {
    %c0_i32 = arith.constant 0 : i32
    %c0_i32_0 = arith.constant 0 : i32
    %c0_i32_1 = arith.constant 0 : i32
    return %c0_i32, %c0_i32_0 : i32, i32
  }
  func.func @transform_3(%arg0: i32) -> (i32, i32) {
    %c0_i32 = arith.constant 0 : i32
    %c0_i32_0 = arith.constant 0 : i32
    %c0_i32_1 = arith.constant 0 : i32
    return %c0_i32, %c0_i32_0 : i32, i32
  }
  func.func @transform_4(%arg0: i32) -> (i32, i32) {
    %c0_i32 = arith.constant 0 : i32
    %c0_i32_0 = arith.constant 0 : i32
    %c0_i32_1 = arith.constant 0 : i32
    return %c0_i32, %c0_i32_0 : i32, i32
  }
  func.func @transform_5(%arg0: i32) -> (i32, i32) {
    %c0_i32 = arith.constant 0 : i32
    %c0_i32_0 = arith.constant 0 : i32
    return %arg0, %c0_i32 : i32, i32
  }
}

</mosaic_0001>

<bundles_post_ra>
// kernel: speech_recognition_forward.5
= control target key start
LH: loop header
LB: loop body
LE: loop exit
PB: predicated region body
PF: predicated region fallthrough
CT: control target
= control target key end

     0   :  { %s459_s0 = inlined_call_operand.vmem [shape: f32[32,128], index: 0, kind: input, shape index: {}]   ;;  %s460_s1 = inlined_call_operand.vmem [shape: f32[1,128], index: 1, kind: input, shape index: {}]   ;;  %s461_s2 = inlined_call_operand.vmem [shape: f32[1,128], index: 2, kind: input, shape index: {}]   ;;  %s462_s4 = inlined_call_operand.vmem [shape: f32[1,128], index: 4, kind: input, shape index: {}]   ;;  %s463_s3 = inlined_call_operand.vmem [shape: bf16[128,128], index: 3, kind: input, shape index: {}]   ;;  %s464_s5 = inlined_call_operand.vmem [shape: f32[32,128], index: 5, kind: output, shape index: {}]  }
   0x1   :  { %v361_v0 = vld [vmem:[%s459_s0 + $0x10] sm:$0xff]  ;;  %v366_v1 = vld [vmem:[%s459_s0] sm:$0xff]  ;;  %v375_v3 = vld [vmem:[%s459_s0 + $0x8] sm:$0xff] }
   0x2   :  { %28 = vadd.xlane.f32.xlu1 %v361_v0  ;;  %24 = vadd.xlane.f32.xlu0 %v366_v1  ;;  %v36_v2 = vmul.f32 %v366_v1, %v366_v1  ;;  %v380_v4 = vld [vmem:[%s459_s0 + $0x18] sm:$0xff]  ;;  %v37_v5 = vmul.f32 %v375_v3, %v375_v3  ;;  %v38_v7 = vmul.f32 %v361_v0, %v361_v0  ;;  %v299_v15 = vld [vmem:[%s463_s3 + $0x30] sm:$0xff]  ;;  %v298_v20 = vld [vmem:[%s463_s3 + $0x28] sm:$0xff] }
   0x3   :  { %v39_v6 = vmul.f32 %v380_v4, %v380_v4  ;;  %v300_v10 = vld [vmem:[%s463_s3 + $0x38] sm:$0xff]  ;;  %v297_v26 = vld [vmem:[%s463_s3 + $0x20] sm:$0xff]  ;;  %v295_v39 = vld [vmem:[%s463_s3 + $0x10] sm:$0xff] }
   0x4   :  { %40 = vadd.xlane.f32.xlu2 %v36_v2  ;;  %234 = vmatpush.bf16.msra.mxu0 %v300_v10  ;;  %v296_v29 = vld [vmem:[%s463_s3 + $0x18] sm:$0xff]  ;;  %v294_v46 = vld [vmem:[%s463_s3 + $0x8] sm:$0xff]  ;;  %v309_v52 = vld [vmem:[%s460_s1] ss:$0 sm:$0xff] }
   0x5   :  { %301 = vmatpush.bf16.msra.mxu1 %v300_v10  ;;  %v293_v53 = vld [vmem:[%s463_s3] sm:$0xff] }
   0x6   :  { %v310_v56 = vld [vmem:[%s461_s2] ss:$0 sm:$0xff] }
   0x8   :  { %235 = vmatpush.bf16.msra.mxu0 %v299_v15 }
   0x9   :  { %302 = vmatpush.bf16.msra.mxu1 %v299_v15 }
   0xa   :  { %30 = vadd.xlane.f32.xlu1 %v380_v4  ;;  %26 = vadd.xlane.f32.xlu0 %v375_v3 }
   0xc   :  { %42 = vadd.xlane.f32.xlu2 %v37_v5  ;;  %236 = vmatpush.bf16.msra.mxu0 %v298_v20 }
   0xd   :  { %303 = vmatpush.bf16.msra.mxu1 %v298_v20 }
  0x10   :  { %237 = vmatpush.bf16.msra.mxu0 %v297_v26 }
  0x11   :  { %304 = vmatpush.bf16.msra.mxu1 %v297_v26 }
  0x12   :  { %46 = vadd.xlane.f32.xlu1 %v39_v6  ;;  %44 = vadd.xlane.f32.xlu0 %v38_v7 }
  0x14   :  { %238 = vmatpush.bf16.msra.mxu0 %v296_v29 }
  0x15   :  { %305 = vmatpush.bf16.msra.mxu1 %v296_v29 }
  0x18   :  { %239 = vmatpush.bf16.msra.mxu0 %v295_v39 }
  0x19   :  { %306 = vmatpush.bf16.msra.mxu1 %v295_v39 }
  0x1c   :  { %240 = vmatpush.bf16.msra.mxu0 %v294_v46 }
  0x1d   :  { %307 = vmatpush.bf16.msra.mxu1 %v294_v46 }
  0x20   :  { %241 = vmatpush.bf16.msra.mxu0 %v293_v53 }
  0x21   :  { %308 = vmatpush.bf16.msra.mxu1 %v293_v53 }
  0x75   :  { %v29_v8 = vpop.xlane.xlu1 %28  ;;  %v25_v9 = vpop.xlane.xlu0 %24 }
  0x76   :  { %v393_v11 = vmul.f32 0.015625, %v25_v9  ;;  %v407_v24 = vmul.f32 0.015625, %v29_v8 }
  0x77   :  { %v41_v12 = vpop.xlane.xlu2 %40 }
  0x78   :  { %v52_v13 = vmul.f32 %v393_v11, %v393_v11  ;;  %v48_v14 = vmul.f32 0.015625, %v41_v12  ;;  %v54_v31 = vmul.f32 %v407_v24, %v407_v24  ;;  %v60_v51 = vsub.f32 %v366_v1, %v393_v11 }
  0x7a   :  { %v56_v16 = vsub.f32 %v48_v14, %v52_v13 }
  0x7c   :  { %v64_v17 = vadd.f32 1e-05, %v56_v16 }
  0x7d   :  { %v31_v18 = vpop.xlane.xlu1 %30  ;;  %v27_v19 = vpop.xlane.xlu0 %26 }
  0x7e   :  { %v403_v21 = vmul.f32 0.015625, %v27_v19  ;;  %312 = vrsqrt.f32 %v64_v17  ;;  %v412_v27 = vmul.f32 0.015625, %v31_v18  ;;  %vm74_vm1 = vweird.f32 %v64_v17 }
  0x7f   :  { %v43_v22 = vpop.xlane.xlu2 %42 }
  0x80   :  { %v53_v23 = vmul.f32 %v403_v21, %v403_v21  ;;  %v49_v25 = vmul.f32 0.015625, %v43_v22  ;;  %v55_v36 = vmul.f32 %v412_v27, %v412_v27  ;;  %v61_v8 = vsub.f32 %v375_v3, %v403_v21 }
  0x81   :  { %v63_v20 = vsub.f32 %v380_v4, %v412_v27  ;;  %v62_v21 = vsub.f32 %v361_v0, %v407_v24 }
  0x82   :  { %v57_v28 = vsub.f32 %v49_v25, %v53_v23 }
  0x84   :  { %v313_v30 = vpop.eup %312  ;;  %v65_v32 = vadd.f32 1e-05, %v57_v28 }
  0x85   :  { %v47_v33 = vpop.xlane.xlu1 %46  ;;  %v45_v34 = vpop.xlane.xlu0 %44  ;;  %v69_v35 = vmul.f32 %v313_v30, %v64_v17  ;;  %vm75_vm0 = vweird.f32 %v313_v30 }
  0x86   :  { %v51_v37 = vmul.f32 0.015625, %v47_v33  ;;  %v50_v38 = vmul.f32 0.015625, %v45_v34  ;;  %314 = vrsqrt.f32 %v65_v32  ;;  %vm76_vm2 = vmor %vm74_vm1, %vm75_vm0  ;;  %vm84_vm4 = vweird.f32 %v65_v32 }
  0x87   :  { %v70_v40 = vmul.f32 %v313_v30, %v69_v35 }
  0x88   :  { %v59_v41 = vsub.f32 %v51_v37, %v55_v36  ;;  %v58_v42 = vsub.f32 %v50_v38, %v54_v31 }
  0x89   :  { %v71_v43 = vmul.f32 0.5, %v70_v40 }
  0x8a   :  { %v67_v44 = vadd.f32 1e-05, %v59_v41  ;;  %v66_v45 = vadd.f32 1e-05, %v58_v42 }
  0x8b   :  { %v72_v47 = vsub.f32 1.5, %v71_v43 }
  0x8c   :  { %316 = vrsqrt.f32 %v67_v44  ;;  %v315_v48 = vpop.eup %314  ;;  %vm104_vm8 = vweird.f32 %v67_v44  ;;  %vm94_vm10 = vweird.f32 %v66_v45 }
  0x8d   :  { %318 = vrsqrt.f32 %v66_v45  ;;  %v73_v49 = vmul.f32 %v313_v30, %v72_v47  ;;  %v79_v50 = vmul.f32 %v315_v48, %v65_v32  ;;  %vm85_vm3 = vweird.f32 %v315_v48 }
  0x8e   :  { %vm86_vm5 = vmor %vm84_vm4, %vm85_vm3 }
  0x8f   :  { %v77_v54 = vsel %vm76_vm2, %v313_v30, %v73_v49  ;;  %v80_v55 = vmul.f32 %v315_v48, %v79_v50 }
  0x90   :  { %v108_v57 = vmul.f32 %v77_v54, %v60_v51 }
  0x91   :  { %v81_v59 = vmul.f32 0.5, %v80_v55 }
  0x92   :  { %v317_v58 = vpop.eup %316  ;;  %v116_v61 = vmul.f32 %v309_v52, %v108_v57 }
  0x93   :  { %v319_v60 = vpop.eup %318  ;;  %v99_v62 = vmul.f32 %v317_v58, %v67_v44  ;;  %v82_v63 = vsub.f32 1.5, %v81_v59  ;;  %vm105_vm6 = vweird.f32 %v317_v58 }
  0x94   :  { %v89_v1 = vmul.f32 %v319_v60, %v66_v45  ;;  %v124_v2 = vadd.f32 %v310_v56, %v116_v61  ;;  %vm95_vm7 = vweird.f32 %v319_v60  ;;  %vm106_vm9 = vmor %vm104_vm8, %vm105_vm6 }
  0x95   :  { %v100_v5 = vmul.f32 %v317_v58, %v99_v62  ;;  %v83_v6 = vmul.f32 %v315_v48, %v82_v63  ;;  %vm96_vm11 = vmor %vm94_vm10, %vm95_vm7 }
  0x96   :  { %v90_v7 = vmul.f32 %v319_v60, %v89_v1  ;;  %v132_v10 = vmul.f32 0.044715, %v124_v2  ;;  %v128_v49 = vmul.f32 0.5, %v124_v2  ;;  %v311_v1 = vld [vmem:[%s462_s4] ss:$0 sm:$0xff] }
  0x97   :  { %v101_v9 = vmul.f32 0.5, %v100_v5  ;;  %v87_v11 = vsel %vm86_vm5, %v315_v48, %v83_v6 }
  0x98   :  { %v91_v12 = vmul.f32 0.5, %v90_v7  ;;  %v109_v13 = vmul.f32 %v87_v11, %v61_v8  ;;  %v136_v15 = vmul.f32 %v132_v10, %v124_v2 }
  0x99   :  { %v102_v14 = vsub.f32 1.5, %v101_v9 }
  0x9a   :  { %v92_v16 = vsub.f32 1.5, %v91_v12  ;;  %v117_v17 = vmul.f32 %v309_v52, %v109_v13  ;;  %v140_v19 = vmul.f32 %v136_v15, %v124_v2 }
  0x9b   :  { %v103_v18 = vmul.f32 %v317_v58, %v102_v14 }
  0x9c   :  { %v93_v3 = vmul.f32 %v319_v60, %v92_v16  ;;  %v125_v22 = vadd.f32 %v310_v56, %v117_v17  ;;  %v144_v25 = vadd.f32 %v140_v19, %v124_v2 }
  0x9d   :  { %v107_v23 = vsel %vm106_vm9, %v317_v58, %v103_v18 }
  0x9e   :  { %v111_v26 = vmul.f32 %v107_v23, %v63_v20  ;;  %v97_v28 = vsel %vm96_vm11, %v319_v60, %v93_v3  ;;  %v133_v30 = vmul.f32 0.044715, %v125_v22  ;;  %v148_v34 = vmul.f32 0.7978846, %v144_v25 }
  0x9f   :  { %v110_v29 = vmul.f32 %v97_v28, %v62_v21  ;;  %v129_v50 = vmul.f32 0.5, %v125_v22 }
  0xa0   :  { %v119_v31 = vmul.f32 %v309_v52, %v111_v26  ;;  %v137_v33 = vmul.f32 %v133_v30, %v125_v22  ;;  %320 = vtanh.f32 %v148_v34 }
  0xa1   :  { %v118_v32 = vmul.f32 %v309_v52, %v110_v29 }
  0xa2   :  { %v127_v35 = vadd.f32 %v310_v56, %v119_v31  ;;  %v141_v27 = vmul.f32 %v137_v33, %v125_v22 }
  0xa3   :  { %v126_v4 = vadd.f32 %v310_v56, %v118_v32 }
  0xa4   :  { %v135_v36 = vmul.f32 0.044715, %v127_v35  ;;  %v145_v37 = vadd.f32 %v141_v27, %v125_v22  ;;  %v131_v57 = vmul.f32 0.5, %v127_v35 }
  0xa5   :  { %v134_v38 = vmul.f32 0.044715, %v126_v4  ;;  %v130_v59 = vmul.f32 0.5, %v126_v4 }
  0xa6   :  { %v139_v0 = vmul.f32 %v135_v36, %v127_v35  ;;  %v149_v24 = vmul.f32 0.7978846, %v145_v37  ;;  %v321_v43 = vpop.eup %320 }
  0xa7   :  { %v138_v39 = vmul.f32 %v134_v38, %v126_v4  ;;  %v156_v47 = vadd.f32 1.0, %v321_v43 }
  0xa8   :  { %v143_v40 = vmul.f32 %v139_v0, %v127_v35  ;;  %322 = vtanh.f32 %v149_v24 }
  0xa9   :  { %v142_v41 = vmul.f32 %v138_v39, %v126_v4  ;;  %v160_v52 = vmul.f32 %v156_v47, %v128_v49 }
  0xaa   :  { %v147_v42 = vadd.f32 %v143_v40, %v127_v35 }
  0xab   :  { %v146_v44 = vadd.f32 %v142_v41, %v126_v4 }
  0xac   :  { %v151_v45 = vmul.f32 0.7978846, %v147_v42 }
  0xad   :  { %v150_v46 = vmul.f32 0.7978846, %v146_v44 }
  0xae   :  { %324 = vtanh.f32 %v151_v45  ;;  %v323_v48 = vpop.eup %322 }
  0xaf   :  { %326 = vtanh.f32 %v150_v46  ;;  %v157_v51 = vadd.f32 1.0, %v323_v48 }
  0xb1   :  { %v161_v53 = vmul.f32 %v157_v51, %v129_v50 }
  0xb3   :  { %v180_v55 = vpack.c.bf16 %v161_v53, %v160_v52 }
  0xb4   :  { %v325_v54 = vpop.eup %324 }
  0xb5   :  { %v327_v56 = vpop.eup %326  ;;  %v159_v58 = vadd.f32 1.0, %v325_v54  ;;  %242 = vmatmul.bf16.vlgmr.msra.gmra.mxu0 %v180_v55 }
  0xb6   :  { %v158_v60 = vadd.f32 1.0, %v327_v56 }
  0xb7   :  { %v163_v61 = vmul.f32 %v159_v58, %v131_v57 }
  0xb8   :  { %v162_v62 = vmul.f32 %v158_v60, %v130_v59 }
  0xba   :  { %v181_v63 = vpack.c.bf16 %v163_v61, %v162_v62 }
  0xbc   :  { %247 = vmatmul.bf16.vlgmr.msra.gmra.mxu1 %v181_v63 }
 0x132   :  { %v243_v2 = vpop.f32.mrf.mxu0 }
 0x133   :  { %v244_v5 = vadd.f32 %v311_v1, %v243_v2 }
 0x135   :  { %253 = vst [vmem:[%s464_s5] sm:$0xff] %v244_v5 }
 0x139   :  { %v248_v6 = vpop.f32.mrf.mxu1 }
 0x13a   :  { %v249_v7 = vadd.f32 %v311_v1, %v248_v6  ;;  %v245_v8 = vpop.f32.mrf.mxu0 }
 0x13b   :  { %v246_v9 = vadd.f32 %v311_v1, %v245_v8 }
 0x13c   :  { %255 = vst [vmem:[%s464_s5 + $0x10] sm:$0xff] %v249_v7 }
 0x13d   :  { %254 = vst [vmem:[%s464_s5 + $0x8] sm:$0xff] %v246_v9 }
 0x141   :  { %v250_v10 = vpop.f32.mrf.mxu1 }
 0x142   :  { %v251_v11 = vadd.f32 %v311_v1, %v250_v10 }
 0x144   :  { %256 = vst [vmem:[%s464_s5 + $0x18] sm:$0xff] %v251_v11 }

// kernel: speech_recognition_forward.3
= control target key start
LH: loop header
LB: loop body
LE: loop exit
PB: predicated region body
PF: predicated region fallthrough
CT: control target
= control target key end

     0   :  { %s1879_s18 = smov 0   ;;  %s1881_s19 = smov 0   ;;  %s2257_s0 = inlined_call_operand.vmem [shape: f32[2,16,256], index: 0, kind: input, shape index: {}]   ;;  %s2258_s1 = inlined_call_operand.vmem [shape: bf16[256,16], index: 1, kind: input, shape index: {}]   ;;  %s2259_s2 = inlined_call_operand.vmem [shape: f32[1,16], index: 2, kind: input, shape index: {}]   ;;  %s2260_s3 = inlined_call_operand.vmem [shape: f32[1,16], index: 3, kind: input, shape index: {}]   ;;  %s2261_s4 = inlined_call_operand.vmem [shape: f32[1,16], index: 4, kind: input, shape index: {}]   ;;  %s2262_s5 = inlined_call_operand.vmem [shape: bf16[16,128], index: 5, kind: input, shape index: {}]   ;;  %s2263_s6 = inlined_call_operand.vmem [shape: f32[1,128], index: 6, kind: input, shape index: {}]   ;;  %s2264_s7 = inlined_call_operand.vmem [shape: f32[1,128], index: 7, kind: input, shape index: {}]   ;;  %s2265_s8 = inlined_call_operand.vmem [shape: f32[1,128], index: 8, kind: input, shape index: {}]   ;;  %s2266_s9 = inlined_call_operand.vmem [shape: bf16[128,128], index: 9, kind: input, shape index: {}]   ;;  %s2267_s10 = inlined_call_operand.vmem [shape: f32[1,128], index: 10, kind: input, shape index: {}]   ;;  %s2268_s11 = inlined_call_operand.vmem [shape: f32[1,128], index: 11, kind: input, shape index: {}]   ;;  %s2269_s12 = inlined_call_operand.vmem [shape: f32[1,128], index: 12, kind: input, shape index: {}]   ;;  %s2270_s13 = inlined_call_operand.vmem [shape: bf16[128,512], index: 13, kind: input, shape index: {}]   ;;  %s2271_s14 = inlined_call_operand.vmem [shape: f32[1,512], index: 14, kind: input, shape index: {}]   ;;  %s2272_s15 = inlined_call_operand.vmem [shape: f32[2,16,512], index: 15, kind: output, shape index: {}]  }
   0x1   :  { %s1883_s20 = smov 0  }
   0x2 LB: > { %s37_s21 = sadd.s32 1, %s1791_s19  ;;  %p1415_p0 = scmp.ge.s32.totalorder %s1795_s20, 1  ;;  %s1795_s20 = sphi %s1883_s20, %s25_s20   ;;  %s1791_s19 = sphi %s1881_s19, %s2276_s19   ;;  %s1787_s18 = sphi %s1879_s18, %s2275_s18  }
   0x3   : > { %p39_p1 = scmp.ge.s32.totalorder %s37_s21, 2  ;;  %p459_p2 = scmp.lt.s32.totalorder %s1795_s20, 3 }
   0x5   : > { %s2278_s21 = smov (%p39_p1, %s37_s21), 0  ;;  %p460_p3 = pnand %p1415_p0, %p459_p2 }
   0x6   : > { %2273 = sst [smem:[#allocation2_spill]] %s2278_s21  ;;  %p518_p4 = scmp.lt.s32.totalorder (!%p460_p3), %s1787_s18, 1 }
   0x7   : > { %463 = sbr.rel (%p460_p3) target bundleno = 1479 (0x5c7), region = 80 }
   0xc   : > { %v1660_v0 = vld [vmem:[%s2258_s1 + $0x38] sm:$0xff]  ;;  %v1659_v2 = vld [vmem:[%s2258_s1 + $0x30] sm:$0xff]  ;;  %v1658_v4 = vld [vmem:[%s2258_s1 + $0x28] sm:$0xff]  ;;  %s2280_s18 = smov (!%p518_p4, %s1787_s18), 1  ;;  %vm708_vm0 = vcmask 130048   ;;  %v1797_v33 = vmov 16.0  }
   0xd   : > { %v1668_v1 = vld [vmem:[%s2258_s1 + $0x78] sm:$0xff]  ;;  %678 = vmatpush.bf16.msra.mxu0 %v1660_v0  ;;  %v1667_v3 = vld [vmem:[%s2258_s1 + $0x70] sm:$0xff]  ;;  %v1666_v5 = vld [vmem:[%s2258_s1 + $0x68] sm:$0xff]  ;;  %s1651_s24 = sshll.u32 %s2280_s18, 5  ;;  %1745 = vrcp.f32 %v1797_v33  ;;  %s1652_s22 = sshll.u32 %s2280_s18, 6 }
   0xe   : > { %692 = vmatpush.bf16.msra.mxu1 %v1668_v1  ;;  %v1657_v6 = vld [vmem:[%s2258_s1 + $0x20] sm:$0xff]  ;;  %v1656_v8 = vld [vmem:[%s2258_s1 + $0x18] sm:$0xff]  ;;  %v1655_v10 = vld [vmem:[%s2258_s1 + $0x10] sm:$0xff]  ;;  %s526_s16 = scalar_lea.vmem %s2257_s0, %s1651_s24  ;;  %s537_s25 = scalar_lea.vmem %s2272_s15, %s1652_s22 }
   0xf   : > { %v1665_v7 = vld [vmem:[%s2258_s1 + $0x60] sm:$0xff]  ;;  %v1664_v9 = vld [vmem:[%s2258_s1 + $0x58] sm:$0xff]  ;;  %v1663_v11 = vld [vmem:[%s2258_s1 + $0x50] sm:$0xff] }
  0x10   : > { %v1654_v12 = vld [vmem:[%s2258_s1 + $0x8] sm:$0xff]  ;;  %v1653_v14 = vld [vmem:[%s2258_s1] sm:$0xff]  ;;  %v542_v17 = vld [vmem:[%s526_s16 + $0x10] sm:$0xff] }
  0x11   : > { %679 = vmatpush.bf16.msra.mxu0 %v1659_v2  ;;  %v1662_v13 = vld [vmem:[%s2258_s1 + $0x48] sm:$0xff]  ;;  %v1661_v15 = vld [vmem:[%s2258_s1 + $0x40] sm:$0xff]  ;;  %v543_v19 = vld [vmem:[%s526_s16 + $0x18] sm:$0xff] }
  0x12   : > { %693 = vmatpush.bf16.msra.mxu1 %v1667_v3  ;;  %v540_v16 = vld [vmem:[%s526_s16] sm:$0xff]  ;;  %v541_v18 = vld [vmem:[%s526_s16 + $0x8] sm:$0xff] }
  0x13   : > { %v576_v20 = vpack.c.bf16 %v542_v17, %v540_v16  ;;  %v577_v21 = vpack.c.bf16 %v543_v19, %v541_v18  ;;  %v1736_v22 = vld [vmem:[%s2259_s2] ss:$0 sm:$0xff]  ;;  %v1746_v34 = vpop.eup %1745 }
  0x14   : > { %v716_v35 = vmul.f32 16.0, %v1746_v34  ;;  %vm720_vm1 = vweird.f32 %v1746_v34  ;;  %v1669_v53 = vld [vmem:[%s2262_s5] sm:$0xff] }
  0x15   : > { %680 = vmatpush.bf16.msra.mxu0 %v1658_v4  ;;  %811 = vmatpush.bf16.msra.mxu2 %v1669_v53  ;;  %v1737_v1 = vld [vmem:[%s2260_s3] ss:$0 sm:$0xff] }
  0x16   : > { %694 = vmatpush.bf16.msra.mxu1 %v1666_v5  ;;  %v717_v36 = vsub.f32 1.0, %v716_v35  ;;  %v1738_v4 = vld [vmem:[%s2261_s4] ss:$0 sm:$0xff] }
  0x18   : > { %v718_v37 = vmul.f32 %v1746_v34, %v717_v36 }
  0x19   : > { %681 = vmatpush.bf16.msra.mxu0 %v1657_v6 }
  0x1a   : > { %695 = vmatpush.bf16.msra.mxu1 %v1665_v7  ;;  %v719_v38 = vadd.f32 %v1746_v34, %v718_v37 }
  0x1c   : > { %v721_v39 = vsel %vm720_vm1, %v1746_v34, %v719_v38  ;;  %v1739_v34 = vld [vmem:[%s2263_s6] ss:$0 sm:$0xff] }
  0x1d   : > { %682 = vmatpush.bf16.msra.mxu0 %v1656_v8 }
  0x1e   : > { %696 = vmatpush.bf16.msra.mxu1 %v1664_v9 }
  0x21   : > { %683 = vmatpush.bf16.msra.mxu0 %v1655_v10 }
  0x22   : > { %697 = vmatpush.bf16.msra.mxu1 %v1663_v11 }
  0x25   : > { %684 = vmatpush.bf16.msra.mxu0 %v1654_v12 }
  0x26   : > { %698 = vmatpush.bf16.msra.mxu1 %v1662_v13 }
  0x29   : > { %685 = vmatpush.bf16.msra.mxu0 %v1653_v14 }
  0x2a   : > { %699 = vmatpush.bf16.msra.mxu1 %v1661_v15 }
  0x2c   : > { %686 = vmatmul.bf16.vlgmr.msra.gmra.mxu0 %v576_v20 }
  0x2d   : > { %700 = vmatmul.bf16.vlgmr.msra.gmra.mxu1 %v577_v21 }
  0xa9   : > { %v687_v23 = vpop.f32.mrf.mxu0 }
  0xaa   : > { %v701_v24 = vpop.f32.mrf.mxu1  ;;  %v688_v25 = vadd.f32 %v1736_v22, %v687_v23 }
  0xac   : > { %v702_v26 = vadd.f32 %v701_v24, %v688_v25 }
  0xae   : > { %v709_v27 = vsel %vm708_vm0, %v702_v26, 0.0 }
  0xaf   : > { %710 = vadd.xlane.f32.xlu0 %v709_v27 }
  0xb1   : > { %v689_v28 = vpop.f32.mrf.mxu0 }
  0xb2   : > { %v690_v29 = vadd.f32 %v1736_v22, %v689_v28  ;;  %v703_v30 = vpop.f32.mrf.mxu1 }
  0xb4   : > { %v704_v31 = vadd.f32 %v703_v30, %v690_v29 }
  0xb6   : > { %v712_v32 = vsel %vm708_vm0, %v704_v31, 0.0 }
  0xb7   : > { %713 = vadd.xlane.f32.xlu0 %v712_v32 }
 0x122   : > { %v711_v40 = vpop.xlane.xlu0 %710 }
 0x123   : > { %v722_v41 = vmul.f32 %v721_v39, %v711_v40 }
 0x125   : > { %v724_v42 = vsub.f32 %v702_v26, %v722_v41 }
 0x127   : > { %v726_v43 = vmul.f32 %v724_v42, %v724_v42 }
 0x129   : > { %v728_v44 = vsel %vm708_vm0, %v726_v43, 0.0 }
 0x12a   : > { %729 = vadd.xlane.f32.xlu1 %v728_v44  ;;  %v714_v45 = vpop.xlane.xlu0 %713 }
 0x12b   : > { %v723_v46 = vmul.f32 %v721_v39, %v714_v45 }
 0x12d   : > { %v725_v47 = vsub.f32 %v704_v31, %v723_v46 }
 0x12f   : > { %v727_v48 = vmul.f32 %v725_v47, %v725_v47 }
 0x131   : > { %v731_v49 = vsel %vm708_vm0, %v727_v48, 0.0 }
 0x132   : > { %732 = vadd.xlane.f32.xlu1 %v731_v49 }
 0x19d   : > { %v730_v50 = vpop.xlane.xlu1 %729 }
 0x19e   : > { %v734_v51 = vmul.f32 %v730_v50, %v721_v39 }
 0x1a0   : > { %v736_v52 = vadd.f32 1e-05, %v734_v51 }
 0x1a2   : > { %1747 = vrsqrt.f32 %v736_v52  ;;  %vm744_vm3 = vweird.f32 %v736_v52 }
 0x1a5   : > { %v733_v54 = vpop.xlane.xlu1 %732 }
 0x1a6   : > { %v735_v55 = vmul.f32 %v733_v54, %v721_v39  ;;  %v1798_v39 = vmov 128.0   ;;  %v1677_v54 = vld [vmem:[%s2266_s9 + $0x38] sm:$0xff] }
 0x1a7   : > { %964 = vmatpush.bf16.msra.mxu3 %v1677_v54 }
 0x1a8   : > { %v1748_v56 = vpop.eup %1747  ;;  %v737_v57 = vadd.f32 1e-05, %v735_v55  ;;  %v1676_v55 = vld [vmem:[%s2266_s9 + $0x30] sm:$0xff] }
 0x1a9   : > { %v739_v58 = vmul.f32 %v1748_v56, %v736_v52  ;;  %vm745_vm2 = vweird.f32 %v1748_v56 }
 0x1aa   : > { %1749 = vrsqrt.f32 %v737_v57  ;;  %vm746_vm4 = vmor %vm744_vm3, %vm745_vm2  ;;  %vm754_vm6 = vweird.f32 %v737_v57 }
 0x1ab   : > { %v740_v59 = vmul.f32 %v1748_v56, %v739_v58  ;;  %965 = vmatpush.bf16.msra.mxu3 %v1676_v55 }
 0x1ad   : > { %v741_v60 = vmul.f32 0.5, %v740_v59  ;;  %v1675_v59 = vld [vmem:[%s2266_s9 + $0x28] sm:$0xff] }
 0x1af   : > { %v742_v61 = vsub.f32 1.5, %v741_v60  ;;  %966 = vmatpush.bf16.msra.mxu3 %v1675_v59  ;;  %v1674_v60 = vld [vmem:[%s2266_s9 + $0x20] sm:$0xff] }
 0x1b0   : > { %v1750_v62 = vpop.eup %1749  ;;  %v1635_v59 = vld [vmem:[%s2270_s13 + $0xe0] sm:$0xf] }
 0x1b1   : > { %v743_v63 = vmul.f32 %v1748_v56, %v742_v61  ;;  %v749_v0 = vmul.f32 %v1750_v62, %v737_v57  ;;  %vm755_vm5 = vweird.f32 %v1750_v62 }
 0x1b2   : > { %vm756_vm7 = vmor %vm754_vm6, %vm755_vm5 }
 0x1b3   : > { %v747_v2 = vsel %vm746_vm4, %v1748_v56, %v743_v63  ;;  %v750_v3 = vmul.f32 %v1750_v62, %v749_v0  ;;  %967 = vmatpush.bf16.msra.mxu3 %v1674_v60  ;;  %v1673_v63 = vld [vmem:[%s2266_s9 + $0x18] sm:$0xff]  ;;  %v1708_v60 = vld [vmem:[%s2270_s13 + $0xec] sm:$0xf0] }
 0x1b4   : > { %v758_v5 = vmul.f32 %v747_v2, %v724_v42 }
 0x1b5   : > { %v751_v6 = vmul.f32 0.5, %v750_v3  ;;  %v1672_v3 = vld [vmem:[%s2266_s9 + $0x10] sm:$0xff] }
 0x1b6   : > { %v763_v7 = vmul.f32 %v1737_v1, %v758_v5 }
 0x1b7   : > { %v752_v8 = vsub.f32 1.5, %v751_v6  ;;  %968 = vmatpush.bf16.msra.mxu3 %v1673_v63  ;;  %v1671_v6 = vld [vmem:[%s2266_s9 + $0x8] sm:$0xff]  ;;  %v1637_v63 = vld [vmem:[%s2270_s13 + $0xf0] sm:$0xf0] }
 0x1b8   : > { %v768_v9 = vadd.f32 %v1738_v4, %v763_v7 }
 0x1b9   : > { %v753_v10 = vmul.f32 %v1750_v62, %v752_v8 }
 0x1ba   : > { %v772_v11 = vmul.f32 0.044715, %v768_v9  ;;  %v770_v28 = vmul.f32 0.5, %v768_v9 }
 0x1bb   : > { %v757_v12 = vsel %vm756_vm7, %v1750_v62, %v753_v10  ;;  %969 = vmatpush.bf16.msra.mxu3 %v1672_v3 }
 0x1bc   : > { %v759_v13 = vmul.f32 %v757_v12, %v725_v47  ;;  %v774_v14 = vmul.f32 %v772_v11, %v768_v9  ;;  %v1740_v11 = vld [vmem:[%s2264_s7] ss:$0 sm:$0xff] }
 0x1bd   : > { %v1670_v12 = vld [vmem:[%s2266_s9] sm:$0xff] }
 0x1be   : > { %v764_v15 = vmul.f32 %v1737_v1, %v759_v13  ;;  %v776_v16 = vmul.f32 %v774_v14, %v768_v9 }
 0x1bf   : > { %970 = vmatpush.bf16.msra.mxu3 %v1671_v6 }
 0x1c0   : > { %v769_v17 = vadd.f32 %v1738_v4, %v764_v15  ;;  %v778_v18 = vadd.f32 %v776_v16, %v768_v9  ;;  %v1741_v15 = vld [vmem:[%s2265_s8] ss:$0 sm:$0xff] }
 0x1c2   : > { %v773_v19 = vmul.f32 0.044715, %v769_v17  ;;  %v780_v21 = vmul.f32 0.7978846, %v778_v18  ;;  %v771_v29 = vmul.f32 0.5, %v769_v17 }
 0x1c3   : > { %971 = vmatpush.bf16.msra.mxu3 %v1670_v12  ;;  %v1627_v12 = vld [vmem:[%s2270_s13 + $0xc8] sm:$0xf] }
 0x1c4   : > { %v775_v20 = vmul.f32 %v773_v19, %v769_v17  ;;  %1751 = vtanh.f32 %v780_v21 }
 0x1c6   : > { %v777_v22 = vmul.f32 %v775_v20, %v769_v17 }
 0x1c8   : > { %v779_v23 = vadd.f32 %v777_v22, %v769_v17 }
 0x1ca   : > { %v781_v24 = vmul.f32 0.7978846, %v779_v23  ;;  %v1752_v25 = vpop.eup %1751 }
 0x1cb   : > { %v784_v26 = vadd.f32 1.0, %v1752_v25 }
 0x1cc   : > { %1753 = vtanh.f32 %v781_v24 }
 0x1cd   : > { %v786_v31 = vmul.f32 %v784_v26, %v770_v28  ;;  %1755 = vrcp.f32 %v1798_v39 }
 0x1d2   : > { %v1754_v27 = vpop.eup %1753 }
 0x1d3   : > { %v785_v30 = vadd.f32 1.0, %v1754_v27  ;;  %v1756_v40 = vpop.eup %1755 }
 0x1d4   : > { %v825_v41 = vmul.f32 128.0, %v1756_v40  ;;  %vm829_vm8 = vweird.f32 %v1756_v40 }
 0x1d5   : > { %v787_v32 = vmul.f32 %v785_v30, %v771_v29 }
 0x1d6   : > { %v826_v42 = vsub.f32 1.0, %v825_v41 }
 0x1d7   : > { %v790_v33 = vpack.c.bf16 %v787_v32, %v786_v31 }
 0x1d8   : > { %v827_v43 = vmul.f32 %v1756_v40, %v826_v42 }
 0x1d9   : > { %1488 = vmatmul.msk.bf16.vlgmr.msra.gmra.mxu2 %vm708_vm0, %v790_v33 }
 0x1da   : > { %v828_v44 = vadd.f32 %v1756_v40, %v827_v43 }
 0x1dc   : > { %v1971_v45 = vsel %vm829_vm8, %v1756_v40, %v828_v44 }
 0x25c   : > { %v813_v35 = vpop.f32.mrf.mxu2 }
 0x25d   : > { %v814_v36 = vadd.f32 %v1739_v34, %v813_v35 }
 0x25f   : > { %820 = vadd.xlane.f32.xlu2 %v814_v36 }
 0x264   : > { %v815_v37 = vpop.f32.mrf.mxu2 }
 0x265   : > { %v816_v38 = vadd.f32 %v1739_v34, %v815_v37 }
 0x267   : > { %822 = vadd.xlane.f32.xlu2 %v816_v38 }
 0x2d2   : > { %v821_v46 = vpop.xlane.xlu2 %820 }
 0x2d3   : > { %v831_v47 = vmul.f32 %v1971_v45, %v821_v46  ;;  %v1742_v46 = vld [vmem:[%s2267_s10] ss:$0 sm:$0xff] }
 0x2d5   : > { %v833_v48 = vsub.f32 %v814_v36, %v831_v47 }
 0x2d7   : > { %v835_v49 = vmul.f32 %v833_v48, %v833_v48 }
 0x2d9   : > { %837 = vadd.xlane.f32.xlu0 %v835_v49 }
 0x2da   : > { %v823_v50 = vpop.xlane.xlu2 %822 }
 0x2db   : > { %v832_v51 = vmul.f32 %v1971_v45, %v823_v50 }
 0x2dd   : > { %v834_v52 = vsub.f32 %v816_v38, %v832_v51 }
 0x2df   : > { %v836_v53 = vmul.f32 %v834_v52, %v834_v52 }
 0x2e1   : > { %839 = vadd.xlane.f32.xlu1 %v836_v53 }
 0x34c   : > { %v838_v56 = vpop.xlane.xlu0 %837 }
 0x34d   : > { %v841_v57 = vmul.f32 %v838_v56, %v1971_v45 }
 0x34f   : > { %v843_v58 = vadd.f32 1e-05, %v841_v57 }
 0x351   : > { %1757 = vrsqrt.f32 %v843_v58  ;;  %vm851_vm10 = vweird.f32 %v843_v58 }
 0x354   : > { %v840_v61 = vpop.xlane.xlu1 %839 }
 0x355   : > { %v842_v62 = vmul.f32 %v840_v61, %v1971_v45  ;;  %v1706_v61 = vld [vmem:[%s2270_s13 + $0xe4] sm:$0xf] }
 0x357   : > { %v1758_v0 = vpop.eup %1757  ;;  %v844_v1 = vadd.f32 1e-05, %v842_v62  ;;  %v1636_v62 = vor.u32 %v1708_v60, %v1635_v59  ;;  %v1555_v60 = vld [vmem:[%s2270_s13 + $0x40] sm:$0xf] }
 0x358   : > { %v846_v2 = vmul.f32 %v1758_v0, %v843_v58  ;;  %vm852_vm9 = vweird.f32 %v1758_v0 }
 0x359   : > { %1759 = vrsqrt.f32 %v844_v1  ;;  %vm853_vm11 = vmor %vm851_vm10, %vm852_vm9  ;;  %vm861_vm13 = vweird.f32 %v844_v1  ;;  %1251 = vmatpush.bf16.msrb.mxu2 %v1636_v62 }
 0x35a   : > { %v847_v4 = vmul.f32 %v1758_v0, %v846_v2  ;;  %v1640_v2 = vor.u32 %v1706_v61, %v1637_v63  ;;  %v1688_v61 = vld [vmem:[%s2270_s13 + $0x4c] sm:$0xf0] }
 0x35c   : > { %v848_v5 = vmul.f32 0.5, %v847_v4  ;;  %v1707_v4 = vld [vmem:[%s2270_s13 + $0xec] sm:$0xf]  ;;  %1265 = vmatpush.bf16.msrb.mxu0 %v1640_v2  ;;  %v1686_v2 = vld [vmem:[%s2270_s13 + $0x44] sm:$0xf] }
 0x35e   : > { %v849_v7 = vsub.f32 1.5, %v848_v5  ;;  %v1645_v5 = vld [vmem:[%s2270_s13 + $0xf8] sm:$0xf0] }
 0x35f   : > { %v1760_v8 = vpop.eup %1759  ;;  %v1648_v6 = vor.u32 %v1707_v4, %v1645_v5  ;;  %v1563_v5 = vld [vmem:[%s2270_s13 + $0x48] sm:$0xf] }
 0x360   : > { %v850_v9 = vmul.f32 %v1758_v0, %v849_v7  ;;  %v856_v10 = vmul.f32 %v1760_v8, %v844_v1  ;;  %vm862_vm12 = vweird.f32 %v1760_v8  ;;  %v1709_v1 = vld [vmem:[%s2270_s13 + $0xf4] sm:$0xf0]  ;;  %v1619_v7 = vld [vmem:[%s2270_s13 + $0xc0] sm:$0xf] }
 0x361   : > { %vm863_vm14 = vmor %vm861_vm13, %vm862_vm12  ;;  %1293 = vmatpush.bf16.msrb.mxu3 %v1648_v6  ;;  %v1689_v6 = vld [vmem:[%s2270_s13 + $0x54] sm:$0xf0] }
 0x362   : > { %v854_v13 = vsel %vm853_vm11, %v1758_v0, %v850_v9  ;;  %v857_v14 = vmul.f32 %v1760_v8, %v856_v10  ;;  %v1643_v0 = vld [vmem:[%s2270_s13 + $0xe8] sm:$0xf]  ;;  %v1702_v9 = vld [vmem:[%s2270_s13 + $0xc4] sm:$0xf] }
 0x363   : > { %v865_v16 = vmul.f32 %v854_v13, %v833_v48  ;;  %v1644_v3 = vor.u32 %v1709_v1, %v1643_v0  ;;  %v1705_v13 = vld [vmem:[%s2270_s13 + $0xd4] sm:$0xf0] }
 0x364   : > { %v858_v17 = vmul.f32 0.5, %v857_v14 }
 0x365   : > { %v870_v18 = vmul.f32 %v1740_v11, %v865_v16  ;;  %1279 = vmatpush.bf16.msrb.mxu1 %v1644_v3  ;;  %v1628_v16 = vor.u32 %v1705_v13, %v1627_v12  ;;  %v1557_v3 = vld [vmem:[%s2270_s13 + $0x50] sm:$0xf0]  ;;  %v1539_v12 = vld [vmem:[%s2270_s13 + $0x20] sm:$0xf]  ;;  %v1684_v13 = vld [vmem:[%s2270_s13 + $0x2c] sm:$0xf0] }
 0x366   : > { %v859_v19 = vsub.f32 1.5, %v858_v17  ;;  %v1703_v17 = vld [vmem:[%s2270_s13 + $0xcc] sm:$0xf] }
 0x367   : > { %v875_v20 = vadd.f32 %v1741_v15, %v870_v18  ;;  %v1629_v18 = vld [vmem:[%s2270_s13 + $0xd8] sm:$0xf0] }
 0x368   : > { %v860_v21 = vmul.f32 %v1760_v8, %v859_v19 }
 0x369   : > { %v879_v22 = vmul.f32 0.044715, %v875_v20  ;;  %v877_v39 = vmul.f32 0.5, %v875_v20  ;;  %1280 = vmatpush.bf16.msrb.mxu1 %v1628_v16 }
 0x36a   : > { %v864_v23 = vsel %vm863_vm14, %v1760_v8, %v860_v21  ;;  %v1704_v8 = vld [vmem:[%s2270_s13 + $0xcc] sm:$0xf0]  ;;  %v1603_v21 = vld [vmem:[%s2270_s13 + $0xa0] sm:$0xf] }
 0x36b   : > { %v866_v24 = vmul.f32 %v864_v23, %v834_v52  ;;  %v881_v25 = vmul.f32 %v879_v22, %v875_v20  ;;  %v1620_v10 = vor.u32 %v1704_v8, %v1619_v7  ;;  %v1700_v22 = vld [vmem:[%s2270_s13 + $0xac] sm:$0xf0]  ;;  %v1698_v23 = vld [vmem:[%s2270_s13 + $0xa4] sm:$0xf]  ;;  %v1687_v7 = vld [vmem:[%s2270_s13 + $0x4c] sm:$0xf]  ;;  %v1556_v8 = vor.u32 %v1688_v61, %v1555_v60 }
 0x36d   : > { %v871_v26 = vmul.f32 %v1740_v11, %v866_v24  ;;  %v883_v27 = vmul.f32 %v881_v25, %v875_v20  ;;  %v1621_v11 = vld [vmem:[%s2270_s13 + $0xd0] sm:$0xf0]  ;;  %1252 = vmatpush.bf16.msrb.mxu2 %v1620_v10  ;;  %v1604_v25 = vor.u32 %v1700_v22, %v1603_v21  ;;  %v1683_v21 = vld [vmem:[%s2270_s13 + $0x2c] sm:$0xf]  ;;  %v1549_v22 = vld [vmem:[%s2270_s13 + $0x38] sm:$0xf0] }
 0x36f   : > { %v876_v28 = vadd.f32 %v1741_v15, %v871_v26  ;;  %v885_v29 = vadd.f32 %v883_v27, %v875_v20  ;;  %v1624_v15 = vor.u32 %v1702_v9, %v1621_v11  ;;  %v1632_v20 = vor.u32 %v1703_v17, %v1629_v18  ;;  %v1605_v26 = vld [vmem:[%s2270_s13 + $0xb0] sm:$0xf0]  ;;  %v1611_v27 = vld [vmem:[%s2270_s13 + $0xa8] sm:$0xf]  ;;  %v1565_v9 = vld [vmem:[%s2270_s13 + $0x58] sm:$0xf0] }
 0x370   : > { %v1560_v11 = vor.u32 %v1686_v2, %v1557_v3  ;;  %v1568_v16 = vor.u32 %v1687_v7, %v1565_v9  ;;  %v1541_v17 = vld [vmem:[%s2270_s13 + $0x30] sm:$0xf0]  ;;  %v1547_v18 = vld [vmem:[%s2270_s13 + $0x28] sm:$0xf] }
 0x371   : > { %v880_v30 = vmul.f32 0.044715, %v876_v28  ;;  %v887_v32 = vmul.f32 0.7978846, %v885_v29  ;;  %v878_v40 = vmul.f32 0.5, %v876_v28  ;;  %1266 = vmatpush.bf16.msrb.mxu0 %v1624_v15  ;;  %1294 = vmatpush.bf16.msrb.mxu3 %v1632_v20  ;;  %v1564_v15 = vor.u32 %v1689_v6, %v1563_v5 }
 0x372   : > { %v1701_v29 = vld [vmem:[%s2270_s13 + $0xb4] sm:$0xf0]  ;;  %1253 = vmatpush.bf16.msrb.mxu2 %v1604_v25 }
 0x373   : > { %v882_v31 = vmul.f32 %v880_v30, %v876_v28  ;;  %1761 = vtanh.f32 %v887_v32  ;;  %v1699_v30 = vld [vmem:[%s2270_s13 + $0xac] sm:$0xf]  ;;  %v1612_v32 = vor.u32 %v1701_v29, %v1611_v27  ;;  %v1523_v27 = vld [vmem:[%s2270_s13] sm:$0xf] }
 0x375   : > { %v884_v33 = vmul.f32 %v882_v31, %v876_v28  ;;  %v1613_v31 = vld [vmem:[%s2270_s13 + $0xb8] sm:$0xf0]  ;;  %1281 = vmatpush.bf16.msrb.mxu1 %v1612_v32  ;;  %v1678_v32 = vld [vmem:[%s2270_s13 + $0x4] sm:$0xf] }
 0x377   : > { %v886_v34 = vadd.f32 %v884_v33, %v876_v28  ;;  %v1608_v28 = vor.u32 %v1698_v23, %v1605_v26  ;;  %v1616_v33 = vor.u32 %v1699_v30, %v1613_v31  ;;  %v1540_v23 = vor.u32 %v1684_v13, %v1539_v12  ;;  %v1081_v12 = vld [vmem:[%s2271_s14] sm:$0xf] }
 0x378   : > { %v1552_v31 = vor.u32 %v1683_v21, %v1549_v22  ;;  %v1084_v13 = vperm.slane %v1081_v12, 1 }
 0x379   : > { %v888_v35 = vmul.f32 0.7978846, %v886_v34  ;;  %v1762_v36 = vpop.eup %1761  ;;  %v1587_v34 = vld [vmem:[%s2270_s13 + $0x80] sm:$0xf]  ;;  %1267 = vmatpush.bf16.msrb.mxu0 %v1608_v28  ;;  %1295 = vmatpush.bf16.msrb.mxu3 %v1616_v33  ;;  %v1680_v28 = vld [vmem:[%s2270_s13 + $0xc] sm:$0xf0] }
 0x37a   : > { %v891_v37 = vadd.f32 1.0, %v1762_v36  ;;  %v1694_v36 = vld [vmem:[%s2270_s13 + $0x84] sm:$0xf]  ;;  %v1525_v33 = vld [vmem:[%s2270_s13 + $0x10] sm:$0xf0] }
 0x37b   : > { %1763 = vtanh.f32 %v888_v35  ;;  %v1696_v35 = vld [vmem:[%s2270_s13 + $0x8c] sm:$0xf0] }
 0x37c   : > { %v893_v42 = vmul.f32 %v891_v37, %v877_v39  ;;  %v1588_v37 = vor.u32 %v1696_v35, %v1587_v34  ;;  %v1595_v39 = vld [vmem:[%s2270_s13 + $0x88] sm:$0xf] }
 0x37d   : > { %v1531_v34 = vld [vmem:[%s2270_s13 + $0x8] sm:$0xf] }
 0x37e   : > { %1254 = vmatpush.bf16.msrb.mxu2 %v1588_v37  ;;  %v1681_v37 = vld [vmem:[%s2270_s13 + $0x14] sm:$0xf0] }
 0x381   : > { %v1764_v38 = vpop.eup %1763 }
 0x382   : > { %v892_v41 = vadd.f32 1.0, %v1764_v38  ;;  %v1589_v38 = vld [vmem:[%s2270_s13 + $0x90] sm:$0xf0] }
 0x384   : > { %v894_v43 = vmul.f32 %v892_v41, %v878_v40  ;;  %v1697_v40 = vld [vmem:[%s2270_s13 + $0x94] sm:$0xf0]  ;;  %v1592_v41 = vor.u32 %v1694_v36, %v1589_v38  ;;  %v1679_v38 = vld [vmem:[%s2270_s13 + $0xc] sm:$0xf] }
 0x386   : > { %v911_v44 = vpack.c.bf16 %v894_v43, %v893_v42  ;;  %v1596_v42 = vor.u32 %v1697_v40, %v1595_v39  ;;  %v1695_v43 = vld [vmem:[%s2270_s13 + $0x8c] sm:$0xf]  ;;  %1268 = vmatpush.bf16.msrb.mxu0 %v1592_v41  ;;  %v1533_v39 = vld [vmem:[%s2270_s13 + $0x18] sm:$0xf0]  ;;  %v1743_v40 = vld [vmem:[%s2268_s11] ss:$0 sm:$0xff] }
 0x388   : > { %972 = vmatmul.bf16.vlgmr.msra.gmra.mxu3 %v911_v44  ;;  %v1597_v44 = vld [vmem:[%s2270_s13 + $0x98] sm:$0xf0]  ;;  %1282 = vmatpush.bf16.msrb.mxu1 %v1596_v42 }
 0x40b   : > { %v973_v47 = vpop.f32.mrf.mxu3 }
 0x40c   : > { %v974_v48 = vadd.f32 %v1742_v46, %v973_v47 }
 0x40e   : > { %980 = vadd.xlane.f32.xlu2 %v974_v48 }
 0x413   : > { %v975_v49 = vpop.f32.mrf.mxu3 }
 0x414   : > { %v976_v50 = vadd.f32 %v1742_v46, %v975_v49  ;;  %v1571_v46 = vld [vmem:[%s2270_s13 + $0x60] sm:$0xf]  ;;  %v1692_v49 = vld [vmem:[%s2270_s13 + $0x6c] sm:$0xf0] }
 0x416   : > { %982 = vadd.xlane.f32.xlu0 %v976_v50 }
 0x481   : > { %v981_v51 = vpop.xlane.xlu2 %980 }
 0x482   : > { %v984_v52 = vmul.f32 %v981_v51, %v1971_v45  ;;  %v1573_v51 = vld [vmem:[%s2270_s13 + $0x70] sm:$0xf0] }
 0x484   : > { %v2011_v53 = vsub.f32 %v974_v48, %v984_v52  ;;  %v1600_v48 = vor.u32 %v1695_v43, %v1597_v44  ;;  %v1528_v43 = vor.u32 %v1678_v32, %v1525_v33  ;;  %v1744_v44 = vld [vmem:[%s2269_s12] ss:$0 sm:$0xff] }
 0x486   : > { %v988_v54 = vmul.f32 %v2011_v53, %v2011_v53  ;;  %1296 = vmatpush.bf16.msrb.mxu3 %v1600_v48  ;;  %v1536_v48 = vor.u32 %v1679_v38, %v1533_v39 }
 0x488   : > { %990 = vadd.xlane.f32.xlu1 %v988_v54  ;;  %v1572_v54 = vor.u32 %v1692_v49, %v1571_v46 }
 0x489   : > { %v983_v55 = vpop.xlane.xlu0 %982 }
 0x48a   : > { %v985_v56 = vmul.f32 %v983_v55, %v1971_v45  ;;  %v1579_v55 = vld [vmem:[%s2270_s13 + $0x68] sm:$0xf]  ;;  %1255 = vmatpush.bf16.msrb.mxu2 %v1572_v54 }
 0x48c   : > { %v2016_v57 = vsub.f32 %v976_v50, %v985_v56  ;;  %v1690_v50 = vld [vmem:[%s2270_s13 + $0x64] sm:$0xf]  ;;  %v1693_v56 = vld [vmem:[%s2270_s13 + $0x74] sm:$0xf0] }
 0x48d   : > { %v1576_v59 = vor.u32 %v1690_v50, %v1573_v51  ;;  %v1580_v0 = vor.u32 %v1693_v56, %v1579_v55 }
 0x48e   : > { %v989_v58 = vmul.f32 %v2016_v57, %v2016_v57  ;;  %1256 = vmatpush.bf16.msrb.mxu2 %v1556_v8 }
 0x48f   : > { %1269 = vmatpush.bf16.msrb.mxu0 %v1576_v59  ;;  %1283 = vmatpush.bf16.msrb.mxu1 %v1580_v0 }
 0x490   : > { %992 = vadd.xlane.f32.xlu2 %v989_v58  ;;  %v1691_v58 = vld [vmem:[%s2270_s13 + $0x6c] sm:$0xf] }
 0x492   : > { %1257 = vmatpush.bf16.msrb.mxu2 %v1540_v23 }
 0x493   : > { %1270 = vmatpush.bf16.msrb.mxu0 %v1560_v11  ;;  %1284 = vmatpush.bf16.msrb.mxu1 %v1564_v15 }
 0x4fb   : > { %v991_v14 = vpop.xlane.xlu1 %990 }
 0x4fc   : > { %v994_v19 = vmul.f32 %v991_v14, %v1971_v45  ;;  %v1682_v14 = vld [vmem:[%s2270_s13 + $0x24] sm:$0xf] }
 0x4fd   : > { %v1544_v26 = vor.u32 %v1682_v14, %v1541_v17  ;;  %v1085_v14 = vperm.slane %v1081_v12, 2 }
 0x4fe   : > { %v2078_v24 = vadd.f32 1e-05, %v994_v19  ;;  %v1685_v19 = vld [vmem:[%s2270_s13 + $0x34] sm:$0xf0] }
 0x4ff   : > { %v1548_v30 = vor.u32 %v1685_v19, %v1547_v18  ;;  %1271 = vmatpush.bf16.msrb.mxu0 %v1544_v26  ;;  %v1083_v19 = vperm.slane %v1081_v12, 0 }
 0x500   : > { %1765 = vrsqrt.f32 %v2078_v24  ;;  %vm1004_vm0 = vweird.f32 %v2078_v24 }
 0x501   : > { %1285 = vmatpush.bf16.msrb.mxu1 %v1548_v30 }
 0x503   : > { %v993_v47 = vpop.xlane.xlu2 %992  ;;  %1272 = vmatpush.bf16.msrb.mxu0 %v1528_v43 }
 0x504   : > { %v995_v52 = vmul.f32 %v993_v47, %v1971_v45  ;;  %v1581_v45 = vld [vmem:[%s2270_s13 + $0x78] sm:$0xf0]  ;;  %v1532_v47 = vor.u32 %v1681_v37, %v1531_v34 }
 0x505   : > { %v1584_v1 = vor.u32 %v1691_v58, %v1581_v45 }
 0x506   : > { %v2151_v62 = vpop.eup %1765  ;;  %v2153_v63 = vadd.f32 1e-05, %v995_v52  ;;  %1286 = vmatpush.bf16.msrb.mxu1 %v1532_v47 }
 0x507   : > { %v999_v4 = vmul.f32 %v2151_v62, %v2078_v24  ;;  %1297 = vmatpush.bf16.msrb.mxu3 %v1584_v1  ;;  %vm1005_vm15 = vweird.f32 %v2151_v62  ;;  %v1524_v24 = vor.u32 %v1680_v28, %v1523_v27 }
 0x508   : > { %1767 = vrsqrt.f32 %v2153_v63  ;;  %vm1006_vm1 = vmor %vm1004_vm0, %vm1005_vm15  ;;  %vm1014_vm3 = vweird.f32 %v2153_v63 }
 0x509   : > { %v1000_v10 = vmul.f32 %v2151_v62, %v999_v4  ;;  %1258 = vmatpush.bf16.msrb.mxu2 %v1524_v24 }
 0x50b   : > { %v1001_v20 = vmul.f32 0.5, %v1000_v10  ;;  %1298 = vmatpush.bf16.msrb.mxu3 %v1568_v16 }
 0x50d   : > { %v1002_v25 = vsub.f32 1.5, %v1001_v20  ;;  %v1086_v20 = vperm.slane %v1081_v12, 3 }
 0x50e   : > { %v1768_v29 = vpop.eup %1767 }
 0x50f   : > { %v1003_v35 = vmul.f32 %v2151_v62, %v1002_v25  ;;  %v1009_v36 = vmul.f32 %v1768_v29, %v2153_v63  ;;  %1299 = vmatpush.bf16.msrb.mxu3 %v1552_v31  ;;  %vm1015_vm2 = vweird.f32 %v1768_v29 }
 0x510   : > { %vm1016_vm4 = vmor %vm1014_vm3, %vm1015_vm2 }
 0x511   : > { %v1007_v41 = vsel %vm1006_vm1, %v2151_v62, %v1003_v35  ;;  %v1010_v42 = vmul.f32 %v1768_v29, %v1009_v36 }
 0x512   : > { %v1018_v46 = vmul.f32 %v1007_v41, %v2011_v53 }
 0x513   : > { %v1011_v49 = vmul.f32 0.5, %v1010_v42  ;;  %1300 = vmatpush.bf16.msrb.mxu3 %v1536_v48 }
 0x514   : > { %v1023_v50 = vmul.f32 %v1743_v40, %v1018_v46 }
 0x515   : > { %v1012_v51 = vsub.f32 1.5, %v1011_v49 }
 0x516   : > { %v1028_v52 = vadd.f32 %v1744_v44, %v1023_v50 }
 0x517   : > { %v1013_v54 = vmul.f32 %v1768_v29, %v1012_v51 }
 0x518   : > { %v1032_v55 = vmul.f32 0.044715, %v1028_v52  ;;  %v1030_v7 = vmul.f32 0.5, %v1028_v52 }
 0x519   : > { %v1017_v56 = vsel %vm1016_vm4, %v1768_v29, %v1013_v54 }
 0x51a   : > { %v1019_v53 = vmul.f32 %v1017_v56, %v2016_v57  ;;  %v1034_v58 = vmul.f32 %v1032_v55, %v1028_v52 }
 0x51c   : > { %v1024_v59 = vmul.f32 %v1743_v40, %v1019_v53  ;;  %v1036_v45 = vmul.f32 %v1034_v58, %v1028_v52 }
 0x51e   : > { %v1029_v60 = vadd.f32 %v1744_v44, %v1024_v59  ;;  %v1038_v61 = vadd.f32 %v1036_v45, %v1028_v52 }
 0x520   : > { %v1033_v62 = vmul.f32 0.044715, %v1029_v60  ;;  %v1040_v1 = vmul.f32 0.7978846, %v1038_v61  ;;  %v1031_v8 = vmul.f32 0.5, %v1029_v60 }
 0x522   : > { %v1035_v0 = vmul.f32 %v1033_v62, %v1029_v60  ;;  %1769 = vtanh.f32 %v1040_v1 }
 0x524   : > { %v1037_v2 = vmul.f32 %v1035_v0, %v1029_v60 }
 0x526   : > { %v1039_v3 = vadd.f32 %v1037_v2, %v1029_v60 }
 0x528   : > { %v1041_v4 = vmul.f32 0.7978846, %v1039_v3  ;;  %v1770_v63 = vpop.eup %1769 }
 0x529   : > { %v1044_v5 = vadd.f32 1.0, %v1770_v63 }
 0x52a   : > { %1771 = vtanh.f32 %v1041_v4 }
 0x52b   : > { %v1046_v9 = vmul.f32 %v1044_v5, %v1030_v7 }
 0x530   : > { %v1772_v6 = vpop.eup %1771 }
 0x531   : > { %v1045_v57 = vadd.f32 1.0, %v1772_v6 }
 0x533   : > { %v1047_v10 = vmul.f32 %v1045_v57, %v1031_v8 }
 0x535   : > { %v1080_v11 = vpack.c.bf16 %v1047_v10, %v1046_v9 }
 0x537   : > { %1259 = vmatmul.bf16.vlgmr.msrb.gmra.mxu2 %v1080_v11  ;;  %1273 = vmatmul.bf16.vlgmr.msrb.gmra.mxu0 %v1080_v11 }
 0x538   : > { %1287 = vmatmul.bf16.vlgmr.msrb.gmra.mxu1 %v1080_v11  ;;  %1301 = vmatmul.bf16.vlgmr.msrb.gmra.mxu3 %v1080_v11 }
 0x5b4   : > { %v1274_v15 = vpop.f32.mrf.mxu0 }
 0x5b5   : > { %v1275_v16 = vadd.f32 %v1274_v15, %v1084_v13  ;;  %v1288_v17 = vpop.f32.mrf.mxu1 }
 0x5b6   : > { %v1289_v18 = vadd.f32 %v1288_v17, %v1085_v14 }
 0x5b7   : > { %1308 = vst [vmem:[%s537_s25 + $0x8] sm:$0xff] %v1275_v16 }
 0x5b8   : > { %1309 = vst [vmem:[%s537_s25 + $0x10] sm:$0xff] %v1289_v18 }
 0x5ba   : > { %v1260_v21 = vpop.f32.mrf.mxu2 }
 0x5bb   : > { %v1261_v22 = vadd.f32 %v1260_v21, %v1083_v19  ;;  %v1302_v23 = vpop.f32.mrf.mxu3 }
 0x5bc   : > { %v1303_v25 = vadd.f32 %v1302_v23, %v1086_v20  ;;  %v1276_v26 = vpop.f32.mrf.mxu0 }
 0x5bd   : > { %1307 = vst [vmem:[%s537_s25] sm:$0xff] %v1261_v22  ;;  %v1277_v27 = vadd.f32 %v1276_v26, %v1084_v13  ;;  %v1290_v28 = vpop.f32.mrf.mxu1 }
 0x5be   : > { %1310 = vst [vmem:[%s537_s25 + $0x18] sm:$0xff] %v1303_v25  ;;  %v1291_v29 = vadd.f32 %v1290_v28, %v1085_v14 }
 0x5bf   : > { %1312 = vst [vmem:[%s537_s25 + $0x28] sm:$0xff] %v1277_v27 }
 0x5c0   : > { %1313 = vst [vmem:[%s537_s25 + $0x30] sm:$0xff] %v1291_v29 }
 0x5c2   : > { %v1262_v30 = vpop.f32.mrf.mxu2 }
 0x5c3   : > { %v1263_v31 = vadd.f32 %v1262_v30, %v1083_v19  ;;  %v1304_v32 = vpop.f32.mrf.mxu3 }
 0x5c4   : > { %v1305_v33 = vadd.f32 %v1304_v32, %v1086_v20 }
 0x5c5   : > { %1311 = vst [vmem:[%s537_s25 + $0x20] sm:$0xff] %v1263_v31 }
 0x5c6   : > { %1314 = vst [vmem:[%s537_s25 + $0x38] sm:$0xff] %v1305_v33 }
 0x5c7 PF: > { %s25_s20 = sadd.s32 1, %s1795_s20   ;;  %s2274_s21 = sld [smem:[#allocation2_spill]] }
 0x5c8   : > { %p22_p5 = scmp.ge.s32.totalorder %s25_s20, 4   ;;  %s2275_s18 = smov %s1791_s19 }
 0x5ca   :  { %24 = sbr.rel (!%p22_p5) target bundleno = 2 (0x2), region = 110 }
 0x5cd   : > { %s2276_s19 = smov %s2274_s21 }

// kernel: speech_recognition_forward.4
= control target key start
LH: loop header
LB: loop body
LE: loop exit
PB: predicated region body
PF: predicated region fallthrough
CT: control target
= control target key end

     0   :  { %vm286_vm0 = vcmask 1040384   ;;  %vm292_vm1 = vcmask 1041409   ;;  %vm288_vm2 = vcmask 1042434   ;;  %vm16528_vm3 = vcmask 1041408   ;;  %s16520_s3 = inlined_call_operand.vmem [shape: bf16[128,512], index: 3, kind: input, shape index: {}]   ;;  %s16521_s1 = inlined_call_operand.vmem [shape: f32[2,128], index: 1, kind: input, shape index: {}]   ;;  %s16522_s2 = inlined_call_operand.vmem [shape: f32[2,128], index: 2, kind: input, shape index: {}]   ;;  %s16523_s0 = inlined_call_operand.vmem [shape: f32[2,16,512], index: 0, kind: input, shape index: {}]   ;;  %s16524_s4 = inlined_call_operand.vmem [shape: f32[16,2,128], index: 4, kind: output, shape index: {0}]   ;;  %s16525_s5 = inlined_call_operand.vmem [shape: f32[2,128], index: 5, kind: output, shape index: {1}]   ;;  %s16526_s6 = inlined_call_operand.vmem [shape: f32[2,128], index: 6, kind: output, shape index: {2}]  }
   0x1   :  { %v7272_v0 = vld [vmem:[%s16520_s3 + $0xe0] sm:$0xf]  ;;  %v9377_v1 = vld [vmem:[%s16520_s3 + $0xec] sm:$0xf0]  ;;  %v9375_v2 = vld [vmem:[%s16520_s3 + $0xe4] sm:$0xf] }
   0x2   :  { %v7273_v3 = vor.u32 %v9377_v1, %v7272_v0  ;;  %v7274_v4 = vld [vmem:[%s16520_s3 + $0xf0] sm:$0xf0]  ;;  %v7280_v5 = vld [vmem:[%s16520_s3 + $0xe8] sm:$0xf]  ;;  %v9378_v6 = vld [vmem:[%s16520_s3 + $0xf4] sm:$0xf0] }
   0x3   :  { %v7277_v7 = vor.u32 %v9375_v2, %v7274_v4  ;;  %v7281_v8 = vor.u32 %v9378_v6, %v7280_v5  ;;  %v9376_v9 = vld [vmem:[%s16520_s3 + $0xec] sm:$0xf]  ;;  %v7282_v10 = vld [vmem:[%s16520_s3 + $0xf8] sm:$0xf0]  ;;  %v7256_v11 = vld [vmem:[%s16520_s3 + $0xc0] sm:$0xf] }
   0x4   :  { %227 = vmatpush.bf16.msra.mxu0 %v7273_v3  ;;  %v7285_v12 = vor.u32 %v9376_v9, %v7282_v10  ;;  %v9373_v13 = vld [vmem:[%s16520_s3 + $0xcc] sm:$0xf0]  ;;  %v9371_v14 = vld [vmem:[%s16520_s3 + $0xc4] sm:$0xf]  ;;  %v7258_v15 = vld [vmem:[%s16520_s3 + $0xd0] sm:$0xf0] }
   0x5   :  { %240 = vmatpush.bf16.msra.mxu1 %v7277_v7  ;;  %253 = vmatpush.bf16.msra.mxu2 %v7281_v8  ;;  %v7257_v16 = vor.u32 %v9373_v13, %v7256_v11  ;;  %v7261_v17 = vor.u32 %v9371_v14, %v7258_v15  ;;  %v7264_v18 = vld [vmem:[%s16520_s3 + $0xc8] sm:$0xf]  ;;  %v9374_v19 = vld [vmem:[%s16520_s3 + $0xd4] sm:$0xf0]  ;;  %v9372_v20 = vld [vmem:[%s16520_s3 + $0xcc] sm:$0xf] }
   0x6   :  { %266 = vmatpush.bf16.msra.mxu3 %v7285_v12  ;;  %v7265_v21 = vor.u32 %v9374_v19, %v7264_v18  ;;  %v7266_v22 = vld [vmem:[%s16520_s3 + $0xd8] sm:$0xf0]  ;;  %v7240_v23 = vld [vmem:[%s16520_s3 + $0xa0] sm:$0xf]  ;;  %v9369_v24 = vld [vmem:[%s16520_s3 + $0xac] sm:$0xf0] }
   0x7   :  { %v7269_v25 = vor.u32 %v9372_v20, %v7266_v22  ;;  %v9367_v26 = vld [vmem:[%s16520_s3 + $0xa4] sm:$0xf]  ;;  %v7242_v27 = vld [vmem:[%s16520_s3 + $0xb0] sm:$0xf0]  ;;  %v7248_v28 = vld [vmem:[%s16520_s3 + $0xa8] sm:$0xf]  ;;  %v7241_v29 = vor.u32 %v9369_v24, %v7240_v23 }
   0x8   :  { %228 = vmatpush.bf16.msra.mxu0 %v7257_v16  ;;  %v9370_v30 = vld [vmem:[%s16520_s3 + $0xb4] sm:$0xf0]  ;;  %v9368_v31 = vld [vmem:[%s16520_s3 + $0xac] sm:$0xf]  ;;  %v7250_v32 = vld [vmem:[%s16520_s3 + $0xb8] sm:$0xf0]  ;;  %v7245_v33 = vor.u32 %v9367_v26, %v7242_v27 }
   0x9   :  { %241 = vmatpush.bf16.msra.mxu1 %v7261_v17  ;;  %254 = vmatpush.bf16.msra.mxu2 %v7265_v21  ;;  %v7249_v34 = vor.u32 %v9370_v30, %v7248_v28  ;;  %v7224_v35 = vld [vmem:[%s16520_s3 + $0x80] sm:$0xf]  ;;  %v9365_v36 = vld [vmem:[%s16520_s3 + $0x8c] sm:$0xf0]  ;;  %v9363_v37 = vld [vmem:[%s16520_s3 + $0x84] sm:$0xf]  ;;  %v7253_v38 = vor.u32 %v9368_v31, %v7250_v32 }
   0xa   :  { %267 = vmatpush.bf16.msra.mxu3 %v7269_v25  ;;  %v7226_v39 = vld [vmem:[%s16520_s3 + $0x90] sm:$0xf0]  ;;  %v7232_v40 = vld [vmem:[%s16520_s3 + $0x88] sm:$0xf]  ;;  %v9366_v41 = vld [vmem:[%s16520_s3 + $0x94] sm:$0xf0]  ;;  %v7225_v44 = vor.u32 %v9365_v36, %v7224_v35 }
   0xb   :  { %v9364_v42 = vld [vmem:[%s16520_s3 + $0x8c] sm:$0xf]  ;;  %v7234_v43 = vld [vmem:[%s16520_s3 + $0x98] sm:$0xf0]  ;;  %v7229_v45 = vor.u32 %v9363_v37, %v7226_v39  ;;  %v7233_v46 = vor.u32 %v9366_v41, %v7232_v40  ;;  %v7208_v47 = vld [vmem:[%s16520_s3 + $0x60] sm:$0xf] }
   0xc   :  { %229 = vmatpush.bf16.msra.mxu0 %v7241_v29  ;;  %v9361_v48 = vld [vmem:[%s16520_s3 + $0x6c] sm:$0xf0]  ;;  %v9359_v49 = vld [vmem:[%s16520_s3 + $0x64] sm:$0xf]  ;;  %v7237_v50 = vor.u32 %v9364_v42, %v7234_v43  ;;  %v7210_v51 = vld [vmem:[%s16520_s3 + $0x70] sm:$0xf0] }
   0xd   :  { %242 = vmatpush.bf16.msra.mxu1 %v7245_v33  ;;  %255 = vmatpush.bf16.msra.mxu2 %v7249_v34  ;;  %v7216_v52 = vld [vmem:[%s16520_s3 + $0x68] sm:$0xf]  ;;  %v9362_v53 = vld [vmem:[%s16520_s3 + $0x74] sm:$0xf0]  ;;  %v9360_v54 = vld [vmem:[%s16520_s3 + $0x6c] sm:$0xf]  ;;  %v7209_v56 = vor.u32 %v9361_v48, %v7208_v47  ;;  %v7213_v57 = vor.u32 %v9359_v49, %v7210_v51 }
   0xe   :  { %268 = vmatpush.bf16.msra.mxu3 %v7253_v38  ;;  %v7218_v55 = vld [vmem:[%s16520_s3 + $0x78] sm:$0xf0]  ;;  %v7217_v58 = vor.u32 %v9362_v53, %v7216_v52  ;;  %v7192_v59 = vld [vmem:[%s16520_s3 + $0x40] sm:$0xf]  ;;  %v9357_v60 = vld [vmem:[%s16520_s3 + $0x4c] sm:$0xf0] }
   0xf   :  { %v9355_v61 = vld [vmem:[%s16520_s3 + $0x44] sm:$0xf]  ;;  %v7221_v62 = vor.u32 %v9360_v54, %v7218_v55  ;;  %v7194_v63 = vld [vmem:[%s16520_s3 + $0x50] sm:$0xf0]  ;;  %v7200_v0 = vld [vmem:[%s16520_s3 + $0x48] sm:$0xf]  ;;  %v7193_v4 = vor.u32 %v9357_v60, %v7192_v59 }
  0x10   :  { %230 = vmatpush.bf16.msra.mxu0 %v7225_v44  ;;  %v9358_v1 = vld [vmem:[%s16520_s3 + $0x54] sm:$0xf0]  ;;  %v9356_v2 = vld [vmem:[%s16520_s3 + $0x4c] sm:$0xf]  ;;  %v7202_v3 = vld [vmem:[%s16520_s3 + $0x58] sm:$0xf0]  ;;  %v7197_v6 = vor.u32 %v9355_v61, %v7194_v63 }
  0x11   :  { %243 = vmatpush.bf16.msra.mxu1 %v7229_v45  ;;  %256 = vmatpush.bf16.msra.mxu2 %v7233_v46  ;;  %v7176_v5 = vld [vmem:[%s16520_s3 + $0x20] sm:$0xf]  ;;  %v7201_v7 = vor.u32 %v9358_v1, %v7200_v0  ;;  %v9353_v8 = vld [vmem:[%s16520_s3 + $0x2c] sm:$0xf0]  ;;  %v9351_v9 = vld [vmem:[%s16520_s3 + $0x24] sm:$0xf]  ;;  %v7205_v11 = vor.u32 %v9356_v2, %v7202_v3 }
  0x12   :  { %269 = vmatpush.bf16.msra.mxu3 %v7237_v50  ;;  %v7178_v10 = vld [vmem:[%s16520_s3 + $0x30] sm:$0xf0]  ;;  %v7184_v12 = vld [vmem:[%s16520_s3 + $0x28] sm:$0xf]  ;;  %v9354_v13 = vld [vmem:[%s16520_s3 + $0x34] sm:$0xf0]  ;;  %v7177_v17 = vor.u32 %v9353_v8, %v7176_v5 }
  0x13   :  { %v24_v14 = vld [vmem:[%s16521_s1] sm:$0x3]  ;;  %v9352_v15 = vld [vmem:[%s16520_s3 + $0x2c] sm:$0xf]  ;;  %v7186_v16 = vld [vmem:[%s16520_s3 + $0x38] sm:$0xf0]  ;;  %v7181_v18 = vor.u32 %v9351_v9, %v7178_v10  ;;  %v7185_v19 = vor.u32 %v9354_v13, %v7184_v12 }
  0x14   :  { %231 = vmatpush.bf16.msra.mxu0 %v7209_v56  ;;  %25 = vst [vmem:[#allocation2] sm:$0x3] %v24_v14  ;;  %v7160_v20 = vld [vmem:[%s16520_s3] sm:$0xf]  ;;  %v9349_v21 = vld [vmem:[%s16520_s3 + $0xc] sm:$0xf0]  ;;  %v7189_v23 = vor.u32 %v9352_v15, %v7186_v16 }
  0x15   :  { %244 = vmatpush.bf16.msra.mxu1 %v7213_v57  ;;  %257 = vmatpush.bf16.msra.mxu2 %v7217_v58  ;;  %v9347_v22 = vld [vmem:[%s16520_s3 + $0x4] sm:$0xf]  ;;  %v7162_v24 = vld [vmem:[%s16520_s3 + $0x10] sm:$0xf0]  ;;  %v7168_v25 = vld [vmem:[%s16520_s3 + $0x8] sm:$0xf]  ;;  %v7161_v29 = vor.u32 %v9349_v21, %v7160_v20 }
  0x16   :  { %270 = vmatpush.bf16.msra.mxu3 %v7221_v62  ;;  %v9350_v26 = vld [vmem:[%s16520_s3 + $0x14] sm:$0xf0]  ;;  %v9348_v27 = vld [vmem:[%s16520_s3 + $0xc] sm:$0xf]  ;;  %v7170_v28 = vld [vmem:[%s16520_s3 + $0x18] sm:$0xf0]  ;;  %v7165_v30 = vor.u32 %v9347_v22, %v7162_v24 }
  0x17   :  { %v7169_v31 = vor.u32 %v9350_v26, %v7168_v25  ;;  %v7173_v32 = vor.u32 %v9348_v27, %v7170_v28  ;;  %v26_v35 = vld [vmem:[%s16522_s2] sm:$0x3]  ;;  %vm294_vm4 = vcmask 1043459   ;;  %vm16527_vm5 = vcmask 1042433   ;;  %v9407_v5 = vld [vmem:[%s16520_s3 + $0xe4] sm:$0xf] }
  0x18   :  { %232 = vmatpush.bf16.msra.mxu0 %v7193_v4  ;;  %27 = vst [vmem:[#allocation3] sm:$0x3] %v26_v35  ;;  %v31_v47 = vld [vmem:[%s16523_s0] ss:$8 sm:$0xf] }
  0x19   :  { %245 = vmatpush.bf16.msra.mxu1 %v7197_v6  ;;  %258 = vmatpush.bf16.msra.mxu2 %v7201_v7  ;;  %v7157_v50 = vld [vmem:[%s16523_s0 + $0x40] ss:$8 sm:$0xf]  ;;  %v7410_v8 = vld [vmem:[%s16520_s3 + $0xf0] sm:$0xf0] }
  0x1a   :  { %271 = vmatpush.bf16.msra.mxu3 %v7205_v11  ;;  %v7408_v2 = vld [vmem:[%s16520_s3 + $0xe0] sm:$0xf]  ;;  %v9409_v4 = vld [vmem:[%s16520_s3 + $0xec] sm:$0xf0]  ;;  %v7413_v9 = vor.u32 %v9407_v5, %v7410_v8  ;;  %v7416_v10 = vld [vmem:[%s16520_s3 + $0xe8] sm:$0xf] }
  0x1b   :  { %v10601_v33 = vld [vmem:[#allocation2] sm:$0x3]  ;;  %v7409_v7 = vor.u32 %v9409_v4, %v7408_v2  ;;  %v9410_v11 = vld [vmem:[%s16520_s3 + $0xf4] sm:$0xf0]  ;;  %v9408_v12 = vld [vmem:[%s16520_s3 + $0xec] sm:$0xf] }
  0x1c   :  { %233 = vmatpush.bf16.msra.mxu0 %v7177_v17  ;;  %v34_v34 = vpack.c.bf16 %v10601_v33, %v10601_v33  ;;  %v7417_v13 = vor.u32 %v9410_v11, %v7416_v10  ;;  %v7418_v14 = vld [vmem:[%s16520_s3 + $0xf8] sm:$0xf0]  ;;  %v7392_v15 = vld [vmem:[%s16520_s3 + $0xc0] sm:$0xf]  ;;  %v9405_v16 = vld [vmem:[%s16520_s3 + $0xcc] sm:$0xf0] }
  0x1d   :  { %246 = vmatpush.bf16.msra.mxu1 %v7181_v18  ;;  %259 = vmatpush.bf16.msra.mxu2 %v7185_v19  ;;  %v7421_v18 = vor.u32 %v9408_v12, %v7418_v14  ;;  %v7393_v19 = vor.u32 %v9405_v16, %v7392_v15  ;;  %v9403_v20 = vld [vmem:[%s16520_s3 + $0xc4] sm:$0xf]  ;;  %v7394_v21 = vld [vmem:[%s16520_s3 + $0xd0] sm:$0xf0]  ;;  %v7400_v22 = vld [vmem:[%s16520_s3 + $0xc8] sm:$0xf] }
  0x1e   :  { %272 = vmatpush.bf16.msra.mxu3 %v7189_v23  ;;  %v7397_v24 = vor.u32 %v9403_v20, %v7394_v21  ;;  %v9406_v25 = vld [vmem:[%s16520_s3 + $0xd4] sm:$0xf0]  ;;  %v9404_v26 = vld [vmem:[%s16520_s3 + $0xcc] sm:$0xf]  ;;  %v9401_v2 = vld [vmem:[%s16520_s3 + $0xac] sm:$0xf0] }
  0x1f   :  { %v7401_v28 = vor.u32 %v9406_v25, %v7400_v22  ;;  %v7378_v8 = vld [vmem:[%s16520_s3 + $0xb0] sm:$0xf0] }
  0x20   :  { %234 = vmatpush.bf16.msra.mxu0 %v7161_v29  ;;  %v7402_v29 = vld [vmem:[%s16520_s3 + $0xd8] sm:$0xf0] }
  0x21   :  { %247 = vmatpush.bf16.msra.mxu1 %v7165_v30  ;;  %260 = vmatpush.bf16.msra.mxu2 %v7169_v31 }
  0x22   :  { %273 = vmatpush.bf16.msra.mxu3 %v7173_v32 }
  0x23   :  { %235 = vmatmul.bf16.vlgmr.msra.gmra.mxu0 %v34_v34 }
  0x24   :  { %248 = vmatmul.bf16.vlgmr.msra.gmra.mxu1 %v34_v34  ;;  %261 = vmatmul.bf16.vlgmr.msra.gmra.mxu2 %v34_v34 }
  0x25   :  { %274 = vmatmul.bf16.vlgmr.msra.gmra.mxu3 %v34_v34  ;;  %676 = vmatpush.bf16.msrb.mxu0 %v7409_v7  ;;  %v9399_v7 = vld [vmem:[%s16520_s3 + $0xa4] sm:$0xf] }
  0x26   :  { %689 = vmatpush.bf16.msrb.mxu1 %v7413_v9  ;;  %702 = vmatpush.bf16.msrb.mxu2 %v7417_v13  ;;  %v7381_v20 = vor.u32 %v9399_v7, %v7378_v8  ;;  %v9391_v7 = vld [vmem:[%s16520_s3 + $0x64] sm:$0xf]  ;;  %v7346_v8 = vld [vmem:[%s16520_s3 + $0x70] sm:$0xf0]  ;;  %v9394_v13 = vld [vmem:[%s16520_s3 + $0x74] sm:$0xf0] }
  0x27   :  { %715 = vmatpush.bf16.msrb.mxu3 %v7421_v18 }
  0x29   :  { %677 = vmatpush.bf16.msrb.mxu0 %v7393_v19 }
  0x2a   :  { %690 = vmatpush.bf16.msrb.mxu1 %v7397_v24  ;;  %703 = vmatpush.bf16.msrb.mxu2 %v7401_v28 }
  0x2e   :  { %691 = vmatpush.bf16.msrb.mxu1 %v7381_v20  ;;  %v9389_v20 = vld [vmem:[%s16520_s3 + $0x4c] sm:$0xf0] }
  0xa0   :  { %v236_v36 = vpop.f32.mrf.mxu0 }
  0xa1   :  { %v249_v37 = vpop.f32.mrf.mxu1 }
  0xa2   :  { %v283_v38 = vrot.slane %v249_v37, 7  ;;  %v10686_v37 = vld [vmem:[#allocation3] sm:$0x3] }
  0xa4   :  { %v287_v43 = vsel %vm286_vm0, %v236_v36, %v283_v38  ;;  %v293_v44 = vsel %vm292_vm1, %v236_v36, %v283_v38  ;;  %v7405_v36 = vor.u32 %v9404_v26, %v7402_v29  ;;  %v7384_v26 = vld [vmem:[%s16520_s3 + $0xa8] sm:$0xf] }
  0xa6   :  { %716 = vmatpush.bf16.msrb.mxu3 %v7405_v36 }
  0xa7   :  { %v262_v39 = vpop.f32.mrf.mxu2 }
  0xa8   :  { %v284_v40 = vrot.slane %v262_v39, 6  ;;  %v275_v41 = vpop.f32.mrf.mxu3  ;;  %v238_v42 = vpop.f32.mrf.mxu0 }
  0xa9   :  { %v285_v45 = vrot.slane %v275_v41, 5  ;;  %v251_v46 = vpop.f32.mrf.mxu1 }
  0xaa   :  { %v434_v46 = vrot.slane %v10686_v37, 1 }
  0xab   :  { %v289_v48 = vsel %vm288_vm2, %v284_v40, %v285_v45  ;;  %v295_v49 = vsel %vm294_vm4, %v284_v40, %v285_v45 }
  0xac   :  { %v291_v51 = vsel %vm16528_vm3, %v287_v43, %v289_v48  ;;  %v297_v52 = vsel %vm16527_vm5, %v293_v44, %v295_v49 }
  0xad   :  { %v298_v53 = vrot.slane %v297_v52, 1  ;;  %v10620_v54 = vadd.f32 %v291_v51, %v31_v47 }
  0xaf   :  { %v10622_v55 = vadd.f32 %v7157_v50, %v298_v53  ;;  %v7286_v56 = vmul.f32 -1.442695, %v10620_v54  ;;  %v343_v57 = vrot.slane %v10620_v54, 1  ;;  %v264_v58 = vpop.f32.mrf.mxu2  ;;  %v391_v59 = vrot.slane %v10620_v54, 3 }
  0xb0   :  { %v277_v60 = vpop.f32.mrf.mxu3  ;;  %v385_v32 = vrot.slane %v10620_v54, 2 }
  0xb1   :  { %9859 = vpow2.f32 %v7286_v56  ;;  %v7287_v61 = vmul.f32 -1.442695, %v10622_v55  ;;  %v344_v62 = vrot.slane %v10622_v55, 1  ;;  %v7288_v63 = vmul.f32 -1.442695, %v343_v57 }
  0xb2   :  { %v392_v0 = vrot.slane %v10622_v55, 3  ;;  %v7290_v1 = vmul.f32 -1.442695, %v391_v59  ;;  %v386_v38 = vrot.slane %v10622_v55, 2  ;;  %v9396_v60 = vld [vmem:[%s16520_s3 + $0x8c] sm:$0xf] }
  0xb3   :  { %9861 = vpow2.f32 %v7287_v61  ;;  %v7289_v3 = vmul.f32 -1.442695, %v344_v62 }
  0xb4   :  { %9863 = vpow2.f32 %v7288_v63  ;;  %v7291_v6 = vmul.f32 -1.442695, %v392_v0 }
  0xb5   :  { %9865 = vpow2.f32 %v7289_v3 }
  0xb6   :  { %9867 = vpow2.f32 %v7290_v1  ;;  %v7376_v1 = vld [vmem:[%s16520_s3 + $0xa0] sm:$0xf] }
  0xb7   :  { %v9860_v17 = vpop.eup %9859  ;;  %9869 = vpow2.f32 %v7291_v6  ;;  %v7377_v16 = vor.u32 %v9401_v2, %v7376_v1  ;;  %v7344_v2 = vld [vmem:[%s16520_s3 + $0x60] sm:$0xf] }
  0xb8   :  { %v10669_v23 = vadd.f32 1.0, %v9860_v17 }
  0xb9   :  { %v9862_v27 = vpop.eup %9861  ;;  %678 = vmatpush.bf16.msrb.mxu0 %v7377_v16 }
  0xba   :  { %v9864_v30 = vpop.eup %9863  ;;  %v10680_v31 = vadd.f32 1.0, %v9862_v27  ;;  %9871 = vrcp.f32 %v10669_v23  ;;  %v320_v40 = vand.u32 2147483647, %v10669_v23  ;;  %v322_v43 = vand.u32 2147483648, %v10669_v23 }
  0xbb   :  { %v9866_v34 = vpop.eup %9865  ;;  %v10684_v35 = vadd.f32 1.0, %v9864_v30  ;;  %vm316_vm6 = vweird.f32 %v10669_v23 }
  0xbc   :  { %9873 = vrcp.f32 %v10680_v31  ;;  %v9868_v39 = vpop.eup %9867  ;;  %v10691_v41 = vadd.f32 1.0, %v9866_v34  ;;  %v335_v44 = vand.u32 2147483647, %v10680_v31  ;;  %v337_v45 = vand.u32 2147483648, %v10680_v31  ;;  %v7386_v34 = vld [vmem:[%s16520_s3 + $0xb8] sm:$0xf0] }
  0xbd   :  { %9875 = vrcp.f32 %v10684_v35  ;;  %v9870_v42 = vpop.eup %9869  ;;  %v364_v48 = vand.u32 2147483647, %v10684_v35  ;;  %v10701_v49 = vadd.f32 1.0, %v9868_v39  ;;  %vm10704_vm7 = vcmp.eq.f32.partialorder %v320_v40, 8.507059e+37  ;;  %v7360_v40 = vld [vmem:[%s16520_s3 + $0x80] sm:$0xf] }
  0xbe   :  { %9877 = vtanh.f32 %v385_v32  ;;  %vm331_vm8 = vweird.f32 %v10680_v31  ;;  %v10709_v52 = vadd.f32 1.0, %v9870_v42  ;;  %v323_v54 = vor.u32 1.1754944e-38, %v322_v43  ;;  %v9400_v32 = vld [vmem:[%s16520_s3 + $0xac] sm:$0xf] }
  0xbf   :  { %9879 = vrcp.f32 %v10691_v41  ;;  %v366_v55 = vand.u32 2147483648, %v10684_v35  ;;  %v379_v56 = vand.u32 2147483647, %v10691_v41  ;;  %vm10720_vm9 = vcmp.eq.f32.partialorder %v335_v44, 8.507059e+37 }
  0xc0   :  { %v9872_v47 = vpop.eup %9871  ;;  %9881 = vtanh.f32 %v386_v38  ;;  %v338_v61 = vor.u32 1.1754944e-38, %v337_v45  ;;  %vm360_vm10 = vweird.f32 %v10684_v35  ;;  %vm10727_vm11 = vcmp.eq.f32.partialorder %v364_v48, 8.507059e+37  ;;  %v9397_v45 = vld [vmem:[%s16520_s3 + $0x8c] sm:$0xf0] }
  0xc1   :  { %v312_v50 = vmul.f32 %v9872_v47, %v10669_v23  ;;  %9883 = vrcp.f32 %v10701_v49  ;;  %vm375_vm12 = vweird.f32 %v10691_v41  ;;  %vm317_vm13 = vweird.f32 %v9872_v47  ;;  %v9402_v23 = vld [vmem:[%s16520_s3 + $0xb4] sm:$0xf0] }
  0xc2   :  { %v10711_v53 = vpop.eup %9873  ;;  %9885 = vrcp.f32 %v10709_v52  ;;  %v381_v6 = vand.u32 2147483648, %v10691_v41  ;;  %v367_v11 = vor.u32 1.1754944e-38, %v366_v55  ;;  %vm10750_vm14 = vcmp.eq.f32.partialorder %v379_v56, 8.507059e+37  ;;  %vm318_vm5 = vmor %vm316_vm6, %vm317_vm13  ;;  %v7368_v55 = vld [vmem:[%s16520_s3 + $0x88] sm:$0xf] }
  0xc3   :  { %v10716_v57 = vpop.eup %9875  ;;  %v313_v58 = vsub.f32 1.0, %v312_v50  ;;  %v327_v59 = vmul.f32 %v10711_v53, %v10680_v31  ;;  %vm332_vm15 = vweird.f32 %v10711_v53  ;;  %v412_v38 = vand.u32 2147483647, %v10701_v49 }
  0xc4   :  { %v9878_v62 = vpop.eup %9877  ;;  %v356_v63 = vmul.f32 %v10716_v57, %v10684_v35  ;;  %vm361_vm3 = vweird.f32 %v10716_v57  ;;  %v382_v24 = vor.u32 1.1754944e-38, %v381_v6  ;;  %v414_v35 = vand.u32 2147483648, %v10701_v49 }
  0xc5   :  { %v10739_v3 = vpop.eup %9879  ;;  %v314_v4 = vmul.f32 %v9872_v47, %v313_v58  ;;  %v328_v5 = vsub.f32 1.0, %v327_v59  ;;  %v7385_v58 = vor.u32 %v9402_v23, %v7384_v26  ;;  %v7389_v59 = vor.u32 %v9400_v32, %v7386_v34  ;;  %v7330_v26 = vld [vmem:[%s16520_s3 + $0x50] sm:$0xf0]  ;;  %v7336_v32 = vld [vmem:[%s16520_s3 + $0x48] sm:$0xf] }
  0xc6   :  { %v9882_v9 = vpop.eup %9881  ;;  %v357_v10 = vsub.f32 1.0, %v356_v63  ;;  %v371_v12 = vmul.f32 %v10739_v3, %v10691_v41  ;;  %vm376_vm6 = vweird.f32 %v10739_v3  ;;  %v9398_v41 = vld [vmem:[%s16520_s3 + $0x94] sm:$0xf0]  ;;  %v7361_v1 = vor.u32 %v9397_v45, %v7360_v40  ;;  %v7338_v40 = vld [vmem:[%s16520_s3 + $0x58] sm:$0xf0] }
  0xc7   :  { %v315_v14 = vadd.f32 %v9872_v47, %v314_v4  ;;  %v329_v15 = vmul.f32 %v10711_v53, %v328_v5  ;;  %v10756_v17 = vpop.eup %9883  ;;  %704 = vmatpush.bf16.msrb.mxu2 %v7385_v58  ;;  %717 = vmatpush.bf16.msrb.mxu3 %v7389_v59  ;;  %v427_v16 = vand.u32 2147483647, %v10709_v52  ;;  %v9385_v45 = vld [vmem:[%s16520_s3 + $0x2c] sm:$0xf0]  ;;  %v9384_v58 = vld [vmem:[%s16520_s3 + $0x2c] sm:$0xf] }
  0xc8   :  { %v358_v18 = vmul.f32 %v10716_v57, %v357_v10  ;;  %v372_v19 = vsub.f32 1.0, %v371_v12  ;;  %v404_v25 = vmul.f32 %v10756_v17, %v10701_v49  ;;  %v10772_v27 = vpop.eup %9885  ;;  %679 = vmatpush.bf16.msrb.mxu0 %v7361_v1  ;;  %v7322_v59 = vld [vmem:[%s16520_s3 + $0x38] sm:$0xf0] }
  0xc9   :  { %v319_v21 = vsel %vm318_vm5, %v9872_v47, %v315_v14  ;;  %v330_v22 = vadd.f32 %v10711_v53, %v329_v15  ;;  %vm333_vm5 = vmor %vm331_vm8, %vm332_vm15  ;;  %v419_v39 = vmul.f32 %v10772_v27, %v10709_v52  ;;  %v9395_v47 = vld [vmem:[%s16520_s3 + $0x84] sm:$0xf]  ;;  %vm409_vm8 = vweird.f32 %v10756_v17  ;;  %v9392_v14 = vld [vmem:[%s16520_s3 + $0x6c] sm:$0xf] }
  0xca   :  { %v324_v28 = vsel %vm10704_vm7, %v323_v54, %v319_v21  ;;  %v359_v29 = vadd.f32 %v10716_v57, %v358_v18  ;;  %v373_v30 = vmul.f32 %v10739_v3, %v372_v19  ;;  %vm362_vm7 = vmor %vm360_vm10, %vm361_vm3  ;;  %v405_v31 = vsub.f32 1.0, %v404_v25  ;;  %v7362_v54 = vld [vmem:[%s16520_s3 + $0x90] sm:$0xf0]  ;;  %v7354_v15 = vld [vmem:[%s16520_s3 + $0x78] sm:$0xf0] }
  0xcb   :  { %v334_v36 = vsel %vm333_vm5, %v10711_v53, %v330_v22  ;;  %vm377_vm3 = vmor %vm375_vm12, %vm376_vm6  ;;  %v420_v51 = vsub.f32 1.0, %v419_v39  ;;  %v438_v53 = vmul.f32 %v9878_v62, %v324_v28  ;;  %v7365_v6 = vor.u32 %v9395_v47, %v7362_v54  ;;  %v7328_v19 = vld [vmem:[%s16520_s3 + $0x40] sm:$0xf]  ;;  %v9387_v25 = vld [vmem:[%s16520_s3 + $0x44] sm:$0xf] }
  0xcc   :  { %v339_v42 = vsel %vm10720_vm9, %v338_v61, %v334_v36  ;;  %v363_v43 = vsel %vm362_vm7, %v10716_v57, %v359_v29  ;;  %v374_v44 = vadd.f32 %v10739_v3, %v373_v30  ;;  %v406_v50 = vmul.f32 %v10756_v17, %v405_v31  ;;  %v7370_v61 = vld [vmem:[%s16520_s3 + $0x98] sm:$0xf0]  ;;  %v9390_v31 = vld [vmem:[%s16520_s3 + $0x54] sm:$0xf0]  ;;  %v9388_v39 = vld [vmem:[%s16520_s3 + $0x4c] sm:$0xf] }
  0xcd   :  { %v368_v48 = vsel %vm10727_vm11, %v367_v11, %v363_v43  ;;  %v421_v63 = vmul.f32 %v10772_v27, %v420_v51  ;;  %v439_v0 = vmul.f32 %v9882_v9, %v339_v42  ;;  %v7352_v9 = vld [vmem:[%s16520_s3 + $0x68] sm:$0xf]  ;;  %v7369_v11 = vor.u32 %v9398_v41, %v7368_v55  ;;  %692 = vmatpush.bf16.msrb.mxu1 %v7365_v6 }
  0xce   :  { %v378_v56 = vsel %vm377_vm3, %v10739_v3, %v374_v44  ;;  %v436_v57 = vmul.f32 %v368_v48, %v10686_v37  ;;  %v9393_v3 = vld [vmem:[%s16520_s3 + $0x6c] sm:$0xf0]  ;;  %v407_v10 = vadd.f32 %v10756_v17, %v406_v50  ;;  %v7373_v12 = vor.u32 %v9396_v60, %v7370_v61  ;;  %v7312_v44 = vld [vmem:[%s16520_s3 + $0x20] sm:$0xf]  ;;  %v9383_v48 = vld [vmem:[%s16520_s3 + $0x24] sm:$0xf] }
  0xcf   :  { %v383_v62 = vsel %vm10750_vm14, %v382_v24, %v378_v56  ;;  %vm408_vm9 = vweird.f32 %v10701_v49  ;;  %v422_v21 = vadd.f32 %v10772_v27, %v421_v63  ;;  %vm424_vm10 = vweird.f32 %v10772_v27  ;;  %705 = vmatpush.bf16.msrb.mxu2 %v7369_v11  ;;  %v7314_v50 = vld [vmem:[%s16520_s3 + $0x30] sm:$0xf0]  ;;  %v9381_v63 = vld [vmem:[%s16520_s3 + $0xc] sm:$0xf0]  ;;  %v9380_v11 = vld [vmem:[%s16520_s3 + $0xc] sm:$0xf] }
  0xd0   :  { %v437_v4 = vmul.f32 %v434_v46, %v383_v62  ;;  %v10846_v5 = vadd.f32 %v438_v53, %v436_v57  ;;  %v7345_v22 = vor.u32 %v9393_v3, %v7344_v2  ;;  %v7349_v24 = vor.u32 %v9391_v7, %v7346_v8  ;;  %vm10889_vm11 = vmor %vm408_vm9, %vm409_vm8  ;;  %718 = vmatpush.bf16.msrb.mxu3 %v7373_v12  ;;  %v9386_v57 = vld [vmem:[%s16520_s3 + $0x34] sm:$0xf0]  ;;  %v7296_v62 = vld [vmem:[%s16520_s3] sm:$0xf] }
  0xd1   :  { %v429_v28 = vand.u32 2147483648, %v10709_v52  ;;  %v7353_v29 = vor.u32 %v9394_v13, %v7352_v9  ;;  %v7357_v30 = vor.u32 %v9392_v14, %v7354_v15  ;;  %v411_v34 = vsel %vm10889_vm11, %v10756_v17, %v407_v10  ;;  %v9379_v2 = vld [vmem:[%s16520_s3 + $0x4] sm:$0xf]  ;;  %v7298_v3 = vld [vmem:[%s16520_s3 + $0x10] sm:$0xf0] }
  0xd2   :  { %v10870_v18 = vadd.f32 %v439_v0, %v437_v4  ;;  %9887 = vtanh.f32 %v10846_v5  ;;  %vm423_vm12 = vweird.f32 %v10709_v52  ;;  %680 = vmatpush.bf16.msrb.mxu0 %v7345_v22  ;;  %v7329_v36 = vor.u32 %v9389_v20, %v7328_v19  ;;  %693 = vmatpush.bf16.msrb.mxu1 %v7349_v24  ;;  %v7304_v7 = vld [vmem:[%s16520_s3 + $0x8] sm:$0xf]  ;;  %v9382_v8 = vld [vmem:[%s16520_s3 + $0x14] sm:$0xf0]  ;;  %v7306_v12 = vld [vmem:[%s16520_s3 + $0x18] sm:$0xf0] }
  0xd3   :  { %v450_v42 = vrot.slane %v10601_v33, 1  ;;  %v415_v17 = vor.u32 1.1754944e-38, %v414_v35  ;;  %vm10916_vm13 = vmor %vm423_vm12, %vm424_vm10  ;;  %v7333_v43 = vor.u32 %v9387_v25, %v7330_v26  ;;  %vm413_vm14 = vcmp.eq.f32.partialorder %v412_v38, 8.507059e+37  ;;  %706 = vmatpush.bf16.msrb.mxu2 %v7353_v29  ;;  %v7292_v29 = vld [vmem:[%s16523_s0 + $0x1] ss:$8 sm:$0xf] }
  0xd4   :  { %9889 = vtanh.f32 %v10870_v18  ;;  %v426_v35 = vsel %vm10916_vm13, %v10772_v27, %v422_v21  ;;  %vm10931_vm15 = vcmp.eq.f32.partialorder %v427_v16, 8.507059e+37  ;;  %v430_v49 = vor.u32 1.1754944e-38, %v429_v28  ;;  %719 = vmatpush.bf16.msrb.mxu3 %v7357_v30  ;;  %v7320_v27 = vld [vmem:[%s16520_s3 + $0x28] sm:$0xf] }
  0xd5   :  { %v416_v53 = vsel %vm413_vm14, %v415_v17, %v411_v34  ;;  %v7337_v38 = vor.u32 %v9390_v31, %v7336_v32  ;;  %v7341_v54 = vor.u32 %v9388_v39, %v7338_v40  ;;  %v7313_v56 = vor.u32 %v9385_v45, %v7312_v44  ;;  %v7293_v31 = vld [vmem:[%s16523_s0 + $0x41] ss:$8 sm:$0xf] }
  0xd6   :  { %681 = vmatpush.bf16.msrb.mxu0 %v7329_v36  ;;  %v431_v60 = vsel %vm10931_vm15, %v430_v49, %v426_v35  ;;  %694 = vmatpush.bf16.msrb.mxu1 %v7333_v43  ;;  %v7317_v61 = vor.u32 %v9383_v48, %v7314_v50  ;;  %v7321_v4 = vor.u32 %v9386_v57, %v7320_v27  ;;  %vm16543_vm5 = vcmask 1041408   ;;  %v9441_v27 = vld [vmem:[%s16520_s3 + $0xec] sm:$0xf0] }
  0xd7   :  { %707 = vmatpush.bf16.msrb.mxu2 %v7337_v38  ;;  %v7325_v6 = vor.u32 %v9384_v58, %v7322_v59  ;;  %v7297_v10 = vor.u32 %v9381_v63, %v7296_v62  ;;  %v7301_v13 = vor.u32 %v9379_v2, %v7298_v3  ;;  %v7305_v14 = vor.u32 %v9382_v8, %v7304_v7  ;;  %v7545_v38 = vld [vmem:[%s16520_s3 + $0xe0] sm:$0xf]  ;;  %v7547_v58 = vld [vmem:[%s16520_s3 + $0xf0] sm:$0xf0]  ;;  %v7553_v59 = vld [vmem:[%s16520_s3 + $0xe8] sm:$0xf] }
  0xd8   :  { %v9888_v51 = vpop.eup %9887  ;;  %720 = vmatpush.bf16.msrb.mxu3 %v7341_v54  ;;  %v7309_v15 = vor.u32 %v9380_v11, %v7306_v12  ;;  %v465_v16 = vsub.f32 %v10846_v5, %v10686_v37  ;;  %v466_v20 = vsub.f32 %v10870_v18, %v434_v46  ;;  %vm16544_vm6 = vcmask 1042433   ;;  %v7555_v62 = vld [vmem:[%s16520_s3 + $0xf8] sm:$0xf0]  ;;  %v9437_v2 = vld [vmem:[%s16520_s3 + $0xcc] sm:$0xf0] }
  0xd9   :  { %v444_v55 = vmul.f32 %v9888_v51, %v416_v53  ;;  %v7546_v57 = vor.u32 %v9441_v27, %v7545_v38  ;;  %v9435_v3 = vld [vmem:[%s16520_s3 + $0xc4] sm:$0xf]  ;;  %v7531_v7 = vld [vmem:[%s16520_s3 + $0xd0] sm:$0xf0]  ;;  %v7537_v8 = vld [vmem:[%s16520_s3 + $0xc8] sm:$0xf] }
  0xda   :  { %v9890_v41 = vpop.eup %9889  ;;  %682 = vmatpush.bf16.msrb.mxu0 %v7313_v56  ;;  %695 = vmatpush.bf16.msrb.mxu1 %v7317_v61  ;;  %v9440_v61 = vld [vmem:[%s16520_s3 + $0xec] sm:$0xf]  ;;  %v7534_v12 = vor.u32 %v9435_v3, %v7531_v7  ;;  %v7513_v38 = vld [vmem:[%s16520_s3 + $0xa0] sm:$0xf] }
  0xdb   :  { %v445_v0 = vmul.f32 %v9890_v41, %v431_v60  ;;  %v452_v1 = vsub.f32 %v444_v55, %v10601_v33  ;;  %708 = vmatpush.bf16.msrb.mxu2 %v7321_v4  ;;  %v9439_v55 = vld [vmem:[%s16520_s3 + $0xe4] sm:$0xf]  ;;  %v9442_v60 = vld [vmem:[%s16520_s3 + $0xf4] sm:$0xf0] }
  0xdc   :  { %721 = vmatpush.bf16.msrb.mxu3 %v7325_v6  ;;  %v7550_v41 = vor.u32 %v9439_v55, %v7547_v58  ;;  %v7554_v63 = vor.u32 %v9442_v60, %v7553_v59  ;;  %v9431_v58 = vld [vmem:[%s16520_s3 + $0xa4] sm:$0xf]  ;;  %v7515_v59 = vld [vmem:[%s16520_s3 + $0xb0] sm:$0xf0] }
  0xdd   :  { %v453_v9 = vsub.f32 %v445_v0, %v450_v42  ;;  %459 = vst [vmem:[#allocation1] ss:$9 sm:$0xff] %v452_v1  ;;  %v7558_v0 = vor.u32 %v9440_v61, %v7555_v62  ;;  %v7529_v1 = vld [vmem:[%s16520_s3 + $0xc0] sm:$0xf]  ;;  %v7518_v7 = vor.u32 %v9431_v58, %v7515_v59  ;;  %v9423_v58 = vld [vmem:[%s16520_s3 + $0x64] sm:$0xf] }
  0xde   :  { %683 = vmatpush.bf16.msrb.mxu0 %v7297_v10  ;;  %696 = vmatpush.bf16.msrb.mxu1 %v7301_v13  ;;  %v7530_v6 = vor.u32 %v9437_v2, %v7529_v1  ;;  %v7483_v59 = vld [vmem:[%s16520_s3 + $0x70] sm:$0xf0] }
  0xdf   :  { %461 = vst [vmem:[#allocation1 + $0x1] ss:$9 sm:$0xff] %v453_v9  ;;  %709 = vmatpush.bf16.msrb.mxu2 %v7305_v14  ;;  %v9438_v9 = vld [vmem:[%s16520_s3 + $0xd4] sm:$0xf0]  ;;  %v9436_v14 = vld [vmem:[%s16520_s3 + $0xcc] sm:$0xf] }
  0xe0   :  { %722 = vmatpush.bf16.msrb.mxu3 %v7309_v15  ;;  %v7538_v13 = vor.u32 %v9438_v9, %v7537_v8  ;;  %v7539_v15 = vld [vmem:[%s16520_s3 + $0xd8] sm:$0xf0] }
  0xe2   :  { %1120 = vmatpush.bf16.msra.mxu0 %v7546_v57  ;;  %1133 = vmatpush.bf16.msra.mxu1 %v7550_v41 }
  0xe3   :  { %1146 = vmatpush.bf16.msra.mxu2 %v7554_v63  ;;  %v9426_v63 = vld [vmem:[%s16520_s3 + $0x74] sm:$0xf0] }
  0xe4   :  { %1159 = vmatpush.bf16.msra.mxu3 %v7558_v0 }
  0xe6   :  { %v462_v19 = vld [vmem:[#allocation1] sm:$0xff]  ;;  %1121 = vmatpush.bf16.msra.mxu0 %v7530_v6  ;;  %1134 = vmatpush.bf16.msra.mxu1 %v7534_v12 }
  0xe7   :  { %471 = vst [vmem:[#allocation1] ss:$9 sm:$0xff] %v465_v16  ;;  %v10986_v21 = vadd.f32 %v462_v19, %v10601_v33  ;;  %v7542_v19 = vor.u32 %v9436_v14, %v7539_v15  ;;  %1147 = vmatpush.bf16.msra.mxu2 %v7538_v13  ;;  %v7521_v13 = vld [vmem:[%s16520_s3 + $0xa8] sm:$0xf] }
  0xe8   :  { %473 = vst [vmem:[#allocation1 + $0x1] ss:$9 sm:$0xff] %v466_v20 }
  0xe9   :  { %477 = vst [vmem:[%s16524_s4] sm:$0x3] %v10986_v21  ;;  %v483_v22 = vpack.c.bf16 %v10986_v21, %v10986_v21  ;;  %1160 = vmatpush.bf16.msra.mxu3 %v7542_v19 }
  0xea   :  { %1135 = vmatpush.bf16.msra.mxu1 %v7518_v7  ;;  %v9421_v7 = vld [vmem:[%s16520_s3 + $0x4c] sm:$0xf0] }
  0xeb   :  { %684 = vmatmul.bf16.vlgmr.msrb.gmra.mxu0 %v483_v22  ;;  %697 = vmatmul.bf16.vlgmr.msrb.gmra.mxu1 %v483_v22 }
  0xec   :  { %710 = vmatmul.bf16.vlgmr.msrb.gmra.mxu2 %v483_v22  ;;  %723 = vmatmul.bf16.vlgmr.msrb.gmra.mxu3 %v483_v22 }
  0xef   :  { %v474_v10 = vld [vmem:[#allocation1] sm:$0xff] }
 0x168   :  { %v685_v5 = vpop.f32.mrf.mxu0  ;;  %v698_v24 = vpop.f32.mrf.mxu1 }
 0x169   :  { %v732_v46 = vrot.slane %v698_v24, 7 }
 0x16b   :  { %v735_v30 = vsel %vm286_vm0, %v685_v5, %v732_v46  ;;  %v738_v32 = vsel %vm292_vm1, %v685_v5, %v732_v46  ;;  %v11071_v46 = vadd.f32 %v474_v10, %v10686_v37 }
 0x16f   :  { %v711_v18 = vpop.f32.mrf.mxu2  ;;  %v724_v25 = vpop.f32.mrf.mxu3 }
 0x170   :  { %v733_v33 = vrot.slane %v711_v18, 6  ;;  %v734_v26 = vrot.slane %v724_v25, 5  ;;  %v687_v23 = vpop.f32.mrf.mxu0  ;;  %v700_v28 = vpop.f32.mrf.mxu1 }
 0x172   :  { %v736_v34 = vsel %vm288_vm2, %v733_v33, %v734_v26  ;;  %v739_v36 = vsel %vm294_vm4, %v733_v33, %v734_v26 }
 0x173   :  { %v737_v39 = vsel %vm16543_vm5, %v735_v30, %v736_v34  ;;  %v740_v40 = vsel %vm16544_vm6, %v738_v32, %v739_v36  ;;  %v877_v32 = vrot.slane %v11071_v46, 1 }
 0x174   :  { %v741_v42 = vrot.slane %v740_v40, 1  ;;  %v11006_v17 = vadd.f32 %v7292_v29, %v737_v39 }
 0x176   :  { %v11008_v52 = vadd.f32 %v7293_v31, %v741_v42  ;;  %v7422_v43 = vmul.f32 -1.442695, %v11006_v17  ;;  %v786_v44 = vrot.slane %v11006_v17, 1  ;;  %v834_v45 = vrot.slane %v11006_v17, 3 }
 0x177   :  { %v713_v35 = vpop.f32.mrf.mxu2  ;;  %v726_v47 = vpop.f32.mrf.mxu3  ;;  %v828_v5 = vrot.slane %v11006_v17, 2 }
 0x178   :  { %9891 = vpow2.f32 %v7422_v43  ;;  %v7423_v48 = vmul.f32 -1.442695, %v11008_v52  ;;  %v787_v50 = vrot.slane %v11008_v52, 1  ;;  %v7424_v51 = vmul.f32 -1.442695, %v786_v44 }
 0x179   :  { %v835_v53 = vrot.slane %v11008_v52, 3  ;;  %v7426_v49 = vmul.f32 -1.442695, %v834_v45  ;;  %v829_v25 = vrot.slane %v11008_v52, 2 }
 0x17a   :  { %9893 = vpow2.f32 %v7423_v48  ;;  %v7425_v54 = vmul.f32 -1.442695, %v787_v50  ;;  %v9428_v48 = vld [vmem:[%s16520_s3 + $0x8c] sm:$0xf] }
 0x17b   :  { %9895 = vpow2.f32 %v7424_v51  ;;  %v7427_v56 = vmul.f32 -1.442695, %v835_v53 }
 0x17c   :  { %9897 = vpow2.f32 %v7425_v54  ;;  %v9433_v54 = vld [vmem:[%s16520_s3 + $0xac] sm:$0xf0] }
 0x17d   :  { %9899 = vpow2.f32 %v7426_v49  ;;  %v7514_v2 = vor.u32 %v9433_v54, %v7513_v38  ;;  %v7481_v54 = vld [vmem:[%s16520_s3 + $0x60] sm:$0xf] }
 0x17e   :  { %v9892_v4 = vpop.eup %9891  ;;  %9901 = vpow2.f32 %v7427_v56 }
 0x17f   :  { %v11058_v11 = vadd.f32 1.0, %v9892_v4  ;;  %1122 = vmatpush.bf16.msra.mxu0 %v7514_v2 }
 0x180   :  { %v9894_v16 = vpop.eup %9893 }
 0x181   :  { %v9896_v20 = vpop.eup %9895  ;;  %v11066_v22 = vadd.f32 1.0, %v9894_v16  ;;  %9903 = vrcp.f32 %v11058_v11  ;;  %v763_v26 = vand.u32 2147483647, %v11058_v11  ;;  %v765_v37 = vand.u32 2147483648, %v11058_v11 }
 0x182   :  { %v9898_v24 = vpop.eup %9897  ;;  %v11073_v18 = vadd.f32 1.0, %v9896_v20  ;;  %vm759_vm7 = vweird.f32 %v11058_v11  ;;  %v9432_v20 = vld [vmem:[%s16520_s3 + $0xac] sm:$0xf] }
 0x183   :  { %9905 = vrcp.f32 %v11066_v22  ;;  %v9900_v33 = vpop.eup %9899  ;;  %v11078_v23 = vadd.f32 1.0, %v9898_v24  ;;  %v778_v29 = vand.u32 2147483647, %v11066_v22  ;;  %v780_v30 = vand.u32 2147483648, %v11066_v22 }
 0x184   :  { %9907 = vrcp.f32 %v11073_v18  ;;  %v9902_v28 = vpop.eup %9901  ;;  %v807_v36 = vand.u32 2147483647, %v11073_v18  ;;  %v11088_v31 = vadd.f32 1.0, %v9900_v33  ;;  %vm11091_vm3 = vcmp.eq.f32.partialorder %v763_v26, 8.507059e+37  ;;  %v7497_v26 = vld [vmem:[%s16520_s3 + $0x80] sm:$0xf] }
 0x185   :  { %9909 = vtanh.f32 %v828_v5  ;;  %vm774_vm8 = vweird.f32 %v11066_v22  ;;  %v11096_v42 = vadd.f32 1.0, %v9902_v28  ;;  %v766_v52 = vor.u32 1.1754944e-38, %v765_v37  ;;  %v7523_v5 = vld [vmem:[%s16520_s3 + $0xb8] sm:$0xf0] }
 0x186   :  { %9911 = vrcp.f32 %v11078_v23  ;;  %v809_v43 = vand.u32 2147483648, %v11073_v18  ;;  %v822_v44 = vand.u32 2147483647, %v11078_v23  ;;  %vm11107_vm9 = vcmp.eq.f32.partialorder %v778_v29, 8.507059e+37 }
 0x187   :  { %v9904_v34 = vpop.eup %9903  ;;  %9913 = vtanh.f32 %v829_v25  ;;  %v781_v50 = vor.u32 1.1754944e-38, %v780_v30  ;;  %vm803_vm10 = vweird.f32 %v11073_v18  ;;  %vm11114_vm11 = vcmp.eq.f32.partialorder %v807_v36, 8.507059e+37  ;;  %v9429_v30 = vld [vmem:[%s16520_s3 + $0x8c] sm:$0xf0] }
 0x188   :  { %v755_v39 = vmul.f32 %v9904_v34, %v11058_v11  ;;  %9915 = vrcp.f32 %v11088_v31  ;;  %vm818_vm12 = vweird.f32 %v11078_v23  ;;  %vm760_vm13 = vweird.f32 %v9904_v34  ;;  %v9434_v11 = vld [vmem:[%s16520_s3 + $0xb4] sm:$0xf0] }
 0x189   :  { %v11098_v17 = vpop.eup %9905  ;;  %9917 = vrcp.f32 %v11096_v42  ;;  %v824_v57 = vand.u32 2147483648, %v11078_v23  ;;  %v810_v61 = vor.u32 1.1754944e-38, %v809_v43  ;;  %vm11137_vm14 = vcmp.eq.f32.partialorder %v822_v44, 8.507059e+37  ;;  %vm761_vm5 = vmor %vm759_vm7, %vm760_vm13  ;;  %v7505_v43 = vld [vmem:[%s16520_s3 + $0x88] sm:$0xf] }
 0x18a   :  { %v11103_v45 = vpop.eup %9907  ;;  %v756_v35 = vsub.f32 1.0, %v755_v39  ;;  %v770_v47 = vmul.f32 %v11098_v17, %v11066_v22  ;;  %vm775_vm15 = vweird.f32 %v11098_v17  ;;  %v855_v25 = vand.u32 2147483647, %v11088_v31 }
 0x18b   :  { %v9910_v51 = vpop.eup %9909  ;;  %v799_v53 = vmul.f32 %v11103_v45, %v11073_v18  ;;  %vm804_vm6 = vweird.f32 %v11103_v45  ;;  %v825_v10 = vor.u32 1.1754944e-38, %v824_v57  ;;  %vm776_vm7 = vmor %vm774_vm8, %vm775_vm15  ;;  %v857_v18 = vand.u32 2147483648, %v11088_v31 }
 0x18c   :  { %v11126_v27 = vpop.eup %9911  ;;  %v757_v55 = vmul.f32 %v9904_v34, %v756_v35  ;;  %v771_v56 = vsub.f32 1.0, %v770_v47  ;;  %v7522_v35 = vor.u32 %v9434_v11, %v7521_v13  ;;  %v7526_v47 = vor.u32 %v9432_v20, %v7523_v5  ;;  %v7467_v13 = vld [vmem:[%s16520_s3 + $0x50] sm:$0xf0]  ;;  %v7473_v20 = vld [vmem:[%s16520_s3 + $0x48] sm:$0xf] }
 0x18d   :  { %v9914_v41 = vpop.eup %9913  ;;  %v800_v60 = vsub.f32 1.0, %v799_v53  ;;  %v814_v62 = vmul.f32 %v11126_v27, %v11078_v23  ;;  %vm819_vm13 = vweird.f32 %v11126_v27  ;;  %v9430_v23 = vld [vmem:[%s16520_s3 + $0x94] sm:$0xf0]  ;;  %v7498_v38 = vor.u32 %v9429_v30, %v7497_v26  ;;  %v7475_v26 = vld [vmem:[%s16520_s3 + $0x58] sm:$0xf0] }
 0x18e   :  { %v758_v0 = vadd.f32 %v9904_v34, %v757_v55  ;;  %v772_v1 = vmul.f32 %v11098_v17, %v771_v56  ;;  %v11143_v3 = vpop.eup %9915  ;;  %vm820_vm8 = vmor %vm818_vm12, %vm819_vm13  ;;  %1148 = vmatpush.bf16.msra.mxu2 %v7522_v35  ;;  %1161 = vmatpush.bf16.msra.mxu3 %v7526_v47  ;;  %v870_v2 = vand.u32 2147483647, %v11096_v42  ;;  %v7459_v35 = vld [vmem:[%s16520_s3 + $0x38] sm:$0xf0]  ;;  %vm16560_vm13 = vcmask 1042433  }
 0x18f   :  { %v801_v4 = vmul.f32 %v11103_v45, %v800_v60  ;;  %v815_v6 = vsub.f32 1.0, %v814_v62  ;;  %v847_v12 = vmul.f32 %v11143_v3, %v11088_v31  ;;  %v11159_v14 = vpop.eup %9917  ;;  %1123 = vmatpush.bf16.msra.mxu0 %v7498_v38 }
 0x190   :  { %v762_v8 = vsel %vm761_vm5, %v9904_v34, %v758_v0  ;;  %v773_v9 = vadd.f32 %v11098_v17, %v772_v1  ;;  %v862_v33 = vmul.f32 %v11159_v14, %v11096_v42  ;;  %v9427_v34 = vld [vmem:[%s16520_s3 + $0x84] sm:$0xf]  ;;  %v9424_v0 = vld [vmem:[%s16520_s3 + $0x6c] sm:$0xf]  ;;  %v7491_v1 = vld [vmem:[%s16520_s3 + $0x78] sm:$0xf0] }
 0x191   :  { %v767_v15 = vsel %vm11091_vm3, %v766_v52, %v762_v8  ;;  %v802_v16 = vadd.f32 %v11103_v45, %v801_v4  ;;  %v816_v19 = vmul.f32 %v11126_v27, %v815_v6  ;;  %vm805_vm3 = vmor %vm803_vm10, %vm804_vm6  ;;  %v848_v22 = vsub.f32 1.0, %v847_v12  ;;  %v7499_v52 = vld [vmem:[%s16520_s3 + $0x90] sm:$0xf0]  ;;  %v7465_v6 = vld [vmem:[%s16520_s3 + $0x40] sm:$0xf] }
 0x192   :  { %v777_v24 = vsel %vm776_vm7, %v11098_v17, %v773_v9  ;;  %v863_v40 = vsub.f32 1.0, %v862_v33  ;;  %v881_v17 = vmul.f32 %v9910_v51, %v767_v15  ;;  %v7502_v57 = vor.u32 %v9427_v34, %v7499_v52  ;;  %v9419_v12 = vld [vmem:[%s16520_s3 + $0x44] sm:$0xf]  ;;  %v9420_v33 = vld [vmem:[%s16520_s3 + $0x4c] sm:$0xf] }
 0x193   :  { %v782_v28 = vsel %vm11107_vm9, %v781_v50, %v777_v24  ;;  %v806_v37 = vsel %vm805_vm3, %v11103_v45, %v802_v16  ;;  %v817_v29 = vadd.f32 %v11126_v27, %v816_v19  ;;  %v849_v39 = vmul.f32 %v11143_v3, %v848_v22  ;;  %v7507_v50 = vld [vmem:[%s16520_s3 + $0x98] sm:$0xf0]  ;;  %v9422_v22 = vld [vmem:[%s16520_s3 + $0x54] sm:$0xf0]  ;;  %v9415_v34 = vld [vmem:[%s16520_s3 + $0x24] sm:$0xf] }
 0x194   :  { %v811_v36 = vsel %vm11114_vm11, %v810_v61, %v806_v37  ;;  %v864_v53 = vmul.f32 %v11159_v14, %v863_v40  ;;  %v882_v49 = vmul.f32 %v9914_v41, %v782_v28  ;;  %v7489_v41 = vld [vmem:[%s16520_s3 + $0x68] sm:$0xf]  ;;  %vm852_vm9 = vweird.f32 %v11143_v3  ;;  %1136 = vmatpush.bf16.msra.mxu1 %v7502_v57  ;;  %v7449_v37 = vld [vmem:[%s16520_s3 + $0x20] sm:$0xf] }
 0x195   :  { %v821_v44 = vsel %vm820_vm8, %v11126_v27, %v817_v29  ;;  %v879_v45 = vmul.f32 %v811_v36, %v11071_v46  ;;  %v9425_v27 = vld [vmem:[%s16520_s3 + $0x6c] sm:$0xf0]  ;;  %v850_v60 = vadd.f32 %v11143_v3, %v849_v39  ;;  %v7506_v61 = vor.u32 %v9430_v23, %v7505_v43  ;;  %v7451_v36 = vld [vmem:[%s16520_s3 + $0x30] sm:$0xf0] }
 0x196   :  { %v826_v51 = vsel %vm11137_vm14, %v825_v10, %v821_v44  ;;  %v7510_v62 = vor.u32 %v9428_v48, %v7507_v50  ;;  %vm851_vm10 = vweird.f32 %v11088_v31  ;;  %v865_v8 = vadd.f32 %v11159_v14, %v864_v53  ;;  %v9417_v29 = vld [vmem:[%s16520_s3 + $0x2c] sm:$0xf0]  ;;  %v9418_v44 = vld [vmem:[%s16520_s3 + $0x34] sm:$0xf0]  ;;  %v7433_v50 = vld [vmem:[%s16520_s3] sm:$0xf] }
 0x197   :  { %v880_v55 = vmul.f32 %v877_v32, %v826_v51  ;;  %v11233_v56 = vadd.f32 %v881_v17, %v879_v45  ;;  %vm867_vm11 = vweird.f32 %v11159_v14  ;;  %v7482_v9 = vor.u32 %v9425_v27, %v7481_v54  ;;  %vm11276_vm12 = vmor %vm851_vm10, %vm852_vm9  ;;  %1149 = vmatpush.bf16.msra.mxu2 %v7506_v61  ;;  %v9416_v45 = vld [vmem:[%s16520_s3 + $0x2c] sm:$0xf]  ;;  %v9413_v51 = vld [vmem:[%s16520_s3 + $0xc] sm:$0xf0] }
 0x198   :  { %v7486_v10 = vor.u32 %v9423_v58, %v7483_v59  ;;  %v872_v15 = vand.u32 2147483648, %v11096_v42  ;;  %1162 = vmatpush.bf16.msra.mxu3 %v7510_v62  ;;  %v7490_v16 = vor.u32 %v9426_v63, %v7489_v41  ;;  %v7494_v19 = vor.u32 %v9424_v0, %v7491_v1  ;;  %v9411_v54 = vld [vmem:[%s16520_s3 + $0x4] sm:$0xf]  ;;  %v7435_v27 = vld [vmem:[%s16520_s3 + $0x10] sm:$0xf0] }
 0x199   :  { %v11257_v4 = vadd.f32 %v882_v49, %v880_v55  ;;  %9919 = vtanh.f32 %v11233_v56  ;;  %v854_v5 = vsel %vm11276_vm12, %v11143_v3, %v850_v60  ;;  %vm866_vm14 = vweird.f32 %v11096_v42  ;;  %1124 = vmatpush.bf16.msra.mxu0 %v7482_v9  ;;  %v7441_v58 = vld [vmem:[%s16520_s3 + $0x8] sm:$0xf]  ;;  %v9414_v59 = vld [vmem:[%s16520_s3 + $0x14] sm:$0xf0]  ;;  %v9412_v61 = vld [vmem:[%s16520_s3 + $0xc] sm:$0xf] }
 0x19a   :  { %v7466_v24 = vor.u32 %v9421_v7, %v7465_v6  ;;  %v858_v28 = vor.u32 1.1754944e-38, %v857_v18  ;;  %vm11302_vm15 = vmor %vm866_vm14, %vm867_vm11  ;;  %1137 = vmatpush.bf16.msra.mxu1 %v7486_v10  ;;  %v7470_v3 = vor.u32 %v9419_v12, %v7467_v13  ;;  %vm856_vm5 = vcmp.eq.f32.partialorder %v855_v25, 8.507059e+37  ;;  %v7443_v62 = vld [vmem:[%s16520_s3 + $0x18] sm:$0xf0] }
 0x19b   :  { %9921 = vtanh.f32 %v11257_v4  ;;  %v869_v18 = vsel %vm11302_vm15, %v11159_v14, %v865_v8  ;;  %vm11317_vm6 = vcmp.eq.f32.partialorder %v870_v2, 8.507059e+37  ;;  %v873_v31 = vor.u32 1.1754944e-38, %v872_v15  ;;  %1150 = vmatpush.bf16.msra.mxu2 %v7490_v16  ;;  %v7457_v14 = vld [vmem:[%s16520_s3 + $0x28] sm:$0xf] }
 0x19c   :  { %v859_v40 = vsel %vm856_vm5, %v858_v28, %v854_v5  ;;  %1163 = vmatpush.bf16.msra.mxu3 %v7494_v19  ;;  %v7474_v25 = vor.u32 %v9422_v22, %v7473_v20  ;;  %v7478_v17 = vor.u32 %v9420_v33, %v7475_v26  ;;  %v7450_v43 = vor.u32 %v9417_v29, %v7449_v37  ;;  %v7429_v16 = vld [vmem:[%s16523_s0 + $0x2] ss:$8 sm:$0xf] }
 0x19d   :  { %1125 = vmatpush.bf16.msra.mxu0 %v7466_v24  ;;  %v874_v23 = vsel %vm11317_vm6, %v873_v31, %v869_v18  ;;  %v7454_v48 = vor.u32 %v9415_v34, %v7451_v36  ;;  %v893_v53 = vrot.slane %v10986_v21, 1  ;;  %v7458_v55 = vor.u32 %v9418_v44, %v7457_v14  ;;  %v7430_v22 = vld [vmem:[%s16523_s0 + $0x42] ss:$8 sm:$0xf] }
 0x19e   :  { %1138 = vmatpush.bf16.msra.mxu1 %v7470_v3  ;;  %v7462_v57 = vor.u32 %v9416_v45, %v7459_v35  ;;  %v7434_v60 = vor.u32 %v9413_v51, %v7433_v50  ;;  %v7438_v63 = vor.u32 %v9411_v54, %v7435_v27  ;;  %v7442_v0 = vor.u32 %v9414_v59, %v7441_v58  ;;  %v7684_v35 = vld [vmem:[%s16520_s3 + $0xf0] sm:$0xf0]  ;;  %v9472_v50 = vld [vmem:[%s16520_s3 + $0xec] sm:$0xf]  ;;  %v7692_v51 = vld [vmem:[%s16520_s3 + $0xf8] sm:$0xf0] }
 0x19f   :  { %v9920_v39 = vpop.eup %9919  ;;  %1151 = vmatpush.bf16.msra.mxu2 %v7474_v25  ;;  %v7446_v1 = vor.u32 %v9412_v61, %v7443_v62  ;;  %v908_v2 = vsub.f32 %v11233_v56, %v11071_v46  ;;  %v909_v7 = vsub.f32 %v11257_v4, %v877_v32  ;;  %vm16559_vm7 = vcmask 1041408   ;;  %v9469_v54 = vld [vmem:[%s16520_s3 + $0xcc] sm:$0xf0]  ;;  %v9467_v27 = vld [vmem:[%s16520_s3 + $0xc4] sm:$0xf] }
 0x1a0   :  { %v887_v52 = vmul.f32 %v9920_v39, %v859_v40  ;;  %1164 = vmatpush.bf16.msra.mxu3 %v7478_v17  ;;  %v7682_v17 = vld [vmem:[%s16520_s3 + $0xe0] sm:$0xf]  ;;  %v7668_v58 = vld [vmem:[%s16520_s3 + $0xd0] sm:$0xf0]  ;;  %v7674_v59 = vld [vmem:[%s16520_s3 + $0xc8] sm:$0xf] }
 0x1a1   :  { %v9922_v47 = vpop.eup %9921  ;;  %1126 = vmatpush.bf16.msra.mxu0 %v7450_v43  ;;  %v9471_v43 = vld [vmem:[%s16520_s3 + $0xe4] sm:$0xf]  ;;  %v7671_v62 = vor.u32 %v9467_v27, %v7668_v58 }
 0x1a2   :  { %v888_v49 = vmul.f32 %v9922_v47, %v874_v23  ;;  %v895_v38 = vsub.f32 %v887_v52, %v10986_v21  ;;  %1139 = vmatpush.bf16.msra.mxu1 %v7454_v48  ;;  %v9473_v52 = vld [vmem:[%s16520_s3 + $0xec] sm:$0xf0]  ;;  %v7690_v47 = vld [vmem:[%s16520_s3 + $0xe8] sm:$0xf]  ;;  %v7687_v23 = vor.u32 %v9471_v43, %v7684_v35  ;;  %v9474_v48 = vld [vmem:[%s16520_s3 + $0xf4] sm:$0xf0] }
 0x1a3   :  { %1152 = vmatpush.bf16.msra.mxu2 %v7458_v55  ;;  %v7683_v45 = vor.u32 %v9473_v52, %v7682_v17  ;;  %v7650_v17 = vld [vmem:[%s16520_s3 + $0xa0] sm:$0xf]  ;;  %v9463_v35 = vld [vmem:[%s16520_s3 + $0xa4] sm:$0xf] }
 0x1a4   :  { %v896_v41 = vsub.f32 %v888_v49, %v893_v53  ;;  %902 = vst [vmem:[#allocation1] ss:$9 sm:$0xff] %v895_v38  ;;  %1165 = vmatpush.bf16.msra.mxu3 %v7462_v57  ;;  %v7691_v53 = vor.u32 %v9474_v48, %v7690_v47  ;;  %v7695_v49 = vor.u32 %v9472_v50, %v7692_v51  ;;  %v7666_v38 = vld [vmem:[%s16520_s3 + $0xc0] sm:$0xf]  ;;  %v7652_v47 = vld [vmem:[%s16520_s3 + $0xb0] sm:$0xf0] }
 0x1a5   :  { %1127 = vmatpush.bf16.msra.mxu0 %v7434_v60  ;;  %v7667_v57 = vor.u32 %v9469_v54, %v7666_v38  ;;  %v7655_v58 = vor.u32 %v9463_v35, %v7652_v47  ;;  %v9455_v35 = vld [vmem:[%s16520_s3 + $0x64] sm:$0xf]  ;;  %v7620_v47 = vld [vmem:[%s16520_s3 + $0x70] sm:$0xf0] }
 0x1a6   :  { %904 = vst [vmem:[#allocation1 + $0x1] ss:$9 sm:$0xff] %v896_v41  ;;  %1140 = vmatpush.bf16.msra.mxu1 %v7438_v63  ;;  %v9470_v41 = vld [vmem:[%s16520_s3 + $0xd4] sm:$0xf0] }
 0x1a7   :  { %1153 = vmatpush.bf16.msra.mxu2 %v7442_v0  ;;  %v7675_v63 = vor.u32 %v9470_v41, %v7674_v59  ;;  %v9468_v0 = vld [vmem:[%s16520_s3 + $0xcc] sm:$0xf] }
 0x1a8   :  { %1166 = vmatpush.bf16.msra.mxu3 %v7446_v1  ;;  %v7676_v1 = vld [vmem:[%s16520_s3 + $0xd8] sm:$0xf0] }
 0x1a9   :  { %1564 = vmatpush.bf16.msrb.mxu0 %v7683_v45 }
 0x1aa   :  { %1577 = vmatpush.bf16.msrb.mxu1 %v7687_v23 }
 0x1ab   :  { %1590 = vmatpush.bf16.msrb.mxu2 %v7691_v53  ;;  %v9458_v53 = vld [vmem:[%s16520_s3 + $0x74] sm:$0xf0] }
 0x1ac   :  { %1603 = vmatpush.bf16.msrb.mxu3 %v7695_v49 }
 0x1ad   :  { %v905_v6 = vld [vmem:[#allocation1] sm:$0xff]  ;;  %1565 = vmatpush.bf16.msrb.mxu0 %v7667_v57 }
 0x1ae   :  { %914 = vst [vmem:[#allocation1] ss:$9 sm:$0xff] %v908_v2  ;;  %v11373_v8 = vadd.f32 %v905_v6, %v10986_v21  ;;  %v7679_v6 = vor.u32 %v9468_v0, %v7676_v1  ;;  %1578 = vmatpush.bf16.msrb.mxu1 %v7671_v62 }
 0x1af   :  { %916 = vst [vmem:[#allocation1 + $0x1] ss:$9 sm:$0xff] %v909_v7  ;;  %1591 = vmatpush.bf16.msrb.mxu2 %v7675_v63  ;;  %v7658_v63 = vld [vmem:[%s16520_s3 + $0xa8] sm:$0xf] }
 0x1b0   :  { %7428 = vst [vmem:[%s16524_s4 + $0x2] sm:$0x3] %v11373_v8  ;;  %v927_v9 = vpack.c.bf16 %v11373_v8, %v11373_v8  ;;  %1604 = vmatpush.bf16.msrb.mxu3 %v7679_v6 }
 0x1b2   :  { %1128 = vmatmul.bf16.vlgmr.msra.gmra.mxu0 %v927_v9  ;;  %1141 = vmatmul.bf16.vlgmr.msra.gmra.mxu1 %v927_v9 }
 0x1b3   :  { %1154 = vmatmul.bf16.vlgmr.msra.gmra.mxu2 %v927_v9  ;;  %1167 = vmatmul.bf16.vlgmr.msra.gmra.mxu3 %v927_v9 }
 0x1b4   :  { %1579 = vmatpush.bf16.msrb.mxu1 %v7655_v58  ;;  %v9453_v58 = vld [vmem:[%s16520_s3 + $0x4c] sm:$0xf0] }
 0x1b6   :  { %v917_v60 = vld [vmem:[#allocation1] sm:$0xff] }
 0x22f   :  { %v1129_v56 = vpop.f32.mrf.mxu0  ;;  %v1142_v10 = vpop.f32.mrf.mxu1 }
 0x230   :  { %v1176_v32 = vrot.slane %v1142_v10, 7 }
 0x232   :  { %v1179_v19 = vsel %vm286_vm0, %v1129_v56, %v1176_v32  ;;  %v1182_v20 = vsel %vm292_vm1, %v1129_v56, %v1176_v32  ;;  %v11458_v32 = vadd.f32 %v917_v60, %v11071_v46 }
 0x236   :  { %v1155_v4 = vpop.f32.mrf.mxu2  ;;  %v1168_v12 = vpop.f32.mrf.mxu3 }
 0x237   :  { %v1177_v21 = vrot.slane %v1155_v4, 6  ;;  %v1178_v13 = vrot.slane %v1168_v12, 5  ;;  %v1131_v11 = vpop.f32.mrf.mxu0  ;;  %v1144_v15 = vpop.f32.mrf.mxu1 }
 0x239   :  { %v1180_v5 = vsel %vm288_vm2, %v1177_v21, %v1178_v13  ;;  %v1183_v24 = vsel %vm294_vm4, %v1177_v21, %v1178_v13 }
 0x23a   :  { %v1181_v33 = vsel %vm16559_vm7, %v1179_v19, %v1180_v5  ;;  %v1184_v26 = vsel %vm16560_vm13, %v1182_v20, %v1183_v24  ;;  %v1321_v20 = vrot.slane %v11458_v32, 1 }
 0x23b   :  { %v1185_v28 = vrot.slane %v1184_v26, 1  ;;  %v11393_v42 = vadd.f32 %v7429_v16, %v1181_v33 }
 0x23d   :  { %v11395_v3 = vadd.f32 %v7430_v22, %v1185_v28  ;;  %v7559_v37 = vmul.f32 -1.442695, %v11393_v42  ;;  %v1230_v29 = vrot.slane %v11393_v42, 1  ;;  %v1278_v18 = vrot.slane %v11393_v42, 3 }
 0x23e   :  { %v1157_v30 = vpop.f32.mrf.mxu2  ;;  %v1170_v34 = vpop.f32.mrf.mxu3  ;;  %v1272_v56 = vrot.slane %v11393_v42, 2 }
 0x23f   :  { %9923 = vpow2.f32 %v7559_v37  ;;  %v7560_v36 = vmul.f32 -1.442695, %v11395_v3  ;;  %v1231_v39 = vrot.slane %v11395_v3, 1  ;;  %v7561_v40 = vmul.f32 -1.442695, %v1230_v29 }
 0x240   :  { %v1279_v31 = vrot.slane %v11395_v3, 3  ;;  %v7563_v25 = vmul.f32 -1.442695, %v1278_v18  ;;  %v1273_v12 = vrot.slane %v11395_v3, 2 }
 0x241   :  { %9925 = vpow2.f32 %v7560_v36  ;;  %v7562_v14 = vmul.f32 -1.442695, %v1231_v39  ;;  %v9460_v36 = vld [vmem:[%s16520_s3 + $0x8c] sm:$0xf] }
 0x242   :  { %9927 = vpow2.f32 %v7561_v40  ;;  %v7564_v44 = vmul.f32 -1.442695, %v1279_v31 }
 0x243   :  { %9929 = vpow2.f32 %v7562_v14  ;;  %v9465_v14 = vld [vmem:[%s16520_s3 + $0xac] sm:$0xf0] }
 0x244   :  { %9931 = vpow2.f32 %v7563_v25  ;;  %v7651_v54 = vor.u32 %v9465_v14, %v7650_v17  ;;  %v7618_v14 = vld [vmem:[%s16520_s3 + $0x60] sm:$0xf] }
 0x245   :  { %v9924_v55 = vpop.eup %9923  ;;  %9933 = vpow2.f32 %v7564_v44 }
 0x246   :  { %v11445_v61 = vadd.f32 1.0, %v9924_v55  ;;  %1566 = vmatpush.bf16.msrb.mxu0 %v7651_v54 }
 0x247   :  { %v9926_v2 = vpop.eup %9925 }
 0x248   :  { %v9928_v7 = vpop.eup %9927  ;;  %v11453_v9 = vadd.f32 1.0, %v9926_v2  ;;  %9935 = vrcp.f32 %v11445_v61  ;;  %v1207_v13 = vand.u32 2147483647, %v11445_v61  ;;  %v1209_v46 = vand.u32 2147483648, %v11445_v61 }
 0x249   :  { %v9930_v10 = vpop.eup %9929  ;;  %v11460_v4 = vadd.f32 1.0, %v9928_v7  ;;  %vm1203_vm3 = vweird.f32 %v11445_v61  ;;  %v9464_v7 = vld [vmem:[%s16520_s3 + $0xac] sm:$0xf] }
 0x24a   :  { %9937 = vrcp.f32 %v11453_v9  ;;  %v9932_v21 = vpop.eup %9931  ;;  %v11465_v11 = vadd.f32 1.0, %v9930_v10  ;;  %v1222_v16 = vand.u32 2147483647, %v11453_v9  ;;  %v1224_v19 = vand.u32 2147483648, %v11453_v9 }
 0x24b   :  { %9939 = vrcp.f32 %v11460_v4  ;;  %v9934_v15 = vpop.eup %9933  ;;  %v1251_v24 = vand.u32 2147483647, %v11460_v4  ;;  %v11475_v22 = vadd.f32 1.0, %v9932_v21  ;;  %vm11478_vm8 = vcmp.eq.f32.partialorder %v1207_v13, 8.507059e+37  ;;  %v7634_v13 = vld [vmem:[%s16520_s3 + $0x80] sm:$0xf] }
 0x24c   :  { %9941 = vtanh.f32 %v1272_v56  ;;  %vm1218_vm9 = vweird.f32 %v11453_v9  ;;  %v11483_v28 = vadd.f32 1.0, %v9934_v15  ;;  %v1210_v3 = vor.u32 1.1754944e-38, %v1209_v46  ;;  %v7660_v56 = vld [vmem:[%s16520_s3 + $0xb8] sm:$0xf0] }
 0x24d   :  { %9943 = vrcp.f32 %v11465_v11  ;;  %v1253_v37 = vand.u32 2147483648, %v11460_v4  ;;  %v1266_v29 = vand.u32 2147483647, %v11465_v11  ;;  %vm11494_vm10 = vcmp.eq.f32.partialorder %v1222_v16, 8.507059e+37 }
 0x24e   :  { %v9936_v5 = vpop.eup %9935  ;;  %9945 = vtanh.f32 %v1273_v12  ;;  %v1225_v39 = vor.u32 1.1754944e-38, %v1224_v19  ;;  %vm1247_vm11 = vweird.f32 %v11460_v4  ;;  %vm11501_vm12 = vcmp.eq.f32.partialorder %v1251_v24, 8.507059e+37  ;;  %v9461_v19 = vld [vmem:[%s16520_s3 + $0x8c] sm:$0xf0] }
 0x24f   :  { %v1199_v33 = vmul.f32 %v9936_v5, %v11445_v61  ;;  %9947 = vrcp.f32 %v11475_v22  ;;  %vm1262_vm14 = vweird.f32 %v11465_v11  ;;  %vm1204_vm15 = vweird.f32 %v9936_v5  ;;  %v9466_v61 = vld [vmem:[%s16520_s3 + $0xb4] sm:$0xf0] }
 0x250   :  { %v11485_v42 = vpop.eup %9937  ;;  %9949 = vrcp.f32 %v11483_v28  ;;  %v1268_v45 = vand.u32 2147483648, %v11465_v11  ;;  %v1254_v50 = vor.u32 1.1754944e-38, %v1253_v37  ;;  %vm11524_vm5 = vcmp.eq.f32.partialorder %v1266_v29, 8.507059e+37  ;;  %vm1205_vm7 = vmor %vm1203_vm3, %vm1204_vm15  ;;  %v7642_v37 = vld [vmem:[%s16520_s3 + $0x88] sm:$0xf] }
 0x251   :  { %v11490_v18 = vpop.eup %9939  ;;  %v1200_v30 = vsub.f32 1.0, %v1199_v33  ;;  %v1214_v34 = vmul.f32 %v11485_v42, %v11453_v9  ;;  %vm1219_vm6 = vweird.f32 %v11485_v42  ;;  %v1299_v12 = vand.u32 2147483647, %v11475_v22 }
 0x252   :  { %v9942_v40 = vpop.eup %9941  ;;  %v1243_v31 = vmul.f32 %v11490_v18, %v11460_v4  ;;  %vm1248_vm13 = vweird.f32 %v11490_v18  ;;  %v1269_v60 = vor.u32 1.1754944e-38, %v1268_v45  ;;  %vm1220_vm3 = vmor %vm1218_vm9, %vm1219_vm6  ;;  %v1301_v4 = vand.u32 2147483648, %v11475_v22 }
 0x253   :  { %v11513_v52 = vpop.eup %9943  ;;  %v1201_v43 = vmul.f32 %v9936_v5, %v1200_v30  ;;  %v1215_v44 = vsub.f32 1.0, %v1214_v34  ;;  %v7659_v30 = vor.u32 %v9466_v61, %v7658_v63  ;;  %v7663_v34 = vor.u32 %v9464_v7, %v7660_v56  ;;  %v7604_v63 = vld [vmem:[%s16520_s3 + $0x50] sm:$0xf0]  ;;  %v7610_v7 = vld [vmem:[%s16520_s3 + $0x48] sm:$0xf] }
 0x254   :  { %v9946_v23 = vpop.eup %9945  ;;  %v1244_v48 = vsub.f32 1.0, %v1243_v31  ;;  %v1258_v51 = vmul.f32 %v11513_v52, %v11465_v11  ;;  %vm1263_vm15 = vweird.f32 %v11513_v52  ;;  %v9462_v11 = vld [vmem:[%s16520_s3 + $0x94] sm:$0xf0]  ;;  %v7635_v17 = vor.u32 %v9461_v19, %v7634_v13  ;;  %v7612_v13 = vld [vmem:[%s16520_s3 + $0x58] sm:$0xf0] }
 0x255   :  { %v1202_v49 = vadd.f32 %v9936_v5, %v1201_v43  ;;  %v1216_v38 = vmul.f32 %v11485_v42, %v1215_v44  ;;  %v11530_v27 = vpop.eup %9947  ;;  %vm1264_vm9 = vmor %vm1262_vm14, %vm1263_vm15  ;;  %1592 = vmatpush.bf16.msrb.mxu2 %v7659_v30  ;;  %1605 = vmatpush.bf16.msrb.mxu3 %v7663_v34  ;;  %v1314_v54 = vand.u32 2147483647, %v11483_v28  ;;  %v7596_v30 = vld [vmem:[%s16520_s3 + $0x38] sm:$0xf0]  ;;  %vm16576_vm15 = vcmask 1042433  }
 0x256   :  { %v1245_v55 = vmul.f32 %v11490_v18, %v1244_v48  ;;  %v1259_v57 = vsub.f32 1.0, %v1258_v51  ;;  %v1291_v62 = vmul.f32 %v11530_v27, %v11475_v22  ;;  %v11546_v0 = vpop.eup %9949  ;;  %1567 = vmatpush.bf16.msrb.mxu0 %v7635_v17 }
 0x257   :  { %v1206_v59 = vsel %vm1205_vm7, %v9936_v5, %v1202_v49  ;;  %v1217_v41 = vadd.f32 %v11485_v42, %v1216_v38  ;;  %v1306_v21 = vmul.f32 %v11546_v0, %v11483_v28  ;;  %v9459_v5 = vld [vmem:[%s16520_s3 + $0x84] sm:$0xf]  ;;  %v9456_v49 = vld [vmem:[%s16520_s3 + $0x6c] sm:$0xf]  ;;  %v7628_v38 = vld [vmem:[%s16520_s3 + $0x78] sm:$0xf0] }
 0x258   :  { %v1211_v1 = vsel %vm11478_vm8, %v1210_v3, %v1206_v59  ;;  %v1246_v2 = vadd.f32 %v11490_v18, %v1245_v55  ;;  %v1260_v6 = vmul.f32 %v11513_v52, %v1259_v57  ;;  %vm1249_vm8 = vmor %vm1247_vm11, %vm1248_vm13  ;;  %v1292_v9 = vsub.f32 1.0, %v1291_v62  ;;  %v7636_v3 = vld [vmem:[%s16520_s3 + $0x90] sm:$0xf0]  ;;  %v7602_v57 = vld [vmem:[%s16520_s3 + $0x40] sm:$0xf] }
 0x259   :  { %v1221_v10 = vsel %vm1220_vm3, %v11485_v42, %v1217_v41  ;;  %v1307_v26 = vsub.f32 1.0, %v1306_v21  ;;  %v1325_v42 = vmul.f32 %v9942_v40, %v1211_v1  ;;  %v7639_v45 = vor.u32 %v9459_v5, %v7636_v3  ;;  %v9451_v62 = vld [vmem:[%s16520_s3 + $0x44] sm:$0xf]  ;;  %v9452_v21 = vld [vmem:[%s16520_s3 + $0x4c] sm:$0xf] }
 0x25a   :  { %v1226_v15 = vsel %vm11494_vm10, %v1225_v39, %v1221_v10  ;;  %v1250_v46 = vsel %vm1249_vm8, %v11490_v18, %v1246_v2  ;;  %v1261_v16 = vadd.f32 %v11513_v52, %v1260_v6  ;;  %v1293_v33 = vmul.f32 %v11530_v27, %v1292_v9  ;;  %v7644_v39 = vld [vmem:[%s16520_s3 + $0x98] sm:$0xf0]  ;;  %v9454_v9 = vld [vmem:[%s16520_s3 + $0x54] sm:$0xf0]  ;;  %v9447_v5 = vld [vmem:[%s16520_s3 + $0x24] sm:$0xf] }
 0x25b   :  { %v1255_v24 = vsel %vm11501_vm12, %v1254_v50, %v1250_v46  ;;  %v1308_v31 = vmul.f32 %v11546_v0, %v1307_v26  ;;  %v1326_v25 = vmul.f32 %v9946_v23, %v1226_v15  ;;  %v7626_v23 = vld [vmem:[%s16520_s3 + $0x68] sm:$0xf]  ;;  %vm1296_vm10 = vweird.f32 %v11530_v27  ;;  %1580 = vmatpush.bf16.msrb.mxu1 %v7639_v45  ;;  %v7586_v46 = vld [vmem:[%s16520_s3 + $0x20] sm:$0xf] }
 0x25c   :  { %v1265_v29 = vsel %vm1264_vm9, %v11513_v52, %v1261_v16  ;;  %v1323_v18 = vmul.f32 %v1255_v24, %v11458_v32  ;;  %v9457_v52 = vld [vmem:[%s16520_s3 + $0x6c] sm:$0xf0]  ;;  %v1294_v48 = vadd.f32 %v11530_v27, %v1293_v33  ;;  %v7643_v50 = vor.u32 %v9462_v11, %v7642_v37  ;;  %v7588_v24 = vld [vmem:[%s16520_s3 + $0x30] sm:$0xf0] }
 0x25d   :  { %v1270_v40 = vsel %vm11524_vm5, %v1269_v60, %v1265_v29  ;;  %v7647_v51 = vor.u32 %v9460_v36, %v7644_v39  ;;  %vm1295_vm11 = vweird.f32 %v11475_v22  ;;  %v1309_v59 = vadd.f32 %v11546_v0, %v1308_v31  ;;  %v9449_v16 = vld [vmem:[%s16520_s3 + $0x2c] sm:$0xf0]  ;;  %v9450_v29 = vld [vmem:[%s16520_s3 + $0x34] sm:$0xf0]  ;;  %v7570_v39 = vld [vmem:[%s16520_s3] sm:$0xf] }
 0x25e   :  { %v1324_v43 = vmul.f32 %v1321_v20, %v1270_v40  ;;  %v11620_v44 = vadd.f32 %v1325_v42, %v1323_v18  ;;  %vm1311_vm12 = vweird.f32 %v11546_v0  ;;  %v7619_v41 = vor.u32 %v9457_v52, %v7618_v14  ;;  %vm11663_vm14 = vmor %vm1295_vm11, %vm1296_vm10  ;;  %1593 = vmatpush.bf16.msrb.mxu2 %v7643_v50  ;;  %v9448_v18 = vld [vmem:[%s16520_s3 + $0x2c] sm:$0xf]  ;;  %v9445_v40 = vld [vmem:[%s16520_s3 + $0xc] sm:$0xf0] }
 0x25f   :  { %v7623_v60 = vor.u32 %v9455_v35, %v7620_v47  ;;  %v1316_v1 = vand.u32 2147483648, %v11483_v28  ;;  %1606 = vmatpush.bf16.msrb.mxu3 %v7647_v51  ;;  %v7627_v2 = vor.u32 %v9458_v53, %v7626_v23  ;;  %v7631_v6 = vor.u32 %v9456_v49, %v7628_v38  ;;  %v9443_v14 = vld [vmem:[%s16520_s3 + $0x4] sm:$0xf]  ;;  %v7572_v52 = vld [vmem:[%s16520_s3 + $0x10] sm:$0xf0] }
 0x260   :  { %v11644_v55 = vadd.f32 %v1326_v25, %v1324_v43  ;;  %9951 = vtanh.f32 %v11620_v44  ;;  %v1298_v56 = vsel %vm11663_vm14, %v11530_v27, %v1294_v48  ;;  %vm1310_vm5 = vweird.f32 %v11483_v28  ;;  %1568 = vmatpush.bf16.msrb.mxu0 %v7619_v41  ;;  %v7578_v35 = vld [vmem:[%s16520_s3 + $0x8] sm:$0xf]  ;;  %v9446_v47 = vld [vmem:[%s16520_s3 + $0x14] sm:$0xf0]  ;;  %v9444_v50 = vld [vmem:[%s16520_s3 + $0xc] sm:$0xf] }
 0x261   :  { %v7603_v10 = vor.u32 %v9453_v58, %v7602_v57  ;;  %v1302_v15 = vor.u32 1.1754944e-38, %v1301_v4  ;;  %vm11689_vm6 = vmor %vm1310_vm5, %vm1311_vm12  ;;  %1581 = vmatpush.bf16.msrb.mxu1 %v7623_v60  ;;  %v7607_v27 = vor.u32 %v9451_v62, %v7604_v63  ;;  %vm1300_vm7 = vcmp.eq.f32.partialorder %v1299_v12, 8.507059e+37  ;;  %v7580_v51 = vld [vmem:[%s16520_s3 + $0x18] sm:$0xf0] }
 0x262   :  { %9953 = vtanh.f32 %v11644_v55  ;;  %v1313_v4 = vsel %vm11689_vm6, %v11546_v0, %v1309_v59  ;;  %vm11704_vm13 = vcmp.eq.f32.partialorder %v1314_v54, 8.507059e+37  ;;  %v1317_v22 = vor.u32 1.1754944e-38, %v1316_v1  ;;  %1594 = vmatpush.bf16.msrb.mxu2 %v7627_v2  ;;  %v7594_v0 = vld [vmem:[%s16520_s3 + $0x28] sm:$0xf] }
 0x263   :  { %v1303_v26 = vsel %vm1300_vm7, %v1302_v15, %v1298_v56  ;;  %1607 = vmatpush.bf16.msrb.mxu3 %v7631_v6  ;;  %v7611_v12 = vor.u32 %v9454_v9, %v7610_v7  ;;  %v7615_v42 = vor.u32 %v9452_v21, %v7612_v13  ;;  %v7587_v37 = vor.u32 %v9449_v16, %v7586_v46  ;;  %v7566_v2 = vld [vmem:[%s16523_s0 + $0x3] ss:$8 sm:$0xf] }
 0x264   :  { %1569 = vmatpush.bf16.msrb.mxu0 %v7603_v10  ;;  %v1318_v11 = vsel %vm11704_vm13, %v1317_v22, %v1313_v4  ;;  %v7591_v36 = vor.u32 %v9447_v5, %v7588_v24  ;;  %v1337_v31 = vrot.slane %v11373_v8, 1  ;;  %v7595_v43 = vor.u32 %v9450_v29, %v7594_v0  ;;  %v7567_v9 = vld [vmem:[%s16523_s0 + $0x43] ss:$8 sm:$0xf] }
 0x265   :  { %1582 = vmatpush.bf16.msrb.mxu1 %v7607_v27  ;;  %v7599_v45 = vor.u32 %v9448_v18, %v7596_v30  ;;  %v7571_v48 = vor.u32 %v9445_v40, %v7570_v39  ;;  %v7575_v53 = vor.u32 %v9443_v14, %v7572_v52  ;;  %v7579_v49 = vor.u32 %v9446_v47, %v7578_v35  ;;  %v7821_v30 = vld [vmem:[%s16520_s3 + $0xf0] sm:$0xf0]  ;;  %v9504_v39 = vld [vmem:[%s16520_s3 + $0xec] sm:$0xf]  ;;  %v7829_v40 = vld [vmem:[%s16520_s3 + $0xf8] sm:$0xf0] }
 0x266   :  { %v9952_v33 = vpop.eup %9951  ;;  %1595 = vmatpush.bf16.msrb.mxu2 %v7611_v12  ;;  %v7583_v38 = vor.u32 %v9444_v50, %v7580_v51  ;;  %v1352_v54 = vsub.f32 %v11620_v44, %v11458_v32  ;;  %v1353_v58 = vsub.f32 %v11644_v55, %v1321_v20  ;;  %vm16575_vm3 = vcmask 1041408   ;;  %v9501_v14 = vld [vmem:[%s16520_s3 + $0xcc] sm:$0xf0]  ;;  %v9499_v52 = vld [vmem:[%s16520_s3 + $0xc4] sm:$0xf] }
 0x267   :  { %v1331_v3 = vmul.f32 %v9952_v33, %v1303_v26  ;;  %1608 = vmatpush.bf16.msrb.mxu3 %v7615_v42  ;;  %v7819_v42 = vld [vmem:[%s16520_s3 + $0xe0] sm:$0xf]  ;;  %v7805_v35 = vld [vmem:[%s16520_s3 + $0xd0] sm:$0xf0]  ;;  %v7811_v47 = vld [vmem:[%s16520_s3 + $0xc8] sm:$0xf] }
 0x268   :  { %v9954_v34 = vpop.eup %9953  ;;  %1570 = vmatpush.bf16.msrb.mxu0 %v7587_v37  ;;  %v9503_v37 = vld [vmem:[%s16520_s3 + $0xe4] sm:$0xf]  ;;  %v7808_v51 = vor.u32 %v9499_v52, %v7805_v35 }
 0x269   :  { %v1332_v25 = vmul.f32 %v9954_v34, %v1318_v11  ;;  %v1339_v17 = vsub.f32 %v1331_v3, %v11373_v8  ;;  %1583 = vmatpush.bf16.msrb.mxu1 %v7591_v36  ;;  %v9505_v3 = vld [vmem:[%s16520_s3 + $0xec] sm:$0xf0]  ;;  %v7827_v34 = vld [vmem:[%s16520_s3 + $0xe8] sm:$0xf]  ;;  %v7824_v11 = vor.u32 %v9503_v37, %v7821_v30  ;;  %v9506_v36 = vld [vmem:[%s16520_s3 + $0xf4] sm:$0xf0] }
 0x26a   :  { %1596 = vmatpush.bf16.msrb.mxu2 %v7595_v43  ;;  %v7820_v18 = vor.u32 %v9505_v3, %v7819_v42  ;;  %v7787_v42 = vld [vmem:[%s16520_s3 + $0xa0] sm:$0xf]  ;;  %v9495_v30 = vld [vmem:[%s16520_s3 + $0xa4] sm:$0xf] }
 0x26b   :  { %v1340_v23 = vsub.f32 %v1332_v25, %v1337_v31  ;;  %1346 = vst [vmem:[#allocation1] ss:$9 sm:$0xff] %v1339_v17  ;;  %1609 = vmatpush.bf16.msrb.mxu3 %v7599_v45  ;;  %v7828_v31 = vor.u32 %v9506_v36, %v7827_v34  ;;  %v7832_v25 = vor.u32 %v9504_v39, %v7829_v40  ;;  %v7803_v17 = vld [vmem:[%s16520_s3 + $0xc0] sm:$0xf]  ;;  %v7789_v34 = vld [vmem:[%s16520_s3 + $0xb0] sm:$0xf0] }
 0x26c   :  { %1571 = vmatpush.bf16.msrb.mxu0 %v7571_v48  ;;  %v7804_v45 = vor.u32 %v9501_v14, %v7803_v17  ;;  %v7792_v35 = vor.u32 %v9495_v30, %v7789_v34  ;;  %v9487_v30 = vld [vmem:[%s16520_s3 + $0x64] sm:$0xf]  ;;  %v7757_v34 = vld [vmem:[%s16520_s3 + $0x70] sm:$0xf0] }
 0x26d   :  { %1348 = vst [vmem:[#allocation1 + $0x1] ss:$9 sm:$0xff] %v1340_v23  ;;  %1584 = vmatpush.bf16.msrb.mxu1 %v7575_v53  ;;  %v9502_v23 = vld [vmem:[%s16520_s3 + $0xd4] sm:$0xf0] }
 0x26e   :  { %1597 = vmatpush.bf16.msrb.mxu2 %v7579_v49  ;;  %v7812_v53 = vor.u32 %v9502_v23, %v7811_v47  ;;  %v9500_v49 = vld [vmem:[%s16520_s3 + $0xcc] sm:$0xf] }
 0x26f   :  { %1610 = vmatpush.bf16.msrb.mxu3 %v7583_v38  ;;  %v7813_v38 = vld [vmem:[%s16520_s3 + $0xd8] sm:$0xf0] }
 0x270   :  { %2008 = vmatpush.bf16.msra.mxu0 %v7820_v18 }
 0x271   :  { %2021 = vmatpush.bf16.msra.mxu1 %v7824_v11 }
 0x272   :  { %2034 = vmatpush.bf16.msra.mxu2 %v7828_v31  ;;  %v9490_v31 = vld [vmem:[%s16520_s3 + $0x74] sm:$0xf0] }
 0x273   :  { %2047 = vmatpush.bf16.msra.mxu3 %v7832_v25 }
 0x274   :  { %v1349_v57 = vld [vmem:[#allocation1] sm:$0xff]  ;;  %2009 = vmatpush.bf16.msra.mxu0 %v7804_v45 }
 0x275   :  { %1358 = vst [vmem:[#allocation1] ss:$9 sm:$0xff] %v1352_v54  ;;  %v11760_v59 = vadd.f32 %v1349_v57, %v11373_v8  ;;  %v7816_v57 = vor.u32 %v9500_v49, %v7813_v38  ;;  %2022 = vmatpush.bf16.msra.mxu1 %v7808_v51 }
 0x276   :  { %1360 = vst [vmem:[#allocation1 + $0x1] ss:$9 sm:$0xff] %v1353_v58  ;;  %2035 = vmatpush.bf16.msra.mxu2 %v7812_v53  ;;  %v7795_v53 = vld [vmem:[%s16520_s3 + $0xa8] sm:$0xf] }
 0x277   :  { %7565 = vst [vmem:[%s16524_s4 + $0x4] sm:$0x3] %v11760_v59  ;;  %v1371_v41 = vpack.c.bf16 %v11760_v59, %v11760_v59  ;;  %2048 = vmatpush.bf16.msra.mxu3 %v7816_v57 }
 0x279   :  { %1572 = vmatmul.bf16.vlgmr.msrb.gmra.mxu0 %v1371_v41  ;;  %1585 = vmatmul.bf16.vlgmr.msrb.gmra.mxu1 %v1371_v41 }
 0x27a   :  { %1598 = vmatmul.bf16.vlgmr.msrb.gmra.mxu2 %v1371_v41  ;;  %1611 = vmatmul.bf16.vlgmr.msrb.gmra.mxu3 %v1371_v41 }
 0x27b   :  { %2023 = vmatpush.bf16.msra.mxu1 %v7792_v35  ;;  %v9485_v35 = vld [vmem:[%s16520_s3 + $0x4c] sm:$0xf0] }
 0x27d   :  { %v1361_v48 = vld [vmem:[#allocation1] sm:$0xff] }
 0x2f6   :  { %v1573_v44 = vpop.f32.mrf.mxu0  ;;  %v1586_v60 = vpop.f32.mrf.mxu1 }
 0x2f7   :  { %v1620_v20 = vrot.slane %v1586_v60, 7 }
 0x2f9   :  { %v1623_v6 = vsel %vm286_vm0, %v1573_v44, %v1620_v20  ;;  %v1626_v7 = vsel %vm292_vm1, %v1573_v44, %v1620_v20  ;;  %v11845_v20 = vadd.f32 %v1361_v48, %v11458_v32 }
 0x2fd   :  { %v1599_v55 = vpop.f32.mrf.mxu2  ;;  %v1612_v62 = vpop.f32.mrf.mxu3 }
 0x2fe   :  { %v1621_v8 = vrot.slane %v1599_v55, 6  ;;  %v1622_v63 = vrot.slane %v1612_v62, 5  ;;  %v1575_v61 = vpop.f32.mrf.mxu0  ;;  %v1588_v1 = vpop.f32.mrf.mxu1 }
 0x300   :  { %v1624_v56 = vsel %vm288_vm2, %v1621_v8, %v1622_v63  ;;  %v1627_v10 = vsel %vm294_vm4, %v1621_v8, %v1622_v63 }
 0x301   :  { %v1625_v21 = vsel %vm16575_vm3, %v1623_v6, %v1624_v56  ;;  %v1628_v13 = vsel %vm16576_vm15, %v1626_v7, %v1627_v10  ;;  %v1765_v7 = vrot.slane %v11845_v20, 1 }
 0x302   :  { %v1629_v15 = vrot.slane %v1628_v13, 1  ;;  %v11780_v28 = vadd.f32 %v7566_v2, %v1625_v21 }
 0x304   :  { %v11782_v27 = vadd.f32 %v7567_v9, %v1629_v15  ;;  %v7696_v46 = vmul.f32 -1.442695, %v11780_v28  ;;  %v1674_v16 = vrot.slane %v11780_v28, 1  ;;  %v1722_v4 = vrot.slane %v11780_v28, 3 }
 0x305   :  { %v1601_v19 = vpop.f32.mrf.mxu2  ;;  %v1614_v5 = vpop.f32.mrf.mxu3  ;;  %v1716_v44 = vrot.slane %v11780_v28, 2 }
 0x306   :  { %9955 = vpow2.f32 %v7696_v46  ;;  %v7697_v24 = vmul.f32 -1.442695, %v11782_v27  ;;  %v1675_v33 = vrot.slane %v11782_v27, 1  ;;  %v7698_v26 = vmul.f32 -1.442695, %v1674_v16 }
 0x307   :  { %v1723_v22 = vrot.slane %v11782_v27, 3  ;;  %v7700_v12 = vmul.f32 -1.442695, %v1722_v4  ;;  %v1717_v62 = vrot.slane %v11782_v27, 2 }
 0x308   :  { %9957 = vpow2.f32 %v7697_v24  ;;  %v7699_v0 = vmul.f32 -1.442695, %v1675_v33  ;;  %v9492_v24 = vld [vmem:[%s16520_s3 + $0x8c] sm:$0xf] }
 0x309   :  { %9959 = vpow2.f32 %v7698_v26  ;;  %v7701_v29 = vmul.f32 -1.442695, %v1723_v22 }
 0x30a   :  { %9961 = vpow2.f32 %v7699_v0  ;;  %v9497_v0 = vld [vmem:[%s16520_s3 + $0xac] sm:$0xf0] }
 0x30b   :  { %9963 = vpow2.f32 %v7700_v12  ;;  %v7788_v14 = vor.u32 %v9497_v0, %v7787_v42  ;;  %v7755_v0 = vld [vmem:[%s16520_s3 + $0x60] sm:$0xf] }
 0x30c   :  { %v9956_v43 = vpop.eup %9955  ;;  %9965 = vpow2.f32 %v7701_v29 }
 0x30d   :  { %v11832_v50 = vadd.f32 1.0, %v9956_v43  ;;  %2010 = vmatpush.bf16.msra.mxu0 %v7788_v14 }
 0x30e   :  { %v9958_v54 = vpop.eup %9957 }
 0x30f   :  { %v9960_v58 = vpop.eup %9959  ;;  %v11840_v41 = vadd.f32 1.0, %v9958_v54  ;;  %9967 = vrcp.f32 %v11832_v50  ;;  %v1651_v63 = vand.u32 2147483647, %v11832_v50  ;;  %v1653_v32 = vand.u32 2147483648, %v11832_v50 }
 0x310   :  { %v9962_v60 = vpop.eup %9961  ;;  %v11847_v55 = vadd.f32 1.0, %v9960_v58  ;;  %vm1647_vm8 = vweird.f32 %v11832_v50  ;;  %v9496_v58 = vld [vmem:[%s16520_s3 + $0xac] sm:$0xf] }
 0x311   :  { %9969 = vrcp.f32 %v11840_v41  ;;  %v9964_v8 = vpop.eup %9963  ;;  %v11852_v61 = vadd.f32 1.0, %v9962_v60  ;;  %v1666_v2 = vand.u32 2147483647, %v11840_v41  ;;  %v1668_v6 = vand.u32 2147483648, %v11840_v41 }
 0x312   :  { %9971 = vrcp.f32 %v11847_v55  ;;  %v9966_v1 = vpop.eup %9965  ;;  %v1695_v10 = vand.u32 2147483647, %v11847_v55  ;;  %v11862_v9 = vadd.f32 1.0, %v9964_v8  ;;  %vm11865_vm9 = vcmp.eq.f32.partialorder %v1651_v63, 8.507059e+37  ;;  %v7771_v63 = vld [vmem:[%s16520_s3 + $0x80] sm:$0xf] }
 0x313   :  { %9973 = vtanh.f32 %v1716_v44  ;;  %vm1662_vm10 = vweird.f32 %v11840_v41  ;;  %v11870_v15 = vadd.f32 1.0, %v9966_v1  ;;  %v1654_v27 = vor.u32 1.1754944e-38, %v1653_v32  ;;  %v7797_v44 = vld [vmem:[%s16520_s3 + $0xb8] sm:$0xf0] }
 0x314   :  { %9975 = vrcp.f32 %v11852_v61  ;;  %v1697_v46 = vand.u32 2147483648, %v11847_v55  ;;  %v1710_v16 = vand.u32 2147483647, %v11852_v61  ;;  %vm11881_vm11 = vcmp.eq.f32.partialorder %v1666_v2, 8.507059e+37 }
 0x315   :  { %v9968_v56 = vpop.eup %9967  ;;  %9977 = vtanh.f32 %v1717_v62  ;;  %v1669_v33 = vor.u32 1.1754944e-38, %v1668_v6  ;;  %vm1691_vm12 = vweird.f32 %v11847_v55  ;;  %vm11888_vm14 = vcmp.eq.f32.partialorder %v1695_v10, 8.507059e+37  ;;  %v9493_v6 = vld [vmem:[%s16520_s3 + $0x8c] sm:$0xf0] }
 0x316   :  { %v1643_v21 = vmul.f32 %v9968_v56, %v11832_v50  ;;  %9979 = vrcp.f32 %v11862_v9  ;;  %vm1706_vm5 = vweird.f32 %v11852_v61  ;;  %vm1648_vm6 = vweird.f32 %v9968_v56  ;;  %v9498_v50 = vld [vmem:[%s16520_s3 + $0xb4] sm:$0xf0] }
 0x317   :  { %v11872_v28 = vpop.eup %9969  ;;  %9981 = vrcp.f32 %v11870_v15  ;;  %v1712_v18 = vand.u32 2147483648, %v11852_v61  ;;  %v1698_v39 = vor.u32 1.1754944e-38, %v1697_v46  ;;  %vm11911_vm7 = vcmp.eq.f32.partialorder %v1710_v16, 8.507059e+37  ;;  %vm1649_vm3 = vmor %vm1647_vm8, %vm1648_vm6  ;;  %v7779_v46 = vld [vmem:[%s16520_s3 + $0x88] sm:$0xf] }
 0x318   :  { %v11877_v4 = vpop.eup %9971  ;;  %v1644_v19 = vsub.f32 1.0, %v1643_v21  ;;  %v1658_v5 = vmul.f32 %v11872_v28, %v11840_v41  ;;  %vm1663_vm13 = vweird.f32 %v11872_v28  ;;  %v1743_v62 = vand.u32 2147483647, %v11862_v9 }
 0x319   :  { %v9974_v26 = vpop.eup %9973  ;;  %v1687_v22 = vmul.f32 %v11877_v4, %v11847_v55  ;;  %vm1692_vm15 = vweird.f32 %v11877_v4  ;;  %v1713_v48 = vor.u32 1.1754944e-38, %v1712_v18  ;;  %vm1664_vm8 = vmor %vm1662_vm10, %vm1663_vm13  ;;  %v1745_v55 = vand.u32 2147483648, %v11862_v9 }
 0x31a   :  { %v11900_v3 = vpop.eup %9975  ;;  %v1645_v37 = vmul.f32 %v9968_v56, %v1644_v19  ;;  %v1659_v29 = vsub.f32 1.0, %v1658_v5  ;;  %v7796_v19 = vor.u32 %v9498_v50, %v7795_v53  ;;  %v7800_v5 = vor.u32 %v9496_v58, %v7797_v44  ;;  %v7741_v53 = vld [vmem:[%s16520_s3 + $0x50] sm:$0xf0]  ;;  %v7747_v58 = vld [vmem:[%s16520_s3 + $0x48] sm:$0xf] }
 0x31b   :  { %v9978_v11 = vpop.eup %9977  ;;  %v1688_v36 = vsub.f32 1.0, %v1687_v22  ;;  %v1702_v40 = vmul.f32 %v11900_v3, %v11852_v61  ;;  %vm1707_vm6 = vweird.f32 %v11900_v3  ;;  %v9494_v61 = vld [vmem:[%s16520_s3 + $0x94] sm:$0xf0]  ;;  %v7772_v42 = vor.u32 %v9493_v6, %v7771_v63  ;;  %v7749_v63 = vld [vmem:[%s16520_s3 + $0x58] sm:$0xf0] }
 0x31c   :  { %v1646_v25 = vadd.f32 %v9968_v56, %v1645_v37  ;;  %v1660_v17 = vmul.f32 %v11872_v28, %v1659_v29  ;;  %v11917_v52 = vpop.eup %9979  ;;  %vm1708_vm10 = vmor %vm1706_vm5, %vm1707_vm6  ;;  %2036 = vmatpush.bf16.msra.mxu2 %v7796_v19  ;;  %2049 = vmatpush.bf16.msra.mxu3 %v7800_v5  ;;  %v1758_v14 = vand.u32 2147483647, %v11870_v15  ;;  %v7733_v19 = vld [vmem:[%s16520_s3 + $0x38] sm:$0xf0]  ;;  %vm16592_vm6 = vcmask 1042433  }
 0x31d   :  { %v1689_v43 = vmul.f32 %v11877_v4, %v1688_v36  ;;  %v1703_v45 = vsub.f32 1.0, %v1702_v40  ;;  %v1735_v51 = vmul.f32 %v11917_v52, %v11862_v9  ;;  %v11933_v49 = vpop.eup %9981  ;;  %2011 = vmatpush.bf16.msra.mxu0 %v7772_v42 }
 0x31e   :  { %v1650_v47 = vsel %vm1649_vm3, %v9968_v56, %v1646_v25  ;;  %v1661_v23 = vadd.f32 %v11872_v28, %v1660_v17  ;;  %v1750_v8 = vmul.f32 %v11933_v49, %v11870_v15  ;;  %v9491_v56 = vld [vmem:[%s16520_s3 + $0x84] sm:$0xf]  ;;  %v9488_v25 = vld [vmem:[%s16520_s3 + $0x6c] sm:$0xf]  ;;  %v7765_v17 = vld [vmem:[%s16520_s3 + $0x78] sm:$0xf0] }
 0x31f   :  { %v1655_v38 = vsel %vm11865_vm9, %v1654_v27, %v1650_v47  ;;  %v1690_v54 = vadd.f32 %v11877_v4, %v1689_v43  ;;  %v1704_v57 = vmul.f32 %v11900_v3, %v1703_v45  ;;  %vm1693_vm9 = vmor %vm1691_vm12, %vm1692_vm15  ;;  %v1736_v41 = vsub.f32 1.0, %v1735_v51  ;;  %v7773_v27 = vld [vmem:[%s16520_s3 + $0x90] sm:$0xf0]  ;;  %v7739_v45 = vld [vmem:[%s16520_s3 + $0x40] sm:$0xf] }
 0x320   :  { %v1665_v60 = vsel %vm1664_vm8, %v11872_v28, %v1661_v23  ;;  %v1751_v13 = vsub.f32 1.0, %v1750_v8  ;;  %v1769_v28 = vmul.f32 %v9974_v26, %v1655_v38  ;;  %v7776_v18 = vor.u32 %v9491_v56, %v7773_v27  ;;  %v9483_v51 = vld [vmem:[%s16520_s3 + $0x44] sm:$0xf]  ;;  %v9484_v8 = vld [vmem:[%s16520_s3 + $0x4c] sm:$0xf] }
 0x321   :  { %v1670_v1 = vsel %vm11881_vm11, %v1669_v33, %v1665_v60  ;;  %v1694_v32 = vsel %vm1693_vm9, %v11877_v4, %v1690_v54  ;;  %v1705_v2 = vadd.f32 %v11900_v3, %v1704_v57  ;;  %v1737_v21 = vmul.f32 %v11917_v52, %v1736_v41  ;;  %v7781_v33 = vld [vmem:[%s16520_s3 + $0x98] sm:$0xf0]  ;;  %v9486_v41 = vld [vmem:[%s16520_s3 + $0x54] sm:$0xf0]  ;;  %v9479_v56 = vld [vmem:[%s16520_s3 + $0x24] sm:$0xf] }
 0x322   :  { %v1699_v10 = vsel %vm11888_vm14, %v1698_v39, %v1694_v32  ;;  %v1752_v22 = vmul.f32 %v11933_v49, %v1751_v13  ;;  %v1770_v12 = vmul.f32 %v9978_v11, %v1670_v1  ;;  %v7763_v11 = vld [vmem:[%s16520_s3 + $0x68] sm:$0xf]  ;;  %vm1740_vm11 = vweird.f32 %v11917_v52  ;;  %2024 = vmatpush.bf16.msra.mxu1 %v7776_v18  ;;  %v7723_v32 = vld [vmem:[%s16520_s3 + $0x20] sm:$0xf] }
 0x323   :  { %v1709_v16 = vsel %vm1708_vm10, %v11900_v3, %v1705_v2  ;;  %v1767_v4 = vmul.f32 %v1699_v10, %v11845_v20  ;;  %v9489_v3 = vld [vmem:[%s16520_s3 + $0x6c] sm:$0xf0]  ;;  %v1738_v36 = vadd.f32 %v11917_v52, %v1737_v21  ;;  %v7780_v39 = vor.u32 %v9494_v61, %v7779_v46  ;;  %v7725_v10 = vld [vmem:[%s16520_s3 + $0x30] sm:$0xf0] }
 0x324   :  { %v1714_v26 = vsel %vm11911_vm7, %v1713_v48, %v1709_v16  ;;  %v7784_v40 = vor.u32 %v9492_v24, %v7781_v33  ;;  %vm1739_vm12 = vweird.f32 %v11862_v9  ;;  %v1753_v47 = vadd.f32 %v11933_v49, %v1752_v22  ;;  %v9481_v2 = vld [vmem:[%s16520_s3 + $0x2c] sm:$0xf0]  ;;  %v9482_v16 = vld [vmem:[%s16520_s3 + $0x34] sm:$0xf0]  ;;  %v7707_v33 = vld [vmem:[%s16520_s3] sm:$0xf] }
 0x325   :  { %v1768_v37 = vmul.f32 %v1765_v7, %v1714_v26  ;;  %v12007_v29 = vadd.f32 %v1769_v28, %v1767_v4  ;;  %vm1755_vm14 = vweird.f32 %v11933_v49  ;;  %v7756_v23 = vor.u32 %v9489_v3, %v7755_v0  ;;  %vm12050_vm5 = vmor %vm1739_vm12, %vm1740_vm11  ;;  %2037 = vmatpush.bf16.msra.mxu2 %v7780_v39  ;;  %v9480_v4 = vld [vmem:[%s16520_s3 + $0x2c] sm:$0xf]  ;;  %v9477_v26 = vld [vmem:[%s16520_s3 + $0xc] sm:$0xf0] }
 0x326   :  { %v7760_v48 = vor.u32 %v9487_v30, %v7757_v34  ;;  %v1760_v38 = vand.u32 2147483648, %v11870_v15  ;;  %2050 = vmatpush.bf16.msra.mxu3 %v7784_v40  ;;  %v7764_v54 = vor.u32 %v9490_v31, %v7763_v11  ;;  %v7768_v57 = vor.u32 %v9488_v25, %v7765_v17  ;;  %v9475_v0 = vld [vmem:[%s16520_s3 + $0x4] sm:$0xf]  ;;  %v7709_v3 = vld [vmem:[%s16520_s3 + $0x10] sm:$0xf0] }
 0x327   :  { %v12031_v43 = vadd.f32 %v1770_v12, %v1768_v37  ;;  %9983 = vtanh.f32 %v12007_v29  ;;  %v1742_v44 = vsel %vm12050_vm5, %v11917_v52, %v1738_v36  ;;  %vm1754_vm7 = vweird.f32 %v11870_v15  ;;  %2012 = vmatpush.bf16.msra.mxu0 %v7756_v23  ;;  %v7715_v30 = vld [vmem:[%s16520_s3 + $0x8] sm:$0xf]  ;;  %v9478_v34 = vld [vmem:[%s16520_s3 + $0x14] sm:$0xf0]  ;;  %v9476_v39 = vld [vmem:[%s16520_s3 + $0xc] sm:$0xf] }
 0x328   :  { %v7740_v60 = vor.u32 %v9485_v35, %v7739_v45  ;;  %v1746_v1 = vor.u32 1.1754944e-38, %v1745_v55  ;;  %vm12076_vm13 = vmor %vm1754_vm7, %vm1755_vm14  ;;  %2025 = vmatpush.bf16.msra.mxu1 %v7760_v48  ;;  %v7744_v52 = vor.u32 %v9483_v51, %v7741_v53  ;;  %vm1744_vm3 = vcmp.eq.f32.partialorder %v1743_v62, 8.507059e+37  ;;  %v7717_v40 = vld [vmem:[%s16520_s3 + $0x18] sm:$0xf0] }
 0x329   :  { %9985 = vtanh.f32 %v12031_v43  ;;  %v1757_v55 = vsel %vm12076_vm13, %v11933_v49, %v1753_v47  ;;  %vm12091_vm15 = vcmp.eq.f32.partialorder %v1758_v14, 8.507059e+37  ;;  %v1761_v9 = vor.u32 1.1754944e-38, %v1760_v38  ;;  %2038 = vmatpush.bf16.msra.mxu2 %v7764_v54  ;;  %v7731_v49 = vld [vmem:[%s16520_s3 + $0x28] sm:$0xf] }
 0x32a   :  { %v1747_v13 = vsel %vm1744_vm3, %v1746_v1, %v1742_v44  ;;  %2051 = vmatpush.bf16.msra.mxu3 %v7768_v57  ;;  %v7748_v62 = vor.u32 %v9486_v41, %v7747_v58  ;;  %v7752_v28 = vor.u32 %v9484_v8, %v7749_v63  ;;  %v7724_v46 = vor.u32 %v9481_v2, %v7723_v32  ;;  %v7703_v54 = vld [vmem:[%s16523_s0 + $0x4] ss:$8 sm:$0xf] }
 0x32b   :  { %2013 = vmatpush.bf16.msra.mxu0 %v7740_v60  ;;  %v1762_v61 = vsel %vm12091_vm15, %v1761_v9, %v1757_v55  ;;  %v7728_v24 = vor.u32 %v9479_v56, %v7725_v10  ;;  %v1781_v22 = vrot.slane %v11760_v59, 1  ;;  %v7732_v37 = vor.u32 %v9482_v16, %v7731_v49  ;;  %v7704_v41 = vld [vmem:[%s16523_s0 + $0x44] ss:$8 sm:$0xf] }
 0x32c   :  { %2026 = vmatpush.bf16.msra.mxu1 %v7744_v52  ;;  %v7736_v18 = vor.u32 %v9480_v4, %v7733_v19  ;;  %v7708_v36 = vor.u32 %v9477_v26, %v7707_v33  ;;  %v7712_v31 = vor.u32 %v9475_v0, %v7709_v3  ;;  %v7716_v25 = vor.u32 %v9478_v34, %v7715_v30  ;;  %v7958_v19 = vld [vmem:[%s16520_s3 + $0xf0] sm:$0xf0]  ;;  %v9536_v33 = vld [vmem:[%s16520_s3 + $0xec] sm:$0xf]  ;;  %v7966_v26 = vld [vmem:[%s16520_s3 + $0xf8] sm:$0xf0] }
 0x32d   :  { %v9984_v21 = vpop.eup %9983  ;;  %2039 = vmatpush.bf16.msra.mxu2 %v7748_v62  ;;  %v7720_v17 = vor.u32 %v9476_v39, %v7717_v40  ;;  %v1796_v14 = vsub.f32 %v12007_v29, %v11845_v20  ;;  %v1797_v35 = vsub.f32 %v12031_v43, %v1765_v7  ;;  %vm16591_vm8 = vcmask 1041408   ;;  %v9533_v0 = vld [vmem:[%s16520_s3 + $0xcc] sm:$0xf0]  ;;  %v9531_v3 = vld [vmem:[%s16520_s3 + $0xc4] sm:$0xf] }
 0x32e   :  { %v1775_v27 = vmul.f32 %v9984_v21, %v1747_v13  ;;  %2052 = vmatpush.bf16.msra.mxu3 %v7752_v28  ;;  %v7956_v28 = vld [vmem:[%s16520_s3 + $0xe0] sm:$0xf]  ;;  %v7942_v30 = vld [vmem:[%s16520_s3 + $0xd0] sm:$0xf0]  ;;  %v7948_v34 = vld [vmem:[%s16520_s3 + $0xc8] sm:$0xf] }
 0x32f   :  { %v9986_v5 = vpop.eup %9985  ;;  %2014 = vmatpush.bf16.msra.mxu0 %v7724_v46  ;;  %v9535_v46 = vld [vmem:[%s16520_s3 + $0xe4] sm:$0xf]  ;;  %v7945_v40 = vor.u32 %v9531_v3, %v7942_v30 }
 0x330   :  { %v1776_v12 = vmul.f32 %v9986_v5, %v1762_v61  ;;  %v1783_v42 = vsub.f32 %v1775_v27, %v11760_v59  ;;  %2027 = vmatpush.bf16.msra.mxu1 %v7728_v24  ;;  %v9537_v27 = vld [vmem:[%s16520_s3 + $0xec] sm:$0xf0]  ;;  %v7964_v5 = vld [vmem:[%s16520_s3 + $0xe8] sm:$0xf]  ;;  %v7961_v61 = vor.u32 %v9535_v46, %v7958_v19  ;;  %v9538_v24 = vld [vmem:[%s16520_s3 + $0xf4] sm:$0xf0] }
 0x331   :  { %2040 = vmatpush.bf16.msra.mxu2 %v7732_v37  ;;  %v7957_v4 = vor.u32 %v9537_v27, %v7956_v28  ;;  %v7924_v28 = vld [vmem:[%s16520_s3 + $0xa0] sm:$0xf]  ;;  %v9527_v19 = vld [vmem:[%s16520_s3 + $0xa4] sm:$0xf] }
 0x332   :  { %v1784_v11 = vsub.f32 %v1776_v12, %v1781_v22  ;;  %1790 = vst [vmem:[#allocation1] ss:$9 sm:$0xff] %v1783_v42  ;;  %2053 = vmatpush.bf16.msra.mxu3 %v7736_v18  ;;  %v7965_v22 = vor.u32 %v9538_v24, %v7964_v5  ;;  %v7969_v12 = vor.u32 %v9536_v33, %v7966_v26  ;;  %v7940_v42 = vld [vmem:[%s16520_s3 + $0xc0] sm:$0xf]  ;;  %v7926_v5 = vld [vmem:[%s16520_s3 + $0xb0] sm:$0xf0] }
 0x333   :  { %2015 = vmatpush.bf16.msra.mxu0 %v7708_v36  ;;  %v7941_v18 = vor.u32 %v9533_v0, %v7940_v42  ;;  %v7929_v30 = vor.u32 %v9527_v19, %v7926_v5  ;;  %v9519_v19 = vld [vmem:[%s16520_s3 + $0x64] sm:$0xf]  ;;  %v7894_v5 = vld [vmem:[%s16520_s3 + $0x70] sm:$0xf0] }
 0x334   :  { %1792 = vst [vmem:[#allocation1 + $0x1] ss:$9 sm:$0xff] %v1784_v11  ;;  %2028 = vmatpush.bf16.msra.mxu1 %v7712_v31  ;;  %v9534_v11 = vld [vmem:[%s16520_s3 + $0xd4] sm:$0xf0] }
 0x335   :  { %2041 = vmatpush.bf16.msra.mxu2 %v7716_v25  ;;  %v7949_v31 = vor.u32 %v9534_v11, %v7948_v34  ;;  %v9532_v25 = vld [vmem:[%s16520_s3 + $0xcc] sm:$0xf] }
 0x336   :  { %2054 = vmatpush.bf16.msra.mxu3 %v7720_v17  ;;  %v7950_v17 = vld [vmem:[%s16520_s3 + $0xd8] sm:$0xf0] }
 0x337   :  { %2452 = vmatpush.bf16.msrb.mxu0 %v7957_v4 }
 0x338   :  { %2465 = vmatpush.bf16.msrb.mxu1 %v7961_v61 }
 0x339   :  { %2478 = vmatpush.bf16.msrb.mxu2 %v7965_v22  ;;  %v9522_v22 = vld [vmem:[%s16520_s3 + $0x74] sm:$0xf0] }
 0x33a   :  { %2491 = vmatpush.bf16.msrb.mxu3 %v7969_v12 }
 0x33b   :  { %v1793_v45 = vld [vmem:[#allocation1] sm:$0xff]  ;;  %2453 = vmatpush.bf16.msrb.mxu0 %v7941_v18 }
 0x33c   :  { %1802 = vst [vmem:[#allocation1] ss:$9 sm:$0xff] %v1796_v14  ;;  %v12147_v47 = vadd.f32 %v1793_v45, %v11760_v59  ;;  %v7953_v45 = vor.u32 %v9532_v25, %v7950_v17  ;;  %2466 = vmatpush.bf16.msrb.mxu1 %v7945_v40 }
 0x33d   :  { %1804 = vst [vmem:[#allocation1 + $0x1] ss:$9 sm:$0xff] %v1797_v35  ;;  %2479 = vmatpush.bf16.msrb.mxu2 %v7949_v31  ;;  %v7932_v31 = vld [vmem:[%s16520_s3 + $0xa8] sm:$0xf] }
 0x33e   :  { %7702 = vst [vmem:[%s16524_s4 + $0x6] sm:$0x3] %v12147_v47  ;;  %v1815_v23 = vpack.c.bf16 %v12147_v47, %v12147_v47  ;;  %2492 = vmatpush.bf16.msrb.mxu3 %v7953_v45 }
 0x340   :  { %2016 = vmatmul.bf16.vlgmr.msra.gmra.mxu0 %v1815_v23  ;;  %2029 = vmatmul.bf16.vlgmr.msra.gmra.mxu1 %v1815_v23 }
 0x341   :  { %2042 = vmatmul.bf16.vlgmr.msra.gmra.mxu2 %v1815_v23  ;;  %2055 = vmatmul.bf16.vlgmr.msra.gmra.mxu3 %v1815_v23 }
 0x342   :  { %2467 = vmatpush.bf16.msrb.mxu1 %v7929_v30  ;;  %v9517_v30 = vld [vmem:[%s16520_s3 + $0x4c] sm:$0xf0] }
 0x344   :  { %v1805_v36 = vld [vmem:[#allocation1] sm:$0xff] }
 0x3bd   :  { %v2017_v29 = vpop.f32.mrf.mxu0  ;;  %v2030_v48 = vpop.f32.mrf.mxu1 }
 0x3be   :  { %v2064_v7 = vrot.slane %v2030_v48, 7 }
 0x3c0   :  { %v2067_v57 = vsel %vm286_vm0, %v2017_v29, %v2064_v7  ;;  %v2070_v58 = vsel %vm292_vm1, %v2017_v29, %v2064_v7  ;;  %v12232_v7 = vadd.f32 %v1805_v36, %v11845_v20 }
 0x3c4   :  { %v2043_v43 = vpop.f32.mrf.mxu2  ;;  %v2056_v51 = vpop.f32.mrf.mxu3 }
 0x3c5   :  { %v2065_v59 = vrot.slane %v2043_v43, 6  ;;  %v2066_v53 = vrot.slane %v2056_v51, 5  ;;  %v2019_v50 = vpop.f32.mrf.mxu0  ;;  %v2032_v38 = vpop.f32.mrf.mxu1 }
 0x3c7   :  { %v2068_v44 = vsel %vm288_vm2, %v2065_v59, %v2066_v53  ;;  %v2071_v60 = vsel %vm294_vm4, %v2065_v59, %v2066_v53 }
 0x3c8   :  { %v2069_v8 = vsel %vm16591_vm8, %v2067_v57, %v2068_v44  ;;  %v2072_v63 = vsel %vm16592_vm6, %v2070_v58, %v2071_v60  ;;  %v2209_v58 = vrot.slane %v12232_v7, 1 }
 0x3c9   :  { %v2073_v1 = vrot.slane %v2072_v63, 1  ;;  %v12167_v15 = vadd.f32 %v7703_v54, %v2069_v8 }
 0x3cb   :  { %v12169_v52 = vadd.f32 %v7704_v41, %v2073_v1  ;;  %v7833_v32 = vmul.f32 -1.442695, %v12167_v15  ;;  %v2118_v2 = vrot.slane %v12167_v15, 1  ;;  %v2166_v55 = vrot.slane %v12167_v15, 3 }
 0x3cc   :  { %v2045_v6 = vpop.f32.mrf.mxu2  ;;  %v2058_v56 = vpop.f32.mrf.mxu3  ;;  %v2160_v29 = vrot.slane %v12167_v15, 2 }
 0x3cd   :  { %9987 = vpow2.f32 %v7833_v32  ;;  %v7834_v10 = vmul.f32 -1.442695, %v12169_v52  ;;  %v2119_v21 = vrot.slane %v12169_v52, 1  ;;  %v7835_v13 = vmul.f32 -1.442695, %v2118_v2 }
 0x3ce   :  { %v2167_v9 = vrot.slane %v12169_v52, 3  ;;  %v7837_v62 = vmul.f32 -1.442695, %v2166_v55  ;;  %v2161_v51 = vrot.slane %v12169_v52, 2 }
 0x3cf   :  { %9989 = vpow2.f32 %v7834_v10  ;;  %v7836_v49 = vmul.f32 -1.442695, %v2119_v21  ;;  %v9524_v10 = vld [vmem:[%s16520_s3 + $0x8c] sm:$0xf] }
 0x3d0   :  { %9991 = vpow2.f32 %v7835_v13  ;;  %v7838_v16 = vmul.f32 -1.442695, %v2167_v9 }
 0x3d1   :  { %9993 = vpow2.f32 %v7836_v49  ;;  %v9529_v49 = vld [vmem:[%s16520_s3 + $0xac] sm:$0xf0] }
 0x3d2   :  { %9995 = vpow2.f32 %v7837_v62  ;;  %v7925_v0 = vor.u32 %v9529_v49, %v7924_v28  ;;  %v7892_v49 = vld [vmem:[%s16520_s3 + $0x60] sm:$0xf] }
 0x3d3   :  { %v9988_v37 = vpop.eup %9987  ;;  %9997 = vpow2.f32 %v7838_v16 }
 0x3d4   :  { %v12219_v39 = vadd.f32 1.0, %v9988_v37  ;;  %2454 = vmatpush.bf16.msrb.mxu0 %v7925_v0 }
 0x3d5   :  { %v9990_v14 = vpop.eup %9989 }
 0x3d6   :  { %v9992_v35 = vpop.eup %9991  ;;  %v12227_v23 = vadd.f32 1.0, %v9990_v14  ;;  %9999 = vrcp.f32 %v12219_v39  ;;  %v2095_v53 = vand.u32 2147483647, %v12219_v39  ;;  %v2097_v20 = vand.u32 2147483648, %v12219_v39 }
 0x3d7   :  { %v9994_v48 = vpop.eup %9993  ;;  %v12234_v43 = vadd.f32 1.0, %v9992_v35  ;;  %vm2091_vm9 = vweird.f32 %v12219_v39  ;;  %v9528_v35 = vld [vmem:[%s16520_s3 + $0xac] sm:$0xf] }
 0x3d8   :  { %10001 = vrcp.f32 %v12227_v23  ;;  %v9996_v59 = vpop.eup %9995  ;;  %v12239_v50 = vadd.f32 1.0, %v9994_v48  ;;  %v2110_v54 = vand.u32 2147483647, %v12227_v23  ;;  %v2112_v57 = vand.u32 2147483648, %v12227_v23 }
 0x3d9   :  { %10003 = vrcp.f32 %v12234_v43  ;;  %v9998_v38 = vpop.eup %9997  ;;  %v2139_v60 = vand.u32 2147483647, %v12234_v43  ;;  %v12249_v41 = vadd.f32 1.0, %v9996_v59  ;;  %vm12252_vm10 = vcmp.eq.f32.partialorder %v2095_v53, 8.507059e+37  ;;  %v7908_v53 = vld [vmem:[%s16520_s3 + $0x80] sm:$0xf] }
 0x3da   :  { %10005 = vtanh.f32 %v2160_v29  ;;  %vm2106_vm11 = vweird.f32 %v12227_v23  ;;  %v12257_v1 = vadd.f32 1.0, %v9998_v38  ;;  %v2098_v52 = vor.u32 1.1754944e-38, %v2097_v20  ;;  %v7934_v29 = vld [vmem:[%s16520_s3 + $0xb8] sm:$0xf0] }
 0x3db   :  { %10007 = vrcp.f32 %v12239_v50  ;;  %v2141_v32 = vand.u32 2147483648, %v12234_v43  ;;  %v2154_v2 = vand.u32 2147483647, %v12239_v50  ;;  %vm12268_vm12 = vcmp.eq.f32.partialorder %v2110_v54, 8.507059e+37 }
 0x3dc   :  { %v10000_v44 = vpop.eup %9999  ;;  %10009 = vtanh.f32 %v2161_v51  ;;  %v2113_v21 = vor.u32 1.1754944e-38, %v2112_v57  ;;  %vm2135_vm14 = vweird.f32 %v12234_v43  ;;  %vm12275_vm5 = vcmp.eq.f32.partialorder %v2139_v60, 8.507059e+37  ;;  %v9525_v57 = vld [vmem:[%s16520_s3 + $0x8c] sm:$0xf0] }
 0x3dd   :  { %v2087_v8 = vmul.f32 %v10000_v44, %v12219_v39  ;;  %10011 = vrcp.f32 %v12249_v41  ;;  %vm2150_vm7 = vweird.f32 %v12239_v50  ;;  %vm2092_vm13 = vweird.f32 %v10000_v44  ;;  %v9530_v39 = vld [vmem:[%s16520_s3 + $0xb4] sm:$0xf0] }
 0x3de   :  { %v12259_v15 = vpop.eup %10001  ;;  %10013 = vrcp.f32 %v12257_v1  ;;  %v2156_v4 = vand.u32 2147483648, %v12239_v50  ;;  %v2142_v33 = vor.u32 1.1754944e-38, %v2141_v32  ;;  %vm12298_vm3 = vcmp.eq.f32.partialorder %v2154_v2, 8.507059e+37  ;;  %vm2093_vm8 = vmor %vm2091_vm9, %vm2092_vm13  ;;  %v7916_v32 = vld [vmem:[%s16520_s3 + $0x88] sm:$0xf] }
 0x3df   :  { %v12264_v55 = vpop.eup %10003  ;;  %v2088_v6 = vsub.f32 1.0, %v2087_v8  ;;  %v2102_v56 = vmul.f32 %v12259_v15, %v12227_v23  ;;  %vm2107_vm15 = vweird.f32 %v12259_v15  ;;  %v2187_v51 = vand.u32 2147483647, %v12249_v41 }
 0x3e0   :  { %v10006_v13 = vpop.eup %10005  ;;  %v2131_v9 = vmul.f32 %v12264_v55, %v12234_v43  ;;  %vm2136_vm6 = vweird.f32 %v12264_v55  ;;  %v2157_v36 = vor.u32 1.1754944e-38, %v2156_v4  ;;  %vm2108_vm9 = vmor %vm2106_vm11, %vm2107_vm15  ;;  %v2189_v43 = vand.u32 2147483648, %v12249_v41 }
 0x3e1   :  { %v12287_v27 = vpop.eup %10007  ;;  %v2089_v46 = vmul.f32 %v10000_v44, %v2088_v6  ;;  %v2103_v16 = vsub.f32 1.0, %v2102_v56  ;;  %v7933_v6 = vor.u32 %v9530_v39, %v7932_v31  ;;  %v7937_v56 = vor.u32 %v9528_v35, %v7934_v29  ;;  %v7878_v31 = vld [vmem:[%s16520_s3 + $0x50] sm:$0xf0]  ;;  %v7884_v35 = vld [vmem:[%s16520_s3 + $0x48] sm:$0xf] }
 0x3e2   :  { %v10010_v61 = vpop.eup %10009  ;;  %v2132_v24 = vsub.f32 1.0, %v2131_v9  ;;  %v2146_v26 = vmul.f32 %v12287_v27, %v12239_v50  ;;  %vm2151_vm13 = vweird.f32 %v12287_v27  ;;  %v9526_v50 = vld [vmem:[%s16520_s3 + $0x94] sm:$0xf0]  ;;  %v7909_v28 = vor.u32 %v9525_v57, %v7908_v53  ;;  %v7886_v53 = vld [vmem:[%s16520_s3 + $0x58] sm:$0xf0] }
 0x3e3   :  { %v2090_v12 = vadd.f32 %v10000_v44, %v2089_v46  ;;  %v2104_v42 = vmul.f32 %v12259_v15, %v2103_v16  ;;  %v12304_v3 = vpop.eup %10011  ;;  %vm2152_vm11 = vmor %vm2150_vm7, %vm2151_vm13  ;;  %2480 = vmatpush.bf16.msrb.mxu2 %v7933_v6  ;;  %2493 = vmatpush.bf16.msrb.mxu3 %v7937_v56  ;;  %v2202_v0 = vand.u32 2147483647, %v12257_v1  ;;  %v7870_v6 = vld [vmem:[%s16520_s3 + $0x38] sm:$0xf0]  ;;  %vm16608_vm13 = vcmask 1042433  }
 0x3e4   :  { %v2133_v37 = vmul.f32 %v12264_v55, %v2132_v24  ;;  %v2147_v18 = vsub.f32 1.0, %v2146_v26  ;;  %v2179_v40 = vmul.f32 %v12304_v3, %v12249_v41  ;;  %v12320_v25 = vpop.eup %10013  ;;  %2455 = vmatpush.bf16.msrb.mxu0 %v7909_v28 }
 0x3e5   :  { %v2094_v34 = vsel %vm2093_vm8, %v10000_v44, %v2090_v12  ;;  %v2105_v11 = vadd.f32 %v12259_v15, %v2104_v42  ;;  %v2194_v59 = vmul.f32 %v12320_v25, %v12257_v1  ;;  %v9523_v44 = vld [vmem:[%s16520_s3 + $0x84] sm:$0xf]  ;;  %v9520_v12 = vld [vmem:[%s16520_s3 + $0x6c] sm:$0xf]  ;;  %v7902_v42 = vld [vmem:[%s16520_s3 + $0x78] sm:$0xf0] }
 0x3e6   :  { %v2099_v17 = vsel %vm12252_vm10, %v2098_v52, %v2094_v34  ;;  %v2134_v14 = vadd.f32 %v12264_v55, %v2133_v37  ;;  %v2148_v45 = vmul.f32 %v12287_v27, %v2147_v18  ;;  %vm2137_vm10 = vmor %vm2135_vm14, %vm2136_vm6  ;;  %v2180_v23 = vsub.f32 1.0, %v2179_v40  ;;  %v7910_v52 = vld [vmem:[%s16520_s3 + $0x90] sm:$0xf0]  ;;  %v7876_v18 = vld [vmem:[%s16520_s3 + $0x40] sm:$0xf] }
 0x3e7   :  { %v2109_v48 = vsel %vm2108_vm9, %v12259_v15, %v2105_v11  ;;  %v2195_v63 = vsub.f32 1.0, %v2194_v59  ;;  %v2213_v15 = vmul.f32 %v10006_v13, %v2099_v17  ;;  %v7913_v4 = vor.u32 %v9523_v44, %v7910_v52  ;;  %v9515_v40 = vld [vmem:[%s16520_s3 + $0x44] sm:$0xf]  ;;  %v9516_v59 = vld [vmem:[%s16520_s3 + $0x4c] sm:$0xf] }
 0x3e8   :  { %v2114_v38 = vsel %vm12268_vm12, %v2113_v21, %v2109_v48  ;;  %v2138_v20 = vsel %vm2137_vm10, %v12264_v55, %v2134_v14  ;;  %v2149_v54 = vadd.f32 %v12287_v27, %v2148_v45  ;;  %v2181_v8 = vmul.f32 %v12304_v3, %v2180_v23  ;;  %v7918_v21 = vld [vmem:[%s16520_s3 + $0x98] sm:$0xf0]  ;;  %v9518_v23 = vld [vmem:[%s16520_s3 + $0x54] sm:$0xf0]  ;;  %v9511_v44 = vld [vmem:[%s16520_s3 + $0x24] sm:$0xf] }
 0x3e9   :  { %v2143_v60 = vsel %vm12275_vm5, %v2142_v33, %v2138_v20  ;;  %v2196_v9 = vmul.f32 %v12320_v25, %v2195_v63  ;;  %v2214_v62 = vmul.f32 %v10010_v61, %v2114_v38  ;;  %v7900_v61 = vld [vmem:[%s16520_s3 + $0x68] sm:$0xf]  ;;  %vm2184_vm12 = vweird.f32 %v12304_v3  ;;  %2468 = vmatpush.bf16.msrb.mxu1 %v7913_v4  ;;  %v7860_v20 = vld [vmem:[%s16520_s3 + $0x20] sm:$0xf] }
 0x3ea   :  { %v2153_v2 = vsel %vm2152_vm11, %v12287_v27, %v2149_v54  ;;  %v2211_v55 = vmul.f32 %v2143_v60, %v12232_v7  ;;  %v9521_v27 = vld [vmem:[%s16520_s3 + $0x6c] sm:$0xf0]  ;;  %v2182_v24 = vadd.f32 %v12304_v3, %v2181_v8  ;;  %v7917_v33 = vor.u32 %v9526_v50, %v7916_v32  ;;  %v7862_v60 = vld [vmem:[%s16520_s3 + $0x30] sm:$0xf0] }
 0x3eb   :  { %v2158_v13 = vsel %vm12298_vm3, %v2157_v36, %v2153_v2  ;;  %v7921_v26 = vor.u32 %v9524_v10, %v7918_v21  ;;  %vm2183_vm14 = vweird.f32 %v12249_v41  ;;  %v2197_v34 = vadd.f32 %v12320_v25, %v2196_v9  ;;  %v9513_v54 = vld [vmem:[%s16520_s3 + $0x2c] sm:$0xf0]  ;;  %v9514_v2 = vld [vmem:[%s16520_s3 + $0x34] sm:$0xf0]  ;;  %v7844_v21 = vld [vmem:[%s16520_s3] sm:$0xf] }
 0x3ec   :  { %v2212_v46 = vmul.f32 %v2209_v58, %v2158_v13  ;;  %v12394_v16 = vadd.f32 %v2213_v15, %v2211_v55  ;;  %vm2199_vm5 = vweird.f32 %v12320_v25  ;;  %v7893_v11 = vor.u32 %v9521_v27, %v7892_v49  ;;  %vm12437_vm7 = vmor %vm2183_vm14, %vm2184_vm12  ;;  %2481 = vmatpush.bf16.msrb.mxu2 %v7917_v33  ;;  %v9512_v55 = vld [vmem:[%s16520_s3 + $0x2c] sm:$0xf]  ;;  %v9509_v13 = vld [vmem:[%s16520_s3 + $0xc] sm:$0xf0] }
 0x3ed   :  { %v7897_v36 = vor.u32 %v9519_v19, %v7894_v5  ;;  %v2204_v17 = vand.u32 2147483648, %v12257_v1  ;;  %2494 = vmatpush.bf16.msrb.mxu3 %v7921_v26  ;;  %v7901_v14 = vor.u32 %v9522_v22, %v7900_v61  ;;  %v7905_v45 = vor.u32 %v9520_v12, %v7902_v42  ;;  %v9507_v49 = vld [vmem:[%s16520_s3 + $0x4] sm:$0xf]  ;;  %v7846_v27 = vld [vmem:[%s16520_s3 + $0x10] sm:$0xf0] }
 0x3ee   :  { %v12418_v37 = vadd.f32 %v2214_v62, %v2212_v46  ;;  %10015 = vtanh.f32 %v12394_v16  ;;  %v2186_v29 = vsel %vm12437_vm7, %v12304_v3, %v2182_v24  ;;  %vm2198_vm3 = vweird.f32 %v12257_v1  ;;  %2456 = vmatpush.bf16.msrb.mxu0 %v7893_v11  ;;  %v7852_v19 = vld [vmem:[%s16520_s3 + $0x8] sm:$0xf]  ;;  %v9510_v5 = vld [vmem:[%s16520_s3 + $0x14] sm:$0xf0]  ;;  %v9508_v33 = vld [vmem:[%s16520_s3 + $0xc] sm:$0xf] }
 0x3ef   :  { %v7877_v48 = vor.u32 %v9517_v30, %v7876_v18  ;;  %v2190_v38 = vor.u32 1.1754944e-38, %v2189_v43  ;;  %vm12463_vm15 = vmor %vm2198_vm3, %vm2199_vm5  ;;  %2469 = vmatpush.bf16.msrb.mxu1 %v7897_v36  ;;  %v7881_v3 = vor.u32 %v9515_v40, %v7878_v31  ;;  %vm2188_vm8 = vcmp.eq.f32.partialorder %v2187_v51, 8.507059e+37  ;;  %v7854_v26 = vld [vmem:[%s16520_s3 + $0x18] sm:$0xf0] }
 0x3f0   :  { %10017 = vtanh.f32 %v12418_v37  ;;  %v2201_v43 = vsel %vm12463_vm15, %v12320_v25, %v2197_v34  ;;  %vm12478_vm6 = vcmp.eq.f32.partialorder %v2202_v0, 8.507059e+37  ;;  %v2205_v41 = vor.u32 1.1754944e-38, %v2204_v17  ;;  %2482 = vmatpush.bf16.msrb.mxu2 %v7901_v14  ;;  %v7868_v25 = vld [vmem:[%s16520_s3 + $0x28] sm:$0xf] }
 0x3f1   :  { %v2191_v63 = vsel %vm2188_vm8, %v2190_v38, %v2186_v29  ;;  %2495 = vmatpush.bf16.msrb.mxu3 %v7905_v45  ;;  %v7885_v51 = vor.u32 %v9518_v23, %v7884_v35  ;;  %v7889_v15 = vor.u32 %v9516_v59, %v7886_v53  ;;  %v7861_v32 = vor.u32 %v9513_v54, %v7860_v20  ;;  %v7840_v14 = vld [vmem:[%s16523_s0 + $0x5] ss:$8 sm:$0xf] }
 0x3f2   :  { %2457 = vmatpush.bf16.msrb.mxu0 %v7877_v48  ;;  %v2206_v50 = vsel %vm12478_vm6, %v2205_v41, %v2201_v43  ;;  %v7865_v10 = vor.u32 %v9511_v44, %v7862_v60  ;;  %v2225_v9 = vrot.slane %v12147_v47, 1  ;;  %v7869_v46 = vor.u32 %v9514_v2, %v7868_v25  ;;  %v7841_v23 = vld [vmem:[%s16523_s0 + $0x45] ss:$8 sm:$0xf] }
 0x3f3   :  { %2470 = vmatpush.bf16.msrb.mxu1 %v7881_v3  ;;  %v7873_v4 = vor.u32 %v9512_v55, %v7870_v6  ;;  %v7845_v24 = vor.u32 %v9509_v13, %v7844_v21  ;;  %v7849_v22 = vor.u32 %v9507_v49, %v7846_v27  ;;  %v7853_v12 = vor.u32 %v9510_v5, %v7852_v19  ;;  %v8095_v6 = vld [vmem:[%s16520_s3 + $0xf0] sm:$0xf0]  ;;  %v9568_v21 = vld [vmem:[%s16520_s3 + $0xec] sm:$0xf]  ;;  %v8103_v13 = vld [vmem:[%s16520_s3 + $0xf8] sm:$0xf0] }
 0x3f4   :  { %v10016_v8 = vpop.eup %10015  ;;  %2483 = vmatpush.bf16.msrb.mxu2 %v7885_v51  ;;  %v7857_v42 = vor.u32 %v9508_v33, %v7854_v26  ;;  %v2240_v0 = vsub.f32 %v12394_v16, %v12232_v7  ;;  %v2241_v30 = vsub.f32 %v12418_v37, %v2209_v58  ;;  %vm16607_vm9 = vcmask 1041408   ;;  %v9565_v49 = vld [vmem:[%s16520_s3 + $0xcc] sm:$0xf0]  ;;  %v9563_v27 = vld [vmem:[%s16520_s3 + $0xc4] sm:$0xf] }
 0x3f5   :  { %v2219_v52 = vmul.f32 %v10016_v8, %v2191_v63  ;;  %2496 = vmatpush.bf16.msrb.mxu3 %v7889_v15  ;;  %v8093_v15 = vld [vmem:[%s16520_s3 + $0xe0] sm:$0xf]  ;;  %v8079_v19 = vld [vmem:[%s16520_s3 + $0xd0] sm:$0xf0]  ;;  %v8085_v5 = vld [vmem:[%s16520_s3 + $0xc8] sm:$0xf] }
 0x3f6   :  { %v10018_v56 = vpop.eup %10017  ;;  %2458 = vmatpush.bf16.msrb.mxu0 %v7861_v32  ;;  %v9567_v32 = vld [vmem:[%s16520_s3 + $0xe4] sm:$0xf]  ;;  %v8082_v26 = vor.u32 %v9563_v27, %v8079_v19 }
 0x3f7   :  { %v2220_v62 = vmul.f32 %v10018_v56, %v2206_v50  ;;  %v2227_v28 = vsub.f32 %v2219_v52, %v12147_v47  ;;  %2471 = vmatpush.bf16.msrb.mxu1 %v7865_v10  ;;  %v9569_v52 = vld [vmem:[%s16520_s3 + $0xec] sm:$0xf0]  ;;  %v8101_v56 = vld [vmem:[%s16520_s3 + $0xe8] sm:$0xf]  ;;  %v8098_v50 = vor.u32 %v9567_v32, %v8095_v6  ;;  %v9570_v10 = vld [vmem:[%s16520_s3 + $0xf4] sm:$0xf0] }
 0x3f8   :  { %2484 = vmatpush.bf16.msrb.mxu2 %v7869_v46  ;;  %v8094_v55 = vor.u32 %v9569_v52, %v8093_v15  ;;  %v8061_v15 = vld [vmem:[%s16520_s3 + $0xa0] sm:$0xf]  ;;  %v9559_v6 = vld [vmem:[%s16520_s3 + $0xa4] sm:$0xf] }
 0x3f9   :  { %v2228_v61 = vsub.f32 %v2220_v62, %v2225_v9  ;;  %2234 = vst [vmem:[#allocation1] ss:$9 sm:$0xff] %v2227_v28  ;;  %2497 = vmatpush.bf16.msrb.mxu3 %v7873_v4  ;;  %v8102_v9 = vor.u32 %v9570_v10, %v8101_v56  ;;  %v8106_v62 = vor.u32 %v9568_v21, %v8103_v13  ;;  %v8077_v28 = vld [vmem:[%s16520_s3 + $0xc0] sm:$0xf]  ;;  %v8063_v56 = vld [vmem:[%s16520_s3 + $0xb0] sm:$0xf0] }
 0x3fa   :  { %2459 = vmatpush.bf16.msrb.mxu0 %v7845_v24  ;;  %v8078_v4 = vor.u32 %v9565_v49, %v8077_v28  ;;  %v8066_v19 = vor.u32 %v9559_v6, %v8063_v56  ;;  %v9551_v6 = vld [vmem:[%s16520_s3 + $0x64] sm:$0xf]  ;;  %v8031_v56 = vld [vmem:[%s16520_s3 + $0x70] sm:$0xf0] }
 0x3fb   :  { %2236 = vst [vmem:[#allocation1 + $0x1] ss:$9 sm:$0xff] %v2228_v61  ;;  %2472 = vmatpush.bf16.msrb.mxu1 %v7849_v22  ;;  %v9566_v61 = vld [vmem:[%s16520_s3 + $0xd4] sm:$0xf0] }
 0x3fc   :  { %2485 = vmatpush.bf16.msrb.mxu2 %v7853_v12  ;;  %v8086_v22 = vor.u32 %v9566_v61, %v8085_v5  ;;  %v9564_v12 = vld [vmem:[%s16520_s3 + $0xcc] sm:$0xf] }
 0x3fd   :  { %2498 = vmatpush.bf16.msrb.mxu3 %v7857_v42  ;;  %v8087_v42 = vld [vmem:[%s16520_s3 + $0xd8] sm:$0xf0] }
 0x3fe   :  { %2896 = vmatpush.bf16.msra.mxu0 %v8094_v55 }
 0x3ff   :  { %2909 = vmatpush.bf16.msra.mxu1 %v8098_v50 }
 0x400   :  { %2922 = vmatpush.bf16.msra.mxu2 %v8102_v9  ;;  %v9554_v9 = vld [vmem:[%s16520_s3 + $0x74] sm:$0xf0] }
 0x401   :  { %2935 = vmatpush.bf16.msra.mxu3 %v8106_v62 }
 0x402   :  { %v2237_v18 = vld [vmem:[#allocation1] sm:$0xff]  ;;  %2897 = vmatpush.bf16.msra.mxu0 %v8078_v4 }
 0x403   :  { %2246 = vst [vmem:[#allocation1] ss:$9 sm:$0xff] %v2240_v0  ;;  %v12534_v34 = vadd.f32 %v2237_v18, %v12147_v47  ;;  %v8090_v18 = vor.u32 %v9564_v12, %v8087_v42  ;;  %2910 = vmatpush.bf16.msra.mxu1 %v8082_v26 }
 0x404   :  { %2248 = vst [vmem:[#allocation1 + $0x1] ss:$9 sm:$0xff] %v2241_v30  ;;  %2923 = vmatpush.bf16.msra.mxu2 %v8086_v22  ;;  %v8069_v22 = vld [vmem:[%s16520_s3 + $0xa8] sm:$0xf] }
 0x405   :  { %7839 = vst [vmem:[%s16524_s4 + $0x8] sm:$0x3] %v12534_v34  ;;  %v2259_v11 = vpack.c.bf16 %v12534_v34, %v12534_v34  ;;  %2936 = vmatpush.bf16.msra.mxu3 %v8090_v18 }
 0x407   :  { %2460 = vmatmul.bf16.vlgmr.msrb.gmra.mxu0 %v2259_v11  ;;  %2473 = vmatmul.bf16.vlgmr.msrb.gmra.mxu1 %v2259_v11 }
 0x408   :  { %2486 = vmatmul.bf16.vlgmr.msrb.gmra.mxu2 %v2259_v11  ;;  %2499 = vmatmul.bf16.vlgmr.msrb.gmra.mxu3 %v2259_v11 }
 0x409   :  { %2911 = vmatpush.bf16.msra.mxu1 %v8066_v19  ;;  %v9549_v19 = vld [vmem:[%s16520_s3 + $0x4c] sm:$0xf0] }
 0x40b   :  { %v2249_v24 = vld [vmem:[#allocation1] sm:$0xff] }
 0x484   :  { %v2461_v16 = vpop.f32.mrf.mxu0  ;;  %v2474_v36 = vpop.f32.mrf.mxu1 }
 0x485   :  { %v2508_v58 = vrot.slane %v2474_v36, 7 }
 0x487   :  { %v2511_v45 = vsel %vm286_vm0, %v2461_v16, %v2508_v58  ;;  %v2514_v35 = vsel %vm292_vm1, %v2461_v16, %v2508_v58  ;;  %v12619_v58 = vadd.f32 %v2249_v24, %v12232_v7 }
 0x48b   :  { %v2487_v37 = vpop.f32.mrf.mxu2  ;;  %v2500_v40 = vpop.f32.mrf.mxu3 }
 0x48c   :  { %v2509_v47 = vrot.slane %v2487_v37, 6  ;;  %v2510_v31 = vrot.slane %v2500_v40, 5  ;;  %v2463_v39 = vpop.f32.mrf.mxu0  ;;  %v2476_v17 = vpop.f32.mrf.mxu1 }
 0x48e   :  { %v2512_v29 = vsel %vm288_vm2, %v2509_v47, %v2510_v31  ;;  %v2515_v48 = vsel %vm294_vm4, %v2509_v47, %v2510_v31 }
 0x48f   :  { %v2513_v59 = vsel %vm16607_vm9, %v2511_v45, %v2512_v29  ;;  %v2516_v53 = vsel %vm16608_vm13, %v2514_v35, %v2515_v48  ;;  %v2653_v35 = vrot.slane %v12619_v58, 1 }
 0x490   :  { %v2517_v38 = vrot.slane %v2516_v53, 1  ;;  %v12554_v1 = vadd.f32 %v7840_v14, %v2513_v59 }
 0x492   :  { %v12556_v3 = vadd.f32 %v7841_v23, %v2517_v38  ;;  %v7970_v20 = vmul.f32 -1.442695, %v12554_v1  ;;  %v2562_v54 = vrot.slane %v12554_v1, 1  ;;  %v2610_v43 = vrot.slane %v12554_v1, 3 }
 0x493   :  { %v2489_v57 = vpop.f32.mrf.mxu2  ;;  %v2502_v44 = vpop.f32.mrf.mxu3  ;;  %v2604_v16 = vrot.slane %v12554_v1, 2 }
 0x494   :  { %10019 = vpow2.f32 %v7970_v20  ;;  %v7971_v60 = vmul.f32 -1.442695, %v12556_v3  ;;  %v2563_v8 = vrot.slane %v12556_v3, 1  ;;  %v7972_v63 = vmul.f32 -1.442695, %v2562_v54 }
 0x495   :  { %v2611_v41 = vrot.slane %v12556_v3, 3  ;;  %v7974_v51 = vmul.f32 -1.442695, %v2610_v43  ;;  %v2605_v40 = vrot.slane %v12556_v3, 2 }
 0x496   :  { %10021 = vpow2.f32 %v7971_v60  ;;  %v7973_v25 = vmul.f32 -1.442695, %v2563_v8  ;;  %v9556_v60 = vld [vmem:[%s16520_s3 + $0x8c] sm:$0xf] }
 0x497   :  { %10023 = vpow2.f32 %v7972_v63  ;;  %v7975_v2 = vmul.f32 -1.442695, %v2611_v41 }
 0x498   :  { %10025 = vpow2.f32 %v7973_v25  ;;  %v9561_v25 = vld [vmem:[%s16520_s3 + $0xac] sm:$0xf0] }
 0x499   :  { %10027 = vpow2.f32 %v7974_v51  ;;  %v8062_v49 = vor.u32 %v9561_v25, %v8061_v15  ;;  %v8029_v25 = vld [vmem:[%s16520_s3 + $0x60] sm:$0xf] }
 0x49a   :  { %v10020_v46 = vpop.eup %10019  ;;  %10029 = vpow2.f32 %v7975_v2 }
 0x49b   :  { %v12606_v33 = vadd.f32 1.0, %v10020_v46  ;;  %2898 = vmatpush.bf16.msra.mxu0 %v8062_v49 }
 0x49c   :  { %v10022_v0 = vpop.eup %10021 }
 0x49d   :  { %v10024_v30 = vpop.eup %10023  ;;  %v12614_v11 = vadd.f32 1.0, %v10022_v0  ;;  %10031 = vrcp.f32 %v12606_v33  ;;  %v2539_v31 = vand.u32 2147483647, %v12606_v33  ;;  %v2541_v7 = vand.u32 2147483648, %v12606_v33 }
 0x49e   :  { %v10026_v36 = vpop.eup %10025  ;;  %v12621_v37 = vadd.f32 1.0, %v10024_v30  ;;  %vm2535_vm10 = vweird.f32 %v12606_v33  ;;  %v9560_v30 = vld [vmem:[%s16520_s3 + $0xac] sm:$0xf] }
 0x49f   :  { %10033 = vrcp.f32 %v12614_v11  ;;  %v10028_v47 = vpop.eup %10027  ;;  %v12626_v39 = vadd.f32 1.0, %v10026_v36  ;;  %v2554_v14 = vand.u32 2147483647, %v12614_v11  ;;  %v2556_v45 = vand.u32 2147483648, %v12614_v11 }
 0x4a0   :  { %10035 = vrcp.f32 %v12621_v37  ;;  %v10030_v17 = vpop.eup %10029  ;;  %v2583_v48 = vand.u32 2147483647, %v12621_v37  ;;  %v12636_v23 = vadd.f32 1.0, %v10028_v47  ;;  %vm12639_vm11 = vcmp.eq.f32.partialorder %v2539_v31, 8.507059e+37  ;;  %v8045_v31 = vld [vmem:[%s16520_s3 + $0x80] sm:$0xf] }
 0x4a1   :  { %10037 = vtanh.f32 %v2604_v16  ;;  %vm2550_vm12 = vweird.f32 %v12614_v11  ;;  %v12644_v38 = vadd.f32 1.0, %v10030_v17  ;;  %v2542_v3 = vor.u32 1.1754944e-38, %v2541_v7  ;;  %v8071_v16 = vld [vmem:[%s16520_s3 + $0xb8] sm:$0xf0] }
 0x4a2   :  { %10039 = vrcp.f32 %v12626_v39  ;;  %v2585_v20 = vand.u32 2147483648, %v12621_v37  ;;  %v2598_v54 = vand.u32 2147483647, %v12626_v39  ;;  %vm12655_vm14 = vcmp.eq.f32.partialorder %v2554_v14, 8.507059e+37 }
 0x4a3   :  { %v10032_v29 = vpop.eup %10031  ;;  %10041 = vtanh.f32 %v2605_v40  ;;  %v2557_v8 = vor.u32 1.1754944e-38, %v2556_v45  ;;  %vm2579_vm5 = vweird.f32 %v12621_v37  ;;  %vm12662_vm7 = vcmp.eq.f32.partialorder %v2583_v48, 8.507059e+37  ;;  %v9557_v45 = vld [vmem:[%s16520_s3 + $0x8c] sm:$0xf0] }
 0x4a4   :  { %v2531_v59 = vmul.f32 %v10032_v29, %v12606_v33  ;;  %10043 = vrcp.f32 %v12636_v23  ;;  %vm2594_vm3 = vweird.f32 %v12626_v39  ;;  %vm2536_vm15 = vweird.f32 %v10032_v29  ;;  %v9562_v33 = vld [vmem:[%s16520_s3 + $0xb4] sm:$0xf0] }
 0x4a5   :  { %v12646_v1 = vpop.eup %10033  ;;  %10045 = vrcp.f32 %v12644_v38  ;;  %v2600_v55 = vand.u32 2147483648, %v12626_v39  ;;  %v2586_v21 = vor.u32 1.1754944e-38, %v2585_v20  ;;  %vm12685_vm8 = vcmp.eq.f32.partialorder %v2598_v54, 8.507059e+37  ;;  %vm2537_vm9 = vmor %vm2535_vm10, %vm2536_vm15  ;;  %v8053_v20 = vld [vmem:[%s16520_s3 + $0x88] sm:$0xf] }
 0x4a6   :  { %v12651_v43 = vpop.eup %10035  ;;  %v2532_v57 = vsub.f32 1.0, %v2531_v59  ;;  %v2546_v44 = vmul.f32 %v12646_v1, %v12614_v11  ;;  %vm2551_vm6 = vweird.f32 %v12646_v1  ;;  %v2631_v40 = vand.u32 2147483647, %v12636_v23 }
 0x4a7   :  { %v10038_v63 = vpop.eup %10037  ;;  %v2575_v41 = vmul.f32 %v12651_v43, %v12621_v37  ;;  %vm2580_vm13 = vweird.f32 %v12651_v43  ;;  %v2601_v24 = vor.u32 1.1754944e-38, %v2600_v55  ;;  %vm2552_vm10 = vmor %vm2550_vm12, %vm2551_vm6  ;;  %v2633_v37 = vand.u32 2147483648, %v12636_v23 }
 0x4a8   :  { %v12674_v52 = vpop.eup %10039  ;;  %v2533_v32 = vmul.f32 %v10032_v29, %v2532_v57  ;;  %v2547_v2 = vsub.f32 1.0, %v2546_v44  ;;  %v8070_v57 = vor.u32 %v9562_v33, %v8069_v22  ;;  %v8074_v44 = vor.u32 %v9560_v30, %v8071_v16  ;;  %v8015_v22 = vld [vmem:[%s16520_s3 + $0x50] sm:$0xf0]  ;;  %v8021_v30 = vld [vmem:[%s16520_s3 + $0x48] sm:$0xf] }
 0x4a9   :  { %v10042_v50 = vpop.eup %10041  ;;  %v2576_v10 = vsub.f32 1.0, %v2575_v41  ;;  %v2590_v13 = vmul.f32 %v12674_v52, %v12626_v39  ;;  %vm2595_vm15 = vweird.f32 %v12674_v52  ;;  %v9558_v39 = vld [vmem:[%s16520_s3 + $0x94] sm:$0xf0]  ;;  %v8046_v15 = vor.u32 %v9557_v45, %v8045_v31  ;;  %v8023_v31 = vld [vmem:[%s16520_s3 + $0x58] sm:$0xf0] }
 0x4aa   :  { %v2534_v62 = vadd.f32 %v10032_v29, %v2533_v32  ;;  %v2548_v28 = vmul.f32 %v12646_v1, %v2547_v2  ;;  %v12691_v27 = vpop.eup %10043  ;;  %vm2596_vm12 = vmor %vm2594_vm3, %vm2595_vm15  ;;  %2924 = vmatpush.bf16.msra.mxu2 %v8070_v57  ;;  %2937 = vmatpush.bf16.msra.mxu3 %v8074_v44  ;;  %v2646_v49 = vand.u32 2147483647, %v12644_v38  ;;  %v8007_v57 = vld [vmem:[%s16520_s3 + $0x38] sm:$0xf0]  ;;  %vm16624_vm15 = vcmask 1042433  }
 0x4ab   :  { %v2577_v46 = vmul.f32 %v12651_v43, %v2576_v10  ;;  %v2591_v4 = vsub.f32 1.0, %v2590_v13  ;;  %v2623_v26 = vmul.f32 %v12691_v27, %v12636_v23  ;;  %v12707_v12 = vpop.eup %10045  ;;  %2899 = vmatpush.bf16.msra.mxu0 %v8046_v15 }
 0x4ac   :  { %v2538_v5 = vsel %vm2537_vm9, %v10032_v29, %v2534_v62  ;;  %v2549_v61 = vadd.f32 %v12646_v1, %v2548_v28  ;;  %v2638_v47 = vmul.f32 %v12707_v12, %v12644_v38  ;;  %v9555_v29 = vld [vmem:[%s16520_s3 + $0x84] sm:$0xf]  ;;  %v9552_v62 = vld [vmem:[%s16520_s3 + $0x6c] sm:$0xf]  ;;  %v8039_v28 = vld [vmem:[%s16520_s3 + $0x78] sm:$0xf0] }
 0x4ad   :  { %v2543_v42 = vsel %vm12639_vm11, %v2542_v3, %v2538_v5  ;;  %v2578_v0 = vadd.f32 %v12651_v43, %v2577_v46  ;;  %v2592_v18 = vmul.f32 %v12674_v52, %v2591_v4  ;;  %vm2581_vm11 = vmor %vm2579_vm5, %vm2580_vm13  ;;  %v2624_v11 = vsub.f32 1.0, %v2623_v26  ;;  %v8047_v3 = vld [vmem:[%s16520_s3 + $0x90] sm:$0xf0]  ;;  %v8013_v4 = vld [vmem:[%s16520_s3 + $0x40] sm:$0xf] }
 0x4ae   :  { %v2553_v36 = vsel %vm2552_vm10, %v12646_v1, %v2549_v61  ;;  %v2639_v53 = vsub.f32 1.0, %v2638_v47  ;;  %v2657_v1 = vmul.f32 %v10038_v63, %v2543_v42  ;;  %v8050_v55 = vor.u32 %v9555_v29, %v8047_v3  ;;  %v9547_v26 = vld [vmem:[%s16520_s3 + $0x44] sm:$0xf]  ;;  %v9548_v47 = vld [vmem:[%s16520_s3 + $0x4c] sm:$0xf] }
 0x4af   :  { %v2558_v17 = vsel %vm12655_vm14, %v2557_v8, %v2553_v36  ;;  %v2582_v7 = vsel %vm2581_vm11, %v12651_v43, %v2578_v0  ;;  %v2593_v14 = vadd.f32 %v12674_v52, %v2592_v18  ;;  %v2625_v59 = vmul.f32 %v12691_v27, %v2624_v11  ;;  %v8055_v8 = vld [vmem:[%s16520_s3 + $0x98] sm:$0xf0]  ;;  %v9550_v11 = vld [vmem:[%s16520_s3 + $0x54] sm:$0xf0]  ;;  %v9543_v29 = vld [vmem:[%s16520_s3 + $0x24] sm:$0xf] }
 0x4b0   :  { %v2587_v48 = vsel %vm12662_vm7, %v2586_v21, %v2582_v7  ;;  %v2640_v41 = vmul.f32 %v12707_v12, %v2639_v53  ;;  %v2658_v51 = vmul.f32 %v10042_v50, %v2558_v17  ;;  %v8037_v50 = vld [vmem:[%s16520_s3 + $0x68] sm:$0xf]  ;;  %vm2628_vm14 = vweird.f32 %v12691_v27  ;;  %2912 = vmatpush.bf16.msra.mxu1 %v8050_v55  ;;  %v7997_v7 = vld [vmem:[%s16520_s3 + $0x20] sm:$0xf] }
 0x4b1   :  { %v2597_v54 = vsel %vm2596_vm12, %v12674_v52, %v2593_v14  ;;  %v2655_v43 = vmul.f32 %v2587_v48, %v12619_v58  ;;  %v9553_v52 = vld [vmem:[%s16520_s3 + $0x6c] sm:$0xf0]  ;;  %v2626_v10 = vadd.f32 %v12691_v27, %v2625_v59  ;;  %v8054_v21 = vor.u32 %v9558_v39, %v8053_v20  ;;  %v7999_v48 = vld [vmem:[%s16520_s3 + $0x30] sm:$0xf0] }
 0x4b2   :  { %v2602_v63 = vsel %vm12685_vm8, %v2601_v24, %v2597_v54  ;;  %v8058_v13 = vor.u32 %v9556_v60, %v8055_v8  ;;  %vm2627_vm5 = vweird.f32 %v12636_v23  ;;  %v2641_v5 = vadd.f32 %v12707_v12, %v2640_v41  ;;  %v9545_v14 = vld [vmem:[%s16520_s3 + $0x2c] sm:$0xf0]  ;;  %v9546_v54 = vld [vmem:[%s16520_s3 + $0x34] sm:$0xf0]  ;;  %v7981_v8 = vld [vmem:[%s16520_s3] sm:$0xf] }
 0x4b3   :  { %v2656_v32 = vmul.f32 %v2653_v35, %v2602_v63  ;;  %v12781_v2 = vadd.f32 %v2657_v1, %v2655_v43  ;;  %vm2643_vm7 = vweird.f32 %v12707_v12  ;;  %v8030_v61 = vor.u32 %v9553_v52, %v8029_v25  ;;  %vm12824_vm3 = vmor %vm2627_vm5, %vm2628_vm14  ;;  %2925 = vmatpush.bf16.msra.mxu2 %v8054_v21  ;;  %v9544_v43 = vld [vmem:[%s16520_s3 + $0x2c] sm:$0xf]  ;;  %v9541_v63 = vld [vmem:[%s16520_s3 + $0xc] sm:$0xf0] }
 0x4b4   :  { %v8034_v24 = vor.u32 %v9551_v6, %v8031_v56  ;;  %v2648_v42 = vand.u32 2147483648, %v12644_v38  ;;  %2938 = vmatpush.bf16.msra.mxu3 %v8058_v13  ;;  %v8038_v0 = vor.u32 %v9554_v9, %v8037_v50  ;;  %v8042_v18 = vor.u32 %v9552_v62, %v8039_v28  ;;  %v9539_v25 = vld [vmem:[%s16520_s3 + $0x4] sm:$0xf]  ;;  %v7983_v52 = vld [vmem:[%s16520_s3 + $0x10] sm:$0xf0] }
 0x4b5   :  { %v12805_v46 = vadd.f32 %v2658_v51, %v2656_v32  ;;  %10047 = vtanh.f32 %v12781_v2  ;;  %v2630_v16 = vsel %vm12824_vm3, %v12691_v27, %v2626_v10  ;;  %vm2642_vm8 = vweird.f32 %v12644_v38  ;;  %2900 = vmatpush.bf16.msra.mxu0 %v8030_v61  ;;  %v7989_v6 = vld [vmem:[%s16520_s3 + $0x8] sm:$0xf]  ;;  %v9542_v56 = vld [vmem:[%s16520_s3 + $0x14] sm:$0xf0]  ;;  %v9540_v21 = vld [vmem:[%s16520_s3 + $0xc] sm:$0xf] }
 0x4b6   :  { %v8014_v36 = vor.u32 %v9549_v19, %v8013_v4  ;;  %v2634_v17 = vor.u32 1.1754944e-38, %v2633_v37  ;;  %vm12850_vm6 = vmor %vm2642_vm8, %vm2643_vm7  ;;  %2913 = vmatpush.bf16.msra.mxu1 %v8034_v24  ;;  %v8018_v27 = vor.u32 %v9547_v26, %v8015_v22  ;;  %vm2632_vm9 = vcmp.eq.f32.partialorder %v2631_v40, 8.507059e+37  ;;  %v7991_v13 = vld [vmem:[%s16520_s3 + $0x18] sm:$0xf0] }
 0x4b7   :  { %10049 = vtanh.f32 %v12805_v46  ;;  %v2645_v37 = vsel %vm12850_vm6, %v12707_v12, %v2641_v5  ;;  %vm12865_vm13 = vcmp.eq.f32.partialorder %v2646_v49, 8.507059e+37  ;;  %v2649_v23 = vor.u32 1.1754944e-38, %v2648_v42  ;;  %2926 = vmatpush.bf16.msra.mxu2 %v8038_v0  ;;  %v8005_v12 = vld [vmem:[%s16520_s3 + $0x28] sm:$0xf] }
 0x4b8   :  { %v2635_v53 = vsel %vm2632_vm9, %v2634_v17, %v2630_v16  ;;  %2939 = vmatpush.bf16.msra.mxu3 %v8042_v18  ;;  %v8022_v40 = vor.u32 %v9550_v11, %v8021_v30  ;;  %v8026_v1 = vor.u32 %v9548_v47, %v8023_v31  ;;  %v7998_v20 = vor.u32 %v9545_v14, %v7997_v7  ;;  %v7977_v0 = vld [vmem:[%s16523_s0 + $0x6] ss:$8 sm:$0xf] }
 0x4b9   :  { %2901 = vmatpush.bf16.msra.mxu0 %v8014_v36  ;;  %v2650_v39 = vsel %vm12865_vm13, %v2649_v23, %v2645_v37  ;;  %v8002_v60 = vor.u32 %v9543_v29, %v7999_v48  ;;  %v2669_v41 = vrot.slane %v12534_v34, 1  ;;  %v8006_v32 = vor.u32 %v9546_v54, %v8005_v12  ;;  %v7978_v11 = vld [vmem:[%s16523_s0 + $0x46] ss:$8 sm:$0xf] }
 0x4ba   :  { %2914 = vmatpush.bf16.msra.mxu1 %v8018_v27  ;;  %v8010_v55 = vor.u32 %v9544_v43, %v8007_v57  ;;  %v7982_v10 = vor.u32 %v9541_v63, %v7981_v8  ;;  %v7986_v9 = vor.u32 %v9539_v25, %v7983_v52  ;;  %v7990_v62 = vor.u32 %v9542_v56, %v7989_v6  ;;  %v8232_v57 = vld [vmem:[%s16520_s3 + $0xf0] sm:$0xf0]  ;;  %v9600_v8 = vld [vmem:[%s16520_s3 + $0xec] sm:$0xf]  ;;  %v8240_v63 = vld [vmem:[%s16520_s3 + $0xf8] sm:$0xf0] }
 0x4bb   :  { %v10048_v59 = vpop.eup %10047  ;;  %2927 = vmatpush.bf16.msra.mxu2 %v8022_v40  ;;  %v7994_v28 = vor.u32 %v9540_v21, %v7991_v13  ;;  %v2684_v49 = vsub.f32 %v12781_v2, %v12619_v58  ;;  %v2685_v19 = vsub.f32 %v12805_v46, %v2653_v35  ;;  %vm16623_vm10 = vcmask 1041408   ;;  %v9597_v25 = vld [vmem:[%s16520_s3 + $0xcc] sm:$0xf0]  ;;  %v9595_v52 = vld [vmem:[%s16520_s3 + $0xc4] sm:$0xf] }
 0x4bc   :  { %v2663_v3 = vmul.f32 %v10048_v59, %v2635_v53  ;;  %2940 = vmatpush.bf16.msra.mxu3 %v8026_v1  ;;  %v8230_v1 = vld [vmem:[%s16520_s3 + $0xe0] sm:$0xf]  ;;  %v8216_v6 = vld [vmem:[%s16520_s3 + $0xd0] sm:$0xf0]  ;;  %v8222_v56 = vld [vmem:[%s16520_s3 + $0xc8] sm:$0xf] }
 0x4bd   :  { %v10050_v44 = vpop.eup %10049  ;;  %2902 = vmatpush.bf16.msra.mxu0 %v7998_v20  ;;  %v9599_v20 = vld [vmem:[%s16520_s3 + $0xe4] sm:$0xf]  ;;  %v8219_v13 = vor.u32 %v9595_v52, %v8216_v6 }
 0x4be   :  { %v2664_v51 = vmul.f32 %v10050_v44, %v2650_v39  ;;  %v2671_v15 = vsub.f32 %v2663_v3, %v12534_v34  ;;  %2915 = vmatpush.bf16.msra.mxu1 %v8002_v60  ;;  %v9601_v3 = vld [vmem:[%s16520_s3 + $0xec] sm:$0xf0]  ;;  %v8238_v44 = vld [vmem:[%s16520_s3 + $0xe8] sm:$0xf]  ;;  %v8235_v39 = vor.u32 %v9599_v20, %v8232_v57  ;;  %v9602_v60 = vld [vmem:[%s16520_s3 + $0xf4] sm:$0xf0] }
 0x4bf   :  { %2928 = vmatpush.bf16.msra.mxu2 %v8006_v32  ;;  %v8231_v43 = vor.u32 %v9601_v3, %v8230_v1  ;;  %v8198_v1 = vld [vmem:[%s16520_s3 + $0xa0] sm:$0xf]  ;;  %v9591_v57 = vld [vmem:[%s16520_s3 + $0xa4] sm:$0xf] }
 0x4c0   :  { %v2672_v50 = vsub.f32 %v2664_v51, %v2669_v41  ;;  %2678 = vst [vmem:[#allocation1] ss:$9 sm:$0xff] %v2671_v15  ;;  %2941 = vmatpush.bf16.msra.mxu3 %v8010_v55  ;;  %v8239_v41 = vor.u32 %v9602_v60, %v8238_v44  ;;  %v8243_v51 = vor.u32 %v9600_v8, %v8240_v63  ;;  %v8214_v15 = vld [vmem:[%s16520_s3 + $0xc0] sm:$0xf]  ;;  %v8200_v44 = vld [vmem:[%s16520_s3 + $0xb0] sm:$0xf0] }
 0x4c1   :  { %2903 = vmatpush.bf16.msra.mxu0 %v7982_v10  ;;  %v8215_v55 = vor.u32 %v9597_v25, %v8214_v15  ;;  %v8203_v6 = vor.u32 %v9591_v57, %v8200_v44  ;;  %v9583_v57 = vld [vmem:[%s16520_s3 + $0x64] sm:$0xf]  ;;  %v8168_v44 = vld [vmem:[%s16520_s3 + $0x70] sm:$0xf0] }
 0x4c2   :  { %2680 = vst [vmem:[#allocation1 + $0x1] ss:$9 sm:$0xff] %v2672_v50  ;;  %2916 = vmatpush.bf16.msra.mxu1 %v7986_v9  ;;  %v9598_v50 = vld [vmem:[%s16520_s3 + $0xd4] sm:$0xf0] }
 0x4c3   :  { %2929 = vmatpush.bf16.msra.mxu2 %v7990_v62  ;;  %v8223_v9 = vor.u32 %v9598_v50, %v8222_v56  ;;  %v9596_v62 = vld [vmem:[%s16520_s3 + $0xcc] sm:$0xf] }
 0x4c4   :  { %2942 = vmatpush.bf16.msra.mxu3 %v7994_v28  ;;  %v8224_v28 = vld [vmem:[%s16520_s3 + $0xd8] sm:$0xf0] }
 0x4c5   :  { %3340 = vmatpush.bf16.msrb.mxu0 %v8231_v43 }
 0x4c6   :  { %3353 = vmatpush.bf16.msrb.mxu1 %v8235_v39 }
 0x4c7   :  { %3366 = vmatpush.bf16.msrb.mxu2 %v8239_v41  ;;  %v9586_v41 = vld [vmem:[%s16520_s3 + $0x74] sm:$0xf0] }
 0x4c8   :  { %3379 = vmatpush.bf16.msrb.mxu3 %v8243_v51 }
 0x4c9   :  { %v2681_v4 = vld [vmem:[#allocation1] sm:$0xff]  ;;  %3341 = vmatpush.bf16.msrb.mxu0 %v8215_v55 }
 0x4ca   :  { %2690 = vst [vmem:[#allocation1] ss:$9 sm:$0xff] %v2684_v49  ;;  %v12921_v5 = vadd.f32 %v2681_v4, %v12534_v34  ;;  %v8227_v4 = vor.u32 %v9596_v62, %v8224_v28  ;;  %3354 = vmatpush.bf16.msrb.mxu1 %v8219_v13 }
 0x4cb   :  { %2692 = vst [vmem:[#allocation1 + $0x1] ss:$9 sm:$0xff] %v2685_v19  ;;  %3367 = vmatpush.bf16.msrb.mxu2 %v8223_v9  ;;  %v8206_v9 = vld [vmem:[%s16520_s3 + $0xa8] sm:$0xf] }
 0x4cc   :  { %7976 = vst [vmem:[%s16524_s4 + $0xa] sm:$0x3] %v12921_v5  ;;  %v2703_v61 = vpack.c.bf16 %v12921_v5, %v12921_v5  ;;  %3380 = vmatpush.bf16.msrb.mxu3 %v8227_v4 }
 0x4ce   :  { %2904 = vmatmul.bf16.vlgmr.msra.gmra.mxu0 %v2703_v61  ;;  %2917 = vmatmul.bf16.vlgmr.msra.gmra.mxu1 %v2703_v61 }
 0x4cf   :  { %2930 = vmatmul.bf16.vlgmr.msra.gmra.mxu2 %v2703_v61  ;;  %2943 = vmatmul.bf16.vlgmr.msra.gmra.mxu3 %v2703_v61 }
 0x4d0   :  { %3355 = vmatpush.bf16.msrb.mxu1 %v8203_v6  ;;  %v9581_v6 = vld [vmem:[%s16520_s3 + $0x4c] sm:$0xf0] }
 0x4d2   :  { %v2693_v10 = vld [vmem:[#allocation1] sm:$0xff] }
 0x54b   :  { %v2905_v2 = vpop.f32.mrf.mxu0  ;;  %v2918_v24 = vpop.f32.mrf.mxu1 }
 0x54c   :  { %v2952_v35 = vrot.slane %v2918_v24, 7 }
 0x54e   :  { %v2955_v18 = vsel %vm286_vm0, %v2905_v2, %v2952_v35  ;;  %v2958_v30 = vsel %vm292_vm1, %v2905_v2, %v2952_v35  ;;  %v13006_v35 = vadd.f32 %v2693_v10, %v12619_v58 }
 0x552   :  { %v2931_v46 = vpop.f32.mrf.mxu2  ;;  %v2944_v26 = vpop.f32.mrf.mxu3 }
 0x553   :  { %v2953_v34 = vrot.slane %v2931_v46, 6  ;;  %v2954_v22 = vrot.slane %v2944_v26, 5  ;;  %v2907_v33 = vpop.f32.mrf.mxu0  ;;  %v2920_v42 = vpop.f32.mrf.mxu1 }
 0x555   :  { %v2956_v16 = vsel %vm288_vm2, %v2953_v34, %v2954_v22  ;;  %v2959_v36 = vsel %vm294_vm4, %v2953_v34, %v2954_v22 }
 0x556   :  { %v2957_v47 = vsel %vm16623_vm10, %v2955_v18, %v2956_v16  ;;  %v2960_v31 = vsel %vm16624_vm15, %v2958_v30, %v2959_v36  ;;  %v3097_v30 = vrot.slane %v13006_v35, 1 }
 0x557   :  { %v2961_v17 = vrot.slane %v2960_v31, 1  ;;  %v12941_v38 = vadd.f32 %v7977_v0, %v2957_v47 }
 0x559   :  { %v12943_v27 = vadd.f32 %v7978_v11, %v2961_v17  ;;  %v8107_v7 = vmul.f32 -1.442695, %v12941_v38  ;;  %v3006_v14 = vrot.slane %v12941_v38, 1  ;;  %v3054_v37 = vrot.slane %v12941_v38, 3 }
 0x55a   :  { %v2933_v45 = vpop.f32.mrf.mxu2  ;;  %v2946_v29 = vpop.f32.mrf.mxu3  ;;  %v3048_v2 = vrot.slane %v12941_v38, 2 }
 0x55b   :  { %10051 = vpow2.f32 %v8107_v7  ;;  %v8108_v48 = vmul.f32 -1.442695, %v12943_v27  ;;  %v3007_v59 = vrot.slane %v12943_v27, 1  ;;  %v8109_v53 = vmul.f32 -1.442695, %v3006_v14 }
 0x55c   :  { %v3055_v23 = vrot.slane %v12943_v27, 3  ;;  %v8111_v40 = vmul.f32 -1.442695, %v3054_v37  ;;  %v3049_v26 = vrot.slane %v12943_v27, 2 }
 0x55d   :  { %10053 = vpow2.f32 %v8108_v48  ;;  %v8110_v12 = vmul.f32 -1.442695, %v3007_v59  ;;  %v9588_v48 = vld [vmem:[%s16520_s3 + $0x8c] sm:$0xf] }
 0x55e   :  { %10055 = vpow2.f32 %v8109_v53  ;;  %v8112_v54 = vmul.f32 -1.442695, %v3055_v23 }
 0x55f   :  { %10057 = vpow2.f32 %v8110_v12  ;;  %v9593_v12 = vld [vmem:[%s16520_s3 + $0xac] sm:$0xf0] }
 0x560   :  { %10059 = vpow2.f32 %v8111_v40  ;;  %v8199_v25 = vor.u32 %v9593_v12, %v8198_v1  ;;  %v8166_v12 = vld [vmem:[%s16520_s3 + $0x60] sm:$0xf] }
 0x561   :  { %v10052_v32 = vpop.eup %10051  ;;  %10061 = vpow2.f32 %v8112_v54 }
 0x562   :  { %v12993_v21 = vadd.f32 1.0, %v10052_v32  ;;  %3342 = vmatpush.bf16.msrb.mxu0 %v8199_v25 }
 0x563   :  { %v10054_v49 = vpop.eup %10053 }
 0x564   :  { %v10056_v19 = vpop.eup %10055  ;;  %v13001_v61 = vadd.f32 1.0, %v10054_v49  ;;  %10063 = vrcp.f32 %v12993_v21  ;;  %v2983_v22 = vand.u32 2147483647, %v12993_v21  ;;  %v2985_v58 = vand.u32 2147483648, %v12993_v21 }
 0x565   :  { %v10058_v24 = vpop.eup %10057  ;;  %v13008_v46 = vadd.f32 1.0, %v10056_v19  ;;  %vm2979_vm11 = vweird.f32 %v12993_v21  ;;  %v9592_v19 = vld [vmem:[%s16520_s3 + $0xac] sm:$0xf] }
 0x566   :  { %10065 = vrcp.f32 %v13001_v61  ;;  %v10060_v34 = vpop.eup %10059  ;;  %v13013_v33 = vadd.f32 1.0, %v10058_v24  ;;  %v2998_v0 = vand.u32 2147483647, %v13001_v61  ;;  %v3000_v18 = vand.u32 2147483648, %v13001_v61 }
 0x567   :  { %10067 = vrcp.f32 %v13008_v46  ;;  %v10062_v42 = vpop.eup %10061  ;;  %v3027_v36 = vand.u32 2147483647, %v13008_v46  ;;  %v13023_v11 = vadd.f32 1.0, %v10060_v34  ;;  %vm13026_vm12 = vcmp.eq.f32.partialorder %v2983_v22, 8.507059e+37  ;;  %v8182_v22 = vld [vmem:[%s16520_s3 + $0x80] sm:$0xf] }
 0x568   :  { %10069 = vtanh.f32 %v3048_v2  ;;  %vm2994_vm14 = vweird.f32 %v13001_v61  ;;  %v13031_v17 = vadd.f32 1.0, %v10062_v42  ;;  %v2986_v27 = vor.u32 1.1754944e-38, %v2985_v58  ;;  %v8208_v2 = vld [vmem:[%s16520_s3 + $0xb8] sm:$0xf0] }
 0x569   :  { %10071 = vrcp.f32 %v13013_v33  ;;  %v3029_v7 = vand.u32 2147483648, %v13008_v46  ;;  %v3042_v14 = vand.u32 2147483647, %v13013_v33  ;;  %vm13042_vm5 = vcmp.eq.f32.partialorder %v2998_v0, 8.507059e+37 }
 0x56a   :  { %v10064_v16 = vpop.eup %10063  ;;  %10073 = vtanh.f32 %v3049_v26  ;;  %v3001_v59 = vor.u32 1.1754944e-38, %v3000_v18  ;;  %vm3023_vm7 = vweird.f32 %v13008_v46  ;;  %vm13049_vm3 = vcmp.eq.f32.partialorder %v3027_v36, 8.507059e+37  ;;  %v9589_v18 = vld [vmem:[%s16520_s3 + $0x8c] sm:$0xf0] }
 0x56b   :  { %v2975_v47 = vmul.f32 %v10064_v16, %v12993_v21  ;;  %10075 = vrcp.f32 %v13023_v11  ;;  %vm3038_vm8 = vweird.f32 %v13013_v33  ;;  %vm2980_vm6 = vweird.f32 %v10064_v16  ;;  %v9594_v21 = vld [vmem:[%s16520_s3 + $0xb4] sm:$0xf0] }
 0x56c   :  { %v13033_v38 = vpop.eup %10065  ;;  %10077 = vrcp.f32 %v13031_v17  ;;  %v3044_v43 = vand.u32 2147483648, %v13013_v33  ;;  %v3030_v8 = vor.u32 1.1754944e-38, %v3029_v7  ;;  %vm13072_vm9 = vcmp.eq.f32.partialorder %v3042_v14, 8.507059e+37  ;;  %vm2981_vm10 = vmor %vm2979_vm11, %vm2980_vm6  ;;  %v8190_v7 = vld [vmem:[%s16520_s3 + $0x88] sm:$0xf] }
 0x56d   :  { %v13038_v37 = vpop.eup %10067  ;;  %v2976_v45 = vsub.f32 1.0, %v2975_v47  ;;  %v2990_v29 = vmul.f32 %v13033_v38, %v13001_v61  ;;  %vm2995_vm13 = vweird.f32 %v13033_v38  ;;  %v3075_v26 = vand.u32 2147483647, %v13023_v11 }
 0x56e   :  { %v10070_v53 = vpop.eup %10069  ;;  %v3019_v23 = vmul.f32 %v13038_v37, %v13008_v46  ;;  %vm3024_vm15 = vweird.f32 %v13038_v37  ;;  %v3045_v10 = vor.u32 1.1754944e-38, %v3044_v43  ;;  %vm2996_vm11 = vmor %vm2994_vm14, %vm2995_vm13  ;;  %v3077_v46 = vand.u32 2147483648, %v13023_v11 }
 0x56f   :  { %v13061_v3 = vpop.eup %10071  ;;  %v2977_v20 = vmul.f32 %v10064_v16, %v2976_v45  ;;  %v2991_v54 = vsub.f32 1.0, %v2990_v29  ;;  %v8207_v45 = vor.u32 %v9594_v21, %v8206_v9  ;;  %v8211_v29 = vor.u32 %v9592_v19, %v8208_v2  ;;  %v8152_v9 = vld [vmem:[%s16520_s3 + $0x50] sm:$0xf0]  ;;  %v8158_v19 = vld [vmem:[%s16520_s3 + $0x48] sm:$0xf] }
 0x570   :  { %v10074_v39 = vpop.eup %10073  ;;  %v3020_v60 = vsub.f32 1.0, %v3019_v23  ;;  %v3034_v63 = vmul.f32 %v13061_v3, %v13013_v33  ;;  %vm3039_vm6 = vweird.f32 %v13061_v3  ;;  %v9590_v33 = vld [vmem:[%s16520_s3 + $0x94] sm:$0xf0]  ;;  %v8183_v1 = vor.u32 %v9589_v18, %v8182_v22  ;;  %v8160_v22 = vld [vmem:[%s16520_s3 + $0x58] sm:$0xf0] }
 0x571   :  { %v2978_v51 = vadd.f32 %v10064_v16, %v2977_v20  ;;  %v2992_v15 = vmul.f32 %v13033_v38, %v2991_v54  ;;  %v13078_v52 = vpop.eup %10075  ;;  %vm3040_vm14 = vmor %vm3038_vm8, %vm3039_vm6  ;;  %3368 = vmatpush.bf16.msrb.mxu2 %v8207_v45  ;;  %3381 = vmatpush.bf16.msrb.mxu3 %v8211_v29  ;;  %v3090_v25 = vand.u32 2147483647, %v13031_v17  ;;  %v8144_v45 = vld [vmem:[%s16520_s3 + $0x38] sm:$0xf0]  ;;  %vm16640_vm6 = vcmask 1042433  }
 0x572   :  { %v3021_v32 = vmul.f32 %v13038_v37, %v3020_v60  ;;  %v3035_v55 = vsub.f32 1.0, %v3034_v63  ;;  %v3067_v13 = vmul.f32 %v13078_v52, %v13023_v11  ;;  %v13094_v62 = vpop.eup %10077  ;;  %3343 = vmatpush.bf16.msrb.mxu0 %v8183_v1 }
 0x573   :  { %v2982_v56 = vsel %vm2981_vm10, %v10064_v16, %v2978_v51  ;;  %v2993_v50 = vadd.f32 %v13033_v38, %v2992_v15  ;;  %v3082_v34 = vmul.f32 %v13094_v62, %v13031_v17  ;;  %v9587_v16 = vld [vmem:[%s16520_s3 + $0x84] sm:$0xf]  ;;  %v9584_v51 = vld [vmem:[%s16520_s3 + $0x6c] sm:$0xf]  ;;  %v8176_v15 = vld [vmem:[%s16520_s3 + $0x78] sm:$0xf0] }
 0x574   :  { %v2987_v28 = vsel %vm13026_vm12, %v2986_v27, %v2982_v56  ;;  %v3022_v49 = vadd.f32 %v13038_v37, %v3021_v32  ;;  %v3036_v4 = vmul.f32 %v13061_v3, %v3035_v55  ;;  %vm3025_vm12 = vmor %vm3023_vm7, %vm3024_vm15  ;;  %v3068_v61 = vsub.f32 1.0, %v3067_v13  ;;  %v8184_v27 = vld [vmem:[%s16520_s3 + $0x90] sm:$0xf0]  ;;  %v8150_v55 = vld [vmem:[%s16520_s3 + $0x40] sm:$0xf] }
 0x575   :  { %v2997_v24 = vsel %vm2996_vm11, %v13033_v38, %v2993_v50  ;;  %v3083_v31 = vsub.f32 1.0, %v3082_v34  ;;  %v3101_v38 = vmul.f32 %v10070_v53, %v2987_v28  ;;  %v8187_v43 = vor.u32 %v9587_v16, %v8184_v27  ;;  %v9579_v13 = vld [vmem:[%s16520_s3 + $0x44] sm:$0xf]  ;;  %v9580_v34 = vld [vmem:[%s16520_s3 + $0x4c] sm:$0xf] }
 0x576   :  { %v3002_v42 = vsel %vm13042_vm5, %v3001_v59, %v2997_v24  ;;  %v3026_v58 = vsel %vm3025_vm12, %v13038_v37, %v3022_v49  ;;  %v3037_v0 = vadd.f32 %v13061_v3, %v3036_v4  ;;  %v3069_v47 = vmul.f32 %v13078_v52, %v3068_v61  ;;  %v8192_v59 = vld [vmem:[%s16520_s3 + $0x98] sm:$0xf0]  ;;  %v9582_v61 = vld [vmem:[%s16520_s3 + $0x54] sm:$0xf0]  ;;  %v9575_v16 = vld [vmem:[%s16520_s3 + $0x24] sm:$0xf] }
 0x577   :  { %v3031_v36 = vsel %vm13049_vm3, %v3030_v8, %v3026_v58  ;;  %v3084_v23 = vmul.f32 %v13094_v62, %v3083_v31  ;;  %v3102_v40 = vmul.f32 %v10074_v39, %v3002_v42  ;;  %v8174_v39 = vld [vmem:[%s16520_s3 + $0x68] sm:$0xf]  ;;  %vm3072_vm5 = vweird.f32 %v13078_v52  ;;  %3356 = vmatpush.bf16.msrb.mxu1 %v8187_v43  ;;  %v8134_v58 = vld [vmem:[%s16520_s3 + $0x20] sm:$0xf] }
 0x578   :  { %v3041_v14 = vsel %vm3040_vm14, %v13061_v3, %v3037_v0  ;;  %v3099_v37 = vmul.f32 %v3031_v36, %v13006_v35  ;;  %v9585_v3 = vld [vmem:[%s16520_s3 + $0x6c] sm:$0xf0]  ;;  %v3070_v60 = vadd.f32 %v13078_v52, %v3069_v47  ;;  %v8191_v8 = vor.u32 %v9590_v33, %v8190_v7  ;;  %v8136_v36 = vld [vmem:[%s16520_s3 + $0x30] sm:$0xf0] }
 0x579   :  { %v3046_v53 = vsel %vm13072_vm9, %v3045_v10, %v3041_v14  ;;  %v8195_v63 = vor.u32 %v9588_v48, %v8192_v59  ;;  %vm3071_vm7 = vweird.f32 %v13023_v11  ;;  %v3085_v56 = vadd.f32 %v13094_v62, %v3084_v23  ;;  %v9577_v0 = vld [vmem:[%s16520_s3 + $0x2c] sm:$0xf0]  ;;  %v9578_v14 = vld [vmem:[%s16520_s3 + $0x34] sm:$0xf0]  ;;  %v8118_v59 = vld [vmem:[%s16520_s3] sm:$0xf] }
 0x57a   :  { %v3100_v20 = vmul.f32 %v3097_v30, %v3046_v53  ;;  %v13168_v54 = vadd.f32 %v3101_v38, %v3099_v37  ;;  %vm3087_vm3 = vweird.f32 %v13094_v62  ;;  %v8167_v50 = vor.u32 %v9585_v3, %v8166_v12  ;;  %vm13211_vm8 = vmor %vm3071_vm7, %vm3072_vm5  ;;  %3369 = vmatpush.bf16.msrb.mxu2 %v8191_v8  ;;  %v9576_v37 = vld [vmem:[%s16520_s3 + $0x2c] sm:$0xf]  ;;  %v9573_v53 = vld [vmem:[%s16520_s3 + $0xc] sm:$0xf0] }
 0x57b   :  { %v8171_v10 = vor.u32 %v9583_v57, %v8168_v44  ;;  %v3092_v28 = vand.u32 2147483648, %v13031_v17  ;;  %3382 = vmatpush.bf16.msrb.mxu3 %v8195_v63  ;;  %v8175_v49 = vor.u32 %v9586_v41, %v8174_v39  ;;  %v8179_v4 = vor.u32 %v9584_v51, %v8176_v15  ;;  %v9571_v12 = vld [vmem:[%s16520_s3 + $0x4] sm:$0xf]  ;;  %v8120_v3 = vld [vmem:[%s16520_s3 + $0x10] sm:$0xf0] }
 0x57c   :  { %v13192_v32 = vadd.f32 %v3102_v40, %v3100_v20  ;;  %10079 = vtanh.f32 %v13168_v54  ;;  %v3074_v2 = vsel %vm13211_vm8, %v13078_v52, %v3070_v60  ;;  %vm3086_vm9 = vweird.f32 %v13031_v17  ;;  %3344 = vmatpush.bf16.msrb.mxu0 %v8167_v50  ;;  %v8126_v57 = vld [vmem:[%s16520_s3 + $0x8] sm:$0xf]  ;;  %v9574_v44 = vld [vmem:[%s16520_s3 + $0x14] sm:$0xf0]  ;;  %v9572_v8 = vld [vmem:[%s16520_s3 + $0xc] sm:$0xf] }
 0x57d   :  { %v8151_v24 = vor.u32 %v9581_v6, %v8150_v55  ;;  %v3078_v42 = vor.u32 1.1754944e-38, %v3077_v46  ;;  %vm13237_vm13 = vmor %vm3086_vm9, %vm3087_vm3  ;;  %3357 = vmatpush.bf16.msrb.mxu1 %v8171_v10  ;;  %v8155_v52 = vor.u32 %v9579_v13, %v8152_v9  ;;  %vm3076_vm10 = vcmp.eq.f32.partialorder %v3075_v26, 8.507059e+37  ;;  %v8128_v63 = vld [vmem:[%s16520_s3 + $0x18] sm:$0xf0] }
 0x57e   :  { %10081 = vtanh.f32 %v13192_v32  ;;  %v3089_v46 = vsel %vm13237_vm13, %v13094_v62, %v3085_v56  ;;  %vm13252_vm15 = vcmp.eq.f32.partialorder %v3090_v25, 8.507059e+37  ;;  %v3093_v11 = vor.u32 1.1754944e-38, %v3092_v28  ;;  %3370 = vmatpush.bf16.msrb.mxu2 %v8175_v49  ;;  %v8142_v62 = vld [vmem:[%s16520_s3 + $0x28] sm:$0xf] }
 0x57f   :  { %v3079_v31 = vsel %vm3076_vm10, %v3078_v42, %v3074_v2  ;;  %3383 = vmatpush.bf16.msrb.mxu3 %v8179_v4  ;;  %v8159_v26 = vor.u32 %v9582_v61, %v8158_v19  ;;  %v8163_v38 = vor.u32 %v9580_v34, %v8160_v22  ;;  %v8135_v7 = vor.u32 %v9577_v0, %v8134_v58  ;;  %v8114_v49 = vld [vmem:[%s16523_s0 + $0x7] ss:$8 sm:$0xf] }
 0x580   :  { %3345 = vmatpush.bf16.msrb.mxu0 %v8151_v24  ;;  %v3094_v33 = vsel %vm13252_vm15, %v3093_v11, %v3089_v46  ;;  %v8139_v48 = vor.u32 %v9575_v16, %v8136_v36  ;;  %v3113_v23 = vrot.slane %v12921_v5, 1  ;;  %v8143_v20 = vor.u32 %v9578_v14, %v8142_v62  ;;  %v8115_v61 = vld [vmem:[%s16523_s0 + $0x47] ss:$8 sm:$0xf] }
 0x581   :  { %3358 = vmatpush.bf16.msrb.mxu1 %v8155_v52  ;;  %v8147_v43 = vor.u32 %v9576_v37, %v8144_v45  ;;  %v8119_v60 = vor.u32 %v9573_v53, %v8118_v59  ;;  %v8123_v41 = vor.u32 %v9571_v12, %v8120_v3  ;;  %v8127_v51 = vor.u32 %v9574_v44, %v8126_v57  ;;  %v8369_v45 = vld [vmem:[%s16520_s3 + $0xf0] sm:$0xf0]  ;;  %v9632_v59 = vld [vmem:[%s16520_s3 + $0xec] sm:$0xf]  ;;  %v8377_v53 = vld [vmem:[%s16520_s3 + $0xf8] sm:$0xf0] }
 0x582   :  { %v10080_v47 = vpop.eup %10079  ;;  %3371 = vmatpush.bf16.msrb.mxu2 %v8159_v26  ;;  %v8131_v15 = vor.u32 %v9572_v8, %v8128_v63  ;;  %v3128_v25 = vsub.f32 %v13168_v54, %v13006_v35  ;;  %v3129_v6 = vsub.f32 %v13192_v32, %v3097_v30  ;;  %vm16639_vm11 = vcmask 1041408   ;;  %v9629_v12 = vld [vmem:[%s16520_s3 + $0xcc] sm:$0xf0]  ;;  %v9627_v3 = vld [vmem:[%s16520_s3 + $0xc4] sm:$0xf] }
 0x583   :  { %v3107_v27 = vmul.f32 %v10080_v47, %v3079_v31  ;;  %3384 = vmatpush.bf16.msrb.mxu3 %v8163_v38  ;;  %v8367_v38 = vld [vmem:[%s16520_s3 + $0xe0] sm:$0xf]  ;;  %v8353_v57 = vld [vmem:[%s16520_s3 + $0xd0] sm:$0xf0]  ;;  %v8359_v44 = vld [vmem:[%s16520_s3 + $0xc8] sm:$0xf] }
 0x584   :  { %v10082_v29 = vpop.eup %10081  ;;  %3346 = vmatpush.bf16.msrb.mxu0 %v8135_v7  ;;  %v9631_v7 = vld [vmem:[%s16520_s3 + $0xe4] sm:$0xf]  ;;  %v8356_v63 = vor.u32 %v9627_v3, %v8353_v57 }
 0x585   :  { %v3108_v40 = vmul.f32 %v10082_v29, %v3094_v33  ;;  %v3115_v1 = vsub.f32 %v3107_v27, %v12921_v5  ;;  %3359 = vmatpush.bf16.msrb.mxu1 %v8139_v48  ;;  %v9633_v27 = vld [vmem:[%s16520_s3 + $0xec] sm:$0xf0]  ;;  %v8375_v29 = vld [vmem:[%s16520_s3 + $0xe8] sm:$0xf]  ;;  %v8372_v33 = vor.u32 %v9631_v7, %v8369_v45  ;;  %v9634_v48 = vld [vmem:[%s16520_s3 + $0xf4] sm:$0xf0] }
 0x586   :  { %3372 = vmatpush.bf16.msrb.mxu2 %v8143_v20  ;;  %v8368_v37 = vor.u32 %v9633_v27, %v8367_v38  ;;  %v8335_v38 = vld [vmem:[%s16520_s3 + $0xa0] sm:$0xf]  ;;  %v9623_v45 = vld [vmem:[%s16520_s3 + $0xa4] sm:$0xf] }
 0x587   :  { %v3116_v39 = vsub.f32 %v3108_v40, %v3113_v23  ;;  %3122 = vst [vmem:[#allocation1] ss:$9 sm:$0xff] %v3115_v1  ;;  %3385 = vmatpush.bf16.msrb.mxu3 %v8147_v43  ;;  %v8376_v23 = vor.u32 %v9634_v48, %v8375_v29  ;;  %v8380_v40 = vor.u32 %v9632_v59, %v8377_v53  ;;  %v8351_v1 = vld [vmem:[%s16520_s3 + $0xc0] sm:$0xf]  ;;  %v8337_v29 = vld [vmem:[%s16520_s3 + $0xb0] sm:$0xf0] }
 0x588   :  { %3347 = vmatpush.bf16.msrb.mxu0 %v8119_v60  ;;  %v8352_v43 = vor.u32 %v9629_v12, %v8351_v1  ;;  %v8340_v57 = vor.u32 %v9623_v45, %v8337_v29  ;;  %v9615_v45 = vld [vmem:[%s16520_s3 + $0x64] sm:$0xf]  ;;  %v8305_v29 = vld [vmem:[%s16520_s3 + $0x70] sm:$0xf0] }
 0x589   :  { %3124 = vst [vmem:[#allocation1 + $0x1] ss:$9 sm:$0xff] %v3116_v39  ;;  %3360 = vmatpush.bf16.msrb.mxu1 %v8123_v41  ;;  %v9630_v39 = vld [vmem:[%s16520_s3 + $0xd4] sm:$0xf0] }
 0x58a   :  { %3373 = vmatpush.bf16.msrb.mxu2 %v8127_v51  ;;  %v8360_v41 = vor.u32 %v9630_v39, %v8359_v44  ;;  %v9628_v51 = vld [vmem:[%s16520_s3 + $0xcc] sm:$0xf] }
 0x58b   :  { %3386 = vmatpush.bf16.msrb.mxu3 %v8131_v15  ;;  %v8361_v15 = vld [vmem:[%s16520_s3 + $0xd8] sm:$0xf0] }
 0x58c   :  { %3784 = vmatpush.bf16.msra.mxu0 %v8368_v37 }
 0x58d   :  { %3797 = vmatpush.bf16.msra.mxu1 %v8372_v33 }
 0x58e   :  { %3810 = vmatpush.bf16.msra.mxu2 %v8376_v23  ;;  %v9618_v23 = vld [vmem:[%s16520_s3 + $0x74] sm:$0xf0] }
 0x58f   :  { %3823 = vmatpush.bf16.msra.mxu3 %v8380_v40 }
 0x590   :  { %v3125_v55 = vld [vmem:[#allocation1] sm:$0xff]  ;;  %3785 = vmatpush.bf16.msra.mxu0 %v8352_v43 }
 0x591   :  { %3134 = vst [vmem:[#allocation1] ss:$9 sm:$0xff] %v3128_v25  ;;  %v13308_v56 = vadd.f32 %v3125_v55, %v12921_v5  ;;  %v8364_v55 = vor.u32 %v9628_v51, %v8361_v15  ;;  %3798 = vmatpush.bf16.msra.mxu1 %v8356_v63 }
 0x592   :  { %3136 = vst [vmem:[#allocation1 + $0x1] ss:$9 sm:$0xff] %v3129_v6  ;;  %3811 = vmatpush.bf16.msra.mxu2 %v8360_v41  ;;  %v8343_v41 = vld [vmem:[%s16520_s3 + $0xa8] sm:$0xf] }
 0x593   :  { %8113 = vst [vmem:[%s16524_s4 + $0xc] sm:$0x3] %v13308_v56  ;;  %v3147_v50 = vpack.c.bf16 %v13308_v56, %v13308_v56  ;;  %3824 = vmatpush.bf16.msra.mxu3 %v8364_v55 }
 0x595   :  { %3348 = vmatmul.bf16.vlgmr.msrb.gmra.mxu0 %v3147_v50  ;;  %3361 = vmatmul.bf16.vlgmr.msrb.gmra.mxu1 %v3147_v50 }
 0x596   :  { %3374 = vmatmul.bf16.vlgmr.msrb.gmra.mxu2 %v3147_v50  ;;  %3387 = vmatmul.bf16.vlgmr.msrb.gmra.mxu3 %v3147_v50 }
 0x597   :  { %3799 = vmatpush.bf16.msra.mxu1 %v8340_v57  ;;  %v9613_v57 = vld [vmem:[%s16520_s3 + $0x4c] sm:$0xf0] }
 0x599   :  { %v3137_v60 = vld [vmem:[#allocation1] sm:$0xff] }
 0x612   :  { %v3349_v54 = vpop.f32.mrf.mxu0  ;;  %v3362_v10 = vpop.f32.mrf.mxu1 }
 0x613   :  { %v3396_v30 = vrot.slane %v3362_v10, 7 }
 0x615   :  { %v3399_v4 = vsel %vm286_vm0, %v3349_v54, %v3396_v30  ;;  %v3402_v19 = vsel %vm292_vm1, %v3349_v54, %v3396_v30  ;;  %v13393_v30 = vadd.f32 %v3137_v60, %v13006_v35 }
 0x619   :  { %v3375_v32 = vpop.f32.mrf.mxu2  ;;  %v3388_v13 = vpop.f32.mrf.mxu3 }
 0x61a   :  { %v3397_v5 = vrot.slane %v3375_v32, 6  ;;  %v3398_v9 = vrot.slane %v3388_v13, 5  ;;  %v3351_v21 = vpop.f32.mrf.mxu0  ;;  %v3364_v28 = vpop.f32.mrf.mxu1 }
 0x61c   :  { %v3400_v2 = vsel %vm288_vm2, %v3397_v5, %v3398_v9  ;;  %v3403_v24 = vsel %vm294_vm4, %v3397_v5, %v3398_v9 }
 0x61d   :  { %v3401_v34 = vsel %vm16639_vm11, %v3399_v4, %v3400_v2  ;;  %v3404_v22 = vsel %vm16640_vm6, %v3402_v19, %v3403_v24  ;;  %v3541_v19 = vrot.slane %v13393_v30, 1 }
 0x61e   :  { %v3405_v42 = vrot.slane %v3404_v22, 1  ;;  %v13328_v17 = vadd.f32 %v8114_v49, %v3401_v34 }
 0x620   :  { %v13330_v52 = vadd.f32 %v8115_v61, %v3405_v42  ;;  %v8244_v58 = vmul.f32 -1.442695, %v13328_v17  ;;  %v3450_v0 = vrot.slane %v13328_v17, 1  ;;  %v3498_v46 = vrot.slane %v13328_v17, 3 }
 0x621   :  { %v3377_v18 = vpop.f32.mrf.mxu2  ;;  %v3390_v16 = vpop.f32.mrf.mxu3  ;;  %v3492_v54 = vrot.slane %v13328_v17, 2 }
 0x622   :  { %10083 = vpow2.f32 %v8244_v58  ;;  %v8245_v36 = vmul.f32 -1.442695, %v13330_v52  ;;  %v3451_v47 = vrot.slane %v13330_v52, 1  ;;  %v8246_v31 = vmul.f32 -1.442695, %v3450_v0 }
 0x623   :  { %v3499_v11 = vrot.slane %v13330_v52, 3  ;;  %v8248_v26 = vmul.f32 -1.442695, %v3498_v46  ;;  %v3493_v13 = vrot.slane %v13330_v52, 2 }
 0x624   :  { %10085 = vpow2.f32 %v8245_v36  ;;  %v8247_v62 = vmul.f32 -1.442695, %v3451_v47  ;;  %v9620_v36 = vld [vmem:[%s16520_s3 + $0x8c] sm:$0xf] }
 0x625   :  { %10087 = vpow2.f32 %v8246_v31  ;;  %v8249_v14 = vmul.f32 -1.442695, %v3499_v11 }
 0x626   :  { %10089 = vpow2.f32 %v8247_v62  ;;  %v9625_v62 = vld [vmem:[%s16520_s3 + $0xac] sm:$0xf0] }
 0x627   :  { %10091 = vpow2.f32 %v8248_v26  ;;  %v8336_v12 = vor.u32 %v9625_v62, %v8335_v38  ;;  %v8303_v62 = vld [vmem:[%s16520_s3 + $0x60] sm:$0xf] }
 0x628   :  { %v10084_v20 = vpop.eup %10083  ;;  %10093 = vpow2.f32 %v8249_v14 }
 0x629   :  { %v13380_v8 = vadd.f32 1.0, %v10084_v20  ;;  %3786 = vmatpush.bf16.msra.mxu0 %v8336_v12 }
 0x62a   :  { %v10086_v25 = vpop.eup %10085 }
 0x62b   :  { %v10088_v6 = vpop.eup %10087  ;;  %v13388_v50 = vadd.f32 1.0, %v10086_v25  ;;  %10095 = vrcp.f32 %v13380_v8  ;;  %v3427_v9 = vand.u32 2147483647, %v13380_v8  ;;  %v3429_v35 = vand.u32 2147483648, %v13380_v8 }
 0x62c   :  { %v10090_v10 = vpop.eup %10089  ;;  %v13395_v32 = vadd.f32 1.0, %v10088_v6  ;;  %vm3423_vm12 = vweird.f32 %v13380_v8  ;;  %v9624_v6 = vld [vmem:[%s16520_s3 + $0xac] sm:$0xf] }
 0x62d   :  { %10097 = vrcp.f32 %v13388_v50  ;;  %v10092_v5 = vpop.eup %10091  ;;  %v13400_v21 = vadd.f32 1.0, %v10090_v10  ;;  %v3442_v49 = vand.u32 2147483647, %v13388_v50  ;;  %v3444_v4 = vand.u32 2147483648, %v13388_v50 }
 0x62e   :  { %10099 = vrcp.f32 %v13395_v32  ;;  %v10094_v28 = vpop.eup %10093  ;;  %v3471_v24 = vand.u32 2147483647, %v13395_v32  ;;  %v13410_v61 = vadd.f32 1.0, %v10092_v5  ;;  %vm13413_vm14 = vcmp.eq.f32.partialorder %v3427_v9, 8.507059e+37  ;;  %v8319_v9 = vld [vmem:[%s16520_s3 + $0x80] sm:$0xf] }
 0x62f   :  { %10101 = vtanh.f32 %v3492_v54  ;;  %vm3438_vm5 = vweird.f32 %v13388_v50  ;;  %v13418_v42 = vadd.f32 1.0, %v10094_v28  ;;  %v3430_v52 = vor.u32 1.1754944e-38, %v3429_v35  ;;  %v8345_v54 = vld [vmem:[%s16520_s3 + $0xb8] sm:$0xf0] }
 0x630   :  { %10103 = vrcp.f32 %v13400_v21  ;;  %v3473_v58 = vand.u32 2147483648, %v13395_v32  ;;  %v3486_v0 = vand.u32 2147483647, %v13400_v21  ;;  %vm13429_vm7 = vcmp.eq.f32.partialorder %v3442_v49, 8.507059e+37 }
 0x631   :  { %v10096_v2 = vpop.eup %10095  ;;  %10105 = vtanh.f32 %v3493_v13  ;;  %v3445_v47 = vor.u32 1.1754944e-38, %v3444_v4  ;;  %vm3467_vm3 = vweird.f32 %v13395_v32  ;;  %vm13436_vm8 = vcmp.eq.f32.partialorder %v3471_v24, 8.507059e+37  ;;  %v9621_v4 = vld [vmem:[%s16520_s3 + $0x8c] sm:$0xf0] }
 0x632   :  { %v3419_v34 = vmul.f32 %v10096_v2, %v13380_v8  ;;  %10107 = vrcp.f32 %v13410_v61  ;;  %vm3482_vm9 = vweird.f32 %v13400_v21  ;;  %vm3424_vm13 = vweird.f32 %v10096_v2  ;;  %v9626_v8 = vld [vmem:[%s16520_s3 + $0xb4] sm:$0xf0] }
 0x633   :  { %v13420_v17 = vpop.eup %10097  ;;  %10109 = vrcp.f32 %v13418_v42  ;;  %v3488_v37 = vand.u32 2147483648, %v13400_v21  ;;  %v3474_v59 = vor.u32 1.1754944e-38, %v3473_v58  ;;  %vm13459_vm10 = vcmp.eq.f32.partialorder %v3486_v0, 8.507059e+37  ;;  %vm3425_vm11 = vmor %vm3423_vm12, %vm3424_vm13  ;;  %v8327_v58 = vld [vmem:[%s16520_s3 + $0x88] sm:$0xf] }
 0x634   :  { %v13425_v46 = vpop.eup %10099  ;;  %v3420_v18 = vsub.f32 1.0, %v3419_v34  ;;  %v3434_v16 = vmul.f32 %v13420_v17, %v13388_v50  ;;  %vm3439_vm15 = vweird.f32 %v13420_v17  ;;  %v3519_v13 = vand.u32 2147483647, %v13410_v61 }
 0x635   :  { %v10102_v31 = vpop.eup %10101  ;;  %v3463_v11 = vmul.f32 %v13425_v46, %v13395_v32  ;;  %vm3468_vm6 = vweird.f32 %v13425_v46  ;;  %v3489_v60 = vor.u32 1.1754944e-38, %v3488_v37  ;;  %vm3440_vm12 = vmor %vm3438_vm5, %vm3439_vm15  ;;  %v3521_v32 = vand.u32 2147483648, %v13410_v61 }
 0x636   :  { %v13448_v27 = vpop.eup %10103  ;;  %v3421_v7 = vmul.f32 %v10096_v2, %v3420_v18  ;;  %v3435_v14 = vsub.f32 1.0, %v3434_v16  ;;  %v8344_v18 = vor.u32 %v9626_v8, %v8343_v41  ;;  %v8348_v16 = vor.u32 %v9624_v6, %v8345_v54  ;;  %v8289_v41 = vld [vmem:[%s16520_s3 + $0x50] sm:$0xf0]  ;;  %v8295_v6 = vld [vmem:[%s16520_s3 + $0x48] sm:$0xf] }
 0x637   :  { %v10106_v33 = vpop.eup %10105  ;;  %v3464_v48 = vsub.f32 1.0, %v3463_v11  ;;  %v3478_v53 = vmul.f32 %v13448_v27, %v13400_v21  ;;  %vm3483_vm13 = vweird.f32 %v13448_v27  ;;  %v9622_v21 = vld [vmem:[%s16520_s3 + $0x94] sm:$0xf0]  ;;  %v8320_v38 = vor.u32 %v9621_v4, %v8319_v9  ;;  %v8297_v9 = vld [vmem:[%s16520_s3 + $0x58] sm:$0xf0] }
 0x638   :  { %v3422_v40 = vadd.f32 %v10096_v2, %v3421_v7  ;;  %v3436_v1 = vmul.f32 %v13420_v17, %v3435_v14  ;;  %v13465_v3 = vpop.eup %10107  ;;  %vm3484_vm5 = vmor %vm3482_vm9, %vm3483_vm13  ;;  %3812 = vmatpush.bf16.msra.mxu2 %v8344_v18  ;;  %3825 = vmatpush.bf16.msra.mxu3 %v8348_v16  ;;  %v3534_v12 = vand.u32 2147483647, %v13418_v42  ;;  %v8281_v18 = vld [vmem:[%s16520_s3 + $0x38] sm:$0xf0]  ;;  %vm16656_vm13 = vcmask 1042433  }
 0x639   :  { %v3465_v20 = vmul.f32 %v13425_v46, %v3464_v48  ;;  %v3479_v43 = vsub.f32 1.0, %v3478_v53  ;;  %v3511_v63 = vmul.f32 %v13465_v3, %v13410_v61  ;;  %v13481_v51 = vpop.eup %10109  ;;  %3787 = vmatpush.bf16.msra.mxu0 %v8320_v38 }
 0x63a   :  { %v3426_v44 = vsel %vm3425_vm11, %v10096_v2, %v3422_v40  ;;  %v3437_v39 = vadd.f32 %v13420_v17, %v3436_v1  ;;  %v3526_v5 = vmul.f32 %v13481_v51, %v13418_v42  ;;  %v9619_v2 = vld [vmem:[%s16520_s3 + $0x84] sm:$0xf]  ;;  %v9616_v40 = vld [vmem:[%s16520_s3 + $0x6c] sm:$0xf]  ;;  %v8313_v1 = vld [vmem:[%s16520_s3 + $0x78] sm:$0xf0] }
 0x63b   :  { %v3431_v15 = vsel %vm13413_vm14, %v3430_v52, %v3426_v44  ;;  %v3466_v25 = vadd.f32 %v13425_v46, %v3465_v20  ;;  %v3480_v55 = vmul.f32 %v13448_v27, %v3479_v43  ;;  %vm3469_vm14 = vmor %vm3467_vm3, %vm3468_vm6  ;;  %v3512_v50 = vsub.f32 1.0, %v3511_v63  ;;  %v8321_v52 = vld [vmem:[%s16520_s3 + $0x90] sm:$0xf0]  ;;  %v8287_v43 = vld [vmem:[%s16520_s3 + $0x40] sm:$0xf] }
 0x63c   :  { %v3441_v10 = vsel %vm3440_vm12, %v13420_v17, %v3437_v39  ;;  %v3527_v22 = vsub.f32 1.0, %v3526_v5  ;;  %v3545_v17 = vmul.f32 %v10102_v31, %v3431_v15  ;;  %v8324_v37 = vor.u32 %v9619_v2, %v8321_v52  ;;  %v9611_v63 = vld [vmem:[%s16520_s3 + $0x44] sm:$0xf]  ;;  %v9612_v5 = vld [vmem:[%s16520_s3 + $0x4c] sm:$0xf] }
 0x63d   :  { %v3446_v28 = vsel %vm13429_vm7, %v3445_v47, %v3441_v10  ;;  %v3470_v35 = vsel %vm3469_vm14, %v13425_v46, %v3466_v25  ;;  %v3481_v49 = vadd.f32 %v13448_v27, %v3480_v55  ;;  %v3513_v34 = vmul.f32 %v13465_v3, %v3512_v50  ;;  %v8329_v47 = vld [vmem:[%s16520_s3 + $0x98] sm:$0xf0]  ;;  %v9614_v50 = vld [vmem:[%s16520_s3 + $0x54] sm:$0xf0]  ;;  %v9607_v2 = vld [vmem:[%s16520_s3 + $0x24] sm:$0xf] }
 0x63e   :  { %v3475_v24 = vsel %vm13436_vm8, %v3474_v59, %v3470_v35  ;;  %v3528_v11 = vmul.f32 %v13481_v51, %v3527_v22  ;;  %v3546_v26 = vmul.f32 %v10106_v33, %v3446_v28  ;;  %v8311_v33 = vld [vmem:[%s16520_s3 + $0x68] sm:$0xf]  ;;  %vm3516_vm7 = vweird.f32 %v13465_v3  ;;  %3800 = vmatpush.bf16.msra.mxu1 %v8324_v37  ;;  %v8271_v35 = vld [vmem:[%s16520_s3 + $0x20] sm:$0xf] }
 0x63f   :  { %v3485_v0 = vsel %vm3484_vm5, %v13448_v27, %v3481_v49  ;;  %v3543_v46 = vmul.f32 %v3475_v24, %v13393_v30  ;;  %v9617_v27 = vld [vmem:[%s16520_s3 + $0x6c] sm:$0xf0]  ;;  %v3514_v48 = vadd.f32 %v13465_v3, %v3513_v34  ;;  %v8328_v59 = vor.u32 %v9622_v21, %v8327_v58  ;;  %v8273_v24 = vld [vmem:[%s16520_s3 + $0x30] sm:$0xf0] }
 0x640   :  { %v3490_v31 = vsel %vm13459_vm10, %v3489_v60, %v3485_v0  ;;  %v8332_v53 = vor.u32 %v9620_v36, %v8329_v47  ;;  %vm3515_vm3 = vweird.f32 %v13410_v61  ;;  %v3529_v44 = vadd.f32 %v13481_v51, %v3528_v11  ;;  %v9609_v49 = vld [vmem:[%s16520_s3 + $0x2c] sm:$0xf0]  ;;  %v9610_v0 = vld [vmem:[%s16520_s3 + $0x34] sm:$0xf0]  ;;  %v8255_v47 = vld [vmem:[%s16520_s3] sm:$0xf] }
 0x641   :  { %v3544_v7 = vmul.f32 %v3541_v19, %v3490_v31  ;;  %v13555_v14 = vadd.f32 %v3545_v17, %v3543_v46  ;;  %vm3531_vm8 = vweird.f32 %v13481_v51  ;;  %v8304_v39 = vor.u32 %v9617_v27, %v8303_v62  ;;  %vm13598_vm9 = vmor %vm3515_vm3, %vm3516_vm7  ;;  %3813 = vmatpush.bf16.msra.mxu2 %v8328_v59  ;;  %v9608_v46 = vld [vmem:[%s16520_s3 + $0x2c] sm:$0xf]  ;;  %v9605_v31 = vld [vmem:[%s16520_s3 + $0xc] sm:$0xf0] }
 0x642   :  { %v8308_v60 = vor.u32 %v9615_v45, %v8305_v29  ;;  %v3536_v15 = vand.u32 2147483648, %v13418_v42  ;;  %3826 = vmatpush.bf16.msra.mxu3 %v8332_v53  ;;  %v8312_v25 = vor.u32 %v9618_v23, %v8311_v33  ;;  %v8316_v55 = vor.u32 %v9616_v40, %v8313_v1  ;;  %v9603_v62 = vld [vmem:[%s16520_s3 + $0x4] sm:$0xf]  ;;  %v8257_v27 = vld [vmem:[%s16520_s3 + $0x10] sm:$0xf0] }
 0x643   :  { %v13579_v20 = vadd.f32 %v3546_v26, %v3544_v7  ;;  %10111 = vtanh.f32 %v13555_v14  ;;  %v3518_v54 = vsel %vm13598_vm9, %v13465_v3, %v3514_v48  ;;  %vm3530_vm10 = vweird.f32 %v13418_v42  ;;  %3788 = vmatpush.bf16.msra.mxu0 %v8304_v39  ;;  %v8263_v45 = vld [vmem:[%s16520_s3 + $0x8] sm:$0xf]  ;;  %v9606_v29 = vld [vmem:[%s16520_s3 + $0x14] sm:$0xf0]  ;;  %v9604_v59 = vld [vmem:[%s16520_s3 + $0xc] sm:$0xf] }
 0x644   :  { %v8288_v10 = vor.u32 %v9613_v57, %v8287_v43  ;;  %v3522_v28 = vor.u32 1.1754944e-38, %v3521_v32  ;;  %vm13624_vm15 = vmor %vm3530_vm10, %vm3531_vm8  ;;  %3801 = vmatpush.bf16.msra.mxu1 %v8308_v60  ;;  %v8292_v3 = vor.u32 %v9611_v63, %v8289_v41  ;;  %vm3520_vm11 = vcmp.eq.f32.partialorder %v3519_v13, 8.507059e+37  ;;  %v8265_v53 = vld [vmem:[%s16520_s3 + $0x18] sm:$0xf0] }
 0x645   :  { %10113 = vtanh.f32 %v13579_v20  ;;  %v3533_v32 = vsel %vm13624_vm15, %v13481_v51, %v3529_v44  ;;  %vm13639_vm6 = vcmp.eq.f32.partialorder %v3534_v12, 8.507059e+37  ;;  %v3537_v61 = vor.u32 1.1754944e-38, %v3536_v15  ;;  %3814 = vmatpush.bf16.msra.mxu2 %v8312_v25  ;;  %v8279_v51 = vld [vmem:[%s16520_s3 + $0x28] sm:$0xf] }
 0x646   :  { %v3523_v22 = vsel %vm3520_vm11, %v3522_v28, %v3518_v54  ;;  %3827 = vmatpush.bf16.msra.mxu3 %v8316_v55  ;;  %v8296_v13 = vor.u32 %v9614_v50, %v8295_v6  ;;  %v8300_v17 = vor.u32 %v9612_v5, %v8297_v9  ;;  %v8272_v58 = vor.u32 %v9609_v49, %v8271_v35  ;;  %v8251_v25 = vld [vmem:[%s16523_s0 + $0x20] ss:$8 sm:$0xf] }
 0x647   :  { %3789 = vmatpush.bf16.msra.mxu0 %v8288_v10  ;;  %v3538_v21 = vsel %vm13639_vm6, %v3537_v61, %v3533_v32  ;;  %v8276_v36 = vor.u32 %v9607_v2, %v8273_v24  ;;  %v3557_v11 = vrot.slane %v13308_v56, 1  ;;  %v8280_v7 = vor.u32 %v9610_v0, %v8279_v51  ;;  %v8252_v50 = vld [vmem:[%s16523_s0 + $0x60] ss:$8 sm:$0xf] }
 0x648   :  { %3802 = vmatpush.bf16.msra.mxu1 %v8292_v3  ;;  %v8284_v37 = vor.u32 %v9608_v46, %v8281_v18  ;;  %v8256_v48 = vor.u32 %v9605_v31, %v8255_v47  ;;  %v8260_v23 = vor.u32 %v9603_v62, %v8257_v27  ;;  %v8264_v40 = vor.u32 %v9606_v29, %v8263_v45  ;;  %v8506_v18 = vld [vmem:[%s16520_s3 + $0xf0] sm:$0xf0]  ;;  %v9664_v47 = vld [vmem:[%s16520_s3 + $0xec] sm:$0xf]  ;;  %v8514_v31 = vld [vmem:[%s16520_s3 + $0xf8] sm:$0xf0] }
 0x649   :  { %v10112_v34 = vpop.eup %10111  ;;  %3815 = vmatpush.bf16.msra.mxu2 %v8296_v13  ;;  %v8268_v1 = vor.u32 %v9604_v59, %v8265_v53  ;;  %v3572_v12 = vsub.f32 %v13555_v14, %v13393_v30  ;;  %v3573_v57 = vsub.f32 %v13579_v20, %v3541_v19  ;;  %vm16655_vm12 = vcmask 1041408   ;;  %v9661_v62 = vld [vmem:[%s16520_s3 + $0xcc] sm:$0xf0]  ;;  %v9659_v27 = vld [vmem:[%s16520_s3 + $0xc4] sm:$0xf] }
 0x64a   :  { %v3551_v52 = vmul.f32 %v10112_v34, %v3523_v22  ;;  %3828 = vmatpush.bf16.msra.mxu3 %v8300_v17  ;;  %v8504_v17 = vld [vmem:[%s16520_s3 + $0xe0] sm:$0xf]  ;;  %v8490_v45 = vld [vmem:[%s16520_s3 + $0xd0] sm:$0xf0]  ;;  %v8496_v29 = vld [vmem:[%s16520_s3 + $0xc8] sm:$0xf] }
 0x64b   :  { %v10114_v16 = vpop.eup %10113  ;;  %3790 = vmatpush.bf16.msra.mxu0 %v8272_v58  ;;  %v9663_v58 = vld [vmem:[%s16520_s3 + $0xe4] sm:$0xf]  ;;  %v8493_v53 = vor.u32 %v9659_v27, %v8490_v45 }
 0x64c   :  { %v3552_v26 = vmul.f32 %v10114_v16, %v3538_v21  ;;  %v3559_v38 = vsub.f32 %v3551_v52, %v13308_v56  ;;  %3803 = vmatpush.bf16.msra.mxu1 %v8276_v36  ;;  %v9665_v52 = vld [vmem:[%s16520_s3 + $0xec] sm:$0xf0]  ;;  %v8512_v16 = vld [vmem:[%s16520_s3 + $0xe8] sm:$0xf]  ;;  %v8509_v21 = vor.u32 %v9663_v58, %v8506_v18  ;;  %v9666_v36 = vld [vmem:[%s16520_s3 + $0xf4] sm:$0xf0] }
 0x64d   :  { %3816 = vmatpush.bf16.msra.mxu2 %v8280_v7  ;;  %v8505_v46 = vor.u32 %v9665_v52, %v8504_v17  ;;  %v8472_v17 = vld [vmem:[%s16520_s3 + $0xa0] sm:$0xf]  ;;  %v9655_v18 = vld [vmem:[%s16520_s3 + $0xa4] sm:$0xf] }
 0x64e   :  { %v3560_v33 = vsub.f32 %v3552_v26, %v3557_v11  ;;  %3566 = vst [vmem:[#allocation1] ss:$9 sm:$0xff] %v3559_v38  ;;  %3829 = vmatpush.bf16.msra.mxu3 %v8284_v37  ;;  %v8513_v11 = vor.u32 %v9666_v36, %v8512_v16  ;;  %v8517_v26 = vor.u32 %v9664_v47, %v8514_v31  ;;  %v8488_v38 = vld [vmem:[%s16520_s3 + $0xc0] sm:$0xf]  ;;  %v8474_v16 = vld [vmem:[%s16520_s3 + $0xb0] sm:$0xf0] }
 0x64f   :  { %3791 = vmatpush.bf16.msra.mxu0 %v8256_v48  ;;  %v8489_v37 = vor.u32 %v9661_v62, %v8488_v38  ;;  %v8477_v45 = vor.u32 %v9655_v18, %v8474_v16  ;;  %v9647_v18 = vld [vmem:[%s16520_s3 + $0x64] sm:$0xf]  ;;  %v8442_v16 = vld [vmem:[%s16520_s3 + $0x70] sm:$0xf0] }
 0x650   :  { %3568 = vst [vmem:[#allocation1 + $0x1] ss:$9 sm:$0xff] %v3560_v33  ;;  %3804 = vmatpush.bf16.msra.mxu1 %v8260_v23  ;;  %v9662_v33 = vld [vmem:[%s16520_s3 + $0xd4] sm:$0xf0] }
 0x651   :  { %3817 = vmatpush.bf16.msra.mxu2 %v8264_v40  ;;  %v8497_v23 = vor.u32 %v9662_v33, %v8496_v29  ;;  %v9660_v40 = vld [vmem:[%s16520_s3 + $0xcc] sm:$0xf] }
 0x652   :  { %3830 = vmatpush.bf16.msra.mxu3 %v8268_v1  ;;  %v8498_v1 = vld [vmem:[%s16520_s3 + $0xd8] sm:$0xf0] }
 0x653   :  { %4228 = vmatpush.bf16.msrb.mxu0 %v8505_v46 }
 0x654   :  { %4241 = vmatpush.bf16.msrb.mxu1 %v8509_v21 }
 0x655   :  { %4254 = vmatpush.bf16.msrb.mxu2 %v8513_v11  ;;  %v9650_v11 = vld [vmem:[%s16520_s3 + $0x74] sm:$0xf0] }
 0x656   :  { %4267 = vmatpush.bf16.msrb.mxu3 %v8517_v26 }
 0x657   :  { %v3569_v43 = vld [vmem:[#allocation1] sm:$0xff]  ;;  %4229 = vmatpush.bf16.msrb.mxu0 %v8489_v37 }
 0x658   :  { %3578 = vst [vmem:[#allocation1] ss:$9 sm:$0xff] %v3572_v12  ;;  %v13695_v44 = vadd.f32 %v3569_v43, %v13308_v56  ;;  %v8501_v43 = vor.u32 %v9660_v40, %v8498_v1  ;;  %4242 = vmatpush.bf16.msrb.mxu1 %v8493_v53 }
 0x659   :  { %3580 = vst [vmem:[#allocation1 + $0x1] ss:$9 sm:$0xff] %v3573_v57  ;;  %4255 = vmatpush.bf16.msrb.mxu2 %v8497_v23  ;;  %v8480_v23 = vld [vmem:[%s16520_s3 + $0xa8] sm:$0xf] }
 0x65a   :  { %8250 = vst [vmem:[%s16524_s4 + $0xe] sm:$0x3] %v13695_v44  ;;  %v3591_v39 = vpack.c.bf16 %v13695_v44, %v13695_v44  ;;  %4268 = vmatpush.bf16.msrb.mxu3 %v8501_v43 }
 0x65c   :  { %3792 = vmatmul.bf16.vlgmr.msra.gmra.mxu0 %v3591_v39  ;;  %3805 = vmatmul.bf16.vlgmr.msra.gmra.mxu1 %v3591_v39 }
 0x65d   :  { %3818 = vmatmul.bf16.vlgmr.msra.gmra.mxu2 %v3591_v39  ;;  %3831 = vmatmul.bf16.vlgmr.msra.gmra.mxu3 %v3591_v39 }
 0x65e   :  { %4243 = vmatpush.bf16.msrb.mxu1 %v8477_v45  ;;  %v9645_v45 = vld [vmem:[%s16520_s3 + $0x4c] sm:$0xf0] }
 0x660   :  { %v3581_v48 = vld [vmem:[#allocation1] sm:$0xff] }
 0x6d9   :  { %v3793_v14 = vpop.f32.mrf.mxu0  ;;  %v3806_v60 = vpop.f32.mrf.mxu1 }
 0x6da   :  { %v3840_v19 = vrot.slane %v3806_v60, 7 }
 0x6dc   :  { %v3843_v55 = vsel %vm286_vm0, %v3793_v14, %v3840_v19  ;;  %v3846_v6 = vsel %vm292_vm1, %v3793_v14, %v3840_v19  ;;  %v13780_v19 = vadd.f32 %v3581_v48, %v13393_v30 }
 0x6e0   :  { %v3819_v20 = vpop.f32.mrf.mxu2  ;;  %v3832_v63 = vpop.f32.mrf.mxu3 }
 0x6e1   :  { %v3841_v56 = vrot.slane %v3819_v20, 6  ;;  %v3842_v41 = vrot.slane %v3832_v63, 5  ;;  %v3795_v8 = vpop.f32.mrf.mxu0  ;;  %v3808_v15 = vpop.f32.mrf.mxu1 }
 0x6e3   :  { %v3844_v54 = vsel %vm288_vm2, %v3841_v56, %v3842_v41  ;;  %v3847_v10 = vsel %vm294_vm4, %v3841_v56, %v3842_v41 }
 0x6e4   :  { %v3845_v5 = vsel %vm16655_vm12, %v3843_v55, %v3844_v54  ;;  %v3848_v9 = vsel %vm16656_vm13, %v3846_v6, %v3847_v10  ;;  %v3985_v6 = vrot.slane %v13780_v19, 1 }
 0x6e5   :  { %v3849_v28 = vrot.slane %v3848_v9, 1  ;;  %v13715_v42 = vadd.f32 %v8251_v25, %v3845_v5 }
 0x6e7   :  { %v13717_v3 = vadd.f32 %v8252_v50, %v3849_v28  ;;  %v8381_v35 = vmul.f32 -1.442695, %v13715_v42  ;;  %v3894_v49 = vrot.slane %v13715_v42, 1  ;;  %v3942_v32 = vrot.slane %v13715_v42, 3 }
 0x6e8   :  { %v3821_v4 = vpop.f32.mrf.mxu2  ;;  %v3834_v2 = vpop.f32.mrf.mxu3  ;;  %v3936_v14 = vrot.slane %v13715_v42, 2 }
 0x6e9   :  { %10115 = vpow2.f32 %v8381_v35  ;;  %v8382_v24 = vmul.f32 -1.442695, %v13717_v3  ;;  %v3895_v34 = vrot.slane %v13717_v3, 1  ;;  %v8383_v22 = vmul.f32 -1.442695, %v3894_v49 }
 0x6ea   :  { %v3943_v61 = vrot.slane %v13717_v3, 3  ;;  %v8385_v13 = vmul.f32 -1.442695, %v3942_v32  ;;  %v3937_v63 = vrot.slane %v13717_v3, 2 }
 0x6eb   :  { %10117 = vpow2.f32 %v8382_v24  ;;  %v8384_v51 = vmul.f32 -1.442695, %v3895_v34  ;;  %v9652_v24 = vld [vmem:[%s16520_s3 + $0x8c] sm:$0xf] }
 0x6ec   :  { %10119 = vpow2.f32 %v8383_v22  ;;  %v8386_v0 = vmul.f32 -1.442695, %v3943_v61 }
 0x6ed   :  { %10121 = vpow2.f32 %v8384_v51  ;;  %v9657_v51 = vld [vmem:[%s16520_s3 + $0xac] sm:$0xf0] }
 0x6ee   :  { %10123 = vpow2.f32 %v8385_v13  ;;  %v8473_v62 = vor.u32 %v9657_v51, %v8472_v17  ;;  %v8440_v51 = vld [vmem:[%s16520_s3 + $0x60] sm:$0xf] }
 0x6ef   :  { %v10116_v7 = vpop.eup %10115  ;;  %10125 = vpow2.f32 %v8386_v0 }
 0x6f0   :  { %v13767_v59 = vadd.f32 1.0, %v10116_v7  ;;  %4230 = vmatpush.bf16.msrb.mxu0 %v8473_v62 }
 0x6f1   :  { %v10118_v12 = vpop.eup %10117 }
 0x6f2   :  { %v10120_v57 = vpop.eup %10119  ;;  %v13775_v39 = vadd.f32 1.0, %v10118_v12  ;;  %10127 = vrcp.f32 %v13767_v59  ;;  %v3871_v41 = vand.u32 2147483647, %v13767_v59  ;;  %v3873_v30 = vand.u32 2147483648, %v13767_v59 }
 0x6f3   :  { %v10122_v60 = vpop.eup %10121  ;;  %v13782_v20 = vadd.f32 1.0, %v10120_v57  ;;  %vm3867_vm14 = vweird.f32 %v13767_v59  ;;  %v9656_v57 = vld [vmem:[%s16520_s3 + $0xac] sm:$0xf] }
 0x6f4   :  { %10129 = vrcp.f32 %v13775_v39  ;;  %v10124_v56 = vpop.eup %10123  ;;  %v13787_v8 = vadd.f32 1.0, %v10122_v60  ;;  %v3886_v25 = vand.u32 2147483647, %v13775_v39  ;;  %v3888_v55 = vand.u32 2147483648, %v13775_v39 }
 0x6f5   :  { %10131 = vrcp.f32 %v13782_v20  ;;  %v10126_v15 = vpop.eup %10125  ;;  %v3915_v10 = vand.u32 2147483647, %v13782_v20  ;;  %v13797_v50 = vadd.f32 1.0, %v10124_v56  ;;  %vm13800_vm5 = vcmp.eq.f32.partialorder %v3871_v41, 8.507059e+37  ;;  %v8456_v41 = vld [vmem:[%s16520_s3 + $0x80] sm:$0xf] }
 0x6f6   :  { %10133 = vtanh.f32 %v3936_v14  ;;  %vm3882_vm7 = vweird.f32 %v13775_v39  ;;  %v13805_v28 = vadd.f32 1.0, %v10126_v15  ;;  %v3874_v3 = vor.u32 1.1754944e-38, %v3873_v30  ;;  %v8482_v14 = vld [vmem:[%s16520_s3 + $0xb8] sm:$0xf0] }
 0x6f7   :  { %10135 = vrcp.f32 %v13787_v8  ;;  %v3917_v35 = vand.u32 2147483648, %v13782_v20  ;;  %v3930_v49 = vand.u32 2147483647, %v13787_v8  ;;  %vm13816_vm3 = vcmp.eq.f32.partialorder %v3886_v25, 8.507059e+37 }
 0x6f8   :  { %v10128_v54 = vpop.eup %10127  ;;  %10137 = vtanh.f32 %v3937_v63  ;;  %v3889_v34 = vor.u32 1.1754944e-38, %v3888_v55  ;;  %vm3911_vm8 = vweird.f32 %v13782_v20  ;;  %vm13823_vm9 = vcmp.eq.f32.partialorder %v3915_v10, 8.507059e+37  ;;  %v9653_v55 = vld [vmem:[%s16520_s3 + $0x8c] sm:$0xf0] }
 0x6f9   :  { %v3863_v5 = vmul.f32 %v10128_v54, %v13767_v59  ;;  %10139 = vrcp.f32 %v13797_v50  ;;  %vm3926_vm10 = vweird.f32 %v13787_v8  ;;  %vm3868_vm15 = vweird.f32 %v10128_v54  ;;  %v9658_v59 = vld [vmem:[%s16520_s3 + $0xb4] sm:$0xf0] }
 0x6fa   :  { %v13807_v42 = vpop.eup %10129  ;;  %10141 = vrcp.f32 %v13805_v28  ;;  %v3932_v46 = vand.u32 2147483648, %v13787_v8  ;;  %v3918_v47 = vor.u32 1.1754944e-38, %v3917_v35  ;;  %vm13846_vm11 = vcmp.eq.f32.partialorder %v3930_v49, 8.507059e+37  ;;  %vm3869_vm12 = vmor %vm3867_vm14, %vm3868_vm15  ;;  %v8464_v35 = vld [vmem:[%s16520_s3 + $0x88] sm:$0xf] }
 0x6fb   :  { %v13812_v32 = vpop.eup %10131  ;;  %v3864_v4 = vsub.f32 1.0, %v3863_v5  ;;  %v3878_v2 = vmul.f32 %v13807_v42, %v13775_v39  ;;  %vm3883_vm6 = vweird.f32 %v13807_v42  ;;  %v3963_v63 = vand.u32 2147483647, %v13797_v50 }
 0x6fc   :  { %v10134_v22 = vpop.eup %10133  ;;  %v3907_v61 = vmul.f32 %v13812_v32, %v13782_v20  ;;  %vm3912_vm13 = vweird.f32 %v13812_v32  ;;  %v3933_v48 = vor.u32 1.1754944e-38, %v3932_v46  ;;  %vm3884_vm14 = vmor %vm3882_vm7, %vm3883_vm6  ;;  %v3965_v20 = vand.u32 2147483648, %v13797_v50 }
 0x6fd   :  { %v13835_v52 = vpop.eup %10135  ;;  %v3865_v58 = vmul.f32 %v10128_v54, %v3864_v4  ;;  %v3879_v0 = vsub.f32 1.0, %v3878_v2  ;;  %v8481_v4 = vor.u32 %v9658_v59, %v8480_v23  ;;  %v8485_v2 = vor.u32 %v9656_v57, %v8482_v14  ;;  %v8426_v23 = vld [vmem:[%s16520_s3 + $0x50] sm:$0xf0]  ;;  %v8432_v57 = vld [vmem:[%s16520_s3 + $0x48] sm:$0xf] }
 0x6fe   :  { %v10138_v21 = vpop.eup %10137  ;;  %v3908_v36 = vsub.f32 1.0, %v3907_v61  ;;  %v3922_v31 = vmul.f32 %v13835_v52, %v13787_v8  ;;  %vm3927_vm15 = vweird.f32 %v13835_v52  ;;  %v9654_v8 = vld [vmem:[%s16520_s3 + $0x94] sm:$0xf0]  ;;  %v8457_v17 = vor.u32 %v9653_v55, %v8456_v41  ;;  %v8434_v41 = vld [vmem:[%s16520_s3 + $0x58] sm:$0xf0] }
 0x6ff   :  { %v3866_v26 = vadd.f32 %v10128_v54, %v3865_v58  ;;  %v3880_v38 = vmul.f32 %v13807_v42, %v3879_v0  ;;  %v13852_v27 = vpop.eup %10139  ;;  %vm3928_vm7 = vmor %vm3926_vm10, %vm3927_vm15  ;;  %4256 = vmatpush.bf16.msrb.mxu2 %v8481_v4  ;;  %4269 = vmatpush.bf16.msrb.mxu3 %v8485_v2  ;;  %v3978_v62 = vand.u32 2147483647, %v13805_v28  ;;  %v8418_v4 = vld [vmem:[%s16520_s3 + $0x38] sm:$0xf0]  ;;  %vm16672_vm15 = vcmask 1042433  }
 0x700   :  { %v3909_v7 = vmul.f32 %v13812_v32, %v3908_v36  ;;  %v3923_v37 = vsub.f32 1.0, %v3922_v31  ;;  %v3955_v53 = vmul.f32 %v13852_v27, %v13797_v50  ;;  %v13868_v40 = vpop.eup %10141  ;;  %4231 = vmatpush.bf16.msrb.mxu0 %v8457_v17 }
 0x701   :  { %v3870_v29 = vsel %vm3869_vm12, %v10128_v54, %v3866_v26  ;;  %v3881_v33 = vadd.f32 %v13807_v42, %v3880_v38  ;;  %v3970_v56 = vmul.f32 %v13868_v40, %v13805_v28  ;;  %v9651_v54 = vld [vmem:[%s16520_s3 + $0x84] sm:$0xf]  ;;  %v9648_v26 = vld [vmem:[%s16520_s3 + $0x6c] sm:$0xf]  ;;  %v8450_v38 = vld [vmem:[%s16520_s3 + $0x78] sm:$0xf0] }
 0x702   :  { %v3875_v1 = vsel %vm13800_vm5, %v3874_v3, %v3870_v29  ;;  %v3910_v12 = vadd.f32 %v13812_v32, %v3909_v7  ;;  %v3924_v43 = vmul.f32 %v13835_v52, %v3923_v37  ;;  %vm3913_vm5 = vmor %vm3911_vm8, %vm3912_vm13  ;;  %v3956_v39 = vsub.f32 1.0, %v3955_v53  ;;  %v8458_v3 = vld [vmem:[%s16520_s3 + $0x90] sm:$0xf0]  ;;  %v8424_v37 = vld [vmem:[%s16520_s3 + $0x40] sm:$0xf] }
 0x703   :  { %v3885_v60 = vsel %vm3884_vm14, %v13807_v42, %v3881_v33  ;;  %v3971_v9 = vsub.f32 1.0, %v3970_v56  ;;  %v3989_v42 = vmul.f32 %v10134_v22, %v3875_v1  ;;  %v8461_v46 = vor.u32 %v9651_v54, %v8458_v3  ;;  %v9643_v53 = vld [vmem:[%s16520_s3 + $0x44] sm:$0xf]  ;;  %v9644_v56 = vld [vmem:[%s16520_s3 + $0x4c] sm:$0xf] }
 0x704   :  { %v3890_v15 = vsel %vm13816_vm3, %v3889_v34, %v3885_v60  ;;  %v3914_v30 = vsel %vm3913_vm5, %v13812_v32, %v3910_v12  ;;  %v3925_v25 = vadd.f32 %v13835_v52, %v3924_v43  ;;  %v3957_v5 = vmul.f32 %v13852_v27, %v3956_v39  ;;  %v8466_v34 = vld [vmem:[%s16520_s3 + $0x98] sm:$0xf0]  ;;  %v9646_v39 = vld [vmem:[%s16520_s3 + $0x54] sm:$0xf0]  ;;  %v9639_v54 = vld [vmem:[%s16520_s3 + $0x24] sm:$0xf] }
 0x705   :  { %v3919_v10 = vsel %vm13823_vm9, %v3918_v47, %v3914_v30  ;;  %v3972_v61 = vmul.f32 %v13868_v40, %v3971_v9  ;;  %v3990_v13 = vmul.f32 %v10138_v21, %v3890_v15  ;;  %v8448_v21 = vld [vmem:[%s16520_s3 + $0x68] sm:$0xf]  ;;  %vm3960_vm3 = vweird.f32 %v13852_v27  ;;  %4244 = vmatpush.bf16.msrb.mxu1 %v8461_v46  ;;  %v8408_v30 = vld [vmem:[%s16520_s3 + $0x20] sm:$0xf] }
 0x706   :  { %v3929_v49 = vsel %vm3928_vm7, %v13835_v52, %v3925_v25  ;;  %v3987_v32 = vmul.f32 %v3919_v10, %v13780_v19  ;;  %v9649_v52 = vld [vmem:[%s16520_s3 + $0x6c] sm:$0xf0]  ;;  %v3958_v36 = vadd.f32 %v13852_v27, %v3957_v5  ;;  %v8465_v47 = vor.u32 %v9654_v8, %v8464_v35  ;;  %v8410_v10 = vld [vmem:[%s16520_s3 + $0x30] sm:$0xf0] }
 0x707   :  { %v3934_v22 = vsel %vm13846_vm11, %v3933_v48, %v3929_v49  ;;  %v8469_v31 = vor.u32 %v9652_v24, %v8466_v34  ;;  %vm3959_vm8 = vweird.f32 %v13797_v50  ;;  %v3973_v29 = vadd.f32 %v13868_v40, %v3972_v61  ;;  %v9641_v25 = vld [vmem:[%s16520_s3 + $0x2c] sm:$0xf0]  ;;  %v9642_v49 = vld [vmem:[%s16520_s3 + $0x34] sm:$0xf0]  ;;  %v8392_v34 = vld [vmem:[%s16520_s3] sm:$0xf] }
 0x708   :  { %v3988_v58 = vmul.f32 %v3985_v6, %v3934_v22  ;;  %v13942_v0 = vadd.f32 %v3989_v42, %v3987_v32  ;;  %vm3975_vm9 = vweird.f32 %v13868_v40  ;;  %v8441_v33 = vor.u32 %v9649_v52, %v8440_v51  ;;  %vm13985_vm10 = vmor %vm3959_vm8, %vm3960_vm3  ;;  %4257 = vmatpush.bf16.msrb.mxu2 %v8465_v47  ;;  %v9640_v32 = vld [vmem:[%s16520_s3 + $0x2c] sm:$0xf]  ;;  %v9637_v22 = vld [vmem:[%s16520_s3 + $0xc] sm:$0xf0] }
 0x709   :  { %v8445_v48 = vor.u32 %v9647_v18, %v8442_v16  ;;  %v3980_v1 = vand.u32 2147483648, %v13805_v28  ;;  %4270 = vmatpush.bf16.msrb.mxu3 %v8469_v31  ;;  %v8449_v12 = vor.u32 %v9650_v11, %v8448_v21  ;;  %v8453_v43 = vor.u32 %v9648_v26, %v8450_v38  ;;  %v9635_v51 = vld [vmem:[%s16520_s3 + $0x4] sm:$0xf]  ;;  %v8394_v52 = vld [vmem:[%s16520_s3 + $0x10] sm:$0xf0] }
 0x70a   :  { %v13966_v7 = vadd.f32 %v3990_v13, %v3988_v58  ;;  %10143 = vtanh.f32 %v13942_v0  ;;  %v3962_v14 = vsel %vm13985_vm10, %v13852_v27, %v3958_v36  ;;  %vm3974_vm11 = vweird.f32 %v13805_v28  ;;  %4232 = vmatpush.bf16.msrb.mxu0 %v8441_v33  ;;  %v8400_v18 = vld [vmem:[%s16520_s3 + $0x8] sm:$0xf]  ;;  %v9638_v16 = vld [vmem:[%s16520_s3 + $0x14] sm:$0xf0]  ;;  %v9636_v47 = vld [vmem:[%s16520_s3 + $0xc] sm:$0xf] }
 0x70b   :  { %v8425_v60 = vor.u32 %v9645_v45, %v8424_v37  ;;  %v3966_v15 = vor.u32 1.1754944e-38, %v3965_v20  ;;  %vm14011_vm6 = vmor %vm3974_vm11, %vm3975_vm9  ;;  %4245 = vmatpush.bf16.msrb.mxu1 %v8445_v48  ;;  %v8429_v27 = vor.u32 %v9643_v53, %v8426_v23  ;;  %vm3964_vm12 = vcmp.eq.f32.partialorder %v3963_v63, 8.507059e+37  ;;  %v8402_v31 = vld [vmem:[%s16520_s3 + $0x18] sm:$0xf0] }
 0x70c   :  { %10145 = vtanh.f32 %v13966_v7  ;;  %v3977_v20 = vsel %vm14011_vm6, %v13868_v40, %v3973_v29  ;;  %vm14026_vm13 = vcmp.eq.f32.partialorder %v3978_v62, 8.507059e+37  ;;  %v3981_v50 = vor.u32 1.1754944e-38, %v3980_v1  ;;  %4258 = vmatpush.bf16.msrb.mxu2 %v8449_v12  ;;  %v8416_v40 = vld [vmem:[%s16520_s3 + $0x28] sm:$0xf] }
 0x70d   :  { %v3967_v9 = vsel %vm3964_vm12, %v3966_v15, %v3962_v14  ;;  %4271 = vmatpush.bf16.msrb.mxu3 %v8453_v43  ;;  %v8433_v63 = vor.u32 %v9646_v39, %v8432_v57  ;;  %v8437_v42 = vor.u32 %v9644_v56, %v8434_v41  ;;  %v8409_v35 = vor.u32 %v9641_v25, %v8408_v30  ;;  %v8388_v12 = vld [vmem:[%s16523_s0 + $0x21] ss:$8 sm:$0xf] }
 0x70e   :  { %4233 = vmatpush.bf16.msrb.mxu0 %v8425_v60  ;;  %v3982_v8 = vsel %vm14026_vm13, %v3981_v50, %v3977_v20  ;;  %v8413_v24 = vor.u32 %v9639_v54, %v8410_v10  ;;  %v4001_v61 = vrot.slane %v13695_v44, 1  ;;  %v8417_v58 = vor.u32 %v9642_v49, %v8416_v40  ;;  %v8389_v39 = vld [vmem:[%s16523_s0 + $0x61] ss:$8 sm:$0xf] }
 0x70f   :  { %4246 = vmatpush.bf16.msrb.mxu1 %v8429_v27  ;;  %v8421_v46 = vor.u32 %v9640_v32, %v8418_v4  ;;  %v8393_v36 = vor.u32 %v9637_v22, %v8392_v34  ;;  %v8397_v11 = vor.u32 %v9635_v51, %v8394_v52  ;;  %v8401_v26 = vor.u32 %v9638_v16, %v8400_v18  ;;  %v9695_v32 = vld [vmem:[%s16520_s3 + $0xe4] sm:$0xf]  ;;  %v8643_v4 = vld [vmem:[%s16520_s3 + $0xf0] sm:$0xf0]  ;;  %v9696_v34 = vld [vmem:[%s16520_s3 + $0xec] sm:$0xf] }
 0x710   :  { %v10144_v5 = vpop.eup %10143  ;;  %4259 = vmatpush.bf16.msrb.mxu2 %v8433_v63  ;;  %v8405_v38 = vor.u32 %v9636_v47, %v8402_v31  ;;  %v4016_v62 = vsub.f32 %v13942_v0, %v13780_v19  ;;  %v4017_v45 = vsub.f32 %v13966_v7, %v3985_v6  ;;  %vm16671_vm14 = vcmask 1041408   ;;  %v8651_v22 = vld [vmem:[%s16520_s3 + $0xf8] sm:$0xf0]  ;;  %v8633_v47 = vld [vmem:[%s16520_s3 + $0xc8] sm:$0xf] }
 0x711   :  { %v3995_v3 = vmul.f32 %v10144_v5, %v3967_v9  ;;  %4272 = vmatpush.bf16.msrb.mxu3 %v8437_v42 }
 0x712   :  { %v10146_v2 = vpop.eup %10145  ;;  %4234 = vmatpush.bf16.msrb.mxu0 %v8409_v35  ;;  %v9697_v35 = vld [vmem:[%s16520_s3 + $0xec] sm:$0xf0] }
 0x713   :  { %v3996_v13 = vmul.f32 %v10146_v2, %v3982_v8  ;;  %v4003_v17 = vsub.f32 %v3995_v3, %v13695_v44  ;;  %4247 = vmatpush.bf16.msrb.mxu1 %v8413_v24  ;;  %v8641_v3 = vld [vmem:[%s16520_s3 + $0xe0] sm:$0xf]  ;;  %v8649_v2 = vld [vmem:[%s16520_s3 + $0xe8] sm:$0xf]  ;;  %v8646_v8 = vor.u32 %v9695_v32, %v8643_v4  ;;  %v9698_v24 = vld [vmem:[%s16520_s3 + $0xf4] sm:$0xf0] }
 0x714   :  { %4260 = vmatpush.bf16.msrb.mxu2 %v8417_v58  ;;  %v8642_v49 = vor.u32 %v9697_v35, %v8641_v3  ;;  %v8625_v58 = vld [vmem:[%s16520_s3 + $0xc0] sm:$0xf]  ;;  %v9689_v32 = vld [vmem:[%s16520_s3 + $0xac] sm:$0xf0] }
 0x715   :  { %v4004_v21 = vsub.f32 %v3996_v13, %v4001_v61  ;;  %4010 = vst [vmem:[#allocation1] ss:$9 sm:$0xff] %v4003_v17  ;;  %4273 = vmatpush.bf16.msrb.mxu3 %v8421_v46  ;;  %v8650_v13 = vor.u32 %v9698_v24, %v8649_v2  ;;  %v8654_v17 = vor.u32 %v9696_v34, %v8651_v22  ;;  %v9693_v46 = vld [vmem:[%s16520_s3 + $0xcc] sm:$0xf0]  ;;  %v9679_v24 = vld [vmem:[%s16520_s3 + $0x64] sm:$0xf] }
 0x716   :  { %4235 = vmatpush.bf16.msrb.mxu0 %v8393_v36  ;;  %v8626_v16 = vor.u32 %v9693_v46, %v8625_v58  ;;  %v8627_v36 = vld [vmem:[%s16520_s3 + $0xd0] sm:$0xf0] }
 0x717   :  { %4012 = vst [vmem:[#allocation1 + $0x1] ss:$9 sm:$0xff] %v4004_v21  ;;  %4248 = vmatpush.bf16.msrb.mxu1 %v8397_v11  ;;  %v9691_v21 = vld [vmem:[%s16520_s3 + $0xc4] sm:$0xf] }
 0x718   :  { %4261 = vmatpush.bf16.msrb.mxu2 %v8401_v26 }
 0x719   :  { %4274 = vmatpush.bf16.msrb.mxu3 %v8405_v38  ;;  %v9694_v38 = vld [vmem:[%s16520_s3 + $0xd4] sm:$0xf0] }
 0x71a   :  { %4672 = vmatpush.bf16.msra.mxu0 %v8642_v49  ;;  %v8609_v49 = vld [vmem:[%s16520_s3 + $0xa0] sm:$0xf] }
 0x71b   :  { %4685 = vmatpush.bf16.msra.mxu1 %v8646_v8  ;;  %v8610_v46 = vor.u32 %v9689_v32, %v8609_v49  ;;  %v8577_v49 = vld [vmem:[%s16520_s3 + $0x60] sm:$0xf]  ;;  %v9681_v32 = vld [vmem:[%s16520_s3 + $0x6c] sm:$0xf0] }
 0x71c   :  { %4698 = vmatpush.bf16.msra.mxu2 %v8650_v13 }
 0x71d   :  { %4711 = vmatpush.bf16.msra.mxu3 %v8654_v17 }
 0x71e   :  { %v4013_v37 = vld [vmem:[#allocation1] sm:$0xff]  ;;  %4673 = vmatpush.bf16.msra.mxu0 %v8626_v16 }
 0x71f   :  { %4022 = vst [vmem:[#allocation1] ss:$9 sm:$0xff] %v4016_v62  ;;  %v14082_v29 = vadd.f32 %v4013_v37, %v13695_v44 }
 0x720   :  { %4024 = vst [vmem:[#allocation1 + $0x1] ss:$9 sm:$0xff] %v4017_v45 }
 0x721   :  { %8387 = vst [vmem:[%s16524_s4 + $0x10] sm:$0x3] %v14082_v29  ;;  %v4035_v33 = vpack.c.bf16 %v14082_v29, %v14082_v29 }
 0x722   :  { %4674 = vmatpush.bf16.msra.mxu0 %v8610_v46 }
 0x723   :  { %4236 = vmatmul.bf16.vlgmr.msrb.gmra.mxu0 %v4035_v33  ;;  %4249 = vmatmul.bf16.vlgmr.msrb.gmra.mxu1 %v4035_v33 }
 0x724   :  { %4262 = vmatmul.bf16.vlgmr.msrb.gmra.mxu2 %v4035_v33  ;;  %4275 = vmatmul.bf16.vlgmr.msrb.gmra.mxu3 %v4035_v33  ;;  %v8630_v33 = vor.u32 %v9691_v21, %v8627_v36 }
 0x726   :  { %4686 = vmatpush.bf16.msra.mxu1 %v8630_v33  ;;  %v8617_v33 = vld [vmem:[%s16520_s3 + $0xa8] sm:$0xf] }
 0x727   :  { %v4025_v51 = vld [vmem:[#allocation1] sm:$0xff] }
 0x728   :  { %v14161_v37 = vadd.f32 %v4025_v51, %v13780_v19 }
 0x7a0   :  { %v4237_v0 = vpop.f32.mrf.mxu0  ;;  %v4250_v48 = vpop.f32.mrf.mxu1 }
 0x7a1   :  { %v4284_v6 = vrot.slane %v4250_v48, 7 }
 0x7a3   :  { %v4287_v43 = vsel %vm286_vm0, %v4237_v0, %v4284_v6  ;;  %v4290_v57 = vsel %vm292_vm1, %v4237_v0, %v4284_v6  ;;  %v8634_v0 = vor.u32 %v9694_v38, %v8633_v47 }
 0x7a5   :  { %4699 = vmatpush.bf16.msra.mxu2 %v8634_v0 }
 0x7a7   :  { %v4263_v7 = vpop.f32.mrf.mxu2  ;;  %v4276_v53 = vpop.f32.mrf.mxu3 }
 0x7a8   :  { %v4285_v44 = vrot.slane %v4263_v7, 6  ;;  %v4286_v23 = vrot.slane %v4276_v53, 5  ;;  %v4239_v59 = vpop.f32.mrf.mxu0  ;;  %v4252_v1 = vpop.f32.mrf.mxu1 }
 0x7a9   :  { %v4429_v1 = vrot.slane %v14161_v37, 1 }
 0x7aa   :  { %v4288_v14 = vsel %vm288_vm2, %v4285_v44, %v4286_v23  ;;  %v4291_v60 = vsel %vm294_vm4, %v4285_v44, %v4286_v23 }
 0x7ab   :  { %v4289_v56 = vsel %vm16671_vm14, %v4287_v43, %v4288_v14  ;;  %v4292_v41 = vsel %vm16672_vm15, %v4290_v57, %v4291_v60 }
 0x7ac   :  { %v4293_v15 = vrot.slane %v4292_v41, 1  ;;  %v14102_v28 = vadd.f32 %v8388_v12, %v4289_v56 }
 0x7ae   :  { %v14104_v27 = vadd.f32 %v8389_v39, %v4293_v15  ;;  %v8518_v30 = vmul.f32 -1.442695, %v14102_v28  ;;  %v4338_v25 = vrot.slane %v14102_v28, 1  ;;  %v4386_v20 = vrot.slane %v14102_v28, 3 }
 0x7af   :  { %v4265_v55 = vpop.f32.mrf.mxu2  ;;  %v4278_v54 = vpop.f32.mrf.mxu3  ;;  %v4380_v26 = vrot.slane %v14102_v28, 2 }
 0x7b0   :  { %10147 = vpow2.f32 %v8518_v30  ;;  %v8519_v10 = vmul.f32 -1.442695, %v14104_v27  ;;  %v4339_v5 = vrot.slane %v14104_v27, 1  ;;  %v8520_v9 = vmul.f32 -1.442695, %v4338_v25 }
 0x7b1   :  { %v4387_v50 = vrot.slane %v14104_v27, 3  ;;  %v8522_v42 = vmul.f32 -1.442695, %v4386_v20  ;;  %v4381_v48 = vrot.slane %v14104_v27, 2  ;;  %v8601_v55 = vld [vmem:[%s16520_s3 + $0x88] sm:$0xf] }
 0x7b2   :  { %10149 = vpow2.f32 %v8519_v10  ;;  %v8521_v63 = vmul.f32 -1.442695, %v4339_v5 }
 0x7b3   :  { %10151 = vpow2.f32 %v8520_v9  ;;  %v8523_v40 = vmul.f32 -1.442695, %v4387_v50  ;;  %v9692_v50 = vld [vmem:[%s16520_s3 + $0xcc] sm:$0xf] }
 0x7b4   :  { %10153 = vpow2.f32 %v8521_v63  ;;  %v8635_v63 = vld [vmem:[%s16520_s3 + $0xd8] sm:$0xf0] }
 0x7b5   :  { %10155 = vpow2.f32 %v8522_v42  ;;  %v8638_v13 = vor.u32 %v9692_v50, %v8635_v63  ;;  %v9684_v63 = vld [vmem:[%s16520_s3 + $0x8c] sm:$0xf] }
 0x7b6   :  { %v10148_v61 = vpop.eup %10147  ;;  %10157 = vpow2.f32 %v8523_v40 }
 0x7b7   :  { %v14136_v52 = vadd.f32 1.0, %v10148_v61  ;;  %4712 = vmatpush.bf16.msra.mxu3 %v8638_v13  ;;  %v9682_v13 = vld [vmem:[%s16520_s3 + $0x74] sm:$0xf0] }
 0x7b8   :  { %v10150_v18 = vpop.eup %10149 }
 0x7b9   :  { %v10152_v31 = vpop.eup %10151  ;;  %v14153_v11 = vadd.f32 1.0, %v10150_v18  ;;  %10159 = vrcp.f32 %v14136_v52  ;;  %v4315_v7 = vand.u32 2147483647, %v14136_v52  ;;  %v4317_v44 = vand.u32 2147483648, %v14136_v52 }
 0x7ba   :  { %v10154_v62 = vpop.eup %10153  ;;  %v14163_v45 = vadd.f32 1.0, %v10152_v31  ;;  %vm4311_vm5 = vweird.f32 %v14136_v52 }
 0x7bb   :  { %10161 = vrcp.f32 %v14153_v11  ;;  %v10156_v6 = vpop.eup %10155  ;;  %v14168_v53 = vadd.f32 1.0, %v10154_v62  ;;  %v4330_v23 = vand.u32 2147483647, %v14153_v11  ;;  %v4332_v59 = vand.u32 2147483648, %v14153_v11  ;;  %v8611_v62 = vld [vmem:[%s16520_s3 + $0xb0] sm:$0xf0] }
 0x7bc   :  { %10163 = vrcp.f32 %v14163_v45  ;;  %v10158_v19 = vpop.eup %10157  ;;  %v4359_v43 = vand.u32 2147483647, %v14163_v45  ;;  %v14178_v57 = vadd.f32 1.0, %v10156_v6  ;;  %vm14181_vm7 = vcmp.eq.f32.partialorder %v4315_v7, 8.507059e+37  ;;  %v9690_v7 = vld [vmem:[%s16520_s3 + $0xb4] sm:$0xf0] }
 0x7bd   :  { %10165 = vtanh.f32 %v4380_v26  ;;  %vm4326_vm3 = vweird.f32 %v14153_v11  ;;  %v4361_v39 = vand.u32 2147483648, %v14163_v45  ;;  %v14187_v56 = vadd.f32 1.0, %v10158_v19  ;;  %v9688_v19 = vld [vmem:[%s16520_s3 + $0xac] sm:$0xf] }
 0x7be   :  { %10167 = vrcp.f32 %v14168_v53  ;;  %v4318_v15 = vor.u32 1.1754944e-38, %v4317_v44  ;;  %v4374_v28 = vand.u32 2147483647, %v14168_v53  ;;  %v4376_v27 = vand.u32 2147483648, %v14168_v53 }
 0x7bf   :  { %v10160_v12 = vpop.eup %10159  ;;  %10169 = vtanh.f32 %v4381_v48  ;;  %vm14198_vm8 = vcmp.eq.f32.partialorder %v4330_v23, 8.507059e+37  ;;  %v4333_v54 = vor.u32 1.1754944e-38, %v4332_v59  ;;  %vm4355_vm9 = vweird.f32 %v14163_v45 }
 0x7c0   :  { %v4307_v14 = vmul.f32 %v10160_v12, %v14136_v52  ;;  %10171 = vrcp.f32 %v14178_v57  ;;  %vm14205_vm10 = vcmp.eq.f32.partialorder %v4359_v43, 8.507059e+37  ;;  %vm4370_vm11 = vweird.f32 %v14168_v53  ;;  %v9687_v52 = vld [vmem:[%s16520_s3 + $0xa4] sm:$0xf]  ;;  %v8593_v43 = vld [vmem:[%s16520_s3 + $0x80] sm:$0xf] }
 0x7c1   :  { %v14189_v41 = vpop.eup %10161  ;;  %10173 = vrcp.f32 %v14187_v56  ;;  %vm4312_vm6 = vweird.f32 %v10160_v12  ;;  %v4362_v35 = vor.u32 1.1754944e-38, %v4361_v39  ;;  %vm14227_vm12 = vcmp.eq.f32.partialorder %v4374_v28, 8.507059e+37  ;;  %v9683_v28 = vld [vmem:[%s16520_s3 + $0x84] sm:$0xf] }
 0x7c2   :  { %v14194_v30 = vpop.eup %10163  ;;  %v4308_v25 = vsub.f32 1.0, %v4307_v14  ;;  %v4322_v20 = vmul.f32 %v14189_v41, %v14153_v11  ;;  %v4377_v34 = vor.u32 1.1754944e-38, %v4376_v27  ;;  %vm4327_vm13 = vweird.f32 %v14189_v41  ;;  %vm4313_vm14 = vmor %vm4311_vm5, %vm4312_vm6 }
 0x7c3   :  { %v10166_v10 = vpop.eup %10165  ;;  %v4351_v5 = vmul.f32 %v14194_v30, %v14163_v45  ;;  %vm4356_vm15 = vweird.f32 %v14194_v30  ;;  %v4407_v36 = vand.u32 2147483647, %v14178_v57  ;;  %vm4328_vm5 = vmor %vm4326_vm3, %vm4327_vm13  ;;  %v4409_v48 = vand.u32 2147483648, %v14178_v57 }
 0x7c4   :  { %v14217_v42 = vpop.eup %10167  ;;  %v4309_v40 = vmul.f32 %v10160_v12, %v4308_v25  ;;  %v4323_v3 = vsub.f32 1.0, %v4322_v20  ;;  %v4422_v59 = vand.u32 2147483647, %v14187_v56  ;;  %v8614_v25 = vor.u32 %v9687_v52, %v8611_v62  ;;  %v9677_v52 = vld [vmem:[%s16520_s3 + $0x4c] sm:$0xf0] }
 0x7c5   :  { %v10170_v4 = vpop.eup %10169  ;;  %v4352_v2 = vsub.f32 1.0, %v4351_v5  ;;  %v4366_v8 = vmul.f32 %v14217_v42, %v14168_v53  ;;  %vm4371_vm6 = vweird.f32 %v14217_v42  ;;  %v8618_v20 = vor.u32 %v9690_v7, %v8617_v33  ;;  %v8595_v53 = vld [vmem:[%s16520_s3 + $0x90] sm:$0xf0]  ;;  %v9675_v62 = vld [vmem:[%s16520_s3 + $0x44] sm:$0xf] }
 0x7c6   :  { %v4310_v22 = vadd.f32 %v10160_v12, %v4309_v40  ;;  %v4324_v61 = vmul.f32 %v14189_v41, %v4323_v3  ;;  %v14233_v17 = vpop.eup %10171  ;;  %vm4372_vm3 = vmor %vm4370_vm11, %vm4371_vm6  ;;  %4687 = vmatpush.bf16.msra.mxu1 %v8614_v25  ;;  %v8569_v7 = vld [vmem:[%s16520_s3 + $0x48] sm:$0xf]  ;;  %vm16688_vm6 = vcmask 1042433  }
 0x7c7   :  { %v4353_v51 = vmul.f32 %v14194_v30, %v4352_v2  ;;  %v4367_v58 = vsub.f32 1.0, %v4366_v8  ;;  %v4399_v21 = vmul.f32 %v14233_v17, %v14178_v57  ;;  %v14247_v47 = vpop.eup %10173  ;;  %4700 = vmatpush.bf16.msra.mxu2 %v8618_v20  ;;  %v8598_v2 = vor.u32 %v9683_v28, %v8595_v53  ;;  %v8547_v28 = vld [vmem:[%s16520_s3 + $0x30] sm:$0xf0] }
 0x7c8   :  { %v4314_v18 = vsel %vm4313_vm14, %v10160_v12, %v4310_v22  ;;  %v4325_v16 = vadd.f32 %v14189_v41, %v4324_v61  ;;  %v4414_v6 = vmul.f32 %v14247_v47, %v14187_v56  ;;  %v8619_v12 = vld [vmem:[%s16520_s3 + $0xb8] sm:$0xf0]  ;;  %v8585_v22 = vld [vmem:[%s16520_s3 + $0x68] sm:$0xf]  ;;  %vm4408_vm14 = vcmp.eq.f32.partialorder %v4407_v36, 8.507059e+37 }
 0x7c9   :  { %v4319_v31 = vsel %vm14181_vm7, %v4318_v15, %v4314_v18  ;;  %v4354_v26 = vadd.f32 %v14194_v30, %v4353_v51  ;;  %v4368_v38 = vmul.f32 %v14217_v42, %v4367_v58  ;;  %vm4357_vm7 = vmor %vm4355_vm9, %vm4356_vm15  ;;  %v4400_v11 = vsub.f32 1.0, %v4399_v21  ;;  %v9685_v15 = vld [vmem:[%s16520_s3 + $0x8c] sm:$0xf0]  ;;  %v9680_v51 = vld [vmem:[%s16520_s3 + $0x6c] sm:$0xf] }
 0x7ca   :  { %v4329_v0 = vsel %vm4328_vm5, %v14189_v41, %v4325_v16  ;;  %v4415_v39 = vsub.f32 1.0, %v4414_v6  ;;  %v4433_v41 = vmul.f32 %v10166_v10, %v4319_v31  ;;  %v8622_v50 = vor.u32 %v9688_v19, %v8619_v12  ;;  %v8587_v58 = vld [vmem:[%s16520_s3 + $0x78] sm:$0xf0]  ;;  %v8561_v21 = vld [vmem:[%s16520_s3 + $0x40] sm:$0xf]  ;;  %4688 = vmatpush.bf16.msra.mxu1 %v8598_v2 }
 0x7cb   :  { %v4334_v44 = vsel %vm14198_vm8, %v4333_v54, %v4329_v0  ;;  %v4358_v45 = vsel %vm4357_vm7, %v14194_v30, %v4354_v26  ;;  %v4369_v23 = vadd.f32 %v14217_v42, %v4368_v38  ;;  %v4401_v60 = vmul.f32 %v14233_v17, %v4400_v11  ;;  %v9686_v54 = vld [vmem:[%s16520_s3 + $0x94] sm:$0xf0]  ;;  %v8563_v6 = vld [vmem:[%s16520_s3 + $0x50] sm:$0xf0]  ;;  %v8571_v12 = vld [vmem:[%s16520_s3 + $0x58] sm:$0xf0] }
 0x7cc   :  { %v4363_v14 = vsel %vm14205_vm10, %v4362_v35, %v4358_v45  ;;  %v4416_v5 = vmul.f32 %v14247_v47, %v4415_v39  ;;  %v4434_v9 = vmul.f32 %v10170_v4, %v4334_v44  ;;  %v8594_v3 = vor.u32 %v9685_v15, %v8593_v43  ;;  %v8603_v35 = vld [vmem:[%s16520_s3 + $0x98] sm:$0xf0]  ;;  %4713 = vmatpush.bf16.msra.mxu3 %v8622_v50  ;;  %v9678_v19 = vld [vmem:[%s16520_s3 + $0x54] sm:$0xf0]  ;;  %v8529_v50 = vld [vmem:[%s16520_s3] sm:$0xf] }
 0x7cd   :  { %v4373_v27 = vsel %vm4372_vm3, %v14217_v42, %v4369_v23  ;;  %v4431_v30 = vmul.f32 %v4363_v14, %v14161_v37  ;;  %v4402_v4 = vadd.f32 %v14233_v17, %v4401_v60  ;;  %vm4404_vm8 = vweird.f32 %v14233_v17  ;;  %v9676_v23 = vld [vmem:[%s16520_s3 + $0x4c] sm:$0xf]  ;;  %v8545_v14 = vld [vmem:[%s16520_s3 + $0x20] sm:$0xf]  ;;  %v9673_v60 = vld [vmem:[%s16520_s3 + $0x2c] sm:$0xf0] }
 0x7ce   :  { %v4378_v10 = vsel %vm14227_vm12, %v4377_v34, %v4373_v27  ;;  %v8602_v8 = vor.u32 %v9686_v54, %v8601_v55  ;;  %v8579_v34 = vld [vmem:[%s16520_s3 + $0x70] sm:$0xf0]  ;;  %vm4403_vm9 = vweird.f32 %v14178_v57  ;;  %4675 = vmatpush.bf16.msra.mxu0 %v8594_v3  ;;  %v4417_v46 = vadd.f32 %v14247_v47, %v4416_v5  ;;  %v8553_v27 = vld [vmem:[%s16520_s3 + $0x28] sm:$0xf]  ;;  %v9672_v55 = vld [vmem:[%s16520_s3 + $0x2c] sm:$0xf] }
 0x7cf   :  { %v4432_v42 = vmul.f32 %v4429_v1, %v4378_v10  ;;  %v14321_v40 = vadd.f32 %v4433_v41, %v4431_v30  ;;  %vm4419_vm10 = vweird.f32 %v14247_v47  ;;  %v8606_v18 = vor.u32 %v9684_v63, %v8603_v35  ;;  %vm14366_vm11 = vmor %vm4403_vm9, %vm4404_vm8  ;;  %v9674_v30 = vld [vmem:[%s16520_s3 + $0x34] sm:$0xf0]  ;;  %v8555_v54 = vld [vmem:[%s16520_s3 + $0x38] sm:$0xf0] }
 0x7d0   :  { %v8578_v16 = vor.u32 %v9681_v32, %v8577_v49  ;;  %v4424_v26 = vand.u32 2147483648, %v14187_v56  ;;  %4701 = vmatpush.bf16.msra.mxu2 %v8602_v8  ;;  %v8582_v38 = vor.u32 %v9679_v24, %v8579_v34  ;;  %v4406_v33 = vsel %vm14366_vm11, %v14233_v17, %v4402_v4  ;;  %v9669_v63 = vld [vmem:[%s16520_s3 + $0xc] sm:$0xf0]  ;;  %v9667_v35 = vld [vmem:[%s16520_s3 + $0x4] sm:$0xf] }
 0x7d1   :  { %v14344_v61 = vadd.f32 %v4434_v9, %v4432_v42  ;;  %10175 = vtanh.f32 %v14321_v40  ;;  %vm4418_vm12 = vweird.f32 %v14187_v56  ;;  %4714 = vmatpush.bf16.msra.mxu3 %v8606_v18  ;;  %v8586_v0 = vor.u32 %v9682_v13, %v8585_v22  ;;  %v9671_v56 = vld [vmem:[%s16520_s3 + $0x24] sm:$0xf]  ;;  %v8531_v49 = vld [vmem:[%s16520_s3 + $0x10] sm:$0xf0]  ;;  %v8537_v8 = vld [vmem:[%s16520_s3 + $0x8] sm:$0xf] }
 0x7d2   :  { %v8590_v11 = vor.u32 %v9680_v51, %v8587_v58  ;;  %v4410_v17 = vor.u32 1.1754944e-38, %v4409_v48  ;;  %vm14392_vm13 = vmor %vm4418_vm12, %vm4419_vm10  ;;  %4676 = vmatpush.bf16.msra.mxu0 %v8578_v16  ;;  %v8562_v45 = vor.u32 %v9677_v52, %v8561_v21  ;;  %vm14409_vm15 = vcmp.eq.f32.partialorder %v4422_v59, 8.507059e+37  ;;  %4689 = vmatpush.bf16.msra.mxu1 %v8582_v38  ;;  %v9670_v24 = vld [vmem:[%s16520_s3 + $0x14] sm:$0xf0]  ;;  %v9668_v22 = vld [vmem:[%s16520_s3 + $0xc] sm:$0xf] }
 0x7d3   :  { %10177 = vtanh.f32 %v14344_v61  ;;  %v4421_v48 = vsel %vm14392_vm13, %v14247_v47, %v4417_v46  ;;  %v4425_v39 = vor.u32 1.1754944e-38, %v4424_v26  ;;  %v8566_v47 = vor.u32 %v9675_v62, %v8563_v6  ;;  %v8539_v13 = vld [vmem:[%s16520_s3 + $0x18] sm:$0xf0] }
 0x7d4   :  { %v4411_v36 = vsel %vm4408_vm14, %v4410_v17, %v4406_v33  ;;  %4702 = vmatpush.bf16.msra.mxu2 %v8586_v0  ;;  %v8570_v41 = vor.u32 %v9678_v19, %v8569_v7  ;;  %v8574_v15 = vor.u32 %v9676_v23, %v8571_v12  ;;  %v8546_v53 = vor.u32 %v9673_v60, %v8545_v14  ;;  %v8525_v19 = vld [vmem:[%s16523_s0 + $0x22] ss:$8 sm:$0xf] }
 0x7d5   :  { %4715 = vmatpush.bf16.msra.mxu3 %v8590_v11  ;;  %v4426_v20 = vsel %vm14409_vm15, %v4425_v39, %v4421_v48  ;;  %v4445_v10 = vrot.slane %v14082_v29, 1  ;;  %v8550_v42 = vor.u32 %v9671_v56, %v8547_v28  ;;  %v8554_v3 = vor.u32 %v9674_v30, %v8553_v27  ;;  %v8526_v12 = vld [vmem:[%s16523_s0 + $0x62] ss:$8 sm:$0xf] }
 0x7d6   :  { %4677 = vmatpush.bf16.msra.mxu0 %v8562_v45  ;;  %4690 = vmatpush.bf16.msra.mxu1 %v8566_v47  ;;  %v8558_v2 = vor.u32 %v9672_v55, %v8555_v54  ;;  %v8530_v34 = vor.u32 %v9669_v63, %v8529_v50  ;;  %v8534_v58 = vor.u32 %v9667_v35, %v8531_v49  ;;  %vm16687_vm5 = vcmask 1041408   ;;  %v9729_v55 = vld [vmem:[%s16520_s3 + $0xec] sm:$0xf0]  ;;  %v9730_v63 = vld [vmem:[%s16520_s3 + $0xf4] sm:$0xf0] }
 0x7d7   :  { %v10176_v57 = vpop.eup %10175  ;;  %v8538_v46 = vor.u32 %v9670_v24, %v8537_v8  ;;  %v8542_v18 = vor.u32 %v9668_v22, %v8539_v13  ;;  %v4460_v16 = vsub.f32 %v14321_v40, %v14161_v37  ;;  %v4461_v21 = vsub.f32 %v14344_v61, %v4429_v1  ;;  %v8762_v8 = vld [vmem:[%s16520_s3 + $0xc0] sm:$0xf]  ;;  %v9725_v24 = vld [vmem:[%s16520_s3 + $0xcc] sm:$0xf0]  ;;  %v9723_v13 = vld [vmem:[%s16520_s3 + $0xc4] sm:$0xf] }
 0x7d8   :  { %v4439_v59 = vmul.f32 %v10176_v57, %v4411_v36  ;;  %4703 = vmatpush.bf16.msra.mxu2 %v8570_v41  ;;  %v8763_v22 = vor.u32 %v9725_v24, %v8762_v8 }
 0x7d9   :  { %v10178_v25 = vpop.eup %10177  ;;  %4716 = vmatpush.bf16.msra.mxu3 %v8574_v15  ;;  %v4462_v52 = vmul.f32 0.0, %v4460_v16  ;;  %v4463_v31 = vmul.f32 0.0, %v4461_v21  ;;  %v9726_v21 = vld [vmem:[%s16520_s3 + $0xd4] sm:$0xf0] }
 0x7da   :  { %v4440_v5 = vmul.f32 %v10178_v25, %v4426_v20  ;;  %v4447_v9 = vsub.f32 %v4439_v59, %v14082_v29  ;;  %4678 = vmatpush.bf16.msra.mxu0 %v8546_v53  ;;  %4691 = vmatpush.bf16.msra.mxu1 %v8550_v42  ;;  %v8778_v53 = vld [vmem:[%s16520_s3 + $0xe0] sm:$0xf]  ;;  %v9728_v42 = vld [vmem:[%s16520_s3 + $0xec] sm:$0xf] }
 0x7db   :  { %v8779_v54 = vor.u32 %v9729_v55, %v8778_v53 }
 0x7dc   :  { %v4448_v32 = vsub.f32 %v4440_v5, %v4445_v10  ;;  %v4450_v4 = vmul.f32 0.0, %v4447_v9  ;;  %4704 = vmatpush.bf16.msra.mxu2 %v8554_v3  ;;  %v9727_v10 = vld [vmem:[%s16520_s3 + $0xe4] sm:$0xf]  ;;  %v8780_v5 = vld [vmem:[%s16520_s3 + $0xf0] sm:$0xf0] }
 0x7dd   :  { %4717 = vmatpush.bf16.msra.mxu3 %v8558_v2  ;;  %v8786_v9 = vld [vmem:[%s16520_s3 + $0xe8] sm:$0xf]  ;;  %v8783_v50 = vor.u32 %v9727_v10, %v8780_v5  ;;  %v8788_v3 = vld [vmem:[%s16520_s3 + $0xf8] sm:$0xf0]  ;;  %v9721_v10 = vld [vmem:[%s16520_s3 + $0xac] sm:$0xf0] }
 0x7de   :  { %v4451_v51 = vmul.f32 0.0, %v4448_v32  ;;  %4454 = vst [vmem:[#allocation1] ss:$9 sm:$0xff] %v4450_v4  ;;  %4679 = vmatpush.bf16.msra.mxu0 %v8530_v34  ;;  %4692 = vmatpush.bf16.msra.mxu1 %v8534_v58  ;;  %v8787_v49 = vor.u32 %v9730_v63, %v8786_v9  ;;  %v8791_v32 = vor.u32 %v9728_v42, %v8788_v3  ;;  %v8770_v58 = vld [vmem:[%s16520_s3 + $0xc8] sm:$0xf] }
 0x7df   :  { %v9711_v63 = vld [vmem:[%s16520_s3 + $0x64] sm:$0xf] }
 0x7e0   :  { %4456 = vst [vmem:[#allocation1 + $0x1] ss:$9 sm:$0xff] %v4451_v51  ;;  %4705 = vmatpush.bf16.msra.mxu2 %v8538_v46  ;;  %v8764_v51 = vld [vmem:[%s16520_s3 + $0xd0] sm:$0xf0] }
 0x7e1   :  { %4718 = vmatpush.bf16.msra.mxu3 %v8542_v18 }
 0x7e2   :  { %5116 = vmatpush.bf16.msrb.mxu0 %v8779_v54  ;;  %5129 = vmatpush.bf16.msrb.mxu1 %v8783_v50  ;;  %v8746_v54 = vld [vmem:[%s16520_s3 + $0xa0] sm:$0xf] }
 0x7e3   :  { %v8747_v24 = vor.u32 %v9721_v10, %v8746_v54  ;;  %v8714_v54 = vld [vmem:[%s16520_s3 + $0x60] sm:$0xf]  ;;  %v9713_v10 = vld [vmem:[%s16520_s3 + $0x6c] sm:$0xf0] }
 0x7e4   :  { %5142 = vmatpush.bf16.msrb.mxu2 %v8787_v49 }
 0x7e5   :  { %5155 = vmatpush.bf16.msrb.mxu3 %v8791_v32 }
 0x7e6   :  { %5117 = vmatpush.bf16.msrb.mxu0 %v8763_v22 }
 0x7e7   :  { %v4457_v26 = vld [vmem:[#allocation1] sm:$0xff] }
 0x7e8   :  { %v14471_v38 = vadd.f32 %v4457_v26, %v14082_v29  ;;  %4466 = vst [vmem:[#allocation1] ss:$9 sm:$0xff] %v4462_v52 }
 0x7e9   :  { %4468 = vst [vmem:[#allocation1 + $0x1] ss:$9 sm:$0xff] %v4463_v31 }
 0x7ea   :  { %8524 = vst [vmem:[%s16524_s4 + $0x12] sm:$0x3] %v14471_v38  ;;  %v4479_v40 = vpack.c.bf16 %v14471_v38, %v14471_v38  ;;  %5118 = vmatpush.bf16.msrb.mxu0 %v8747_v24 }
 0x7ec   :  { %4680 = vmatmul.bf16.vlgmr.msra.gmra.mxu0 %v4479_v40  ;;  %4693 = vmatmul.bf16.vlgmr.msra.gmra.mxu1 %v4479_v40 }
 0x7ed   :  { %4706 = vmatmul.bf16.vlgmr.msra.gmra.mxu2 %v4479_v40  ;;  %4719 = vmatmul.bf16.vlgmr.msra.gmra.mxu3 %v4479_v40  ;;  %v8767_v40 = vor.u32 %v9723_v13, %v8764_v51 }
 0x7ef   :  { %5130 = vmatpush.bf16.msrb.mxu1 %v8767_v40  ;;  %v8754_v40 = vld [vmem:[%s16520_s3 + $0xa8] sm:$0xf] }
 0x7f0   :  { %v4469_v4 = vld [vmem:[#allocation1] sm:$0xff] }
 0x7f1   :  { %v14550_v31 = vadd.f32 %v4469_v4, %v14161_v37 }
 0x869   :  { %v4681_v1 = vpop.f32.mrf.mxu0  ;;  %v4694_v61 = vpop.f32.mrf.mxu1 }
 0x86a   :  { %v4728_v62 = vrot.slane %v4694_v61, 7 }
 0x86c   :  { %v4731_v17 = vsel %vm286_vm0, %v4681_v1, %v4728_v62  ;;  %v4734_v44 = vsel %vm292_vm1, %v4681_v1, %v4728_v62  ;;  %v8771_v1 = vor.u32 %v9726_v21, %v8770_v58 }
 0x86e   :  { %5143 = vmatpush.bf16.msrb.mxu2 %v8771_v1 }
 0x870   :  { %v4707_v33 = vpop.f32.mrf.mxu2  ;;  %v4720_v29 = vpop.f32.mrf.mxu3 }
 0x871   :  { %v4729_v0 = vrot.slane %v4707_v33, 6  ;;  %v4730_v11 = vrot.slane %v4720_v29, 5  ;;  %v4683_v6 = vpop.f32.mrf.mxu0  ;;  %v4696_v7 = vpop.f32.mrf.mxu1 }
 0x872   :  { %v4873_v7 = vrot.slane %v14550_v31, 1 }
 0x873   :  { %v4732_v45 = vsel %vm288_vm2, %v4729_v0, %v4730_v11  ;;  %v4735_v23 = vsel %vm294_vm4, %v4729_v0, %v4730_v11 }
 0x874   :  { %v4733_v48 = vsel %vm16687_vm5, %v4731_v17, %v4732_v45  ;;  %v4736_v43 = vsel %vm16688_vm6, %v4734_v44, %v4735_v23 }
 0x875   :  { %v4737_v14 = vrot.slane %v4736_v43, 1  ;;  %v14491_v60 = vadd.f32 %v8525_v19, %v4733_v48 }
 0x877   :  { %v14493_v57 = vadd.f32 %v8526_v12, %v4737_v14  ;;  %v8655_v36 = vmul.f32 -1.442695, %v14491_v60  ;;  %v4782_v39 = vrot.slane %v14491_v60, 1  ;;  %v4830_v47 = vrot.slane %v14491_v60, 3 }
 0x878   :  { %v4709_v41 = vpop.f32.mrf.mxu2  ;;  %v4722_v56 = vpop.f32.mrf.mxu3  ;;  %v4824_v16 = vrot.slane %v14491_v60, 2 }
 0x879   :  { %10179 = vpow2.f32 %v8655_v36  ;;  %v8656_v59 = vmul.f32 -1.442695, %v14493_v57  ;;  %v4783_v15 = vrot.slane %v14493_v57, 1  ;;  %v8657_v28 = vmul.f32 -1.442695, %v4782_v39 }
 0x87a   :  { %v4831_v27 = vrot.slane %v14493_v57, 3  ;;  %v8659_v25 = vmul.f32 -1.442695, %v4830_v47  ;;  %v4825_v61 = vrot.slane %v14493_v57, 2  ;;  %v8738_v41 = vld [vmem:[%s16520_s3 + $0x88] sm:$0xf] }
 0x87b   :  { %10181 = vpow2.f32 %v8656_v59  ;;  %v8658_v30 = vmul.f32 -1.442695, %v4783_v15 }
 0x87c   :  { %10183 = vpow2.f32 %v8657_v28  ;;  %v8660_v20 = vmul.f32 -1.442695, %v4831_v27  ;;  %v9724_v27 = vld [vmem:[%s16520_s3 + $0xcc] sm:$0xf] }
 0x87d   :  { %10185 = vpow2.f32 %v8658_v30  ;;  %v8772_v30 = vld [vmem:[%s16520_s3 + $0xd8] sm:$0xf0] }
 0x87e   :  { %10187 = vpow2.f32 %v8659_v25  ;;  %v8775_v49 = vor.u32 %v9724_v27, %v8772_v30  ;;  %v9716_v30 = vld [vmem:[%s16520_s3 + $0x8c] sm:$0xf] }
 0x87f   :  { %v10180_v35 = vpop.eup %10179  ;;  %10189 = vpow2.f32 %v8660_v20 }
 0x880   :  { %v14525_v2 = vadd.f32 1.0, %v10180_v35  ;;  %5156 = vmatpush.bf16.msrb.mxu3 %v8775_v49  ;;  %v9714_v49 = vld [vmem:[%s16520_s3 + $0x74] sm:$0xf0] }
 0x881   :  { %v10182_v34 = vpop.eup %10181 }
 0x882   :  { %v10184_v46 = vpop.eup %10183  ;;  %v14542_v18 = vadd.f32 1.0, %v10182_v34  ;;  %10191 = vrcp.f32 %v14525_v2  ;;  %v4759_v33 = vand.u32 2147483647, %v14525_v2  ;;  %v4761_v0 = vand.u32 2147483648, %v14525_v2 }
 0x883   :  { %v10186_v52 = vpop.eup %10185  ;;  %v14552_v26 = vadd.f32 1.0, %v10184_v46  ;;  %vm4755_vm7 = vweird.f32 %v14525_v2 }
 0x884   :  { %10193 = vrcp.f32 %v14542_v18  ;;  %v10188_v62 = vpop.eup %10187  ;;  %v14557_v29 = vadd.f32 1.0, %v10186_v52  ;;  %v4774_v11 = vand.u32 2147483647, %v14542_v18  ;;  %v4776_v6 = vand.u32 2147483648, %v14542_v18  ;;  %v8748_v52 = vld [vmem:[%s16520_s3 + $0xb0] sm:$0xf0] }
 0x885   :  { %10195 = vrcp.f32 %v14552_v26  ;;  %v10190_v37 = vpop.eup %10189  ;;  %v4803_v17 = vand.u32 2147483647, %v14552_v26  ;;  %v14567_v44 = vadd.f32 1.0, %v10188_v62  ;;  %vm14570_vm3 = vcmp.eq.f32.partialorder %v4759_v33, 8.507059e+37  ;;  %v9722_v33 = vld [vmem:[%s16520_s3 + $0xb4] sm:$0xf0] }
 0x886   :  { %10197 = vtanh.f32 %v4824_v16  ;;  %vm4770_vm8 = vweird.f32 %v14542_v18  ;;  %v4805_v12 = vand.u32 2147483648, %v14552_v26  ;;  %v14576_v48 = vadd.f32 1.0, %v10190_v37  ;;  %v9720_v37 = vld [vmem:[%s16520_s3 + $0xac] sm:$0xf] }
 0x887   :  { %10199 = vrcp.f32 %v14557_v29  ;;  %v4762_v14 = vor.u32 1.1754944e-38, %v4761_v0  ;;  %v4818_v60 = vand.u32 2147483647, %v14557_v29  ;;  %v4820_v57 = vand.u32 2147483648, %v14557_v29 }
 0x888   :  { %v10192_v19 = vpop.eup %10191  ;;  %10201 = vtanh.f32 %v4825_v61  ;;  %vm14587_vm9 = vcmp.eq.f32.partialorder %v4774_v11, 8.507059e+37  ;;  %v4777_v56 = vor.u32 1.1754944e-38, %v4776_v6  ;;  %vm4799_vm10 = vweird.f32 %v14552_v26 }
 0x889   :  { %v4751_v45 = vmul.f32 %v10192_v19, %v14525_v2  ;;  %10203 = vrcp.f32 %v14567_v44  ;;  %vm14594_vm11 = vcmp.eq.f32.partialorder %v4803_v17, 8.507059e+37  ;;  %vm4814_vm12 = vweird.f32 %v14557_v29  ;;  %v9719_v2 = vld [vmem:[%s16520_s3 + $0xa4] sm:$0xf]  ;;  %v8730_v17 = vld [vmem:[%s16520_s3 + $0x80] sm:$0xf] }
 0x88a   :  { %v14578_v43 = vpop.eup %10193  ;;  %10205 = vrcp.f32 %v14576_v48  ;;  %vm4756_vm13 = vweird.f32 %v10192_v19  ;;  %v4806_v55 = vor.u32 1.1754944e-38, %v4805_v12  ;;  %vm14616_vm14 = vcmp.eq.f32.partialorder %v4818_v60, 8.507059e+37  ;;  %v9715_v60 = vld [vmem:[%s16520_s3 + $0x84] sm:$0xf] }
 0x88b   :  { %v14583_v36 = vpop.eup %10195  ;;  %v4752_v39 = vsub.f32 1.0, %v4751_v45  ;;  %v4766_v47 = vmul.f32 %v14578_v43, %v14542_v18  ;;  %v4821_v42 = vor.u32 1.1754944e-38, %v4820_v57  ;;  %vm4771_vm15 = vweird.f32 %v14578_v43  ;;  %vm4757_vm5 = vmor %vm4755_vm7, %vm4756_vm13 }
 0x88c   :  { %v10198_v59 = vpop.eup %10197  ;;  %v4795_v15 = vmul.f32 %v14583_v36, %v14552_v26  ;;  %vm4800_vm6 = vweird.f32 %v14583_v36  ;;  %v4851_v51 = vand.u32 2147483647, %v14567_v44  ;;  %vm4772_vm7 = vmor %vm4770_vm8, %vm4771_vm15  ;;  %v4853_v61 = vand.u32 2147483648, %v14567_v44 }
 0x88d   :  { %v14606_v25 = vpop.eup %10199  ;;  %v4753_v20 = vmul.f32 %v10192_v19, %v4752_v39  ;;  %v4767_v53 = vsub.f32 1.0, %v4766_v47  ;;  %v4866_v6 = vand.u32 2147483647, %v14576_v48  ;;  %v8751_v39 = vor.u32 %v9719_v2, %v8748_v52  ;;  %v9709_v2 = vld [vmem:[%s16520_s3 + $0x4c] sm:$0xf0] }
 0x88e   :  { %v10202_v5 = vpop.eup %10201  ;;  %v4796_v9 = vsub.f32 1.0, %v4795_v15  ;;  %v4810_v50 = vmul.f32 %v14606_v25, %v14557_v29  ;;  %vm4815_vm13 = vweird.f32 %v14606_v25  ;;  %v8755_v47 = vor.u32 %v9722_v33, %v8754_v40  ;;  %v8732_v29 = vld [vmem:[%s16520_s3 + $0x90] sm:$0xf0]  ;;  %v9707_v52 = vld [vmem:[%s16520_s3 + $0x44] sm:$0xf] }
 0x88f   :  { %v4754_v3 = vadd.f32 %v10192_v19, %v4753_v20  ;;  %v4768_v35 = vmul.f32 %v14578_v43, %v4767_v53  ;;  %v14622_v32 = vpop.eup %10203  ;;  %vm4816_vm8 = vmor %vm4814_vm12, %vm4815_vm13  ;;  %5131 = vmatpush.bf16.msrb.mxu1 %v8751_v39  ;;  %v8706_v33 = vld [vmem:[%s16520_s3 + $0x48] sm:$0xf]  ;;  %vm16704_vm13 = vcmask 1042433  }
 0x890   :  { %v4797_v4 = vmul.f32 %v14583_v36, %v4796_v9  ;;  %v4811_v8 = vsub.f32 1.0, %v4810_v50  ;;  %v4843_v13 = vmul.f32 %v14622_v32, %v14567_v44  ;;  %v14636_v58 = vpop.eup %10205  ;;  %5144 = vmatpush.bf16.msrb.mxu2 %v8755_v47  ;;  %v8735_v9 = vor.u32 %v9715_v60, %v8732_v29  ;;  %v8684_v60 = vld [vmem:[%s16520_s3 + $0x30] sm:$0xf0] }
 0x891   :  { %v4758_v34 = vsel %vm4757_vm5, %v10192_v19, %v4754_v3  ;;  %v4769_v22 = vadd.f32 %v14578_v43, %v4768_v35  ;;  %v4858_v62 = vmul.f32 %v14636_v58, %v14576_v48  ;;  %v8756_v19 = vld [vmem:[%s16520_s3 + $0xb8] sm:$0xf0]  ;;  %v8722_v3 = vld [vmem:[%s16520_s3 + $0x68] sm:$0xf]  ;;  %vm4852_vm5 = vcmp.eq.f32.partialorder %v4851_v51, 8.507059e+37 }
 0x892   :  { %v4763_v46 = vsel %vm14570_vm3, %v4762_v14, %v4758_v34  ;;  %v4798_v16 = vadd.f32 %v14583_v36, %v4797_v4  ;;  %v4812_v21 = vmul.f32 %v14606_v25, %v4811_v8  ;;  %vm4801_vm3 = vmor %vm4799_vm10, %vm4800_vm6  ;;  %v4844_v18 = vsub.f32 1.0, %v4843_v13  ;;  %v9717_v14 = vld [vmem:[%s16520_s3 + $0x8c] sm:$0xf0]  ;;  %v9712_v4 = vld [vmem:[%s16520_s3 + $0x6c] sm:$0xf] }
 0x893   :  { %v4773_v1 = vsel %vm4772_vm7, %v14578_v43, %v4769_v22  ;;  %v4859_v12 = vsub.f32 1.0, %v4858_v62  ;;  %v4877_v43 = vmul.f32 %v10198_v59, %v4763_v46  ;;  %v8759_v27 = vor.u32 %v9720_v37, %v8756_v19  ;;  %v8724_v8 = vld [vmem:[%s16520_s3 + $0x78] sm:$0xf0]  ;;  %v8698_v13 = vld [vmem:[%s16520_s3 + $0x40] sm:$0xf]  ;;  %5132 = vmatpush.bf16.msrb.mxu1 %v8735_v9 }
 0x894   :  { %v4778_v0 = vsel %vm14587_vm9, %v4777_v56, %v4773_v1  ;;  %v4802_v26 = vsel %vm4801_vm3, %v14583_v36, %v4798_v16  ;;  %v4813_v11 = vadd.f32 %v14606_v25, %v4812_v21  ;;  %v4845_v23 = vmul.f32 %v14622_v32, %v4844_v18  ;;  %v9718_v56 = vld [vmem:[%s16520_s3 + $0x94] sm:$0xf0]  ;;  %v8700_v62 = vld [vmem:[%s16520_s3 + $0x50] sm:$0xf0]  ;;  %v8708_v19 = vld [vmem:[%s16520_s3 + $0x58] sm:$0xf0] }
 0x895   :  { %v4807_v45 = vsel %vm14594_vm11, %v4806_v55, %v4802_v26  ;;  %v4860_v15 = vmul.f32 %v14636_v58, %v4859_v12  ;;  %v4878_v28 = vmul.f32 %v10202_v5, %v4778_v0  ;;  %v8731_v53 = vor.u32 %v9717_v14, %v8730_v17  ;;  %v8740_v55 = vld [vmem:[%s16520_s3 + $0x98] sm:$0xf0]  ;;  %5157 = vmatpush.bf16.msrb.mxu3 %v8759_v27  ;;  %v9710_v37 = vld [vmem:[%s16520_s3 + $0x54] sm:$0xf0]  ;;  %v8666_v27 = vld [vmem:[%s16520_s3] sm:$0xf] }
 0x896   :  { %v4817_v57 = vsel %vm4816_vm8, %v14606_v25, %v4813_v11  ;;  %v4875_v36 = vmul.f32 %v4807_v45, %v14550_v31  ;;  %v4846_v5 = vadd.f32 %v14622_v32, %v4845_v23  ;;  %vm4848_vm9 = vweird.f32 %v14622_v32  ;;  %v9708_v11 = vld [vmem:[%s16520_s3 + $0x4c] sm:$0xf]  ;;  %v8682_v45 = vld [vmem:[%s16520_s3 + $0x20] sm:$0xf]  ;;  %v9705_v23 = vld [vmem:[%s16520_s3 + $0x2c] sm:$0xf0] }
 0x897   :  { %v4822_v59 = vsel %vm14616_vm14, %v4821_v42, %v4817_v57  ;;  %v8739_v50 = vor.u32 %v9718_v56, %v8738_v41  ;;  %v8716_v42 = vld [vmem:[%s16520_s3 + $0x70] sm:$0xf0]  ;;  %vm4847_vm10 = vweird.f32 %v14567_v44  ;;  %5119 = vmatpush.bf16.msrb.mxu0 %v8731_v53  ;;  %v4861_v24 = vadd.f32 %v14636_v58, %v4860_v15  ;;  %v8690_v57 = vld [vmem:[%s16520_s3 + $0x28] sm:$0xf]  ;;  %v9704_v41 = vld [vmem:[%s16520_s3 + $0x2c] sm:$0xf] }
 0x898   :  { %v4876_v25 = vmul.f32 %v4873_v7, %v4822_v59  ;;  %v14710_v20 = vadd.f32 %v4877_v43, %v4875_v36  ;;  %vm4863_vm11 = vweird.f32 %v14636_v58  ;;  %v8743_v34 = vor.u32 %v9716_v30, %v8740_v55  ;;  %vm14755_vm12 = vmor %vm4847_vm10, %vm4848_vm9  ;;  %v9706_v36 = vld [vmem:[%s16520_s3 + $0x34] sm:$0xf0]  ;;  %v8692_v56 = vld [vmem:[%s16520_s3 + $0x38] sm:$0xf0] }
 0x899   :  { %v8715_v22 = vor.u32 %v9713_v10, %v8714_v54  ;;  %v4868_v16 = vand.u32 2147483648, %v14576_v48  ;;  %5145 = vmatpush.bf16.msrb.mxu2 %v8739_v50  ;;  %v8719_v21 = vor.u32 %v9711_v63, %v8716_v42  ;;  %v4850_v40 = vsel %vm14755_vm12, %v14622_v32, %v4846_v5  ;;  %v9701_v30 = vld [vmem:[%s16520_s3 + $0xc] sm:$0xf0]  ;;  %v9699_v55 = vld [vmem:[%s16520_s3 + $0x4] sm:$0xf] }
 0x89a   :  { %v14733_v35 = vadd.f32 %v4878_v28, %v4876_v25  ;;  %10207 = vtanh.f32 %v14710_v20  ;;  %vm4862_vm14 = vweird.f32 %v14576_v48  ;;  %5158 = vmatpush.bf16.msrb.mxu3 %v8743_v34  ;;  %v8723_v1 = vor.u32 %v9714_v49, %v8722_v3  ;;  %v9703_v48 = vld [vmem:[%s16520_s3 + $0x24] sm:$0xf]  ;;  %v8668_v54 = vld [vmem:[%s16520_s3 + $0x10] sm:$0xf0]  ;;  %v8674_v50 = vld [vmem:[%s16520_s3 + $0x8] sm:$0xf] }
 0x89b   :  { %v8727_v18 = vor.u32 %v9712_v4, %v8724_v8  ;;  %v4854_v32 = vor.u32 1.1754944e-38, %v4853_v61  ;;  %vm14781_vm15 = vmor %vm4862_vm14, %vm4863_vm11  ;;  %5120 = vmatpush.bf16.msrb.mxu0 %v8715_v22  ;;  %v8699_v26 = vor.u32 %v9709_v2, %v8698_v13  ;;  %vm14798_vm6 = vcmp.eq.f32.partialorder %v4866_v6, 8.507059e+37  ;;  %5133 = vmatpush.bf16.msrb.mxu1 %v8719_v21  ;;  %v9702_v63 = vld [vmem:[%s16520_s3 + $0x14] sm:$0xf0]  ;;  %v9700_v3 = vld [vmem:[%s16520_s3 + $0xc] sm:$0xf] }
 0x89c   :  { %10209 = vtanh.f32 %v14733_v35  ;;  %v4865_v61 = vsel %vm14781_vm15, %v14636_v58, %v4861_v24  ;;  %v4869_v12 = vor.u32 1.1754944e-38, %v4868_v16  ;;  %v8703_v58 = vor.u32 %v9707_v52, %v8700_v62  ;;  %v8676_v49 = vld [vmem:[%s16520_s3 + $0x18] sm:$0xf0] }
 0x89d   :  { %v4855_v51 = vsel %vm4852_vm5, %v4854_v32, %v4850_v40  ;;  %5146 = vmatpush.bf16.msrb.mxu2 %v8723_v1  ;;  %v8707_v43 = vor.u32 %v9710_v37, %v8706_v33  ;;  %v8711_v14 = vor.u32 %v9708_v11, %v8708_v19  ;;  %v8683_v29 = vor.u32 %v9705_v23, %v8682_v45  ;;  %v8662_v37 = vld [vmem:[%s16523_s0 + $0x23] ss:$8 sm:$0xf] }
 0x89e   :  { %5159 = vmatpush.bf16.msrb.mxu3 %v8727_v18  ;;  %v4870_v47 = vsel %vm14798_vm6, %v4869_v12, %v4865_v61  ;;  %v4889_v59 = vrot.slane %v14471_v38, 1  ;;  %v8687_v25 = vor.u32 %v9703_v48, %v8684_v60  ;;  %v8691_v53 = vor.u32 %v9706_v36, %v8690_v57  ;;  %v8663_v19 = vld [vmem:[%s16523_s0 + $0x63] ss:$8 sm:$0xf] }
 0x89f   :  { %5121 = vmatpush.bf16.msrb.mxu0 %v8699_v26  ;;  %5134 = vmatpush.bf16.msrb.mxu1 %v8703_v58  ;;  %v8695_v9 = vor.u32 %v9704_v41, %v8692_v56  ;;  %v8667_v42 = vor.u32 %v9701_v30, %v8666_v27  ;;  %v8671_v8 = vor.u32 %v9699_v55, %v8668_v54  ;;  %vm16703_vm7 = vcmask 1041408   ;;  %v9761_v41 = vld [vmem:[%s16520_s3 + $0xec] sm:$0xf0]  ;;  %v9762_v30 = vld [vmem:[%s16520_s3 + $0xf4] sm:$0xf0] }
 0x8a0   :  { %v10208_v44 = vpop.eup %10207  ;;  %v8675_v24 = vor.u32 %v9702_v63, %v8674_v50  ;;  %v8679_v34 = vor.u32 %v9700_v3, %v8676_v49  ;;  %v4904_v22 = vsub.f32 %v14710_v20, %v14550_v31  ;;  %v4905_v13 = vsub.f32 %v14733_v35, %v4873_v7  ;;  %v8899_v50 = vld [vmem:[%s16520_s3 + $0xc0] sm:$0xf]  ;;  %v9757_v63 = vld [vmem:[%s16520_s3 + $0xcc] sm:$0xf0]  ;;  %v9755_v49 = vld [vmem:[%s16520_s3 + $0xc4] sm:$0xf] }
 0x8a1   :  { %v4883_v6 = vmul.f32 %v10208_v44, %v4855_v51  ;;  %5147 = vmatpush.bf16.msrb.mxu2 %v8707_v43  ;;  %v8900_v3 = vor.u32 %v9757_v63, %v8899_v50 }
 0x8a2   :  { %v10210_v39 = vpop.eup %10209  ;;  %5160 = vmatpush.bf16.msrb.mxu3 %v8711_v14  ;;  %v4906_v2 = vmul.f32 0.0, %v4904_v22  ;;  %v4907_v46 = vmul.f32 0.0, %v4905_v13  ;;  %v9758_v13 = vld [vmem:[%s16520_s3 + $0xd4] sm:$0xf0] }
 0x8a3   :  { %v4884_v15 = vmul.f32 %v10210_v39, %v4870_v47  ;;  %v4891_v28 = vsub.f32 %v4883_v6, %v14471_v38  ;;  %5122 = vmatpush.bf16.msrb.mxu0 %v8683_v29  ;;  %5135 = vmatpush.bf16.msrb.mxu1 %v8687_v25  ;;  %v8915_v29 = vld [vmem:[%s16520_s3 + $0xe0] sm:$0xf]  ;;  %v9760_v25 = vld [vmem:[%s16520_s3 + $0xec] sm:$0xf] }
 0x8a4   :  { %v8916_v56 = vor.u32 %v9761_v41, %v8915_v29 }
 0x8a5   :  { %v4892_v10 = vsub.f32 %v4884_v15, %v4889_v59  ;;  %v4894_v5 = vmul.f32 0.0, %v4891_v28  ;;  %5148 = vmatpush.bf16.msrb.mxu2 %v8691_v53  ;;  %v9759_v59 = vld [vmem:[%s16520_s3 + $0xe4] sm:$0xf]  ;;  %v8917_v15 = vld [vmem:[%s16520_s3 + $0xf0] sm:$0xf0] }
 0x8a6   :  { %5161 = vmatpush.bf16.msrb.mxu3 %v8695_v9  ;;  %v8923_v28 = vld [vmem:[%s16520_s3 + $0xe8] sm:$0xf]  ;;  %v8920_v27 = vor.u32 %v9759_v59, %v8917_v15  ;;  %v8925_v53 = vld [vmem:[%s16520_s3 + $0xf8] sm:$0xf0]  ;;  %v9753_v59 = vld [vmem:[%s16520_s3 + $0xac] sm:$0xf0] }
 0x8a7   :  { %v4895_v4 = vmul.f32 0.0, %v4892_v10  ;;  %4898 = vst [vmem:[#allocation1] ss:$9 sm:$0xff] %v4894_v5  ;;  %5123 = vmatpush.bf16.msrb.mxu0 %v8667_v42  ;;  %5136 = vmatpush.bf16.msrb.mxu1 %v8671_v8  ;;  %v8924_v54 = vor.u32 %v9762_v30, %v8923_v28  ;;  %v8928_v10 = vor.u32 %v9760_v25, %v8925_v53  ;;  %v8907_v8 = vld [vmem:[%s16520_s3 + $0xc8] sm:$0xf] }
 0x8a8   :  { %v9743_v30 = vld [vmem:[%s16520_s3 + $0x64] sm:$0xf] }
 0x8a9   :  { %4900 = vst [vmem:[#allocation1 + $0x1] ss:$9 sm:$0xff] %v4895_v4  ;;  %5149 = vmatpush.bf16.msrb.mxu2 %v8675_v24  ;;  %v8901_v4 = vld [vmem:[%s16520_s3 + $0xd0] sm:$0xf0] }
 0x8aa   :  { %5162 = vmatpush.bf16.msrb.mxu3 %v8679_v34 }
 0x8ab   :  { %5560 = vmatpush.bf16.msra.mxu0 %v8916_v56  ;;  %5573 = vmatpush.bf16.msra.mxu1 %v8920_v27  ;;  %v8883_v56 = vld [vmem:[%s16520_s3 + $0xa0] sm:$0xf] }
 0x8ac   :  { %v8884_v63 = vor.u32 %v9753_v59, %v8883_v56  ;;  %v8851_v56 = vld [vmem:[%s16520_s3 + $0x60] sm:$0xf]  ;;  %v9745_v59 = vld [vmem:[%s16520_s3 + $0x6c] sm:$0xf0] }
 0x8ad   :  { %5586 = vmatpush.bf16.msra.mxu2 %v8924_v54 }
 0x8ae   :  { %5599 = vmatpush.bf16.msra.mxu3 %v8928_v10 }
 0x8af   :  { %5561 = vmatpush.bf16.msra.mxu0 %v8900_v3 }
 0x8b0   :  { %v4901_v16 = vld [vmem:[#allocation1] sm:$0xff] }
 0x8b1   :  { %v14860_v21 = vadd.f32 %v4901_v16, %v14471_v38  ;;  %4910 = vst [vmem:[#allocation1] ss:$9 sm:$0xff] %v4906_v2 }
 0x8b2   :  { %4912 = vst [vmem:[#allocation1 + $0x1] ss:$9 sm:$0xff] %v4907_v46 }
 0x8b3   :  { %8661 = vst [vmem:[%s16524_s4 + $0x14] sm:$0x3] %v14860_v21  ;;  %v4923_v20 = vpack.c.bf16 %v14860_v21, %v14860_v21  ;;  %5562 = vmatpush.bf16.msra.mxu0 %v8884_v63 }
 0x8b5   :  { %5124 = vmatmul.bf16.vlgmr.msrb.gmra.mxu0 %v4923_v20  ;;  %5137 = vmatmul.bf16.vlgmr.msrb.gmra.mxu1 %v4923_v20 }
 0x8b6   :  { %5150 = vmatmul.bf16.vlgmr.msrb.gmra.mxu2 %v4923_v20  ;;  %5163 = vmatmul.bf16.vlgmr.msrb.gmra.mxu3 %v4923_v20  ;;  %v8904_v20 = vor.u32 %v9755_v49, %v8901_v4 }
 0x8b8   :  { %5574 = vmatpush.bf16.msra.mxu1 %v8904_v20  ;;  %v8891_v20 = vld [vmem:[%s16520_s3 + $0xa8] sm:$0xf] }
 0x8b9   :  { %v4913_v5 = vld [vmem:[#allocation1] sm:$0xff] }
 0x8ba   :  { %v14939_v46 = vadd.f32 %v4913_v5, %v14550_v31 }
 0x932   :  { %v5125_v7 = vpop.f32.mrf.mxu0  ;;  %v5138_v35 = vpop.f32.mrf.mxu1 }
 0x933   :  { %v5172_v52 = vrot.slane %v5138_v35, 7 }
 0x935   :  { %v5175_v32 = vsel %vm286_vm0, %v5125_v7, %v5172_v52  ;;  %v5178_v0 = vsel %vm292_vm1, %v5125_v7, %v5172_v52  ;;  %v8908_v7 = vor.u32 %v9758_v13, %v8907_v8 }
 0x937   :  { %5587 = vmatpush.bf16.msra.mxu2 %v8908_v7 }
 0x939   :  { %v5151_v40 = vpop.f32.mrf.mxu2  ;;  %v5164_v38 = vpop.f32.mrf.mxu3 }
 0x93a   :  { %v5173_v1 = vrot.slane %v5151_v40, 6  ;;  %v5174_v18 = vrot.slane %v5164_v38, 5  ;;  %v5127_v62 = vpop.f32.mrf.mxu0  ;;  %v5140_v33 = vpop.f32.mrf.mxu1 }
 0x93b   :  { %v5317_v33 = vrot.slane %v14939_v46, 1 }
 0x93c   :  { %v5176_v26 = vsel %vm288_vm2, %v5173_v1, %v5174_v18  ;;  %v5179_v11 = vsel %vm294_vm4, %v5173_v1, %v5174_v18 }
 0x93d   :  { %v5177_v61 = vsel %vm16703_vm7, %v5175_v32, %v5176_v26  ;;  %v5180_v17 = vsel %vm16704_vm13, %v5178_v0, %v5179_v11 }
 0x93e   :  { %v5181_v45 = vrot.slane %v5180_v17, 1  ;;  %v14880_v23 = vadd.f32 %v8662_v37, %v5177_v61 }
 0x940   :  { %v14882_v44 = vadd.f32 %v8663_v19, %v5181_v45  ;;  %v8792_v51 = vmul.f32 -1.442695, %v14880_v23  ;;  %v5226_v12 = vrot.slane %v14880_v23, 1  ;;  %v5274_v58 = vrot.slane %v14880_v23, 3 }
 0x941   :  { %v5153_v43 = vpop.f32.mrf.mxu2  ;;  %v5166_v48 = vpop.f32.mrf.mxu3  ;;  %v5268_v22 = vrot.slane %v14880_v23, 2 }
 0x942   :  { %10211 = vpow2.f32 %v8792_v51  ;;  %v8793_v6 = vmul.f32 -1.442695, %v14882_v44  ;;  %v5227_v14 = vrot.slane %v14882_v44, 1  ;;  %v8794_v60 = vmul.f32 -1.442695, %v5226_v12 }
 0x943   :  { %v5275_v57 = vrot.slane %v14882_v44, 3  ;;  %v8796_v39 = vmul.f32 -1.442695, %v5274_v58  ;;  %v5269_v35 = vrot.slane %v14882_v44, 2  ;;  %v8875_v43 = vld [vmem:[%s16520_s3 + $0x88] sm:$0xf] }
 0x944   :  { %10213 = vpow2.f32 %v8793_v6  ;;  %v8795_v36 = vmul.f32 -1.442695, %v5227_v14 }
 0x945   :  { %10215 = vpow2.f32 %v8794_v60  ;;  %v8797_v47 = vmul.f32 -1.442695, %v5275_v57  ;;  %v9756_v57 = vld [vmem:[%s16520_s3 + $0xcc] sm:$0xf] }
 0x946   :  { %10217 = vpow2.f32 %v8795_v36  ;;  %v8909_v36 = vld [vmem:[%s16520_s3 + $0xd8] sm:$0xf0] }
 0x947   :  { %10219 = vpow2.f32 %v8796_v39  ;;  %v8912_v54 = vor.u32 %v9756_v57, %v8909_v36  ;;  %v9748_v36 = vld [vmem:[%s16520_s3 + $0x8c] sm:$0xf] }
 0x948   :  { %v10212_v55 = vpop.eup %10211  ;;  %10221 = vpow2.f32 %v8797_v47 }
 0x949   :  { %v14914_v9 = vadd.f32 1.0, %v10212_v55  ;;  %5600 = vmatpush.bf16.msra.mxu3 %v8912_v54  ;;  %v9746_v54 = vld [vmem:[%s16520_s3 + $0x74] sm:$0xf0] }
 0x94a   :  { %v10214_v42 = vpop.eup %10213 }
 0x94b   :  { %v10216_v24 = vpop.eup %10215  ;;  %v14931_v34 = vadd.f32 1.0, %v10214_v42  ;;  %10223 = vrcp.f32 %v14914_v9  ;;  %v5203_v40 = vand.u32 2147483647, %v14914_v9  ;;  %v5205_v1 = vand.u32 2147483648, %v14914_v9 }
 0x94c   :  { %v10218_v2 = vpop.eup %10217  ;;  %v14941_v16 = vadd.f32 1.0, %v10216_v24  ;;  %vm5199_vm3 = vweird.f32 %v14914_v9 }
 0x94d   :  { %10225 = vrcp.f32 %v14931_v34  ;;  %v10220_v52 = vpop.eup %10219  ;;  %v14946_v38 = vadd.f32 1.0, %v10218_v2  ;;  %v5218_v18 = vand.u32 2147483647, %v14931_v34  ;;  %v5220_v62 = vand.u32 2147483648, %v14931_v34  ;;  %v8885_v2 = vld [vmem:[%s16520_s3 + $0xb0] sm:$0xf0] }
 0x94e   :  { %10227 = vrcp.f32 %v14941_v16  ;;  %v10222_v31 = vpop.eup %10221  ;;  %v5247_v32 = vand.u32 2147483647, %v14941_v16  ;;  %v14956_v0 = vadd.f32 1.0, %v10220_v52  ;;  %vm14959_vm8 = vcmp.eq.f32.partialorder %v5203_v40, 8.507059e+37  ;;  %v9754_v40 = vld [vmem:[%s16520_s3 + $0xb4] sm:$0xf0] }
 0x94f   :  { %10229 = vtanh.f32 %v5268_v22  ;;  %vm5214_vm9 = vweird.f32 %v14931_v34  ;;  %v5249_v19 = vand.u32 2147483648, %v14941_v16  ;;  %v14965_v61 = vadd.f32 1.0, %v10222_v31  ;;  %v9752_v31 = vld [vmem:[%s16520_s3 + $0xac] sm:$0xf] }
 0x950   :  { %10231 = vrcp.f32 %v14946_v38  ;;  %v5206_v45 = vor.u32 1.1754944e-38, %v5205_v1  ;;  %v5262_v23 = vand.u32 2147483647, %v14946_v38  ;;  %v5264_v44 = vand.u32 2147483648, %v14946_v38 }
 0x951   :  { %v10224_v37 = vpop.eup %10223  ;;  %10233 = vtanh.f32 %v5269_v35  ;;  %vm14976_vm10 = vcmp.eq.f32.partialorder %v5218_v18, 8.507059e+37  ;;  %v5221_v48 = vor.u32 1.1754944e-38, %v5220_v62  ;;  %vm5243_vm11 = vweird.f32 %v14941_v16 }
 0x952   :  { %v5195_v26 = vmul.f32 %v10224_v37, %v14914_v9  ;;  %10235 = vrcp.f32 %v14956_v0  ;;  %vm14983_vm12 = vcmp.eq.f32.partialorder %v5247_v32, 8.507059e+37  ;;  %vm5258_vm14 = vweird.f32 %v14946_v38  ;;  %v9751_v9 = vld [vmem:[%s16520_s3 + $0xa4] sm:$0xf]  ;;  %v8867_v32 = vld [vmem:[%s16520_s3 + $0x80] sm:$0xf] }
 0x953   :  { %v14967_v17 = vpop.eup %10225  ;;  %10237 = vrcp.f32 %v14965_v61  ;;  %vm5200_vm15 = vweird.f32 %v10224_v37  ;;  %v5250_v41 = vor.u32 1.1754944e-38, %v5249_v19  ;;  %vm15005_vm5 = vcmp.eq.f32.partialorder %v5262_v23, 8.507059e+37  ;;  %v9747_v23 = vld [vmem:[%s16520_s3 + $0x84] sm:$0xf] }
 0x954   :  { %v14972_v51 = vpop.eup %10227  ;;  %v5196_v12 = vsub.f32 1.0, %v5195_v26  ;;  %v5210_v58 = vmul.f32 %v14967_v17, %v14931_v34  ;;  %v5265_v25 = vor.u32 1.1754944e-38, %v5264_v44  ;;  %vm5215_vm6 = vweird.f32 %v14967_v17  ;;  %vm5201_vm7 = vmor %vm5199_vm3, %vm5200_vm15 }
 0x955   :  { %v10230_v6 = vpop.eup %10229  ;;  %v5239_v14 = vmul.f32 %v14972_v51, %v14941_v16  ;;  %vm5244_vm13 = vweird.f32 %v14972_v51  ;;  %v5295_v4 = vand.u32 2147483647, %v14956_v0  ;;  %vm5216_vm3 = vmor %vm5214_vm9, %vm5215_vm6  ;;  %v5297_v35 = vand.u32 2147483648, %v14956_v0 }
 0x956   :  { %v14995_v39 = vpop.eup %10231  ;;  %v5197_v47 = vmul.f32 %v10224_v37, %v5196_v12  ;;  %v5211_v29 = vsub.f32 1.0, %v5210_v58  ;;  %v5310_v62 = vand.u32 2147483647, %v14965_v61  ;;  %v8888_v12 = vor.u32 %v9751_v9, %v8885_v2  ;;  %v9741_v9 = vld [vmem:[%s16520_s3 + $0x4c] sm:$0xf0] }
 0x957   :  { %v10234_v15 = vpop.eup %10233  ;;  %v5240_v28 = vsub.f32 1.0, %v5239_v14  ;;  %v5254_v27 = vmul.f32 %v14995_v39, %v14946_v38  ;;  %vm5259_vm15 = vweird.f32 %v14995_v39  ;;  %v8892_v58 = vor.u32 %v9754_v40, %v8891_v20  ;;  %v8869_v38 = vld [vmem:[%s16520_s3 + $0x90] sm:$0xf0]  ;;  %v9739_v2 = vld [vmem:[%s16520_s3 + $0x44] sm:$0xf] }
 0x958   :  { %v5198_v53 = vadd.f32 %v10224_v37, %v5197_v47  ;;  %v5212_v55 = vmul.f32 %v14967_v17, %v5211_v29  ;;  %v15011_v10 = vpop.eup %10235  ;;  %vm5260_vm9 = vmor %vm5258_vm14, %vm5259_vm15  ;;  %5575 = vmatpush.bf16.msra.mxu1 %v8888_v12  ;;  %v8843_v40 = vld [vmem:[%s16520_s3 + $0x48] sm:$0xf]  ;;  %vm16720_vm15 = vcmask 1042433  }
 0x959   :  { %v5241_v5 = vmul.f32 %v14972_v51, %v5240_v28  ;;  %v5255_v50 = vsub.f32 1.0, %v5254_v27  ;;  %v5287_v49 = vmul.f32 %v15011_v10, %v14956_v0  ;;  %v15025_v8 = vpop.eup %10237  ;;  %5588 = vmatpush.bf16.msra.mxu2 %v8892_v58  ;;  %v8872_v28 = vor.u32 %v9747_v23, %v8869_v38  ;;  %v8821_v23 = vld [vmem:[%s16520_s3 + $0x30] sm:$0xf0] }
 0x95a   :  { %v5202_v42 = vsel %vm5201_vm7, %v10224_v37, %v5198_v53  ;;  %v5213_v3 = vadd.f32 %v14967_v17, %v5212_v55  ;;  %v5302_v52 = vmul.f32 %v15025_v8, %v14965_v61  ;;  %v8893_v37 = vld [vmem:[%s16520_s3 + $0xb8] sm:$0xf0]  ;;  %v8859_v53 = vld [vmem:[%s16520_s3 + $0x68] sm:$0xf]  ;;  %vm5296_vm7 = vcmp.eq.f32.partialorder %v5295_v4, 8.507059e+37 }
 0x95b   :  { %v5207_v24 = vsel %vm14959_vm8, %v5206_v45, %v5202_v42  ;;  %v5242_v22 = vadd.f32 %v14972_v51, %v5241_v5  ;;  %v5256_v13 = vmul.f32 %v14995_v39, %v5255_v50  ;;  %vm5245_vm8 = vmor %vm5243_vm11, %vm5244_vm13  ;;  %v5288_v34 = vsub.f32 1.0, %v5287_v49  ;;  %v9749_v45 = vld [vmem:[%s16520_s3 + $0x8c] sm:$0xf0]  ;;  %v9744_v5 = vld [vmem:[%s16520_s3 + $0x6c] sm:$0xf] }
 0x95c   :  { %v5217_v7 = vsel %vm5216_vm3, %v14967_v17, %v5213_v3  ;;  %v5303_v19 = vsub.f32 1.0, %v5302_v52  ;;  %v5321_v17 = vmul.f32 %v10230_v6, %v5207_v24  ;;  %v8896_v57 = vor.u32 %v9752_v31, %v8893_v37  ;;  %v8861_v50 = vld [vmem:[%s16520_s3 + $0x78] sm:$0xf0]  ;;  %v8835_v49 = vld [vmem:[%s16520_s3 + $0x40] sm:$0xf]  ;;  %5576 = vmatpush.bf16.msra.mxu1 %v8872_v28 }
 0x95d   :  { %v5222_v1 = vsel %vm14976_vm10, %v5221_v48, %v5217_v7  ;;  %v5246_v16 = vsel %vm5245_vm8, %v14972_v51, %v5242_v22  ;;  %v5257_v18 = vadd.f32 %v14995_v39, %v5256_v13  ;;  %v5289_v11 = vmul.f32 %v15011_v10, %v5288_v34  ;;  %v9750_v48 = vld [vmem:[%s16520_s3 + $0x94] sm:$0xf0]  ;;  %v8837_v52 = vld [vmem:[%s16520_s3 + $0x50] sm:$0xf0]  ;;  %v8845_v37 = vld [vmem:[%s16520_s3 + $0x58] sm:$0xf0] }
 0x95e   :  { %v5251_v26 = vsel %vm14983_vm12, %v5250_v41, %v5246_v16  ;;  %v5304_v14 = vmul.f32 %v15025_v8, %v5303_v19  ;;  %v5322_v60 = vmul.f32 %v10234_v15, %v5222_v1  ;;  %v8868_v29 = vor.u32 %v9749_v45, %v8867_v32  ;;  %v8877_v41 = vld [vmem:[%s16520_s3 + $0x98] sm:$0xf0]  ;;  %5601 = vmatpush.bf16.msra.mxu3 %v8896_v57  ;;  %v9742_v31 = vld [vmem:[%s16520_s3 + $0x54] sm:$0xf0]  ;;  %v8803_v57 = vld [vmem:[%s16520_s3] sm:$0xf] }
 0x95f   :  { %v5261_v44 = vsel %vm5260_vm9, %v14995_v39, %v5257_v18  ;;  %v5319_v51 = vmul.f32 %v5251_v26, %v14939_v46  ;;  %v5290_v15 = vadd.f32 %v15011_v10, %v5289_v11  ;;  %vm5292_vm10 = vweird.f32 %v15011_v10  ;;  %v9740_v18 = vld [vmem:[%s16520_s3 + $0x4c] sm:$0xf]  ;;  %v8819_v26 = vld [vmem:[%s16520_s3 + $0x20] sm:$0xf]  ;;  %v9737_v11 = vld [vmem:[%s16520_s3 + $0x2c] sm:$0xf0] }
 0x960   :  { %v5266_v6 = vsel %vm15005_vm5, %v5265_v25, %v5261_v44  ;;  %v8876_v27 = vor.u32 %v9750_v48, %v8875_v43  ;;  %v8853_v25 = vld [vmem:[%s16520_s3 + $0x70] sm:$0xf0]  ;;  %vm5291_vm11 = vweird.f32 %v14956_v0  ;;  %5563 = vmatpush.bf16.msra.mxu0 %v8868_v29  ;;  %v5305_v63 = vadd.f32 %v15025_v8, %v5304_v14  ;;  %v8827_v44 = vld [vmem:[%s16520_s3 + $0x28] sm:$0xf]  ;;  %v9736_v43 = vld [vmem:[%s16520_s3 + $0x2c] sm:$0xf] }
 0x961   :  { %v5320_v39 = vmul.f32 %v5317_v33, %v5266_v6  ;;  %v15099_v47 = vadd.f32 %v5321_v17, %v5319_v51  ;;  %vm5307_vm12 = vweird.f32 %v15025_v8  ;;  %v8880_v42 = vor.u32 %v9748_v36, %v8877_v41  ;;  %vm15144_vm14 = vmor %vm5291_vm11, %vm5292_vm10  ;;  %v9738_v51 = vld [vmem:[%s16520_s3 + $0x34] sm:$0xf0]  ;;  %v8829_v48 = vld [vmem:[%s16520_s3 + $0x38] sm:$0xf0] }
 0x962   :  { %v8852_v3 = vor.u32 %v9745_v59, %v8851_v56  ;;  %v5312_v22 = vand.u32 2147483648, %v14965_v61  ;;  %5589 = vmatpush.bf16.msra.mxu2 %v8876_v27  ;;  %v8856_v13 = vor.u32 %v9743_v30, %v8853_v25  ;;  %v5294_v20 = vsel %vm15144_vm14, %v15011_v10, %v5290_v15  ;;  %v9733_v36 = vld [vmem:[%s16520_s3 + $0xc] sm:$0xf0]  ;;  %v9731_v41 = vld [vmem:[%s16520_s3 + $0x4] sm:$0xf] }
 0x963   :  { %v15122_v55 = vadd.f32 %v5322_v60, %v5320_v39  ;;  %10239 = vtanh.f32 %v15099_v47  ;;  %vm5306_vm5 = vweird.f32 %v14965_v61  ;;  %5602 = vmatpush.bf16.msra.mxu3 %v8880_v42  ;;  %v8860_v7 = vor.u32 %v9746_v54, %v8859_v53  ;;  %v9735_v61 = vld [vmem:[%s16520_s3 + $0x24] sm:$0xf]  ;;  %v8805_v56 = vld [vmem:[%s16520_s3 + $0x10] sm:$0xf0]  ;;  %v8811_v27 = vld [vmem:[%s16520_s3 + $0x8] sm:$0xf] }
 0x964   :  { %v8864_v34 = vor.u32 %v9744_v5, %v8861_v50  ;;  %v5298_v10 = vor.u32 1.1754944e-38, %v5297_v35  ;;  %vm15170_vm6 = vmor %vm5306_vm5, %vm5307_vm12  ;;  %5564 = vmatpush.bf16.msra.mxu0 %v8852_v3  ;;  %v8836_v16 = vor.u32 %v9741_v9, %v8835_v49  ;;  %vm15187_vm13 = vcmp.eq.f32.partialorder %v5310_v62, 8.507059e+37  ;;  %5577 = vmatpush.bf16.msra.mxu1 %v8856_v13  ;;  %v9734_v30 = vld [vmem:[%s16520_s3 + $0x14] sm:$0xf0]  ;;  %v9732_v53 = vld [vmem:[%s16520_s3 + $0xc] sm:$0xf] }
 0x965   :  { %10241 = vtanh.f32 %v15122_v55  ;;  %v5309_v35 = vsel %vm15170_vm6, %v15025_v8, %v5305_v63  ;;  %v5313_v19 = vor.u32 1.1754944e-38, %v5312_v22  ;;  %v8840_v8 = vor.u32 %v9739_v2, %v8837_v52  ;;  %v8813_v54 = vld [vmem:[%s16520_s3 + $0x18] sm:$0xf0] }
 0x966   :  { %v5299_v4 = vsel %vm5296_vm7, %v5298_v10, %v5294_v20  ;;  %5590 = vmatpush.bf16.msra.mxu2 %v8860_v7  ;;  %v8844_v17 = vor.u32 %v9742_v31, %v8843_v40  ;;  %v8848_v45 = vor.u32 %v9740_v18, %v8845_v37  ;;  %v8820_v38 = vor.u32 %v9737_v11, %v8819_v26  ;;  %v8799_v31 = vld [vmem:[%s16523_s0 + $0x24] ss:$8 sm:$0xf] }
 0x967   :  { %5603 = vmatpush.bf16.msra.mxu3 %v8864_v34  ;;  %v5314_v58 = vsel %vm15187_vm13, %v5313_v19, %v5309_v35  ;;  %v5333_v6 = vrot.slane %v14860_v21, 1  ;;  %v8824_v39 = vor.u32 %v9735_v61, %v8821_v23  ;;  %v8828_v29 = vor.u32 %v9738_v51, %v8827_v44  ;;  %v8800_v37 = vld [vmem:[%s16523_s0 + $0x64] ss:$8 sm:$0xf] }
 0x968   :  { %5565 = vmatpush.bf16.msra.mxu0 %v8836_v16  ;;  %5578 = vmatpush.bf16.msra.mxu1 %v8840_v8  ;;  %v8832_v28 = vor.u32 %v9736_v43, %v8829_v48  ;;  %v8804_v25 = vor.u32 %v9733_v36, %v8803_v57  ;;  %v8808_v50 = vor.u32 %v9731_v41, %v8805_v56  ;;  %vm16719_vm3 = vcmask 1041408   ;;  %v9793_v43 = vld [vmem:[%s16520_s3 + $0xec] sm:$0xf0]  ;;  %v9794_v36 = vld [vmem:[%s16520_s3 + $0xf4] sm:$0xf0] }
 0x969   :  { %v10240_v0 = vpop.eup %10239  ;;  %v8812_v63 = vor.u32 %v9734_v30, %v8811_v27  ;;  %v8816_v42 = vor.u32 %v9732_v53, %v8813_v54  ;;  %v5348_v3 = vsub.f32 %v15099_v47, %v14939_v46  ;;  %v5349_v49 = vsub.f32 %v15122_v55, %v5317_v33  ;;  %v9036_v27 = vld [vmem:[%s16520_s3 + $0xc0] sm:$0xf]  ;;  %v9789_v30 = vld [vmem:[%s16520_s3 + $0xcc] sm:$0xf0]  ;;  %v9787_v54 = vld [vmem:[%s16520_s3 + $0xc4] sm:$0xf] }
 0x96a   :  { %v5327_v62 = vmul.f32 %v10240_v0, %v5299_v4  ;;  %5591 = vmatpush.bf16.msra.mxu2 %v8844_v17  ;;  %v9037_v53 = vor.u32 %v9789_v30, %v9036_v27 }
 0x96b   :  { %v10242_v12 = vpop.eup %10241  ;;  %5604 = vmatpush.bf16.msra.mxu3 %v8848_v45  ;;  %v5350_v9 = vmul.f32 0.0, %v5348_v3  ;;  %v5351_v24 = vmul.f32 0.0, %v5349_v49  ;;  %v9790_v49 = vld [vmem:[%s16520_s3 + $0xd4] sm:$0xf0] }
 0x96c   :  { %v5328_v14 = vmul.f32 %v10242_v12, %v5314_v58  ;;  %v5335_v60 = vsub.f32 %v5327_v62, %v14860_v21  ;;  %5566 = vmatpush.bf16.msra.mxu0 %v8820_v38  ;;  %5579 = vmatpush.bf16.msra.mxu1 %v8824_v39  ;;  %v9052_v38 = vld [vmem:[%s16520_s3 + $0xe0] sm:$0xf]  ;;  %v9792_v39 = vld [vmem:[%s16520_s3 + $0xec] sm:$0xf] }
 0x96d   :  { %v9053_v48 = vor.u32 %v9793_v43, %v9052_v38 }
 0x96e   :  { %v5336_v59 = vsub.f32 %v5328_v14, %v5333_v6  ;;  %v5338_v15 = vmul.f32 0.0, %v5335_v60  ;;  %5592 = vmatpush.bf16.msra.mxu2 %v8828_v29  ;;  %v9791_v6 = vld [vmem:[%s16520_s3 + $0xe4] sm:$0xf]  ;;  %v9054_v14 = vld [vmem:[%s16520_s3 + $0xf0] sm:$0xf0] }
 0x96f   :  { %5605 = vmatpush.bf16.msra.mxu3 %v8832_v28  ;;  %v9060_v60 = vld [vmem:[%s16520_s3 + $0xe8] sm:$0xf]  ;;  %v9057_v57 = vor.u32 %v9791_v6, %v9054_v14  ;;  %v9062_v29 = vld [vmem:[%s16520_s3 + $0xf8] sm:$0xf0]  ;;  %v9785_v6 = vld [vmem:[%s16520_s3 + $0xac] sm:$0xf0] }
 0x970   :  { %v5339_v5 = vmul.f32 0.0, %v5336_v59  ;;  %5342 = vst [vmem:[#allocation1] ss:$9 sm:$0xff] %v5338_v15  ;;  %5567 = vmatpush.bf16.msra.mxu0 %v8804_v25  ;;  %5580 = vmatpush.bf16.msra.mxu1 %v8808_v50  ;;  %v9061_v56 = vor.u32 %v9794_v36, %v9060_v60  ;;  %v9065_v59 = vor.u32 %v9792_v39, %v9062_v29  ;;  %v9044_v50 = vld [vmem:[%s16520_s3 + $0xc8] sm:$0xf] }
 0x971   :  { %v9775_v36 = vld [vmem:[%s16520_s3 + $0x64] sm:$0xf] }
 0x972   :  { %5344 = vst [vmem:[#allocation1 + $0x1] ss:$9 sm:$0xff] %v5339_v5  ;;  %5593 = vmatpush.bf16.msra.mxu2 %v8812_v63  ;;  %v9038_v5 = vld [vmem:[%s16520_s3 + $0xd0] sm:$0xf0] }
 0x973   :  { %5606 = vmatpush.bf16.msra.mxu3 %v8816_v42 }
 0x974   :  { %6004 = vmatpush.bf16.msrb.mxu0 %v9053_v48  ;;  %6017 = vmatpush.bf16.msrb.mxu1 %v9057_v57  ;;  %v9020_v48 = vld [vmem:[%s16520_s3 + $0xa0] sm:$0xf] }
 0x975   :  { %v9021_v30 = vor.u32 %v9785_v6, %v9020_v48  ;;  %v8988_v48 = vld [vmem:[%s16520_s3 + $0x60] sm:$0xf]  ;;  %v9777_v6 = vld [vmem:[%s16520_s3 + $0x6c] sm:$0xf0] }
 0x976   :  { %6030 = vmatpush.bf16.msrb.mxu2 %v9061_v56 }
 0x977   :  { %6043 = vmatpush.bf16.msrb.mxu3 %v9065_v59 }
 0x978   :  { %6005 = vmatpush.bf16.msrb.mxu0 %v9037_v53 }
 0x979   :  { %v5345_v22 = vld [vmem:[#allocation1] sm:$0xff] }
 0x97a   :  { %v15249_v13 = vadd.f32 %v5345_v22, %v14860_v21  ;;  %5354 = vst [vmem:[#allocation1] ss:$9 sm:$0xff] %v5350_v9 }
 0x97b   :  { %5356 = vst [vmem:[#allocation1 + $0x1] ss:$9 sm:$0xff] %v5351_v24 }
 0x97c   :  { %8798 = vst [vmem:[%s16524_s4 + $0x16] sm:$0x3] %v15249_v13  ;;  %v5367_v47 = vpack.c.bf16 %v15249_v13, %v15249_v13  ;;  %6006 = vmatpush.bf16.msrb.mxu0 %v9021_v30 }
 0x97e   :  { %5568 = vmatmul.bf16.vlgmr.msra.gmra.mxu0 %v5367_v47  ;;  %5581 = vmatmul.bf16.vlgmr.msra.gmra.mxu1 %v5367_v47 }
 0x97f   :  { %5594 = vmatmul.bf16.vlgmr.msra.gmra.mxu2 %v5367_v47  ;;  %5607 = vmatmul.bf16.vlgmr.msra.gmra.mxu3 %v5367_v47  ;;  %v9041_v47 = vor.u32 %v9787_v54, %v9038_v5 }
 0x981   :  { %6018 = vmatpush.bf16.msrb.mxu1 %v9041_v47  ;;  %v9028_v47 = vld [vmem:[%s16520_s3 + $0xa8] sm:$0xf] }
 0x982   :  { %v5357_v15 = vld [vmem:[#allocation1] sm:$0xff] }
 0x983   :  { %v15328_v24 = vadd.f32 %v5357_v15, %v14939_v46 }
 0x9fb   :  { %v5569_v33 = vpop.f32.mrf.mxu0  ;;  %v5582_v55 = vpop.f32.mrf.mxu1 }
 0x9fc   :  { %v5616_v2 = vrot.slane %v5582_v55, 7 }
 0x9fe   :  { %v5619_v10 = vsel %vm286_vm0, %v5569_v33, %v5616_v2  ;;  %v5622_v1 = vsel %vm292_vm1, %v5569_v33, %v5616_v2  ;;  %v9045_v33 = vor.u32 %v9790_v49, %v9044_v50 }
 0xa00   :  { %6031 = vmatpush.bf16.msrb.mxu2 %v9045_v33 }
 0xa02   :  { %v5595_v20 = vpop.f32.mrf.mxu2  ;;  %v5608_v21 = vpop.f32.mrf.mxu3 }
 0xa03   :  { %v5617_v7 = vrot.slane %v5595_v20, 6  ;;  %v5618_v34 = vrot.slane %v5608_v21, 5  ;;  %v5571_v52 = vpop.f32.mrf.mxu0  ;;  %v5584_v40 = vpop.f32.mrf.mxu1 }
 0xa04   :  { %v5761_v40 = vrot.slane %v15328_v24, 1 }
 0xa05   :  { %v5620_v16 = vsel %vm288_vm2, %v5617_v7, %v5618_v34  ;;  %v5623_v18 = vsel %vm294_vm4, %v5617_v7, %v5618_v34 }
 0xa06   :  { %v5621_v35 = vsel %vm16719_vm3, %v5619_v10, %v5620_v16  ;;  %v5624_v32 = vsel %vm16720_vm15, %v5622_v1, %v5623_v18 }
 0xa07   :  { %v5625_v26 = vrot.slane %v5624_v32, 1  ;;  %v15269_v11 = vadd.f32 %v8799_v31, %v5621_v35 }
 0xa09   :  { %v15271_v0 = vadd.f32 %v8800_v37, %v5625_v26  ;;  %v8929_v4 = vmul.f32 -1.442695, %v15269_v11  ;;  %v5670_v19 = vrot.slane %v15269_v11, 1  ;;  %v5718_v8 = vrot.slane %v15269_v11, 3 }
 0xa0a   :  { %v5597_v17 = vpop.f32.mrf.mxu2  ;;  %v5610_v61 = vpop.f32.mrf.mxu3  ;;  %v5712_v3 = vrot.slane %v15269_v11, 2 }
 0xa0b   :  { %10243 = vpow2.f32 %v8929_v4  ;;  %v8930_v62 = vmul.f32 -1.442695, %v15271_v0  ;;  %v5671_v45 = vrot.slane %v15271_v0, 1  ;;  %v8931_v23 = vmul.f32 -1.442695, %v5670_v19 }
 0xa0c   :  { %v5719_v44 = vrot.slane %v15271_v0, 3  ;;  %v8933_v12 = vmul.f32 -1.442695, %v5718_v8  ;;  %v5713_v55 = vrot.slane %v15271_v0, 2  ;;  %v9012_v17 = vld [vmem:[%s16520_s3 + $0x88] sm:$0xf] }
 0xa0d   :  { %10245 = vpow2.f32 %v8930_v62  ;;  %v8932_v51 = vmul.f32 -1.442695, %v5671_v45 }
 0xa0e   :  { %10247 = vpow2.f32 %v8931_v23  ;;  %v8934_v58 = vmul.f32 -1.442695, %v5719_v44  ;;  %v9788_v44 = vld [vmem:[%s16520_s3 + $0xcc] sm:$0xf] }
 0xa0f   :  { %10249 = vpow2.f32 %v8932_v51  ;;  %v9046_v51 = vld [vmem:[%s16520_s3 + $0xd8] sm:$0xf0] }
 0xa10   :  { %10251 = vpow2.f32 %v8933_v12  ;;  %v9049_v56 = vor.u32 %v9788_v44, %v9046_v51  ;;  %v9780_v51 = vld [vmem:[%s16520_s3 + $0x8c] sm:$0xf] }
 0xa11   :  { %v10244_v41 = vpop.eup %10243  ;;  %10253 = vpow2.f32 %v8934_v58 }
 0xa12   :  { %v15303_v28 = vadd.f32 1.0, %v10244_v41  ;;  %6044 = vmatpush.bf16.msrb.mxu3 %v9049_v56  ;;  %v9778_v56 = vld [vmem:[%s16520_s3 + $0x74] sm:$0xf0] }
 0xa13   :  { %v10246_v25 = vpop.eup %10245 }
 0xa14   :  { %v10248_v63 = vpop.eup %10247  ;;  %v15320_v42 = vadd.f32 1.0, %v10246_v25  ;;  %10255 = vrcp.f32 %v15303_v28  ;;  %v5647_v20 = vand.u32 2147483647, %v15303_v28  ;;  %v5649_v7 = vand.u32 2147483648, %v15303_v28 }
 0xa15   :  { %v10250_v9 = vpop.eup %10249  ;;  %v15330_v22 = vadd.f32 1.0, %v10248_v63  ;;  %vm5643_vm8 = vweird.f32 %v15303_v28 }
 0xa16   :  { %10257 = vrcp.f32 %v15320_v42  ;;  %v10252_v2 = vpop.eup %10251  ;;  %v15335_v21 = vadd.f32 1.0, %v10250_v9  ;;  %v5662_v34 = vand.u32 2147483647, %v15320_v42  ;;  %v5664_v52 = vand.u32 2147483648, %v15320_v42  ;;  %v9022_v9 = vld [vmem:[%s16520_s3 + $0xb0] sm:$0xf0] }
 0xa17   :  { %10259 = vrcp.f32 %v15330_v22  ;;  %v10254_v46 = vpop.eup %10253  ;;  %v5691_v10 = vand.u32 2147483647, %v15330_v22  ;;  %v15345_v1 = vadd.f32 1.0, %v10252_v2  ;;  %vm15348_vm9 = vcmp.eq.f32.partialorder %v5647_v20, 8.507059e+37  ;;  %v9786_v20 = vld [vmem:[%s16520_s3 + $0xb4] sm:$0xf0] }
 0xa18   :  { %10261 = vtanh.f32 %v5712_v3  ;;  %vm5658_vm10 = vweird.f32 %v15320_v42  ;;  %v5693_v37 = vand.u32 2147483648, %v15330_v22  ;;  %v15354_v35 = vadd.f32 1.0, %v10254_v46  ;;  %v9784_v46 = vld [vmem:[%s16520_s3 + $0xac] sm:$0xf] }
 0xa19   :  { %10263 = vrcp.f32 %v15335_v21  ;;  %v5650_v26 = vor.u32 1.1754944e-38, %v5649_v7  ;;  %v5706_v11 = vand.u32 2147483647, %v15335_v21  ;;  %v5708_v0 = vand.u32 2147483648, %v15335_v21 }
 0xa1a   :  { %v10256_v31 = vpop.eup %10255  ;;  %10265 = vtanh.f32 %v5713_v55  ;;  %vm15365_vm11 = vcmp.eq.f32.partialorder %v5662_v34, 8.507059e+37  ;;  %v5665_v61 = vor.u32 1.1754944e-38, %v5664_v52  ;;  %vm5687_vm12 = vweird.f32 %v15330_v22 }
 0xa1b   :  { %v5639_v16 = vmul.f32 %v10256_v31, %v15303_v28  ;;  %10267 = vrcp.f32 %v15345_v1  ;;  %vm15372_vm14 = vcmp.eq.f32.partialorder %v5691_v10, 8.507059e+37  ;;  %vm5702_vm5 = vweird.f32 %v15335_v21  ;;  %v9783_v28 = vld [vmem:[%s16520_s3 + $0xa4] sm:$0xf]  ;;  %v9004_v10 = vld [vmem:[%s16520_s3 + $0x80] sm:$0xf] }
 0xa1c   :  { %v15356_v32 = vpop.eup %10257  ;;  %10269 = vrcp.f32 %v15354_v35  ;;  %vm5644_vm6 = vweird.f32 %v10256_v31  ;;  %v5694_v43 = vor.u32 1.1754944e-38, %v5693_v37  ;;  %vm15394_vm7 = vcmp.eq.f32.partialorder %v5706_v11, 8.507059e+37  ;;  %v9779_v11 = vld [vmem:[%s16520_s3 + $0x84] sm:$0xf] }
 0xa1d   :  { %v15361_v4 = vpop.eup %10259  ;;  %v5640_v19 = vsub.f32 1.0, %v5639_v16  ;;  %v5654_v8 = vmul.f32 %v15356_v32, %v15320_v42  ;;  %v5709_v39 = vor.u32 1.1754944e-38, %v5708_v0  ;;  %vm5659_vm13 = vweird.f32 %v15356_v32  ;;  %vm5645_vm3 = vmor %vm5643_vm8, %vm5644_vm6 }
 0xa1e   :  { %v10262_v62 = vpop.eup %10261  ;;  %v5683_v45 = vmul.f32 %v15361_v4, %v15330_v22  ;;  %vm5688_vm15 = vweird.f32 %v15361_v4  ;;  %v5739_v5 = vand.u32 2147483647, %v15345_v1  ;;  %vm5660_vm8 = vmor %vm5658_vm10, %vm5659_vm13  ;;  %v5741_v55 = vand.u32 2147483648, %v15345_v1 }
 0xa1f   :  { %v15384_v12 = vpop.eup %10263  ;;  %v5641_v58 = vmul.f32 %v10256_v31, %v5640_v19  ;;  %v5655_v38 = vsub.f32 1.0, %v5654_v8  ;;  %v5754_v52 = vand.u32 2147483647, %v15354_v35  ;;  %v9025_v19 = vor.u32 %v9783_v28, %v9022_v9  ;;  %v9773_v28 = vld [vmem:[%s16520_s3 + $0x4c] sm:$0xf0] }
 0xa20   :  { %v10266_v14 = vpop.eup %10265  ;;  %v5684_v60 = vsub.f32 1.0, %v5683_v45  ;;  %v5698_v57 = vmul.f32 %v15384_v12, %v15335_v21  ;;  %vm5703_vm6 = vweird.f32 %v15384_v12  ;;  %v9029_v8 = vor.u32 %v9786_v20, %v9028_v47  ;;  %v9006_v21 = vld [vmem:[%s16520_s3 + $0x90] sm:$0xf0]  ;;  %v9771_v9 = vld [vmem:[%s16520_s3 + $0x44] sm:$0xf] }
 0xa21   :  { %v5642_v29 = vadd.f32 %v10256_v31, %v5641_v58  ;;  %v5656_v41 = vmul.f32 %v15356_v32, %v5655_v38  ;;  %v15400_v59 = vpop.eup %10267  ;;  %vm5704_vm10 = vmor %vm5702_vm5, %vm5703_vm6  ;;  %6019 = vmatpush.bf16.msrb.mxu1 %v9025_v19  ;;  %v8980_v20 = vld [vmem:[%s16520_s3 + $0x48] sm:$0xf]  ;;  %vm16736_vm6 = vcmask 1042433  }
 0xa22   :  { %v5685_v15 = vmul.f32 %v15361_v4, %v5684_v60  ;;  %v5699_v27 = vsub.f32 1.0, %v5698_v57  ;;  %v5731_v54 = vmul.f32 %v15400_v59, %v15345_v1  ;;  %v15414_v50 = vpop.eup %10269  ;;  %6032 = vmatpush.bf16.msrb.mxu2 %v9029_v8  ;;  %v9009_v60 = vor.u32 %v9779_v11, %v9006_v21  ;;  %v8958_v11 = vld [vmem:[%s16520_s3 + $0x30] sm:$0xf0] }
 0xa23   :  { %v5646_v25 = vsel %vm5645_vm3, %v10256_v31, %v5642_v29  ;;  %v5657_v53 = vadd.f32 %v15356_v32, %v5656_v41  ;;  %v5746_v2 = vmul.f32 %v15414_v50, %v15354_v35  ;;  %v9030_v31 = vld [vmem:[%s16520_s3 + $0xb8] sm:$0xf0]  ;;  %v8996_v29 = vld [vmem:[%s16520_s3 + $0x68] sm:$0xf]  ;;  %vm5740_vm3 = vcmp.eq.f32.partialorder %v5739_v5, 8.507059e+37 }
 0xa24   :  { %v5651_v63 = vsel %vm15348_vm9, %v5650_v26, %v5646_v25  ;;  %v5686_v3 = vadd.f32 %v15361_v4, %v5685_v15  ;;  %v5700_v49 = vmul.f32 %v15384_v12, %v5699_v27  ;;  %vm5689_vm9 = vmor %vm5687_vm12, %vm5688_vm15  ;;  %v5732_v42 = vsub.f32 1.0, %v5731_v54  ;;  %v9781_v26 = vld [vmem:[%s16520_s3 + $0x8c] sm:$0xf0]  ;;  %v9776_v15 = vld [vmem:[%s16520_s3 + $0x6c] sm:$0xf] }
 0xa25   :  { %v5661_v33 = vsel %vm5660_vm8, %v15356_v32, %v5657_v53  ;;  %v5747_v37 = vsub.f32 1.0, %v5746_v2  ;;  %v5765_v32 = vmul.f32 %v10262_v62, %v5651_v63  ;;  %v9033_v44 = vor.u32 %v9784_v46, %v9030_v31  ;;  %v8998_v27 = vld [vmem:[%s16520_s3 + $0x78] sm:$0xf0]  ;;  %v8972_v54 = vld [vmem:[%s16520_s3 + $0x40] sm:$0xf]  ;;  %6020 = vmatpush.bf16.msrb.mxu1 %v9009_v60 }
 0xa26   :  { %v5666_v7 = vsel %vm15365_vm11, %v5665_v61, %v5661_v33  ;;  %v5690_v22 = vsel %vm5689_vm9, %v15361_v4, %v5686_v3  ;;  %v5701_v34 = vadd.f32 %v15384_v12, %v5700_v49  ;;  %v5733_v18 = vmul.f32 %v15400_v59, %v5732_v42  ;;  %v9782_v61 = vld [vmem:[%s16520_s3 + $0x94] sm:$0xf0]  ;;  %v8974_v2 = vld [vmem:[%s16520_s3 + $0x50] sm:$0xf0]  ;;  %v8982_v31 = vld [vmem:[%s16520_s3 + $0x58] sm:$0xf0] }
 0xa27   :  { %v5695_v16 = vsel %vm15372_vm14, %v5694_v43, %v5690_v22  ;;  %v5748_v45 = vmul.f32 %v15414_v50, %v5747_v37  ;;  %v5766_v23 = vmul.f32 %v10266_v14, %v5666_v7  ;;  %v9005_v38 = vor.u32 %v9781_v26, %v9004_v10  ;;  %v9014_v43 = vld [vmem:[%s16520_s3 + $0x98] sm:$0xf0]  ;;  %6045 = vmatpush.bf16.msrb.mxu3 %v9033_v44  ;;  %v9774_v46 = vld [vmem:[%s16520_s3 + $0x54] sm:$0xf0]  ;;  %v8940_v44 = vld [vmem:[%s16520_s3] sm:$0xf] }
 0xa28   :  { %v5705_v0 = vsel %vm5704_vm10, %v15384_v12, %v5701_v34  ;;  %v5763_v4 = vmul.f32 %v5695_v16, %v15328_v24  ;;  %v5734_v14 = vadd.f32 %v15400_v59, %v5733_v18  ;;  %vm5736_vm11 = vweird.f32 %v15400_v59  ;;  %v9772_v34 = vld [vmem:[%s16520_s3 + $0x4c] sm:$0xf]  ;;  %v8956_v16 = vld [vmem:[%s16520_s3 + $0x20] sm:$0xf]  ;;  %v9769_v18 = vld [vmem:[%s16520_s3 + $0x2c] sm:$0xf0] }
 0xa29   :  { %v5710_v62 = vsel %vm15394_vm7, %v5709_v39, %v5705_v0  ;;  %v9013_v57 = vor.u32 %v9782_v61, %v9012_v17  ;;  %v8990_v39 = vld [vmem:[%s16520_s3 + $0x70] sm:$0xf0]  ;;  %vm5735_vm12 = vweird.f32 %v15345_v1  ;;  %6007 = vmatpush.bf16.msrb.mxu0 %v9005_v38  ;;  %v5749_v30 = vadd.f32 %v15414_v50, %v5748_v45  ;;  %v8964_v0 = vld [vmem:[%s16520_s3 + $0x28] sm:$0xf]  ;;  %v9768_v17 = vld [vmem:[%s16520_s3 + $0x2c] sm:$0xf] }
 0xa2a   :  { %v5764_v12 = vmul.f32 %v5761_v40, %v5710_v62  ;;  %v15488_v58 = vadd.f32 %v5765_v32, %v5763_v4  ;;  %vm5751_vm14 = vweird.f32 %v15414_v50  ;;  %v9017_v25 = vor.u32 %v9780_v51, %v9014_v43  ;;  %vm15533_vm5 = vmor %vm5735_vm12, %vm5736_vm11  ;;  %v9770_v4 = vld [vmem:[%s16520_s3 + $0x34] sm:$0xf0]  ;;  %v8966_v61 = vld [vmem:[%s16520_s3 + $0x38] sm:$0xf0] }
 0xa2b   :  { %v8989_v53 = vor.u32 %v9777_v6, %v8988_v48  ;;  %v5756_v3 = vand.u32 2147483648, %v15354_v35  ;;  %6033 = vmatpush.bf16.msrb.mxu2 %v9013_v57  ;;  %v8993_v49 = vor.u32 %v9775_v36, %v8990_v39  ;;  %v5738_v47 = vsel %vm15533_vm5, %v15400_v59, %v5734_v14  ;;  %v9765_v51 = vld [vmem:[%s16520_s3 + $0xc] sm:$0xf0]  ;;  %v9763_v43 = vld [vmem:[%s16520_s3 + $0x4] sm:$0xf] }
 0xa2c   :  { %v15511_v41 = vadd.f32 %v5766_v23, %v5764_v12  ;;  %10271 = vtanh.f32 %v15488_v58  ;;  %vm5750_vm7 = vweird.f32 %v15354_v35  ;;  %6046 = vmatpush.bf16.msrb.mxu3 %v9017_v25  ;;  %v8997_v33 = vor.u32 %v9778_v56, %v8996_v29  ;;  %v9767_v35 = vld [vmem:[%s16520_s3 + $0x24] sm:$0xf]  ;;  %v8942_v48 = vld [vmem:[%s16520_s3 + $0x10] sm:$0xf0]  ;;  %v8948_v57 = vld [vmem:[%s16520_s3 + $0x8] sm:$0xf] }
 0xa2d   :  { %v9001_v42 = vor.u32 %v9776_v15, %v8998_v27  ;;  %v5742_v59 = vor.u32 1.1754944e-38, %v5741_v55  ;;  %vm15559_vm13 = vmor %vm5750_vm7, %vm5751_vm14  ;;  %6008 = vmatpush.bf16.msrb.mxu0 %v8989_v53  ;;  %v8973_v22 = vor.u32 %v9773_v28, %v8972_v54  ;;  %vm15576_vm15 = vcmp.eq.f32.partialorder %v5754_v52, 8.507059e+37  ;;  %6021 = vmatpush.bf16.msrb.mxu1 %v8993_v49  ;;  %v9766_v36 = vld [vmem:[%s16520_s3 + $0x14] sm:$0xf0]  ;;  %v9764_v29 = vld [vmem:[%s16520_s3 + $0xc] sm:$0xf] }
 0xa2e   :  { %10273 = vtanh.f32 %v15511_v41  ;;  %v5753_v55 = vsel %vm15559_vm13, %v15414_v50, %v5749_v30  ;;  %v5757_v37 = vor.u32 1.1754944e-38, %v5756_v3  ;;  %v8977_v50 = vor.u32 %v9771_v9, %v8974_v2  ;;  %v8950_v56 = vld [vmem:[%s16520_s3 + $0x18] sm:$0xf0] }
 0xa2f   :  { %v5743_v5 = vsel %vm5740_vm3, %v5742_v59, %v5738_v47  ;;  %6034 = vmatpush.bf16.msrb.mxu2 %v8997_v33  ;;  %v8981_v32 = vor.u32 %v9774_v46, %v8980_v20  ;;  %v8985_v26 = vor.u32 %v9772_v34, %v8982_v31  ;;  %v8957_v21 = vor.u32 %v9769_v18, %v8956_v16  ;;  %v8936_v46 = vld [vmem:[%s16523_s0 + $0x25] ss:$8 sm:$0xf] }
 0xa30   :  { %6047 = vmatpush.bf16.msrb.mxu3 %v9001_v42  ;;  %v5758_v8 = vsel %vm15576_vm15, %v5757_v37, %v5753_v55  ;;  %v5777_v62 = vrot.slane %v15249_v13, 1  ;;  %v8961_v12 = vor.u32 %v9767_v35, %v8958_v11  ;;  %v8965_v38 = vor.u32 %v9770_v4, %v8964_v0  ;;  %v8937_v31 = vld [vmem:[%s16523_s0 + $0x65] ss:$8 sm:$0xf] }
 0xa31   :  { %6009 = vmatpush.bf16.msrb.mxu0 %v8973_v22  ;;  %6022 = vmatpush.bf16.msrb.mxu1 %v8977_v50  ;;  %v8969_v60 = vor.u32 %v9768_v17, %v8966_v61  ;;  %v8941_v39 = vor.u32 %v9765_v51, %v8940_v44  ;;  %v8945_v27 = vor.u32 %v9763_v43, %v8942_v48  ;;  %vm16735_vm8 = vcmask 1041408   ;;  %v9825_v17 = vld [vmem:[%s16520_s3 + $0xec] sm:$0xf0]  ;;  %v9826_v51 = vld [vmem:[%s16520_s3 + $0xf4] sm:$0xf0] }
 0xa32   :  { %v10272_v1 = vpop.eup %10271  ;;  %v8949_v30 = vor.u32 %v9766_v36, %v8948_v57  ;;  %v8953_v25 = vor.u32 %v9764_v29, %v8950_v56  ;;  %v5792_v53 = vsub.f32 %v15488_v58, %v15328_v24  ;;  %v5793_v54 = vsub.f32 %v15511_v41, %v5761_v40  ;;  %v9173_v57 = vld [vmem:[%s16520_s3 + $0xc0] sm:$0xf]  ;;  %v9821_v36 = vld [vmem:[%s16520_s3 + $0xcc] sm:$0xf0]  ;;  %v9819_v56 = vld [vmem:[%s16520_s3 + $0xc4] sm:$0xf] }
 0xa33   :  { %v5771_v52 = vmul.f32 %v10272_v1, %v5743_v5  ;;  %6035 = vmatpush.bf16.msrb.mxu2 %v8981_v32  ;;  %v9174_v29 = vor.u32 %v9821_v36, %v9173_v57 }
 0xa34   :  { %v10274_v19 = vpop.eup %10273  ;;  %6048 = vmatpush.bf16.msrb.mxu3 %v8985_v26  ;;  %v5794_v28 = vmul.f32 0.0, %v5792_v53  ;;  %v5795_v63 = vmul.f32 0.0, %v5793_v54  ;;  %v9822_v54 = vld [vmem:[%s16520_s3 + $0xd4] sm:$0xf0] }
 0xa35   :  { %v5772_v45 = vmul.f32 %v10274_v19, %v5758_v8  ;;  %v5779_v23 = vsub.f32 %v5771_v52, %v15249_v13  ;;  %6010 = vmatpush.bf16.msrb.mxu0 %v8957_v21  ;;  %6023 = vmatpush.bf16.msrb.mxu1 %v8961_v12  ;;  %v9189_v21 = vld [vmem:[%s16520_s3 + $0xe0] sm:$0xf]  ;;  %v9824_v12 = vld [vmem:[%s16520_s3 + $0xec] sm:$0xf] }
 0xa36   :  { %v9190_v61 = vor.u32 %v9825_v17, %v9189_v21 }
 0xa37   :  { %v5780_v6 = vsub.f32 %v5772_v45, %v5777_v62  ;;  %v5782_v14 = vmul.f32 0.0, %v5779_v23  ;;  %6036 = vmatpush.bf16.msrb.mxu2 %v8965_v38  ;;  %v9823_v62 = vld [vmem:[%s16520_s3 + $0xe4] sm:$0xf]  ;;  %v9191_v45 = vld [vmem:[%s16520_s3 + $0xf0] sm:$0xf0] }
 0xa38   :  { %6049 = vmatpush.bf16.msrb.mxu3 %v8969_v60  ;;  %v9197_v23 = vld [vmem:[%s16520_s3 + $0xe8] sm:$0xf]  ;;  %v9194_v44 = vor.u32 %v9823_v62, %v9191_v45  ;;  %v9199_v38 = vld [vmem:[%s16520_s3 + $0xf8] sm:$0xf0]  ;;  %v9817_v62 = vld [vmem:[%s16520_s3 + $0xac] sm:$0xf0] }
 0xa39   :  { %v5783_v15 = vmul.f32 0.0, %v5780_v6  ;;  %5786 = vst [vmem:[#allocation1] ss:$9 sm:$0xff] %v5782_v14  ;;  %6011 = vmatpush.bf16.msrb.mxu0 %v8941_v39  ;;  %6024 = vmatpush.bf16.msrb.mxu1 %v8945_v27  ;;  %v9198_v48 = vor.u32 %v9826_v51, %v9197_v23  ;;  %v9202_v6 = vor.u32 %v9824_v12, %v9199_v38  ;;  %v9181_v27 = vld [vmem:[%s16520_s3 + $0xc8] sm:$0xf] }
 0xa3a   :  { %v9807_v51 = vld [vmem:[%s16520_s3 + $0x64] sm:$0xf] }
 0xa3b   :  { %5788 = vst [vmem:[#allocation1 + $0x1] ss:$9 sm:$0xff] %v5783_v15  ;;  %6037 = vmatpush.bf16.msrb.mxu2 %v8949_v30  ;;  %v9175_v15 = vld [vmem:[%s16520_s3 + $0xd0] sm:$0xf0] }
 0xa3c   :  { %6050 = vmatpush.bf16.msrb.mxu3 %v8953_v25 }
 0xa3d   :  { %6448 = vmatpush.bf16.msra.mxu0 %v9190_v61  ;;  %6461 = vmatpush.bf16.msra.mxu1 %v9194_v44  ;;  %v9157_v61 = vld [vmem:[%s16520_s3 + $0xa0] sm:$0xf] }
 0xa3e   :  { %v9158_v36 = vor.u32 %v9817_v62, %v9157_v61  ;;  %v9125_v61 = vld [vmem:[%s16520_s3 + $0x60] sm:$0xf]  ;;  %v9809_v62 = vld [vmem:[%s16520_s3 + $0x6c] sm:$0xf0] }
 0xa3f   :  { %6474 = vmatpush.bf16.msra.mxu2 %v9198_v48 }
 0xa40   :  { %6487 = vmatpush.bf16.msra.mxu3 %v9202_v6 }
 0xa41   :  { %6449 = vmatpush.bf16.msra.mxu0 %v9174_v29 }
 0xa42   :  { %v5789_v3 = vld [vmem:[#allocation1] sm:$0xff] }
 0xa43   :  { %v15638_v49 = vadd.f32 %v5789_v3, %v15249_v13  ;;  %5798 = vst [vmem:[#allocation1] ss:$9 sm:$0xff] %v5794_v28 }
 0xa44   :  { %5800 = vst [vmem:[#allocation1 + $0x1] ss:$9 sm:$0xff] %v5795_v63 }
 0xa45   :  { %8935 = vst [vmem:[%s16524_s4 + $0x18] sm:$0x3] %v15638_v49  ;;  %v5811_v58 = vpack.c.bf16 %v15638_v49, %v15638_v49  ;;  %6450 = vmatpush.bf16.msra.mxu0 %v9158_v36 }
 0xa47   :  { %6012 = vmatmul.bf16.vlgmr.msrb.gmra.mxu0 %v5811_v58  ;;  %6025 = vmatmul.bf16.vlgmr.msrb.gmra.mxu1 %v5811_v58 }
 0xa48   :  { %6038 = vmatmul.bf16.vlgmr.msrb.gmra.mxu2 %v5811_v58  ;;  %6051 = vmatmul.bf16.vlgmr.msrb.gmra.mxu3 %v5811_v58  ;;  %v9178_v58 = vor.u32 %v9819_v56, %v9175_v15 }
 0xa4a   :  { %6462 = vmatpush.bf16.msra.mxu1 %v9178_v58  ;;  %v9165_v58 = vld [vmem:[%s16520_s3 + $0xa8] sm:$0xf] }
 0xa4b   :  { %v5801_v14 = vld [vmem:[#allocation1] sm:$0xff] }
 0xa4c   :  { %v15717_v63 = vadd.f32 %v5801_v14, %v15328_v24 }
 0xac4   :  { %v6013_v40 = vpop.f32.mrf.mxu0  ;;  %v6026_v41 = vpop.f32.mrf.mxu1 }
 0xac5   :  { %v6060_v9 = vrot.slane %v6026_v41, 7 }
 0xac7   :  { %v6063_v59 = vsel %vm286_vm0, %v6013_v40, %v6060_v9  ;;  %v6066_v7 = vsel %vm292_vm1, %v6013_v40, %v6060_v9  ;;  %v9182_v40 = vor.u32 %v9822_v54, %v9181_v27 }
 0xac9   :  { %6475 = vmatpush.bf16.msra.mxu2 %v9182_v40 }
 0xacb   :  { %v6039_v47 = vpop.f32.mrf.mxu2  ;;  %v6052_v13 = vpop.f32.mrf.mxu3 }
 0xacc   :  { %v6061_v33 = vrot.slane %v6039_v47, 6  ;;  %v6062_v42 = vrot.slane %v6052_v13, 5  ;;  %v6015_v2 = vpop.f32.mrf.mxu0  ;;  %v6028_v20 = vpop.f32.mrf.mxu1 }
 0xacd   :  { %v6205_v20 = vrot.slane %v15717_v63, 1 }
 0xace   :  { %v6064_v22 = vsel %vm288_vm2, %v6061_v33, %v6062_v42  ;;  %v6067_v34 = vsel %vm294_vm4, %v6061_v33, %v6062_v42 }
 0xacf   :  { %v6065_v55 = vsel %vm16735_vm8, %v6063_v59, %v6064_v22  ;;  %v6068_v10 = vsel %vm16736_vm6, %v6066_v7, %v6067_v34 }
 0xad0   :  { %v6069_v16 = vrot.slane %v6068_v10, 1  ;;  %v15658_v18 = vadd.f32 %v8936_v46, %v6065_v55 }
 0xad2   :  { %v15660_v1 = vadd.f32 %v8937_v31, %v6069_v16  ;;  %v9066_v5 = vmul.f32 -1.442695, %v15658_v18  ;;  %v6114_v37 = vrot.slane %v15658_v18, 1  ;;  %v6162_v50 = vrot.slane %v15658_v18, 3 }
 0xad3   :  { %v6041_v32 = vpop.f32.mrf.mxu2  ;;  %v6054_v35 = vpop.f32.mrf.mxu3  ;;  %v6156_v53 = vrot.slane %v15658_v18, 2 }
 0xad4   :  { %10275 = vpow2.f32 %v9066_v5  ;;  %v9067_v52 = vmul.f32 -1.442695, %v15660_v1  ;;  %v6115_v26 = vrot.slane %v15660_v1, 1  ;;  %v9068_v11 = vmul.f32 -1.442695, %v6114_v37 }
 0xad5   :  { %v6163_v0 = vrot.slane %v15660_v1, 3  ;;  %v9070_v19 = vmul.f32 -1.442695, %v6162_v50  ;;  %v6157_v41 = vrot.slane %v15660_v1, 2  ;;  %v9149_v32 = vld [vmem:[%s16520_s3 + $0x88] sm:$0xf] }
 0xad6   :  { %10277 = vpow2.f32 %v9067_v52  ;;  %v9069_v4 = vmul.f32 -1.442695, %v6115_v26 }
 0xad7   :  { %10279 = vpow2.f32 %v9068_v11  ;;  %v9071_v8 = vmul.f32 -1.442695, %v6163_v0  ;;  %v9820_v0 = vld [vmem:[%s16520_s3 + $0xcc] sm:$0xf] }
 0xad8   :  { %10281 = vpow2.f32 %v9069_v4  ;;  %v9183_v4 = vld [vmem:[%s16520_s3 + $0xd8] sm:$0xf0] }
 0xad9   :  { %10283 = vpow2.f32 %v9070_v19  ;;  %v9186_v48 = vor.u32 %v9820_v0, %v9183_v4  ;;  %v9812_v4 = vld [vmem:[%s16520_s3 + $0x8c] sm:$0xf] }
 0xada   :  { %v10276_v43 = vpop.eup %10275  ;;  %10285 = vpow2.f32 %v9071_v8 }
 0xadb   :  { %v15692_v60 = vadd.f32 1.0, %v10276_v43  ;;  %6488 = vmatpush.bf16.msra.mxu3 %v9186_v48  ;;  %v9810_v48 = vld [vmem:[%s16520_s3 + $0x74] sm:$0xf0] }
 0xadc   :  { %v10278_v39 = vpop.eup %10277 }
 0xadd   :  { %v10280_v30 = vpop.eup %10279  ;;  %v15709_v25 = vadd.f32 1.0, %v10278_v39  ;;  %10287 = vrcp.f32 %v15692_v60  ;;  %v6091_v47 = vand.u32 2147483647, %v15692_v60  ;;  %v6093_v33 = vand.u32 2147483648, %v15692_v60 }
 0xade   :  { %v10282_v28 = vpop.eup %10281  ;;  %v15719_v3 = vadd.f32 1.0, %v10280_v30  ;;  %vm6087_vm9 = vweird.f32 %v15692_v60 }
 0xadf   :  { %10289 = vrcp.f32 %v15709_v25  ;;  %v10284_v9 = vpop.eup %10283  ;;  %v15724_v13 = vadd.f32 1.0, %v10282_v28  ;;  %v6106_v42 = vand.u32 2147483647, %v15709_v25  ;;  %v6108_v2 = vand.u32 2147483648, %v15709_v25  ;;  %v9159_v28 = vld [vmem:[%s16520_s3 + $0xb0] sm:$0xf0] }
 0xae0   :  { %10291 = vrcp.f32 %v15719_v3  ;;  %v10286_v24 = vpop.eup %10285  ;;  %v6135_v59 = vand.u32 2147483647, %v15719_v3  ;;  %v15734_v7 = vadd.f32 1.0, %v10284_v9  ;;  %vm15737_vm10 = vcmp.eq.f32.partialorder %v6091_v47, 8.507059e+37  ;;  %v9818_v47 = vld [vmem:[%s16520_s3 + $0xb4] sm:$0xf0] }
 0xae1   :  { %10293 = vtanh.f32 %v6156_v53  ;;  %vm6102_vm11 = vweird.f32 %v15709_v25  ;;  %v6137_v31 = vand.u32 2147483648, %v15719_v3  ;;  %v15743_v55 = vadd.f32 1.0, %v10286_v24  ;;  %v9816_v24 = vld [vmem:[%s16520_s3 + $0xac] sm:$0xf] }
 0xae2   :  { %10295 = vrcp.f32 %v15724_v13  ;;  %v6094_v16 = vor.u32 1.1754944e-38, %v6093_v33  ;;  %v6150_v18 = vand.u32 2147483647, %v15724_v13  ;;  %v6152_v1 = vand.u32 2147483648, %v15724_v13 }
 0xae3   :  { %v10288_v46 = vpop.eup %10287  ;;  %10297 = vtanh.f32 %v6157_v41  ;;  %vm15754_vm12 = vcmp.eq.f32.partialorder %v6106_v42, 8.507059e+37  ;;  %v6109_v35 = vor.u32 1.1754944e-38, %v6108_v2  ;;  %vm6131_vm14 = vweird.f32 %v15719_v3 }
 0xae4   :  { %v6083_v22 = vmul.f32 %v10288_v46, %v15692_v60  ;;  %10299 = vrcp.f32 %v15734_v7  ;;  %vm15761_vm5 = vcmp.eq.f32.partialorder %v6135_v59, 8.507059e+37  ;;  %vm6146_vm7 = vweird.f32 %v15724_v13  ;;  %v9815_v60 = vld [vmem:[%s16520_s3 + $0xa4] sm:$0xf]  ;;  %v9141_v59 = vld [vmem:[%s16520_s3 + $0x80] sm:$0xf] }
 0xae5   :  { %v15745_v10 = vpop.eup %10289  ;;  %10301 = vrcp.f32 %v15743_v55  ;;  %vm6088_vm13 = vweird.f32 %v10288_v46  ;;  %v6138_v17 = vor.u32 1.1754944e-38, %v6137_v31  ;;  %vm15783_vm3 = vcmp.eq.f32.partialorder %v6150_v18, 8.507059e+37  ;;  %v9811_v18 = vld [vmem:[%s16520_s3 + $0x84] sm:$0xf] }
 0xae6   :  { %v15750_v5 = vpop.eup %10291  ;;  %v6084_v37 = vsub.f32 1.0, %v6083_v22  ;;  %v6098_v50 = vmul.f32 %v15745_v10, %v15709_v25  ;;  %v6153_v12 = vor.u32 1.1754944e-38, %v6152_v1  ;;  %vm6103_vm15 = vweird.f32 %v15745_v10  ;;  %vm6089_vm8 = vmor %vm6087_vm9, %vm6088_vm13 }
 0xae7   :  { %v10294_v52 = vpop.eup %10293  ;;  %v6127_v26 = vmul.f32 %v15750_v5, %v15719_v3  ;;  %vm6132_vm6 = vweird.f32 %v15750_v5  ;;  %v6183_v15 = vand.u32 2147483647, %v15734_v7  ;;  %vm6104_vm9 = vmor %vm6102_vm11, %vm6103_vm15  ;;  %v6185_v41 = vand.u32 2147483648, %v15734_v7 }
 0xae8   :  { %v15773_v19 = vpop.eup %10295  ;;  %v6085_v8 = vmul.f32 %v10288_v46, %v6084_v37  ;;  %v6099_v21 = vsub.f32 1.0, %v6098_v50  ;;  %v6198_v2 = vand.u32 2147483647, %v15743_v55  ;;  %v9162_v37 = vor.u32 %v9815_v60, %v9159_v28  ;;  %v9805_v60 = vld [vmem:[%s16520_s3 + $0x4c] sm:$0xf0] }
 0xae9   :  { %v10298_v45 = vpop.eup %10297  ;;  %v6128_v23 = vsub.f32 1.0, %v6127_v26  ;;  %v6142_v44 = vmul.f32 %v15773_v19, %v15724_v13  ;;  %vm6147_vm13 = vweird.f32 %v15773_v19  ;;  %v9166_v50 = vor.u32 %v9818_v47, %v9165_v58  ;;  %v9143_v13 = vld [vmem:[%s16520_s3 + $0x90] sm:$0xf0]  ;;  %v9803_v28 = vld [vmem:[%s16520_s3 + $0x44] sm:$0xf] }
 0xaea   :  { %v6086_v38 = vadd.f32 %v10288_v46, %v6085_v8  ;;  %v6100_v43 = vmul.f32 %v15745_v10, %v6099_v21  ;;  %v15789_v6 = vpop.eup %10299  ;;  %vm6148_vm11 = vmor %vm6146_vm7, %vm6147_vm13  ;;  %6463 = vmatpush.bf16.msra.mxu1 %v9162_v37  ;;  %v9117_v47 = vld [vmem:[%s16520_s3 + $0x48] sm:$0xf]  ;;  %vm16752_vm13 = vcmask 1042433  }
 0xaeb   :  { %v6129_v14 = vmul.f32 %v15750_v5, %v6128_v23  ;;  %v6143_v57 = vsub.f32 1.0, %v6142_v44  ;;  %v6175_v56 = vmul.f32 %v15789_v6, %v15734_v7  ;;  %v15803_v27 = vpop.eup %10301  ;;  %6476 = vmatpush.bf16.msra.mxu2 %v9166_v50  ;;  %v9146_v23 = vor.u32 %v9811_v18, %v9143_v13  ;;  %v9095_v18 = vld [vmem:[%s16520_s3 + $0x30] sm:$0xf0] }
 0xaec   :  { %v6090_v39 = vsel %vm6089_vm8, %v10288_v46, %v6086_v38  ;;  %v6101_v29 = vadd.f32 %v15745_v10, %v6100_v43  ;;  %v6190_v9 = vmul.f32 %v15803_v27, %v15743_v55  ;;  %v9167_v46 = vld [vmem:[%s16520_s3 + $0xb8] sm:$0xf0]  ;;  %v9133_v38 = vld [vmem:[%s16520_s3 + $0x68] sm:$0xf]  ;;  %vm6184_vm8 = vcmp.eq.f32.partialorder %v6183_v15, 8.507059e+37 }
 0xaed   :  { %v6095_v30 = vsel %vm15737_vm10, %v6094_v16, %v6090_v39  ;;  %v6130_v53 = vadd.f32 %v15750_v5, %v6129_v14  ;;  %v6144_v54 = vmul.f32 %v15773_v19, %v6143_v57  ;;  %vm6133_vm10 = vmor %vm6131_vm14, %vm6132_vm6  ;;  %v6176_v25 = vsub.f32 1.0, %v6175_v56  ;;  %v9813_v16 = vld [vmem:[%s16520_s3 + $0x8c] sm:$0xf0]  ;;  %v9808_v14 = vld [vmem:[%s16520_s3 + $0x6c] sm:$0xf] }
 0xaee   :  { %v6105_v40 = vsel %vm6104_vm9, %v15745_v10, %v6101_v29  ;;  %v6191_v31 = vsub.f32 1.0, %v6190_v9  ;;  %v6209_v10 = vmul.f32 %v10294_v52, %v6095_v30  ;;  %v9170_v0 = vor.u32 %v9816_v24, %v9167_v46  ;;  %v9135_v57 = vld [vmem:[%s16520_s3 + $0x78] sm:$0xf0]  ;;  %v9109_v56 = vld [vmem:[%s16520_s3 + $0x40] sm:$0xf]  ;;  %6464 = vmatpush.bf16.msra.mxu1 %v9146_v23 }
 0xaef   :  { %v6110_v33 = vsel %vm15754_vm12, %v6109_v35, %v6105_v40  ;;  %v6134_v3 = vsel %vm6133_vm10, %v15750_v5, %v6130_v53  ;;  %v6145_v42 = vadd.f32 %v15773_v19, %v6144_v54  ;;  %v6177_v34 = vmul.f32 %v15789_v6, %v6176_v25  ;;  %v9814_v35 = vld [vmem:[%s16520_s3 + $0x94] sm:$0xf0]  ;;  %v9111_v9 = vld [vmem:[%s16520_s3 + $0x50] sm:$0xf0]  ;;  %v9119_v46 = vld [vmem:[%s16520_s3 + $0x58] sm:$0xf0] }
 0xaf0   :  { %v6139_v22 = vsel %vm15761_vm5, %v6138_v17, %v6134_v3  ;;  %v6192_v26 = vmul.f32 %v15803_v27, %v6191_v31  ;;  %v6210_v11 = vmul.f32 %v10298_v45, %v6110_v33  ;;  %v9142_v21 = vor.u32 %v9813_v16, %v9141_v59  ;;  %v9151_v17 = vld [vmem:[%s16520_s3 + $0x98] sm:$0xf0]  ;;  %6489 = vmatpush.bf16.msra.mxu3 %v9170_v0  ;;  %v9806_v24 = vld [vmem:[%s16520_s3 + $0x54] sm:$0xf0]  ;;  %v9077_v0 = vld [vmem:[%s16520_s3] sm:$0xf] }
 0xaf1   :  { %v6149_v1 = vsel %vm6148_vm11, %v15773_v19, %v6145_v42  ;;  %v6207_v5 = vmul.f32 %v6139_v22, %v15717_v63  ;;  %v6178_v45 = vadd.f32 %v15789_v6, %v6177_v34  ;;  %vm6180_vm12 = vweird.f32 %v15789_v6  ;;  %v9804_v42 = vld [vmem:[%s16520_s3 + $0x4c] sm:$0xf]  ;;  %v9093_v22 = vld [vmem:[%s16520_s3 + $0x20] sm:$0xf]  ;;  %v9801_v34 = vld [vmem:[%s16520_s3 + $0x2c] sm:$0xf0] }
 0xaf2   :  { %v6154_v52 = vsel %vm15783_vm3, %v6153_v12, %v6149_v1  ;;  %v9150_v44 = vor.u32 %v9814_v35, %v9149_v32  ;;  %v9127_v12 = vld [vmem:[%s16520_s3 + $0x70] sm:$0xf0]  ;;  %vm6179_vm14 = vweird.f32 %v15734_v7  ;;  %6451 = vmatpush.bf16.msra.mxu0 %v9142_v21  ;;  %v6193_v36 = vadd.f32 %v15803_v27, %v6192_v26  ;;  %v9101_v1 = vld [vmem:[%s16520_s3 + $0x28] sm:$0xf]  ;;  %v9800_v32 = vld [vmem:[%s16520_s3 + $0x2c] sm:$0xf] }
 0xaf3   :  { %v6208_v19 = vmul.f32 %v6205_v20, %v6154_v52  ;;  %v15877_v8 = vadd.f32 %v6209_v10, %v6207_v5  ;;  %vm6195_vm5 = vweird.f32 %v15803_v27  ;;  %v9154_v39 = vor.u32 %v9812_v4, %v9151_v17  ;;  %vm15922_vm7 = vmor %vm6179_vm14, %vm6180_vm12  ;;  %v9802_v5 = vld [vmem:[%s16520_s3 + $0x34] sm:$0xf0]  ;;  %v9103_v35 = vld [vmem:[%s16520_s3 + $0x38] sm:$0xf0] }
 0xaf4   :  { %v9126_v29 = vor.u32 %v9809_v62, %v9125_v61  ;;  %v6200_v53 = vand.u32 2147483648, %v15743_v55  ;;  %6477 = vmatpush.bf16.msra.mxu2 %v9150_v44  ;;  %v9130_v54 = vor.u32 %v9807_v51, %v9127_v12  ;;  %v6182_v58 = vsel %vm15922_vm7, %v15789_v6, %v6178_v45  ;;  %v9797_v4 = vld [vmem:[%s16520_s3 + $0xc] sm:$0xf0]  ;;  %v9795_v17 = vld [vmem:[%s16520_s3 + $0x4] sm:$0xf] }
 0xaf5   :  { %v15900_v43 = vadd.f32 %v6210_v11, %v6208_v19  ;;  %10303 = vtanh.f32 %v15877_v8  ;;  %vm6194_vm3 = vweird.f32 %v15743_v55  ;;  %6490 = vmatpush.bf16.msra.mxu3 %v9154_v39  ;;  %v9134_v40 = vor.u32 %v9810_v48, %v9133_v38  ;;  %v9799_v55 = vld [vmem:[%s16520_s3 + $0x24] sm:$0xf]  ;;  %v9079_v61 = vld [vmem:[%s16520_s3 + $0x10] sm:$0xf0]  ;;  %v9085_v44 = vld [vmem:[%s16520_s3 + $0x8] sm:$0xf] }
 0xaf6   :  { %v9138_v25 = vor.u32 %v9808_v14, %v9135_v57  ;;  %v6186_v6 = vor.u32 1.1754944e-38, %v6185_v41  ;;  %vm15948_vm15 = vmor %vm6194_vm3, %vm6195_vm5  ;;  %6452 = vmatpush.bf16.msra.mxu0 %v9126_v29  ;;  %v9110_v3 = vor.u32 %v9805_v60, %v9109_v56  ;;  %vm15965_vm6 = vcmp.eq.f32.partialorder %v6198_v2, 8.507059e+37  ;;  %6465 = vmatpush.bf16.msra.mxu1 %v9130_v54  ;;  %v9798_v51 = vld [vmem:[%s16520_s3 + $0x14] sm:$0xf0]  ;;  %v9796_v38 = vld [vmem:[%s16520_s3 + $0xc] sm:$0xf] }
 0xaf7   :  { %10305 = vtanh.f32 %v15900_v43  ;;  %v6197_v41 = vsel %vm15948_vm15, %v15803_v27, %v6193_v36  ;;  %v6201_v31 = vor.u32 1.1754944e-38, %v6200_v53  ;;  %v9114_v27 = vor.u32 %v9803_v28, %v9111_v9  ;;  %v9087_v48 = vld [vmem:[%s16520_s3 + $0x18] sm:$0xf0] }
 0xaf8   :  { %v6187_v15 = vsel %vm6184_vm8, %v6186_v6, %v6182_v58  ;;  %6478 = vmatpush.bf16.msra.mxu2 %v9134_v40  ;;  %v9118_v10 = vor.u32 %v9806_v24, %v9117_v47  ;;  %v9122_v16 = vor.u32 %v9804_v42, %v9119_v46  ;;  %v9094_v13 = vor.u32 %v9801_v34, %v9093_v22  ;;  %v9073_v24 = vld [vmem:[%s16523_s0 + $0x26] ss:$8 sm:$0xf] }
 0xaf9   :  { %6491 = vmatpush.bf16.msra.mxu3 %v9138_v25  ;;  %v6202_v50 = vsel %vm15965_vm6, %v6201_v31, %v6197_v41  ;;  %v6221_v52 = vrot.slane %v15638_v49, 1  ;;  %v9098_v19 = vor.u32 %v9799_v55, %v9095_v18  ;;  %v9102_v21 = vor.u32 %v9802_v5, %v9101_v1  ;;  %v9074_v46 = vld [vmem:[%s16523_s0 + $0x66] ss:$8 sm:$0xf] }
 0xafa   :  { %6453 = vmatpush.bf16.msra.mxu0 %v9110_v3  ;;  %6466 = vmatpush.bf16.msra.mxu1 %v9114_v27  ;;  %v9106_v23 = vor.u32 %v9800_v32, %v9103_v35  ;;  %v9078_v12 = vor.u32 %v9797_v4, %v9077_v0  ;;  %v9082_v57 = vor.u32 %v9795_v17, %v9079_v61  ;;  %vm16751_vm9 = vcmask 1041408   ;;  %v9857_v32 = vld [vmem:[%s16520_s3 + $0xec] sm:$0xf0]  ;;  %v9858_v4 = vld [vmem:[%s16520_s3 + $0xf4] sm:$0xf0] }
 0xafb   :  { %v10304_v7 = vpop.eup %10303  ;;  %v9086_v36 = vor.u32 %v9798_v51, %v9085_v44  ;;  %v9090_v39 = vor.u32 %v9796_v38, %v9087_v48  ;;  %v6236_v29 = vsub.f32 %v15877_v8, %v15717_v63  ;;  %v6237_v56 = vsub.f32 %v15900_v43, %v6205_v20  ;;  %v9310_v44 = vld [vmem:[%s16520_s3 + $0xc0] sm:$0xf]  ;;  %v9853_v51 = vld [vmem:[%s16520_s3 + $0xcc] sm:$0xf0]  ;;  %v9851_v48 = vld [vmem:[%s16520_s3 + $0xc4] sm:$0xf] }
 0xafc   :  { %v6215_v2 = vmul.f32 %v10304_v7, %v6187_v15  ;;  %6479 = vmatpush.bf16.msra.mxu2 %v9118_v10  ;;  %v9311_v38 = vor.u32 %v9853_v51, %v9310_v44 }
 0xafd   :  { %v10306_v37 = vpop.eup %10305  ;;  %6492 = vmatpush.bf16.msra.mxu3 %v9122_v16  ;;  %v6238_v60 = vmul.f32 0.0, %v6236_v29  ;;  %v6239_v30 = vmul.f32 0.0, %v6237_v56  ;;  %v9854_v56 = vld [vmem:[%s16520_s3 + $0xd4] sm:$0xf0] }
 0xafe   :  { %v6216_v26 = vmul.f32 %v10306_v37, %v6202_v50  ;;  %v6223_v11 = vsub.f32 %v6215_v2, %v15638_v49  ;;  %6454 = vmatpush.bf16.msra.mxu0 %v9094_v13  ;;  %6467 = vmatpush.bf16.msra.mxu1 %v9098_v19  ;;  %v9326_v13 = vld [vmem:[%s16520_s3 + $0xe0] sm:$0xf]  ;;  %v9856_v19 = vld [vmem:[%s16520_s3 + $0xec] sm:$0xf] }
 0xaff   :  { %v9327_v35 = vor.u32 %v9857_v32, %v9326_v13 }
 0xb00   :  { %v6224_v62 = vsub.f32 %v6216_v26, %v6221_v52  ;;  %v6226_v45 = vmul.f32 0.0, %v6223_v11  ;;  %6480 = vmatpush.bf16.msra.mxu2 %v9102_v21  ;;  %v9855_v52 = vld [vmem:[%s16520_s3 + $0xe4] sm:$0xf]  ;;  %v9328_v26 = vld [vmem:[%s16520_s3 + $0xf0] sm:$0xf0] }
 0xb01   :  { %6493 = vmatpush.bf16.msra.mxu3 %v9106_v23  ;;  %v9334_v11 = vld [vmem:[%s16520_s3 + $0xe8] sm:$0xf]  ;;  %v9331_v0 = vor.u32 %v9855_v52, %v9328_v26  ;;  %v9336_v21 = vld [vmem:[%s16520_s3 + $0xf8] sm:$0xf0]  ;;  %v9849_v52 = vld [vmem:[%s16520_s3 + $0xac] sm:$0xf0] }
 0xb02   :  { %v6227_v14 = vmul.f32 0.0, %v6224_v62  ;;  %6230 = vst [vmem:[#allocation1] ss:$9 sm:$0xff] %v6226_v45  ;;  %6455 = vmatpush.bf16.msra.mxu0 %v9078_v12  ;;  %6468 = vmatpush.bf16.msra.mxu1 %v9082_v57  ;;  %v9335_v61 = vor.u32 %v9858_v4, %v9334_v11  ;;  %v9339_v62 = vor.u32 %v9856_v19, %v9336_v21  ;;  %v9318_v57 = vld [vmem:[%s16520_s3 + $0xc8] sm:$0xf] }
 0xb03   :  { %v9839_v4 = vld [vmem:[%s16520_s3 + $0x64] sm:$0xf] }
 0xb04   :  { %6232 = vst [vmem:[#allocation1 + $0x1] ss:$9 sm:$0xff] %v6227_v14  ;;  %6481 = vmatpush.bf16.msra.mxu2 %v9086_v36  ;;  %v9312_v14 = vld [vmem:[%s16520_s3 + $0xd0] sm:$0xf0] }
 0xb05   :  { %6494 = vmatpush.bf16.msra.mxu3 %v9090_v39 }
 0xb06   :  { %6892 = vmatpush.bf16.msrb.mxu0 %v9327_v35  ;;  %6905 = vmatpush.bf16.msrb.mxu1 %v9331_v0  ;;  %v9294_v35 = vld [vmem:[%s16520_s3 + $0xa0] sm:$0xf] }
 0xb07   :  { %v9295_v51 = vor.u32 %v9849_v52, %v9294_v35  ;;  %v9262_v35 = vld [vmem:[%s16520_s3 + $0x60] sm:$0xf]  ;;  %v9841_v52 = vld [vmem:[%s16520_s3 + $0x6c] sm:$0xf0] }
 0xb08   :  { %6918 = vmatpush.bf16.msrb.mxu2 %v9335_v61 }
 0xb09   :  { %6931 = vmatpush.bf16.msrb.mxu3 %v9339_v62 }
 0xb0a   :  { %6893 = vmatpush.bf16.msrb.mxu0 %v9311_v38 }
 0xb0b   :  { %v6233_v53 = vld [vmem:[#allocation1] sm:$0xff] }
 0xb0c   :  { %v16027_v54 = vadd.f32 %v6233_v53, %v15638_v49  ;;  %6242 = vst [vmem:[#allocation1] ss:$9 sm:$0xff] %v6238_v60 }
 0xb0d   :  { %6244 = vst [vmem:[#allocation1 + $0x1] ss:$9 sm:$0xff] %v6239_v30 }
 0xb0e   :  { %9072 = vst [vmem:[%s16524_s4 + $0x1a] sm:$0x3] %v16027_v54  ;;  %v6255_v8 = vpack.c.bf16 %v16027_v54, %v16027_v54  ;;  %6894 = vmatpush.bf16.msrb.mxu0 %v9295_v51 }
 0xb10   :  { %6456 = vmatmul.bf16.vlgmr.msra.gmra.mxu0 %v6255_v8  ;;  %6469 = vmatmul.bf16.vlgmr.msra.gmra.mxu1 %v6255_v8 }
 0xb11   :  { %6482 = vmatmul.bf16.vlgmr.msra.gmra.mxu2 %v6255_v8  ;;  %6495 = vmatmul.bf16.vlgmr.msra.gmra.mxu3 %v6255_v8  ;;  %v9315_v8 = vor.u32 %v9851_v48, %v9312_v14 }
 0xb13   :  { %6906 = vmatpush.bf16.msrb.mxu1 %v9315_v8  ;;  %v9302_v8 = vld [vmem:[%s16520_s3 + $0xa8] sm:$0xf] }
 0xb14   :  { %v6245_v45 = vld [vmem:[#allocation1] sm:$0xff] }
 0xb15   :  { %v16106_v30 = vadd.f32 %v6245_v45, %v15717_v63 }
 0xb8d   :  { %v6457_v20 = vpop.f32.mrf.mxu0  ;;  %v6470_v43 = vpop.f32.mrf.mxu1 }
 0xb8e   :  { %v6504_v28 = vrot.slane %v6470_v43, 7 }
 0xb90   :  { %v6507_v6 = vsel %vm286_vm0, %v6457_v20, %v6504_v28  ;;  %v6510_v33 = vsel %vm292_vm1, %v6457_v20, %v6504_v28  ;;  %v9319_v20 = vor.u32 %v9854_v56, %v9318_v57 }
 0xb92   :  { %6919 = vmatpush.bf16.msrb.mxu2 %v9319_v20 }
 0xb94   :  { %v6483_v58 = vpop.f32.mrf.mxu2  ;;  %v6496_v49 = vpop.f32.mrf.mxu3 }
 0xb95   :  { %v6505_v40 = vrot.slane %v6483_v58, 6  ;;  %v6506_v25 = vrot.slane %v6496_v49, 5  ;;  %v6459_v9 = vpop.f32.mrf.mxu0  ;;  %v6472_v47 = vpop.f32.mrf.mxu1 }
 0xb96   :  { %v6649_v47 = vrot.slane %v16106_v30, 1 }
 0xb97   :  { %v6508_v3 = vsel %vm288_vm2, %v6505_v40, %v6506_v25  ;;  %v6511_v42 = vsel %vm294_vm4, %v6505_v40, %v6506_v25 }
 0xb98   :  { %v6509_v41 = vsel %vm16751_vm9, %v6507_v6, %v6508_v3  ;;  %v6512_v59 = vsel %vm16752_vm13, %v6510_v33, %v6511_v42 }
 0xb99   :  { %v6513_v22 = vrot.slane %v6512_v59, 1  ;;  %v16047_v34 = vadd.f32 %v9073_v24, %v6509_v41 }
 0xb9b   :  { %v16049_v7 = vadd.f32 %v9074_v46, %v6513_v22  ;;  %v9203_v15 = vmul.f32 -1.442695, %v16047_v34  ;;  %v6558_v31 = vrot.slane %v16047_v34, 1  ;;  %v6606_v27 = vrot.slane %v16047_v34, 3 }
 0xb9c   :  { %v6485_v10 = vpop.f32.mrf.mxu2  ;;  %v6498_v55 = vpop.f32.mrf.mxu3  ;;  %v6600_v29 = vrot.slane %v16047_v34, 2 }
 0xb9d   :  { %10307 = vpow2.f32 %v9203_v15  ;;  %v9204_v2 = vmul.f32 -1.442695, %v16049_v7  ;;  %v6559_v16 = vrot.slane %v16049_v7, 1  ;;  %v9205_v18 = vmul.f32 -1.442695, %v6558_v31 }
 0xb9e   :  { %v6607_v1 = vrot.slane %v16049_v7, 3  ;;  %v9207_v37 = vmul.f32 -1.442695, %v6606_v27  ;;  %v6601_v43 = vrot.slane %v16049_v7, 2  ;;  %v9286_v10 = vld [vmem:[%s16520_s3 + $0x88] sm:$0xf] }
 0xb9f   :  { %10309 = vpow2.f32 %v9204_v2  ;;  %v9206_v5 = vmul.f32 -1.442695, %v6559_v16 }
 0xba0   :  { %10311 = vpow2.f32 %v9205_v18  ;;  %v9208_v50 = vmul.f32 -1.442695, %v6607_v1  ;;  %v9852_v1 = vld [vmem:[%s16520_s3 + $0xcc] sm:$0xf] }
 0xba1   :  { %10313 = vpow2.f32 %v9206_v5  ;;  %v9320_v5 = vld [vmem:[%s16520_s3 + $0xd8] sm:$0xf0] }
 0xba2   :  { %10315 = vpow2.f32 %v9207_v37  ;;  %v9323_v61 = vor.u32 %v9852_v1, %v9320_v5  ;;  %v9844_v5 = vld [vmem:[%s16520_s3 + $0x8c] sm:$0xf] }
 0xba3   :  { %v10308_v17 = vpop.eup %10307  ;;  %10317 = vpow2.f32 %v9208_v50 }
 0xba4   :  { %v16081_v23 = vadd.f32 1.0, %v10308_v17  ;;  %6932 = vmatpush.bf16.msrb.mxu3 %v9323_v61  ;;  %v9842_v61 = vld [vmem:[%s16520_s3 + $0x74] sm:$0xf0] }
 0xba5   :  { %v10310_v12 = vpop.eup %10309 }
 0xba6   :  { %v10312_v36 = vpop.eup %10311  ;;  %v16098_v39 = vadd.f32 1.0, %v10310_v12  ;;  %10319 = vrcp.f32 %v16081_v23  ;;  %v6535_v58 = vand.u32 2147483647, %v16081_v23  ;;  %v6537_v40 = vand.u32 2147483648, %v16081_v23 }
 0xba7   :  { %v10314_v60 = vpop.eup %10313  ;;  %v16108_v53 = vadd.f32 1.0, %v10312_v36  ;;  %vm6531_vm10 = vweird.f32 %v16081_v23 }
 0xba8   :  { %10321 = vrcp.f32 %v16098_v39  ;;  %v10316_v28 = vpop.eup %10315  ;;  %v16113_v49 = vadd.f32 1.0, %v10314_v60  ;;  %v6550_v25 = vand.u32 2147483647, %v16098_v39  ;;  %v6552_v9 = vand.u32 2147483648, %v16098_v39  ;;  %v9296_v60 = vld [vmem:[%s16520_s3 + $0xb0] sm:$0xf0] }
 0xba9   :  { %10323 = vrcp.f32 %v16108_v53  ;;  %v10318_v63 = vpop.eup %10317  ;;  %v6579_v6 = vand.u32 2147483647, %v16108_v53  ;;  %v16123_v33 = vadd.f32 1.0, %v10316_v28  ;;  %vm16126_vm11 = vcmp.eq.f32.partialorder %v6535_v58, 8.507059e+37  ;;  %v9850_v58 = vld [vmem:[%s16520_s3 + $0xb4] sm:$0xf0] }
 0xbaa   :  { %10325 = vtanh.f32 %v6600_v29  ;;  %vm6546_vm12 = vweird.f32 %v16098_v39  ;;  %v6581_v46 = vand.u32 2147483648, %v16108_v53  ;;  %v16132_v41 = vadd.f32 1.0, %v10318_v63  ;;  %v9848_v63 = vld [vmem:[%s16520_s3 + $0xac] sm:$0xf] }
 0xbab   :  { %10327 = vrcp.f32 %v16113_v49  ;;  %v6538_v22 = vor.u32 1.1754944e-38, %v6537_v40  ;;  %v6594_v34 = vand.u32 2147483647, %v16113_v49  ;;  %v6596_v7 = vand.u32 2147483648, %v16113_v49 }
 0xbac   :  { %v10320_v24 = vpop.eup %10319  ;;  %10329 = vtanh.f32 %v6601_v43  ;;  %vm16143_vm14 = vcmp.eq.f32.partialorder %v6550_v25, 8.507059e+37  ;;  %v6553_v55 = vor.u32 1.1754944e-38, %v6552_v9  ;;  %vm6575_vm5 = vweird.f32 %v16108_v53 }
 0xbad   :  { %v6527_v3 = vmul.f32 %v10320_v24, %v16081_v23  ;;  %10331 = vrcp.f32 %v16123_v33  ;;  %vm16150_vm7 = vcmp.eq.f32.partialorder %v6579_v6, 8.507059e+37  ;;  %vm6590_vm3 = vweird.f32 %v16113_v49  ;;  %v9847_v23 = vld [vmem:[%s16520_s3 + $0xa4] sm:$0xf]  ;;  %v9278_v6 = vld [vmem:[%s16520_s3 + $0x80] sm:$0xf] }
 0xbae   :  { %v16134_v59 = vpop.eup %10321  ;;  %10333 = vrcp.f32 %v16132_v41  ;;  %vm6532_vm15 = vweird.f32 %v10320_v24  ;;  %v6582_v32 = vor.u32 1.1754944e-38, %v6581_v46  ;;  %vm16172_vm8 = vcmp.eq.f32.partialorder %v6594_v34, 8.507059e+37  ;;  %v9843_v34 = vld [vmem:[%s16520_s3 + $0x84] sm:$0xf] }
 0xbaf   :  { %v16139_v15 = vpop.eup %10323  ;;  %v6528_v31 = vsub.f32 1.0, %v6527_v3  ;;  %v6542_v27 = vmul.f32 %v16134_v59, %v16098_v39  ;;  %v6597_v19 = vor.u32 1.1754944e-38, %v6596_v7  ;;  %vm6547_vm6 = vweird.f32 %v16134_v59  ;;  %vm6533_vm9 = vmor %vm6531_vm10, %vm6532_vm15 }
 0xbb0   :  { %v10326_v2 = vpop.eup %10325  ;;  %v6571_v16 = vmul.f32 %v16139_v15, %v16108_v53  ;;  %vm6576_vm13 = vweird.f32 %v16139_v15  ;;  %v6627_v14 = vand.u32 2147483647, %v16123_v33  ;;  %vm6548_vm10 = vmor %vm6546_vm12, %vm6547_vm6  ;;  %v6629_v43 = vand.u32 2147483648, %v16123_v33 }
 0xbb1   :  { %v16162_v37 = vpop.eup %10327  ;;  %v6529_v50 = vmul.f32 %v10320_v24, %v6528_v31  ;;  %v6543_v13 = vsub.f32 1.0, %v6542_v27  ;;  %v6642_v9 = vand.u32 2147483647, %v16132_v41  ;;  %v9299_v31 = vor.u32 %v9847_v23, %v9296_v60  ;;  %v9837_v23 = vld [vmem:[%s16520_s3 + $0x4c] sm:$0xf0] }
 0xbb2   :  { %v10330_v26 = vpop.eup %10329  ;;  %v6572_v11 = vsub.f32 1.0, %v6571_v16  ;;  %v6586_v0 = vmul.f32 %v16162_v37, %v16113_v49  ;;  %vm6591_vm15 = vweird.f32 %v16162_v37  ;;  %v9303_v27 = vor.u32 %v9850_v58, %v9302_v8  ;;  %v9280_v49 = vld [vmem:[%s16520_s3 + $0x90] sm:$0xf0]  ;;  %v9835_v60 = vld [vmem:[%s16520_s3 + $0x44] sm:$0xf] }
 0xbb3   :  { %v6530_v21 = vadd.f32 %v10320_v24, %v6529_v50  ;;  %v6544_v17 = vmul.f32 %v16134_v59, %v6543_v13  ;;  %v16178_v62 = vpop.eup %10331  ;;  %vm6592_vm12 = vmor %vm6590_vm3, %vm6591_vm15  ;;  %6907 = vmatpush.bf16.msrb.mxu1 %v9299_v31  ;;  %v9254_v58 = vld [vmem:[%s16520_s3 + $0x48] sm:$0xf]  ;;  %vm16768_vm15 = vcmask 1042433  }
 0xbb4   :  { %v6573_v45 = vmul.f32 %v16139_v15, %v6572_v11  ;;  %v6587_v44 = vsub.f32 1.0, %v6586_v0  ;;  %v6619_v48 = vmul.f32 %v16178_v62, %v16123_v33  ;;  %v16192_v57 = vpop.eup %10333  ;;  %6920 = vmatpush.bf16.msrb.mxu2 %v9303_v27  ;;  %v9283_v11 = vor.u32 %v9843_v34, %v9280_v49  ;;  %v9232_v34 = vld [vmem:[%s16520_s3 + $0x30] sm:$0xf0] }
 0xbb5   :  { %v6534_v12 = vsel %vm6533_vm9, %v10320_v24, %v6530_v21  ;;  %v6545_v38 = vadd.f32 %v16134_v59, %v6544_v17  ;;  %v6634_v28 = vmul.f32 %v16192_v57, %v16132_v41  ;;  %v9304_v24 = vld [vmem:[%s16520_s3 + $0xb8] sm:$0xf0]  ;;  %v9270_v21 = vld [vmem:[%s16520_s3 + $0x68] sm:$0xf]  ;;  %vm6628_vm9 = vcmp.eq.f32.partialorder %v6627_v14, 8.507059e+37 }
 0xbb6   :  { %v6539_v36 = vsel %vm16126_vm11, %v6538_v22, %v6534_v12  ;;  %v6574_v29 = vadd.f32 %v16139_v15, %v6573_v45  ;;  %v6588_v56 = vmul.f32 %v16162_v37, %v6587_v44  ;;  %vm6577_vm11 = vmor %vm6575_vm5, %vm6576_vm13  ;;  %v6620_v39 = vsub.f32 1.0, %v6619_v48  ;;  %v9845_v22 = vld [vmem:[%s16520_s3 + $0x8c] sm:$0xf0]  ;;  %v9840_v45 = vld [vmem:[%s16520_s3 + $0x6c] sm:$0xf] }
 0xbb7   :  { %v6549_v20 = vsel %vm6548_vm10, %v16134_v59, %v6545_v38  ;;  %v6635_v46 = vsub.f32 1.0, %v6634_v28  ;;  %v6653_v59 = vmul.f32 %v10326_v2, %v6539_v36  ;;  %v9307_v1 = vor.u32 %v9848_v63, %v9304_v24  ;;  %v9272_v44 = vld [vmem:[%s16520_s3 + $0x78] sm:$0xf0]  ;;  %v9246_v48 = vld [vmem:[%s16520_s3 + $0x40] sm:$0xf]  ;;  %6908 = vmatpush.bf16.msrb.mxu1 %v9283_v11 }
 0xbb8   :  { %v6554_v40 = vsel %vm16143_vm14, %v6553_v55, %v6549_v20  ;;  %v6578_v53 = vsel %vm6577_vm11, %v16139_v15, %v6574_v29  ;;  %v6589_v25 = vadd.f32 %v16162_v37, %v6588_v56  ;;  %v6621_v42 = vmul.f32 %v16178_v62, %v6620_v39  ;;  %v9846_v55 = vld [vmem:[%s16520_s3 + $0x94] sm:$0xf0]  ;;  %v9248_v28 = vld [vmem:[%s16520_s3 + $0x50] sm:$0xf0]  ;;  %v9256_v24 = vld [vmem:[%s16520_s3 + $0x58] sm:$0xf0] }
 0xbb9   :  { %v6583_v3 = vsel %vm16150_vm7, %v6582_v32, %v6578_v53  ;;  %v6636_v16 = vmul.f32 %v16192_v57, %v6635_v46  ;;  %v6654_v18 = vmul.f32 %v10330_v26, %v6554_v40  ;;  %v9279_v13 = vor.u32 %v9845_v22, %v9278_v6  ;;  %v9288_v32 = vld [vmem:[%s16520_s3 + $0x98] sm:$0xf0]  ;;  %6933 = vmatpush.bf16.msrb.mxu3 %v9307_v1  ;;  %v9838_v63 = vld [vmem:[%s16520_s3 + $0x54] sm:$0xf0]  ;;  %v9214_v1 = vld [vmem:[%s16520_s3] sm:$0xf] }
 0xbba   :  { %v6593_v7 = vsel %vm6592_vm12, %v16162_v37, %v6589_v25  ;;  %v6651_v15 = vmul.f32 %v6583_v3, %v16106_v30  ;;  %v6622_v26 = vadd.f32 %v16178_v62, %v6621_v42  ;;  %vm6624_vm14 = vweird.f32 %v16178_v62  ;;  %v9836_v25 = vld [vmem:[%s16520_s3 + $0x4c] sm:$0xf]  ;;  %v9230_v3 = vld [vmem:[%s16520_s3 + $0x20] sm:$0xf]  ;;  %v9833_v42 = vld [vmem:[%s16520_s3 + $0x2c] sm:$0xf0] }
 0xbbb   :  { %v6598_v2 = vsel %vm16172_vm8, %v6597_v19, %v6593_v7  ;;  %v9287_v0 = vor.u32 %v9846_v55, %v9286_v10  ;;  %v9264_v19 = vld [vmem:[%s16520_s3 + $0x70] sm:$0xf0]  ;;  %vm6623_vm5 = vweird.f32 %v16123_v33  ;;  %6895 = vmatpush.bf16.msrb.mxu0 %v9279_v13  ;;  %v6637_v51 = vadd.f32 %v16192_v57, %v6636_v16  ;;  %v9238_v7 = vld [vmem:[%s16520_s3 + $0x28] sm:$0xf]  ;;  %v9832_v10 = vld [vmem:[%s16520_s3 + $0x2c] sm:$0xf] }
 0xbbc   :  { %v6652_v37 = vmul.f32 %v6649_v47, %v6598_v2  ;;  %v16266_v50 = vadd.f32 %v6653_v59, %v6651_v15  ;;  %vm6639_vm7 = vweird.f32 %v16192_v57  ;;  %v9291_v12 = vor.u32 %v9844_v5, %v9288_v32  ;;  %vm16311_vm3 = vmor %vm6623_vm5, %vm6624_vm14  ;;  %v9834_v15 = vld [vmem:[%s16520_s3 + $0x34] sm:$0xf0]  ;;  %v9240_v55 = vld [vmem:[%s16520_s3 + $0x38] sm:$0xf0] }
 0xbbd   :  { %v9263_v38 = vor.u32 %v9841_v52, %v9262_v35  ;;  %v6644_v29 = vand.u32 2147483648, %v16132_v41  ;;  %6921 = vmatpush.bf16.msrb.mxu2 %v9287_v0  ;;  %v9267_v56 = vor.u32 %v9839_v4, %v9264_v19  ;;  %v6626_v8 = vsel %vm16311_vm3, %v16178_v62, %v6622_v26  ;;  %v9829_v5 = vld [vmem:[%s16520_s3 + $0xc] sm:$0xf0]  ;;  %v9827_v32 = vld [vmem:[%s16520_s3 + $0x4] sm:$0xf] }
 0xbbe   :  { %v16289_v17 = vadd.f32 %v6654_v18, %v6652_v37  ;;  %10335 = vtanh.f32 %v16266_v50  ;;  %vm6638_vm8 = vweird.f32 %v16132_v41  ;;  %6934 = vmatpush.bf16.msrb.mxu3 %v9291_v12  ;;  %v9271_v20 = vor.u32 %v9842_v61, %v9270_v21  ;;  %v9831_v41 = vld [vmem:[%s16520_s3 + $0x24] sm:$0xf]  ;;  %v9216_v35 = vld [vmem:[%s16520_s3 + $0x10] sm:$0xf0]  ;;  %v9222_v0 = vld [vmem:[%s16520_s3 + $0x8] sm:$0xf] }
 0xbbf   :  { %v9275_v39 = vor.u32 %v9840_v45, %v9272_v44  ;;  %v6630_v62 = vor.u32 1.1754944e-38, %v6629_v43  ;;  %vm16337_vm6 = vmor %vm6638_vm8, %vm6639_vm7  ;;  %6896 = vmatpush.bf16.msrb.mxu0 %v9263_v38  ;;  %v9247_v53 = vor.u32 %v9837_v23, %v9246_v48  ;;  %vm16354_vm13 = vcmp.eq.f32.partialorder %v6642_v9, 8.507059e+37  ;;  %6909 = vmatpush.bf16.msrb.mxu1 %v9267_v56  ;;  %v9830_v4 = vld [vmem:[%s16520_s3 + $0x14] sm:$0xf0]  ;;  %v9828_v21 = vld [vmem:[%s16520_s3 + $0xc] sm:$0xf] }
 0xbc0   :  { %10337 = vtanh.f32 %v16289_v17  ;;  %v6641_v43 = vsel %vm16337_vm6, %v16192_v57, %v6637_v51  ;;  %v6645_v46 = vor.u32 1.1754944e-38, %v6644_v29  ;;  %v9251_v57 = vor.u32 %v9835_v60, %v9248_v28  ;;  %v9224_v61 = vld [vmem:[%s16520_s3 + $0x18] sm:$0xf0] }
 0xbc1   :  { %v6631_v14 = vsel %vm6628_vm9, %v6630_v62, %v6626_v8  ;;  %6922 = vmatpush.bf16.msrb.mxu2 %v9271_v20  ;;  %v9255_v59 = vor.u32 %v9838_v63, %v9254_v58  ;;  %v9259_v22 = vor.u32 %v9836_v25, %v9256_v24  ;;  %v9231_v49 = vor.u32 %v9833_v42, %v9230_v3  ;;  %v9210_v63 = vld [vmem:[%s16523_s0 + $0x27] ss:$8 sm:$0xf] }
 0xbc2   :  { %6935 = vmatpush.bf16.msrb.mxu3 %v9275_v39  ;;  %v6646_v27 = vsel %vm16354_vm13, %v6645_v46, %v6641_v43  ;;  %v6665_v2 = vrot.slane %v16027_v54, 1  ;;  %v9235_v37 = vor.u32 %v9831_v41, %v9232_v34  ;;  %v9239_v13 = vor.u32 %v9834_v15, %v9238_v7  ;;  %v9211_v24 = vld [vmem:[%s16523_s0 + $0x67] ss:$8 sm:$0xf] }
 0xbc3   :  { %6897 = vmatpush.bf16.msrb.mxu0 %v9247_v53  ;;  %6910 = vmatpush.bf16.msrb.mxu1 %v9251_v57  ;;  %v9243_v11 = vor.u32 %v9832_v10, %v9240_v55  ;;  %v9215_v19 = vor.u32 %v9829_v5, %v9214_v1  ;;  %v9219_v44 = vor.u32 %v9827_v32, %v9216_v35  ;;  %vm16767_vm10 = vcmask 1041408  }
 0xbc4   :  { %v10336_v33 = vpop.eup %10335  ;;  %v9223_v51 = vor.u32 %v9830_v4, %v9222_v0  ;;  %v9227_v12 = vor.u32 %v9828_v21, %v9224_v61  ;;  %v6680_v38 = vsub.f32 %v16266_v50, %v16106_v30  ;;  %v6681_v48 = vsub.f32 %v16289_v17, %v6649_v47 }
 0xbc5   :  { %v6659_v9 = vmul.f32 %v10336_v33, %v6631_v14  ;;  %6923 = vmatpush.bf16.msrb.mxu2 %v9255_v59 }
 0xbc6   :  { %v10338_v31 = vpop.eup %10337  ;;  %6936 = vmatpush.bf16.msrb.mxu3 %v9259_v22  ;;  %v6682_v23 = vmul.f32 0.0, %v6680_v38  ;;  %v6683_v36 = vmul.f32 0.0, %v6681_v48 }
 0xbc7   :  { %v6660_v16 = vmul.f32 %v10338_v31, %v6646_v27  ;;  %v6667_v18 = vsub.f32 %v6659_v9, %v16027_v54  ;;  %6898 = vmatpush.bf16.msrb.mxu0 %v9231_v49  ;;  %6911 = vmatpush.bf16.msrb.mxu1 %v9235_v37 }
 0xbc9   :  { %v6668_v52 = vsub.f32 %v6660_v16, %v6665_v2  ;;  %v6670_v26 = vmul.f32 0.0, %v6667_v18  ;;  %6924 = vmatpush.bf16.msrb.mxu2 %v9239_v13 }
 0xbca   :  { %6937 = vmatpush.bf16.msrb.mxu3 %v9243_v11 }
 0xbcb   :  { %v6671_v45 = vmul.f32 0.0, %v6668_v52  ;;  %6674 = vst [vmem:[#allocation1] ss:$9 sm:$0xff] %v6670_v26  ;;  %6899 = vmatpush.bf16.msrb.mxu0 %v9215_v19  ;;  %6912 = vmatpush.bf16.msrb.mxu1 %v9219_v44 }
 0xbcd   :  { %6676 = vst [vmem:[#allocation1 + $0x1] ss:$9 sm:$0xff] %v6671_v45  ;;  %6925 = vmatpush.bf16.msrb.mxu2 %v9223_v51 }
 0xbce   :  { %6938 = vmatpush.bf16.msrb.mxu3 %v9227_v12 }
 0xbd4   :  { %v6677_v29 = vld [vmem:[#allocation1] sm:$0xff] }
 0xbd5   :  { %v16416_v56 = vadd.f32 %v6677_v29, %v16027_v54  ;;  %6686 = vst [vmem:[#allocation1] ss:$9 sm:$0xff] %v6682_v23 }
 0xbd6   :  { %6688 = vst [vmem:[#allocation1 + $0x1] ss:$9 sm:$0xff] %v6683_v36 }
 0xbd7   :  { %9209 = vst [vmem:[%s16524_s4 + $0x1c] sm:$0x3] %v16416_v56  ;;  %v6699_v50 = vpack.c.bf16 %v16416_v56, %v16416_v56 }
 0xbd9   :  { %6900 = vmatmul.bf16.vlgmr.msrb.gmra.mxu0 %v6699_v50  ;;  %6913 = vmatmul.bf16.vlgmr.msrb.gmra.mxu1 %v6699_v50 }
 0xbda   :  { %6926 = vmatmul.bf16.vlgmr.msrb.gmra.mxu2 %v6699_v50  ;;  %6939 = vmatmul.bf16.vlgmr.msrb.gmra.mxu3 %v6699_v50 }
 0xbdd   :  { %v6689_v16 = vld [vmem:[#allocation1] sm:$0xff] }
 0xbde   :  { %v16442_v32 = vadd.f32 %v6689_v16, %v16106_v30 }
 0xbe0   :  { %v7093_v45 = vrot.slane %v16442_v32, 1 }
 0xc56   :  { %v6901_v47 = vpop.f32.mrf.mxu0  ;;  %v6914_v17 = vpop.f32.mrf.mxu1 }
 0xc57   :  { %v6948_v60 = vrot.slane %v6914_v17, 7 }
 0xc59   :  { %v6951_v62 = vsel %vm286_vm0, %v6901_v47, %v6948_v60  ;;  %v6954_v40 = vsel %vm292_vm1, %v6901_v47, %v6948_v60 }
 0xc5d   :  { %v6927_v8 = vpop.f32.mrf.mxu2  ;;  %v6940_v54 = vpop.f32.mrf.mxu3 }
 0xc5e   :  { %v6949_v20 = vrot.slane %v6927_v8, 6  ;;  %v6950_v39 = vrot.slane %v6940_v54, 5  ;;  %v6903_v28 = vpop.f32.mrf.mxu0  ;;  %v6916_v58 = vpop.f32.mrf.mxu1 }
 0xc60   :  { %v6952_v53 = vsel %vm288_vm2, %v6949_v20, %v6950_v39  ;;  %v6955_v25 = vsel %vm294_vm4, %v6949_v20, %v6950_v39 }
 0xc61   :  { %v6953_v43 = vsel %vm16767_vm10, %v6951_v62, %v6952_v53  ;;  %v6956_v6 = vsel %vm16768_vm15, %v6954_v40, %v6955_v25 }
 0xc62   :  { %v6957_v3 = vrot.slane %v6956_v6, 1  ;;  %v6960_v42 = vadd.f32 %v9210_v63, %v6953_v43 }
 0xc64   :  { %v6961_v33 = vadd.f32 %v9211_v24, %v6957_v3  ;;  %v9340_v14 = vmul.f32 -1.442695, %v6960_v42  ;;  %v7002_v46 = vrot.slane %v6960_v42, 1  ;;  %v7050_v57 = vrot.slane %v6960_v42, 3 }
 0xc65   :  { %v6929_v59 = vpop.f32.mrf.mxu2  ;;  %v6942_v41 = vpop.f32.mrf.mxu3  ;;  %v7044_v37 = vrot.slane %v6960_v42, 2 }
 0xc66   :  { %10339 = vpow2.f32 %v9340_v14  ;;  %v9341_v9 = vmul.f32 -1.442695, %v6961_v33  ;;  %v7003_v22 = vrot.slane %v6961_v33, 1  ;;  %v9342_v34 = vmul.f32 -1.442695, %v7002_v46 }
 0xc67   :  { %v7051_v7 = vrot.slane %v6961_v33, 3  ;;  %v9344_v31 = vmul.f32 -1.442695, %v7050_v57  ;;  %v7045_v52 = vrot.slane %v6961_v33, 2 }
 0xc68   :  { %10341 = vpow2.f32 %v9341_v9  ;;  %v9343_v15 = vmul.f32 -1.442695, %v7003_v22 }
 0xc69   :  { %10343 = vpow2.f32 %v9342_v34  ;;  %v9345_v27 = vmul.f32 -1.442695, %v7051_v7 }
 0xc6a   :  { %10345 = vpow2.f32 %v9343_v15 }
 0xc6b   :  { %10347 = vpow2.f32 %v9344_v31 }
 0xc6c   :  { %v10340_v49 = vpop.eup %10339  ;;  %10349 = vpow2.f32 %v9345_v27 }
 0xc6d   :  { %v6968_v10 = vadd.f32 1.0, %v10340_v49 }
 0xc6e   :  { %v10342_v55 = vpop.eup %10341 }
 0xc6f   :  { %v10344_v2 = vpop.eup %10343  ;;  %v16436_v18 = vadd.f32 1.0, %v10342_v55  ;;  %10351 = vrcp.f32 %v6968_v10  ;;  %v6979_v11 = vand.u32 2147483647, %v6968_v10  ;;  %v6981_v0 = vand.u32 2147483648, %v6968_v10 }
 0xc70   :  { %v10346_v1 = vpop.eup %10345  ;;  %v16438_v5 = vadd.f32 1.0, %v10344_v2  ;;  %vm6975_vm0 = vweird.f32 %v6968_v10 }
 0xc71   :  { %10353 = vrcp.f32 %v16436_v18  ;;  %v10348_v13 = vpop.eup %10347  ;;  %v16444_v35 = vadd.f32 1.0, %v10346_v1  ;;  %v6994_v19 = vand.u32 2147483647, %v16436_v18  ;;  %vm16454_vm1 = vcmp.eq.f32.partialorder %v6979_v11, 8.507059e+37 }
 0xc72   :  { %10355 = vrcp.f32 %v16438_v5  ;;  %v10350_v26 = vpop.eup %10349  ;;  %v16449_v21 = vadd.f32 1.0, %v10348_v13  ;;  %v6996_v12 = vand.u32 2147483648, %v16436_v18  ;;  %v6982_v23 = vor.u32 1.1754944e-38, %v6981_v0 }
 0xc73   :  { %10357 = vrcp.f32 %v16444_v35  ;;  %v16451_v30 = vadd.f32 1.0, %v10350_v26  ;;  %vm6990_vm2 = vweird.f32 %v16436_v18  ;;  %vm16462_vm4 = vcmp.eq.f32.partialorder %v6994_v19, 8.507059e+37 }
 0xc74   :  { %10359 = vtanh.f32 %v7044_v37  ;;  %vm7019_vm11 = vweird.f32 %v16438_v5  ;;  %v7023_v8 = vand.u32 2147483647, %v16438_v5  ;;  %v6997_v20 = vor.u32 1.1754944e-38, %v6996_v12 }
 0xc75   :  { %v10352_v4 = vpop.eup %10351  ;;  %10361 = vtanh.f32 %v7045_v52  ;;  %v7025_v28 = vand.u32 2147483648, %v16438_v5  ;;  %vm7034_vm5 = vweird.f32 %v16444_v35  ;;  %v7040_v6 = vand.u32 2147483648, %v16444_v35 }
 0xc76   :  { %v6971_v61 = vmul.f32 %v10352_v4, %v6968_v10  ;;  %10363 = vrcp.f32 %v16449_v21  ;;  %vm6976_vm12 = vweird.f32 %v10352_v4  ;;  %v7038_v33 = vand.u32 2147483647, %v16444_v35 }
 0xc77   :  { %v10354_v44 = vpop.eup %10353  ;;  %10365 = vrcp.f32 %v16451_v30  ;;  %vm16474_vm7 = vmor %vm6975_vm0, %vm6976_vm12  ;;  %v7026_v59 = vor.u32 1.1754944e-38, %v7025_v28  ;;  %vm7024_vm13 = vcmp.eq.f32.partialorder %v7023_v8, 8.507059e+37  ;;  %v7041_v27 = vor.u32 1.1754944e-38, %v7040_v6 }
 0xc78   :  { %v10356_v38 = vpop.eup %10355  ;;  %v6972_v48 = vsub.f32 1.0, %v6971_v61  ;;  %v6986_v36 = vmul.f32 %v10354_v44, %v16436_v18  ;;  %vm6991_vm14 = vweird.f32 %v10354_v44  ;;  %vm7039_vm15 = vcmp.eq.f32.partialorder %v7038_v33, 8.507059e+37 }
 0xc79   :  { %v7015_v50 = vmul.f32 %v10356_v38, %v16438_v5  ;;  %v10358_v47 = vpop.eup %10357  ;;  %vm7020_vm3 = vweird.f32 %v10356_v38  ;;  %vm6992_vm8 = vmor %vm6990_vm2, %vm6991_vm14  ;;  %v7073_v0 = vand.u32 2147483648, %v16449_v21  ;;  %v7088_v61 = vand.u32 2147483648, %v16451_v30 }
 0xc7a   :  { %v6973_v17 = vmul.f32 %v10352_v4, %v6972_v48  ;;  %v6987_v60 = vsub.f32 1.0, %v6986_v36  ;;  %v10360_v54 = vpop.eup %10359  ;;  %v7030_v58 = vmul.f32 %v10358_v47, %v16444_v35  ;;  %vm7035_vm6 = vweird.f32 %v10358_v47  ;;  %vm7021_vm9 = vmor %vm7019_vm11, %vm7020_vm3 }
 0xc7b   :  { %v7016_v39 = vsub.f32 1.0, %v7015_v50  ;;  %v10362_v63 = vpop.eup %10361  ;;  %vm7036_vm10 = vmor %vm7034_vm5, %vm7035_vm6  ;;  %vm7082_vm11 = vweird.f32 %v16451_v30  ;;  %v7086_v51 = vand.u32 2147483647, %v16451_v30  ;;  %v7074_v12 = vor.u32 1.1754944e-38, %v7073_v0 }
 0xc7c   :  { %v6974_v62 = vadd.f32 %v10352_v4, %v6973_v17  ;;  %v6988_v40 = vmul.f32 %v10354_v44, %v6987_v60  ;;  %v10364_v53 = vpop.eup %10363  ;;  %v7031_v43 = vsub.f32 1.0, %v7030_v58  ;;  %v7089_v36 = vor.u32 1.1754944e-38, %v7088_v61 }
 0xc7d   :  { %v7017_v24 = vmul.f32 %v10356_v38, %v7016_v39  ;;  %v7063_v14 = vmul.f32 %v10364_v53, %v16449_v21  ;;  %v10366_v46 = vpop.eup %10365  ;;  %vm7068_vm0 = vweird.f32 %v10364_v53  ;;  %vm7087_vm5 = vcmp.eq.f32.partialorder %v7086_v51, 8.507059e+37 }
 0xc7e   :  { %v6978_v3 = vsel %vm16474_vm7, %v10352_v4, %v6974_v62  ;;  %v6989_v42 = vadd.f32 %v10354_v44, %v6988_v40  ;;  %v7032_v41 = vmul.f32 %v10358_v47, %v7031_v43  ;;  %v7078_v7 = vmul.f32 %v10366_v46, %v16451_v30 }
 0xc7f   :  { %v7018_v57 = vadd.f32 %v10356_v38, %v7017_v24  ;;  %v6983_v9 = vsel %vm16454_vm1, %v6982_v23, %v6978_v3  ;;  %v7064_v34 = vsub.f32 1.0, %v7063_v14  ;;  %vm7067_vm1 = vweird.f32 %v16449_v21 }
 0xc80   :  { %v6993_v22 = vsel %vm6992_vm8, %v10354_v44, %v6989_v42  ;;  %v7033_v31 = vadd.f32 %v10358_v47, %v7032_v41  ;;  %v7079_v2 = vsub.f32 1.0, %v7078_v7  ;;  %v7097_v1 = vmul.f32 %v10360_v54, %v6983_v9 }
 0xc81   :  { %v7022_v15 = vsel %vm7021_vm9, %v10356_v38, %v7018_v57  ;;  %v6998_v49 = vsel %vm16462_vm4, %v6997_v20, %v6993_v22  ;;  %v7065_v55 = vmul.f32 %v10364_v53, %v7064_v34  ;;  %v7071_v4 = vand.u32 2147483647, %v16449_v21  ;;  %vm7069_vm4 = vmor %vm7067_vm1, %vm7068_vm0 }
 0xc82   :  { %v7027_v10 = vsel %vm7024_vm13, %v7026_v59, %v7022_v15  ;;  %v7037_v16 = vsel %vm7036_vm10, %v10358_v47, %v7033_v31  ;;  %v7080_v37 = vmul.f32 %v10366_v46, %v7079_v2  ;;  %v7098_v52 = vmul.f32 %v10362_v63, %v6998_v49 }
 0xc83   :  { %v7095_v18 = vmul.f32 %v7027_v10, %v16442_v32  ;;  %v7042_v5 = vsel %vm7039_vm15, %v7041_v27, %v7037_v16  ;;  %v7066_v11 = vadd.f32 %v10364_v53, %v7065_v55  ;;  %vm7083_vm2 = vweird.f32 %v10366_v46 }
 0xc84   :  { %v7096_v13 = vmul.f32 %v7093_v45, %v7042_v5  ;;  %v7081_v19 = vadd.f32 %v10366_v46, %v7080_v37  ;;  %vm7084_vm12 = vmor %vm7082_vm11, %vm7083_vm2  ;;  %vm7072_vm14 = vcmp.eq.f32.partialorder %v7071_v4, 8.507059e+37  ;;  %v7109_v47 = vrot.slane %v16416_v56, 1 }
 0xc85   :  { %v7099_v26 = vadd.f32 %v7097_v1, %v7095_v18  ;;  %v7070_v44 = vsel %vm7069_vm4, %v10364_v53, %v7066_v11 }
 0xc86   :  { %v7100_v35 = vadd.f32 %v7098_v52, %v7096_v13  ;;  %v7085_v38 = vsel %vm7084_vm12, %v10366_v46, %v7081_v19  ;;  %v7075_v23 = vsel %vm7072_vm14, %v7074_v12, %v7070_v44 }
 0xc87   :  { %10367 = vtanh.f32 %v7099_v26  ;;  %v7090_v50 = vsel %vm7087_vm5, %v7089_v36, %v7085_v38  ;;  %v7124_v30 = vsub.f32 %v7099_v26, %v16442_v32 }
 0xc88   :  { %10369 = vtanh.f32 %v7100_v35  ;;  %v7125_v39 = vsub.f32 %v7100_v35, %v7093_v45 }
 0xc89   :  { %v7126_v28 = vmul.f32 0.0, %v7124_v30 }
 0xc8a   :  { %v7127_v63 = vmul.f32 0.0, %v7125_v39 }
 0xc8d   :  { %v10368_v48 = vpop.eup %10367 }
 0xc8e   :  { %v7103_v21 = vmul.f32 %v10368_v48, %v7075_v23  ;;  %v10370_v29 = vpop.eup %10369 }
 0xc8f   :  { %v7104_v17 = vmul.f32 %v10370_v29, %v7090_v50 }
 0xc90   :  { %v7111_v60 = vsub.f32 %v7103_v21, %v16416_v56 }
 0xc91   :  { %v7112_v8 = vsub.f32 %v7104_v17, %v7109_v47 }
 0xc92   :  { %v7114_v54 = vmul.f32 0.0, %v7111_v60 }
 0xc93   :  { %v7115_v20 = vmul.f32 0.0, %v7112_v8 }
 0xc94   :  { %7118 = vst [vmem:[#allocation1] ss:$9 sm:$0xff] %v7114_v54 }
 0xc95   :  { %7120 = vst [vmem:[#allocation1 + $0x1] ss:$9 sm:$0xff] %v7115_v20 }
 0xc9c   :  { %v7121_v58 = vld [vmem:[#allocation1] sm:$0xff] }
 0xc9d   :  { %v7123_v62 = vadd.f32 %v7121_v58, %v16416_v56  ;;  %7130 = vst [vmem:[#allocation1] ss:$9 sm:$0xff] %v7126_v28 }
 0xc9e   :  { %7132 = vst [vmem:[#allocation1 + $0x1] ss:$9 sm:$0xff] %v7127_v63 }
 0xc9f   :  { %9346 = vst [vmem:[%s16524_s4 + $0x1e] sm:$0x3] %v7123_v62 }
 0xca0   :  { %7138 = vst [vmem:[#allocation2] sm:$0x3] %v7123_v62 }
 0xca1   :  { %7143 = vst [vmem:[%s16525_s5] sm:$0x3] %v7123_v62 }
 0xca5   :  { %v7133_v40 = vld [vmem:[#allocation1] sm:$0xff] }
 0xca6   :  { %v7135_v53 = vadd.f32 %v7133_v40, %v16442_v32 }
 0xca8   :  { %7139 = vst [vmem:[#allocation3] sm:$0x3] %v7135_v53 }
 0xca9   :  { %7144 = vst [vmem:[%s16526_s6] sm:$0x3] %v7135_v53 }

</bundles_post_ra>
